<compile_context>
chip_gen: v7x
topology: tpu7x:2x2x1
jax: 0.10.0
libtpu: 0.0.40
codegen_flags: <defaults>
</compile_context>

<pallas_src>
import functools

import jax
import jax.numpy as jnp
from jax.experimental import pallas as pl
from jax.experimental.pallas import tpu as pltpu


def _round_up(x, m):
    return ((x + m - 1) // m) * m


# ---------------------------------------------------------------------------
# Pallas kernel:  out = act(A @ B * scale + shift)
#   A: (tm, tk) bf16, B: (tk, tn) bf16, accumulation in f32 scratch,
#   v_ref: (8, tn) f32 -> row 0 = per-column scale, row 1 = per-column shift.
# ---------------------------------------------------------------------------
@functools.lru_cache(maxsize=None)
def _make_kernel(act):
    def kernel(a_ref, b_ref, v_ref, o_ref, acc_ref):
        @pl.when(pl.program_id(2) == 0)
        def _():
            acc_ref[...] = jnp.zeros_like(acc_ref)

        acc_ref[...] += jnp.dot(a_ref[...], b_ref[...],
                                preferred_element_type=jnp.float32)

        @pl.when(pl.program_id(2) == pl.num_programs(2) - 1)
        def _():
            v = v_ref[...]                       # (8, tn) f32
            y = acc_ref[...] * v[0:1, :] + v[1:2, :]
            if act == "relu":
                y = jnp.maximum(y, 0.0)
            o_ref[...] = y.astype(o_ref.dtype)

    return kernel


def _pick_tm(M):
    if M <= 256:
        return _round_up(M, 16)              # single row-block, bf16-friendly
    if _round_up(M, 256) - M <= M // 8:      # prefer 256-row tiles (2x256 MXU)
        return 256
    return 128


def _pick_tk(Kp):
    for tk in (2048, 1024, 512, 256, 128):
        if Kp % tk == 0:
            return tk
    return 128


def _pad_n(N):
    """Padded output width: lane-dense, prefer multiples of 256 when cheap."""
    np128 = _round_up(N, 128)
    np256 = _round_up(N, 256)
    if np256 - np128 <= N // 4:
        return np256
    return np128


def matmul_fused(a, b_p, v_p, n_out, act="none"):
    """a: (M, K) float; b_p: (Kp, Np) bf16 pre-padded weights;
    v_p: (8, Np) f32 [scale; shift; zeros].  Returns f32 (M, n_out)."""
    M, K = a.shape
    Kp, Np = b_p.shape

    tm = _pick_tm(M)
    Mp = _round_up(M, tm)
    tk = _pick_tk(Kp)
    tn = 512 if (Np % 512 == 0 and Np >= 512) else (256 if Np % 256 == 0 else 128)

    a_p = a.astype(jnp.bfloat16)
    if Mp != M or Kp != K:
        a_p = jnp.pad(a_p, ((0, Mp - M), (0, Kp - K)))

    grid = (Mp // tm, Np // tn, Kp // tk)
    out = pl.pallas_call(
        _make_kernel(act),
        out_shape=jax.ShapeDtypeStruct((Mp, Np), jnp.float32),
        grid_spec=pltpu.PrefetchScalarGridSpec(
            num_scalar_prefetch=0,
            grid=grid,
            in_specs=[
                pl.BlockSpec((tm, tk), lambda i, j, k: (i, k)),
                pl.BlockSpec((tk, tn), lambda i, j, k: (k, j)),
                pl.BlockSpec((8, tn), lambda i, j, k: (0, j)),
            ],
            out_specs=pl.BlockSpec((tm, tn), lambda i, j, k: (i, j)),
            scratch_shapes=[pltpu.VMEM((tm, tn), jnp.float32)],
        ),
        compiler_params=pltpu.CompilerParams(
            dimension_semantics=("parallel", "parallel", "arbitrary"),
            vmem_limit_bytes=32 * 1024 * 1024,   # safe on v5e/v6e/v7x
        ),
    )(a_p, b_p, v_p)
    return out[:M, :n_out]


# ---------------------------------------------------------------------------
# Weight / BN preparation (done ONCE, outside the forward pass)
# ---------------------------------------------------------------------------
def bn_scale_shift(gamma, beta, mean, var, eps=1e-5):
    scale = gamma / jnp.sqrt(var + eps)
    shift = beta - mean * scale
    return scale, shift


def _prep_weight_mat(wmat):
    """wmat: (K, N) f32 -> bf16 padded (Kp, Np)."""
    K, N = wmat.shape
    Kp, Np = _round_up(K, 128), _pad_n(N)
    return jnp.pad(wmat.astype(jnp.bfloat16), ((0, Kp - K), (0, Np - N)))


def _prep_vecs(Np, N, scale=None, shift=None):
    s = jnp.ones((N,), jnp.float32) if scale is None else scale.astype(jnp.float32)
    t = jnp.zeros((N,), jnp.float32) if shift is None else shift.astype(jnp.float32)
    v = jnp.zeros((8, Np), jnp.float32)
    return v.at[0, :N].set(s).at[1, :N].set(t)


def _prep_linear(w, b):
    K, N = w.shape
    wp = _prep_weight_mat(w)
    return dict(wp=wp, vp=_prep_vecs(wp.shape[1], N, shift=b), n=N)


def _prep_convT(w_iohw, b, bn, stride, padding, output_padding, fold_bn=True):
    """PyTorch ConvTranspose2d weight (Cin, Cout, kh, kw) -> tap matrix (Cin, k*k*Cout)."""
    Cin, Cout, kh, kw = w_iohw.shape
    d = dict(k=kh, stride=stride, padding=padding,
             output_padding=output_padding, cout=Cout, n=kh * kw * Cout)
    if fold_bn:                                  # ConvT -> BN -> ReLU
        scale, shift = bn_scale_shift(*bn)
        w_iohw = w_iohw * scale[None, :, None, None]
        d['add'] = b * scale + shift             # y = relu(conv*scale + add)
    else:                                        # ConvT -> ReLU -> BN
        d['bias'] = b
        scale, shift = bn_scale_shift(*bn)
        d['scale'], d['shift'] = scale, shift
    wmat = jnp.transpose(w_iohw, (0, 2, 3, 1)).reshape(Cin, kh * kw * Cout)
    wp = _prep_weight_mat(wmat)
    d['wp'] = wp
    d['vp'] = _prep_vecs(wp.shape[1], kh * kw * Cout)
    return d


def _prep_conv(w_oihw, b, padding):
    """PyTorch Conv2d weight (Cout, Cin, kh, kw) -> tap matrix (Cin, k*k*Cout)."""
    Cout, Cin, kh, kw = w_oihw.shape
    wmat = jnp.transpose(w_oihw, (1, 2, 3, 0)).reshape(Cin, kh * kw * Cout)
    wp = _prep_weight_mat(wmat)
    return dict(k=kh, padding=padding, cout=Cout, bias=b, n=kh * kw * Cout,
                wp=wp, vp=_prep_vecs(wp.shape[1], kh * kw * Cout))


def prepare_params(p):
    prep = {}
    prep['lin1'] = _prep_linear(p['w1'], p['b1'])
    prep['lin2'] = _prep_linear(p['w2'], p['b2'])
    prep['ct1'] = _prep_convT(p['ct1_w'], p['ct1_b'], p['bn1'], 2, 1, 1)
    prep['ct2'] = _prep_convT(p['ct2_w'], p['ct2_b'], p['bn2'], 2, 1, 1)
    prep['ct3'] = _prep_convT(p['ct3_w'], p['ct3_b'], p['bn3'], 2, 1, 0)
    prep['ct4'] = _prep_convT(p['ct4_w'], p['ct4_b'], p['bn4'], 2, 2, 0)
    prep['ct5'] = _prep_convT(p['ct5_w'], p['ct5_b'], p['bn5'], 1, 1, 0)
    prep['ct6'] = _prep_convT(p['ct6_w'], p['ct6_b'], p['bn6'], 1, 1, 0, fold_bn=False)
    prep['c7'] = _prep_conv(p['c7_w'], p['c7_b'], 1)
    prep['c8'] = _prep_conv(p['c8_w'], p['c8_b'], 0)
    return prep


# ---------------------------------------------------------------------------
# Conv layers as tap-matmul + tap-combine (no im2col, no dilated zeros)
# ---------------------------------------------------------------------------
def conv_transpose2d_taps(x, L):
    """x: (B, H, W, Cin) NHWC f32 -> (B, Hout, Wout, Cout) f32 (pre-bias)."""
    B, H, W, Cin = x.shape
    k, s, p, op, cout = L['k'], L['stride'], L['padding'], L['output_padding'], L['cout']
    Hout = (H - 1) * s - 2 * p + k + op
    Wout = (W - 1) * s - 2 * p + k + op
    a = x.reshape(B * H * W, Cin)
    y = matmul_fused(a, L['wp'], L['vp'], L['n'], act="none")
    y = y.reshape(B, H, W, k, k, cout)
    Hf, Wf = (H - 1) * s + k + op, (W - 1) * s + k + op
    out = jnp.zeros((B, Hf, Wf, cout), jnp.float32)
    for dh in range(k):
        for dw in range(k):
            out = out.at[:, dh:dh + (H - 1) * s + 1:s,
                            dw:dw + (W - 1) * s + 1:s, :].add(y[:, :, :, dh, dw, :])
    return out[:, p:p + Hout, p:p + Wout, :]


def conv2d_taps(x, L):
    """x: (B, H, W, Cin) NHWC f32 -> (B, Ho, Wo, Cout) f32 (pre-bias)."""
    B, H, W, Cin = x.shape
    k, p, cout = L['k'], L['padding'], L['cout']
    xp = jnp.pad(x, ((0, 0), (p, p), (p, p), (0, 0)))
    Hp, Wp = H + 2 * p, W + 2 * p
    Ho, Wo = Hp - k + 1, Wp - k + 1
    a = xp.reshape(B * Hp * Wp, Cin)
    y = matmul_fused(a, L['wp'], L['vp'], L['n'], act="none")
    y = y.reshape(B, Hp, Wp, k, k, cout)
    out = jnp.zeros((B, Ho, Wo, cout), jnp.float32)
    for dh in range(k):
        for dw in range(k):
            out = out + y[:, dh:dh + Ho, dw:dw + Wo, dh, dw, :]
    return out


# ---------------------------------------------------------------------------
# Deterministic parameter init (shapes from DecoderSmall.__init__)
# ---------------------------------------------------------------------------
def init_params(key, latent):
    keys = iter(jax.random.split(key, 64))

    def w_init(shape, fan_in):
        bound = 1.0 / float(fan_in) ** 0.5
        return jax.random.uniform(next(keys), shape, jnp.float32, -bound, bound)

    def bn_init(c):
        g = 1.0 + 0.1 * jax.random.normal(next(keys), (c,), jnp.float32)
        b = 0.1 * jax.random.normal(next(keys), (c,), jnp.float32)
        m = 0.1 * jax.random.normal(next(keys), (c,), jnp.float32)
        v = jax.random.uniform(next(keys), (c,), jnp.float32, 0.5, 1.5)
        return (g, b, m, v)

    def conv_w(cout, cin, k):      # Conv2d: (Cout, Cin, k, k)
        return w_init((cout, cin, k, k), cin * k * k)

    def convT_w(cin, cout, k):     # ConvTranspose2d: (Cin, Cout, k, k)
        return w_init((cin, cout, k, k), cout * k * k)

    p = {}
    p['w1'], p['b1'] = w_init((latent, 1024), latent), w_init((1024,), latent)
    p['w2'], p['b2'] = w_init((1024, 9216), 1024), w_init((9216,), 1024)
    p['ct1_w'], p['ct1_b'], p['bn1'] = convT_w(1024, 512, 3), w_init((512,), 512 * 9), bn_init(512)
    p['ct2_w'], p['ct2_b'], p['bn2'] = convT_w(512, 256, 3), w_init((256,), 256 * 9), bn_init(256)
    p['ct3_w'], p['ct3_b'], p['bn3'] = convT_w(256, 128, 3), w_init((128,), 128 * 9), bn_init(128)
    p['ct4_w'], p['ct4_b'], p['bn4'] = convT_w(128, 64, 3), w_init((64,), 64 * 9), bn_init(64)
    p['ct5_w'], p['ct5_b'], p['bn5'] = convT_w(64, 32, 3), w_init((32,), 32 * 9), bn_init(32)
    p['ct6_w'], p['ct6_b'], p['bn6'] = convT_w(32, 16, 3), w_init((16,), 16 * 9), bn_init(16)
    p['c7_w'], p['c7_b'] = conv_w(8, 16, 4), w_init((8,), 16 * 16)
    p['c8_w'], p['c8_b'] = conv_w(3, 8, 3), w_init((3,), 8 * 9)
    return p


# ---------------------------------------------------------------------------
# Forward pass (matches DecoderSmall.forward, inference mode)
#   Dropout / Dropout2d: identity; BatchNorm2d: eval-mode running stats.
# ---------------------------------------------------------------------------
def decoder_forward(x, prep):
    B = x.shape[0]

    # Linear -> Dropout(id) -> ReLU, twice (bias + ReLU fused in kernel epilogue)
    h = matmul_fused(x, prep['lin1']['wp'], prep['lin1']['vp'], prep['lin1']['n'], act="relu")
    h = matmul_fused(h, prep['lin2']['wp'], prep['lin2']['vp'], prep['lin2']['n'], act="relu")

    # reshape(-1, 1024, 3, 3) NCHW -> NHWC
    h = h.reshape(B, 1024, 3, 3).transpose(0, 2, 3, 1)

    # ConvT -> BN -> (Dropout2d id) -> ReLU blocks (BN scale folded into weights)
    for name in ('ct1', 'ct2', 'ct3', 'ct4', 'ct5'):
        L = prep[name]
        h = conv_transpose2d_taps(h, L)
        h = jnp.maximum(h + L['add'], 0.0)
    # spatial: 3 -> 6 -> 12 -> 23 -> 43 -> 43

    # ConvT -> ReLU -> BN (swapped order in the PyTorch module)
    L = prep['ct6']
    h = conv_transpose2d_taps(h, L)                       # 43 -> 43
    h = jnp.maximum(h + L['bias'], 0.0) * L['scale'] + L['shift']

    # Conv2d(16->8, k4, p1) -> ReLU
    L = prep['c7']
    h = conv2d_taps(h, L)                                 # 43 -> 42
    h = jnp.maximum(h + L['bias'], 0.0)

    # Conv2d(8->3, k3, p0) -> Tanh
    L = prep['c8']
    h = conv2d_taps(h, L)                                 # 42 -> 40
    h = jnp.tanh(h + L['bias'])

    return h.transpose(0, 3, 1, 2)                        # NHWC -> NCHW (B, 3, 40, 40)


if __name__ == "__main__":
    latent_size = 32
    batch = 2
    key = jax.random.PRNGKey(0)
    kx, kp = jax.random.split(key)
    x = jax.random.normal(kx, (batch, latent_size), dtype=jnp.float32)

    params = init_params(kp, latent_size)
    prep = prepare_params(params)      # weight pad/transpose/bf16 cast, done once

    fwd = jax.jit(functools.partial(decoder_forward, prep=prep))
    out = jax.block_until_ready(fwd(x))

    assert out.shape == (batch, 3, 40, 40), out.shape
    assert bool(jnp.all(jnp.isfinite(out)))
    assert bool(jnp.all(jnp.abs(out) <= 1.0 + 1e-6))   # tanh output range
    print("KERNEL_OK")
</pallas_src>

<mosaic_0001>
module attributes {stable_mosaic.version = 11 : i64} {
  func.func @kernel(%arg0: i32, %arg1: i32, %arg2: i32, %arg3: memref<16x1024xbf16, #tpu.memory_space<vmem>>, %arg4: memref<1024x512xbf16, #tpu.memory_space<vmem>>, %arg5: memref<8x512xf32, #tpu.memory_space<vmem>>, %arg6: memref<16x512xf32, #tpu.memory_space<vmem>>, %arg7: memref<16x512xf32, #tpu.memory_space<vmem>>) attributes {dimension_semantics = [#tpu.dimension_semantics<parallel>, #tpu.dimension_semantics<parallel>, #tpu.dimension_semantics<arbitrary>], iteration_bounds = array<i64: 1, 18, 1>, scalar_prefetch = 0 : i64, scratch_operands = 1 : i64, tpu.core_type = #tpu.core_type<tc>, window_params = [{transform_indices = @transform_0, window_bounds = array<i64: 16, 1024>}, {transform_indices = @transform_1, window_bounds = array<i64: 1024, 512>}, {transform_indices = @transform_2, window_bounds = array<i64: 8, 512>}, {transform_indices = @transform_3, window_bounds = array<i64: 16, 512>}]} {
    %c0_i32 = arith.constant 0 : i32
    %0 = arith.cmpi eq, %arg2, %c0_i32 : i32
    %1 = arith.extui %0 : i1 to i32
    %c0_i32_0 = arith.constant 0 : i32
    %2 = arith.cmpi ne, %1, %c0_i32_0 : i32
    scf.if %2 {
      %cst_10 = arith.constant 0.000000e+00 : f32
      %12 = vector.broadcast %cst_10 : f32 to vector<16x512xf32>
      %c0_11 = arith.constant 0 : index
      %c0_12 = arith.constant 0 : index
      %13 = vector.load %arg7[%c0_11, %c0_12] : memref<16x512xf32, #tpu.memory_space<vmem>>, vector<16x512xf32>
      tpu.vector_store %arg7[%c0_11, %c0_12], %12 {strides = array<i32>} : memref<16x512xf32, #tpu.memory_space<vmem>>, vector<16x512xf32>,
    } else {
    }
    %c0 = arith.constant 0 : index
    %c0_1 = arith.constant 0 : index
    %3 = vector.load %arg7[%c0, %c0_1] : memref<16x512xf32, #tpu.memory_space<vmem>>, vector<16x512xf32>
    %c0_2 = arith.constant 0 : index
    %c0_3 = arith.constant 0 : index
    %4 = vector.load %arg3[%c0_2, %c0_3] : memref<16x1024xbf16, #tpu.memory_space<vmem>>, vector<16x1024xbf16>
    %c0_4 = arith.constant 0 : index
    %c0_5 = arith.constant 0 : index
    %5 = vector.load %arg4[%c0_4, %c0_5] : memref<1024x512xbf16, #tpu.memory_space<vmem>>, vector<1024x512xbf16>
    %cst = arith.constant dense<0.000000e+00> : vector<16x512xf32>
    %6 = tpu.matmul %4, %5, %cst {dimension_numbers = #tpu.dot_dimension_numbers<[1], [0], [0], [1], [0, 0, 1, 1], [], []>} : vector<16x1024xbf16>, vector<1024x512xbf16>, vector<16x512xf32> -> vector<16x512xf32>
    %7 = arith.addf %3, %6 : vector<16x512xf32>
    %c0_6 = arith.constant 0 : index
    %c0_7 = arith.constant 0 : index
    %8 = vector.load %arg7[%c0_6, %c0_7] : memref<16x512xf32, #tpu.memory_space<vmem>>, vector<16x512xf32>
    tpu.vector_store %arg7[%c0_6, %c0_7], %7 {strides = array<i32>} : memref<16x512xf32, #tpu.memory_space<vmem>>, vector<16x512xf32>,
    %c0_i32_8 = arith.constant 0 : i32
    %9 = arith.cmpi eq, %arg2, %c0_i32_8 : i32
    %10 = arith.extui %9 : i1 to i32
    %c0_i32_9 = arith.constant 0 : i32
    %11 = arith.cmpi ne, %10, %c0_i32_9 : i32
    scf.if %11 {
      %c0_10 = arith.constant 0 : index
      %c0_11 = arith.constant 0 : index
      %12 = vector.load %arg5[%c0_10, %c0_11] : memref<8x512xf32, #tpu.memory_space<vmem>>, vector<8x512xf32>
      %c0_12 = arith.constant 0 : index
      %c0_13 = arith.constant 0 : index
      %13 = vector.load %arg7[%c0_12, %c0_13] : memref<16x512xf32, #tpu.memory_space<vmem>>, vector<16x512xf32>
      %14 = vector.extract_strided_slice %12 {offsets = [0, 0], sizes = [1, 512], strides = [1, 1]} : vector<8x512xf32> to vector<1x512xf32>
      %15 = vector.broadcast %14 : vector<1x512xf32> to vector<16x512xf32>
      %16 = arith.mulf %13, %15 : vector<16x512xf32>
      %17 = vector.extract_strided_slice %12 {offsets = [1, 0], sizes = [1, 512], strides = [1, 1]} : vector<8x512xf32> to vector<1x512xf32>
      %18 = vector.broadcast %17 : vector<1x512xf32> to vector<16x512xf32>
      %19 = arith.addf %16, %18 : vector<16x512xf32>
      %cst_14 = arith.constant 0.000000e+00 : f32
      %20 = vector.broadcast %cst_14 : f32 to vector<16x512xf32>
      %21 = arith.maximumf %19, %20 : vector<16x512xf32>
      %c0_15 = arith.constant 0 : index
      %c0_16 = arith.constant 0 : index
      %22 = vector.load %arg6[%c0_15, %c0_16] : memref<16x512xf32, #tpu.memory_space<vmem>>, vector<16x512xf32>
      tpu.vector_store %arg6[%c0_15, %c0_16], %21 {strides = array<i32>} : memref<16x512xf32, #tpu.memory_space<vmem>>, vector<16x512xf32>,
    } else {
    }
    return
  }
  func.func @transform_0(%arg0: i32, %arg1: i32, %arg2: i32) -> (i32, i32) {
    %c0_i32 = arith.constant 0 : i32
    return %arg0, %arg2 : i32, i32
  }
  func.func @transform_1(%arg0: i32, %arg1: i32, %arg2: i32) -> (i32, i32) {
    %c0_i32 = arith.constant 0 : i32
    return %arg2, %arg1 : i32, i32
  }
  func.func @transform_2(%arg0: i32, %arg1: i32, %arg2: i32) -> (i32, i32) {
    %c0_i32 = arith.constant 0 : i32
    %c0_i32_0 = arith.constant 0 : i32
    return %c0_i32, %arg1 : i32, i32
  }
  func.func @transform_3(%arg0: i32, %arg1: i32, %arg2: i32) -> (i32, i32) {
    %c0_i32 = arith.constant 0 : i32
    return %arg0, %arg1 : i32, i32
  }
}

module attributes {stable_mosaic.version = 11 : i64} {
  func.func @kernel(%arg0: i32, %arg1: i32, %arg2: i32, %arg3: memref<16x128xbf16, #tpu.memory_space<vmem>>, %arg4: memref<128x512xbf16, #tpu.memory_space<vmem>>, %arg5: memref<8x512xf32, #tpu.memory_space<vmem>>, %arg6: memref<16x512xf32, #tpu.memory_space<vmem>>, %arg7: memref<16x512xf32, #tpu.memory_space<vmem>>) attributes {dimension_semantics = [#tpu.dimension_semantics<parallel>, #tpu.dimension_semantics<parallel>, #tpu.dimension_semantics<arbitrary>], iteration_bounds = array<i64: 1, 2, 1>, scalar_prefetch = 0 : i64, scratch_operands = 1 : i64, tpu.core_type = #tpu.core_type<tc>, window_params = [{transform_indices = @transform_0, window_bounds = array<i64: 16, 128>}, {transform_indices = @transform_1, window_bounds = array<i64: 128, 512>}, {transform_indices = @transform_2, window_bounds = array<i64: 8, 512>}, {transform_indices = @transform_3, window_bounds = array<i64: 16, 512>}]} {
    %c0_i32 = arith.constant 0 : i32
    %0 = arith.cmpi eq, %arg2, %c0_i32 : i32
    %1 = arith.extui %0 : i1 to i32
    %c0_i32_0 = arith.constant 0 : i32
    %2 = arith.cmpi ne, %1, %c0_i32_0 : i32
    scf.if %2 {
      %cst_10 = arith.constant 0.000000e+00 : f32
      %12 = vector.broadcast %cst_10 : f32 to vector<16x512xf32>
      %c0_11 = arith.constant 0 : index
      %c0_12 = arith.constant 0 : index
      %13 = vector.load %arg7[%c0_11, %c0_12] : memref<16x512xf32, #tpu.memory_space<vmem>>, vector<16x512xf32>
      tpu.vector_store %arg7[%c0_11, %c0_12], %12 {strides = array<i32>} : memref<16x512xf32, #tpu.memory_space<vmem>>, vector<16x512xf32>,
    } else {
    }
    %c0 = arith.constant 0 : index
    %c0_1 = arith.constant 0 : index
    %3 = vector.load %arg7[%c0, %c0_1] : memref<16x512xf32, #tpu.memory_space<vmem>>, vector<16x512xf32>
    %c0_2 = arith.constant 0 : index
    %c0_3 = arith.constant 0 : index
    %4 = vector.load %arg3[%c0_2, %c0_3] : memref<16x128xbf16, #tpu.memory_space<vmem>>, vector<16x128xbf16>
    %c0_4 = arith.constant 0 : index
    %c0_5 = arith.constant 0 : index
    %5 = vector.load %arg4[%c0_4, %c0_5] : memref<128x512xbf16, #tpu.memory_space<vmem>>, vector<128x512xbf16>
    %cst = arith.constant dense<0.000000e+00> : vector<16x512xf32>
    %6 = tpu.matmul %4, %5, %cst {dimension_numbers = #tpu.dot_dimension_numbers<[1], [0], [0], [1], [0, 0, 1, 1], [], []>} : vector<16x128xbf16>, vector<128x512xbf16>, vector<16x512xf32> -> vector<16x512xf32>
    %7 = arith.addf %3, %6 : vector<16x512xf32>
    %c0_6 = arith.constant 0 : index
    %c0_7 = arith.constant 0 : index
    %8 = vector.load %arg7[%c0_6, %c0_7] : memref<16x512xf32, #tpu.memory_space<vmem>>, vector<16x512xf32>
    tpu.vector_store %arg7[%c0_6, %c0_7], %7 {strides = array<i32>} : memref<16x512xf32, #tpu.memory_space<vmem>>, vector<16x512xf32>,
    %c0_i32_8 = arith.constant 0 : i32
    %9 = arith.cmpi eq, %arg2, %c0_i32_8 : i32
    %10 = arith.extui %9 : i1 to i32
    %c0_i32_9 = arith.constant 0 : i32
    %11 = arith.cmpi ne, %10, %c0_i32_9 : i32
    scf.if %11 {
      %c0_10 = arith.constant 0 : index
      %c0_11 = arith.constant 0 : index
      %12 = vector.load %arg5[%c0_10, %c0_11] : memref<8x512xf32, #tpu.memory_space<vmem>>, vector<8x512xf32>
      %c0_12 = arith.constant 0 : index
      %c0_13 = arith.constant 0 : index
      %13 = vector.load %arg7[%c0_12, %c0_13] : memref<16x512xf32, #tpu.memory_space<vmem>>, vector<16x512xf32>
      %14 = vector.extract_strided_slice %12 {offsets = [0, 0], sizes = [1, 512], strides = [1, 1]} : vector<8x512xf32> to vector<1x512xf32>
      %15 = vector.broadcast %14 : vector<1x512xf32> to vector<16x512xf32>
      %16 = arith.mulf %13, %15 : vector<16x512xf32>
      %17 = vector.extract_strided_slice %12 {offsets = [1, 0], sizes = [1, 512], strides = [1, 1]} : vector<8x512xf32> to vector<1x512xf32>
      %18 = vector.broadcast %17 : vector<1x512xf32> to vector<16x512xf32>
      %19 = arith.addf %16, %18 : vector<16x512xf32>
      %cst_14 = arith.constant 0.000000e+00 : f32
      %20 = vector.broadcast %cst_14 : f32 to vector<16x512xf32>
      %21 = arith.maximumf %19, %20 : vector<16x512xf32>
      %c0_15 = arith.constant 0 : index
      %c0_16 = arith.constant 0 : index
      %22 = vector.load %arg6[%c0_15, %c0_16] : memref<16x512xf32, #tpu.memory_space<vmem>>, vector<16x512xf32>
      tpu.vector_store %arg6[%c0_15, %c0_16], %21 {strides = array<i32>} : memref<16x512xf32, #tpu.memory_space<vmem>>, vector<16x512xf32>,
    } else {
    }
    return
  }
  func.func @transform_0(%arg0: i32, %arg1: i32, %arg2: i32) -> (i32, i32) {
    %c0_i32 = arith.constant 0 : i32
    return %arg0, %arg2 : i32, i32
  }
  func.func @transform_1(%arg0: i32, %arg1: i32, %arg2: i32) -> (i32, i32) {
    %c0_i32 = arith.constant 0 : i32
    return %arg2, %arg1 : i32, i32
  }
  func.func @transform_2(%arg0: i32, %arg1: i32, %arg2: i32) -> (i32, i32) {
    %c0_i32 = arith.constant 0 : i32
    %c0_i32_0 = arith.constant 0 : i32
    return %c0_i32, %arg1 : i32, i32
  }
  func.func @transform_3(%arg0: i32, %arg1: i32, %arg2: i32) -> (i32, i32) {
    %c0_i32 = arith.constant 0 : i32
    return %arg0, %arg1 : i32, i32
  }
}

module attributes {stable_mosaic.version = 11 : i64} {
  func.func @kernel(%arg0: i32, %arg1: i32, %arg2: i32, %arg3: memref<32x1024xbf16, #tpu.memory_space<vmem>>, %arg4: memref<1024x512xbf16, #tpu.memory_space<vmem>>, %arg5: memref<8x512xf32, #tpu.memory_space<vmem>>, %arg6: memref<32x512xf32, #tpu.memory_space<vmem>>, %arg7: memref<32x512xf32, #tpu.memory_space<vmem>>) attributes {dimension_semantics = [#tpu.dimension_semantics<parallel>, #tpu.dimension_semantics<parallel>, #tpu.dimension_semantics<arbitrary>], iteration_bounds = array<i64: 1, 9, 1>, scalar_prefetch = 0 : i64, scratch_operands = 1 : i64, tpu.core_type = #tpu.core_type<tc>, window_params = [{transform_indices = @transform_0, window_bounds = array<i64: 32, 1024>}, {transform_indices = @transform_1, window_bounds = array<i64: 1024, 512>}, {transform_indices = @transform_2, window_bounds = array<i64: 8, 512>}, {transform_indices = @transform_3, window_bounds = array<i64: 32, 512>}]} {
    %c0_i32 = arith.constant 0 : i32
    %0 = arith.cmpi eq, %arg2, %c0_i32 : i32
    %1 = arith.extui %0 : i1 to i32
    %c0_i32_0 = arith.constant 0 : i32
    %2 = arith.cmpi ne, %1, %c0_i32_0 : i32
    scf.if %2 {
      %cst_10 = arith.constant 0.000000e+00 : f32
      %12 = vector.broadcast %cst_10 : f32 to vector<32x512xf32>
      %c0_11 = arith.constant 0 : index
      %c0_12 = arith.constant 0 : index
      %13 = vector.load %arg7[%c0_11, %c0_12] : memref<32x512xf32, #tpu.memory_space<vmem>>, vector<32x512xf32>
      tpu.vector_store %arg7[%c0_11, %c0_12], %12 {strides = array<i32>} : memref<32x512xf32, #tpu.memory_space<vmem>>, vector<32x512xf32>,
    } else {
    }
    %c0 = arith.constant 0 : index
    %c0_1 = arith.constant 0 : index
    %3 = vector.load %arg7[%c0, %c0_1] : memref<32x512xf32, #tpu.memory_space<vmem>>, vector<32x512xf32>
    %c0_2 = arith.constant 0 : index
    %c0_3 = arith.constant 0 : index
    %4 = vector.load %arg3[%c0_2, %c0_3] : memref<32x1024xbf16, #tpu.memory_space<vmem>>, vector<32x1024xbf16>
    %c0_4 = arith.constant 0 : index
    %c0_5 = arith.constant 0 : index
    %5 = vector.load %arg4[%c0_4, %c0_5] : memref<1024x512xbf16, #tpu.memory_space<vmem>>, vector<1024x512xbf16>
    %cst = arith.constant dense<0.000000e+00> : vector<32x512xf32>
    %6 = tpu.matmul %4, %5, %cst {dimension_numbers = #tpu.dot_dimension_numbers<[1], [0], [0], [1], [0, 0, 1, 1], [], []>} : vector<32x1024xbf16>, vector<1024x512xbf16>, vector<32x512xf32> -> vector<32x512xf32>
    %7 = arith.addf %3, %6 : vector<32x512xf32>
    %c0_6 = arith.constant 0 : index
    %c0_7 = arith.constant 0 : index
    %8 = vector.load %arg7[%c0_6, %c0_7] : memref<32x512xf32, #tpu.memory_space<vmem>>, vector<32x512xf32>
    tpu.vector_store %arg7[%c0_6, %c0_7], %7 {strides = array<i32>} : memref<32x512xf32, #tpu.memory_space<vmem>>, vector<32x512xf32>,
    %c0_i32_8 = arith.constant 0 : i32
    %9 = arith.cmpi eq, %arg2, %c0_i32_8 : i32
    %10 = arith.extui %9 : i1 to i32
    %c0_i32_9 = arith.constant 0 : i32
    %11 = arith.cmpi ne, %10, %c0_i32_9 : i32
    scf.if %11 {
      %c0_10 = arith.constant 0 : index
      %c0_11 = arith.constant 0 : index
      %12 = vector.load %arg5[%c0_10, %c0_11] : memref<8x512xf32, #tpu.memory_space<vmem>>, vector<8x512xf32>
      %c0_12 = arith.constant 0 : index
      %c0_13 = arith.constant 0 : index
      %13 = vector.load %arg7[%c0_12, %c0_13] : memref<32x512xf32, #tpu.memory_space<vmem>>, vector<32x512xf32>
      %14 = vector.extract_strided_slice %12 {offsets = [0, 0], sizes = [1, 512], strides = [1, 1]} : vector<8x512xf32> to vector<1x512xf32>
      %15 = vector.broadcast %14 : vector<1x512xf32> to vector<32x512xf32>
      %16 = arith.mulf %13, %15 : vector<32x512xf32>
      %17 = vector.extract_strided_slice %12 {offsets = [1, 0], sizes = [1, 512], strides = [1, 1]} : vector<8x512xf32> to vector<1x512xf32>
      %18 = vector.broadcast %17 : vector<1x512xf32> to vector<32x512xf32>
      %19 = arith.addf %16, %18 : vector<32x512xf32>
      %c0_14 = arith.constant 0 : index
      %c0_15 = arith.constant 0 : index
      %20 = vector.load %arg6[%c0_14, %c0_15] : memref<32x512xf32, #tpu.memory_space<vmem>>, vector<32x512xf32>
      tpu.vector_store %arg6[%c0_14, %c0_15], %19 {strides = array<i32>} : memref<32x512xf32, #tpu.memory_space<vmem>>, vector<32x512xf32>,
    } else {
    }
    return
  }
  func.func @transform_0(%arg0: i32, %arg1: i32, %arg2: i32) -> (i32, i32) {
    %c0_i32 = arith.constant 0 : i32
    return %arg0, %arg2 : i32, i32
  }
  func.func @transform_1(%arg0: i32, %arg1: i32, %arg2: i32) -> (i32, i32) {
    %c0_i32 = arith.constant 0 : i32
    return %arg2, %arg1 : i32, i32
  }
  func.func @transform_2(%arg0: i32, %arg1: i32, %arg2: i32) -> (i32, i32) {
    %c0_i32 = arith.constant 0 : i32
    %c0_i32_0 = arith.constant 0 : i32
    return %c0_i32, %arg1 : i32, i32
  }
  func.func @transform_3(%arg0: i32, %arg1: i32, %arg2: i32) -> (i32, i32) {
    %c0_i32 = arith.constant 0 : i32
    return %arg0, %arg1 : i32, i32
  }
}

module attributes {stable_mosaic.version = 11 : i64} {
  func.func @kernel(%arg0: i32, %arg1: i32, %arg2: i32, %arg3: memref<80x512xbf16, #tpu.memory_space<vmem>>, %arg4: memref<512x256xbf16, #tpu.memory_space<vmem>>, %arg5: memref<8x256xf32, #tpu.memory_space<vmem>>, %arg6: memref<80x256xf32, #tpu.memory_space<vmem>>, %arg7: memref<80x256xf32, #tpu.memory_space<vmem>>) attributes {dimension_semantics = [#tpu.dimension_semantics<parallel>, #tpu.dimension_semantics<parallel>, #tpu.dimension_semantics<arbitrary>], iteration_bounds = array<i64: 1, 9, 1>, scalar_prefetch = 0 : i64, scratch_operands = 1 : i64, tpu.core_type = #tpu.core_type<tc>, window_params = [{transform_indices = @transform_0, window_bounds = array<i64: 80, 512>}, {transform_indices = @transform_1, window_bounds = array<i64: 512, 256>}, {transform_indices = @transform_2, window_bounds = array<i64: 8, 256>}, {transform_indices = @transform_3, window_bounds = array<i64: 80, 256>}]} {
    %c0_i32 = arith.constant 0 : i32
    %0 = arith.cmpi eq, %arg2, %c0_i32 : i32
    %1 = arith.extui %0 : i1 to i32
    %c0_i32_0 = arith.constant 0 : i32
    %2 = arith.cmpi ne, %1, %c0_i32_0 : i32
    scf.if %2 {
      %cst_10 = arith.constant 0.000000e+00 : f32
      %12 = vector.broadcast %cst_10 : f32 to vector<80x256xf32>
      %c0_11 = arith.constant 0 : index
      %c0_12 = arith.constant 0 : index
      %13 = vector.load %arg7[%c0_11, %c0_12] : memref<80x256xf32, #tpu.memory_space<vmem>>, vector<80x256xf32>
      tpu.vector_store %arg7[%c0_11, %c0_12], %12 {strides = array<i32>} : memref<80x256xf32, #tpu.memory_space<vmem>>, vector<80x256xf32>,
    } else {
    }
    %c0 = arith.constant 0 : index
    %c0_1 = arith.constant 0 : index
    %3 = vector.load %arg7[%c0, %c0_1] : memref<80x256xf32, #tpu.memory_space<vmem>>, vector<80x256xf32>
    %c0_2 = arith.constant 0 : index
    %c0_3 = arith.constant 0 : index
    %4 = vector.load %arg3[%c0_2, %c0_3] : memref<80x512xbf16, #tpu.memory_space<vmem>>, vector<80x512xbf16>
    %c0_4 = arith.constant 0 : index
    %c0_5 = arith.constant 0 : index
    %5 = vector.load %arg4[%c0_4, %c0_5] : memref<512x256xbf16, #tpu.memory_space<vmem>>, vector<512x256xbf16>
    %cst = arith.constant dense<0.000000e+00> : vector<80x256xf32>
    %6 = tpu.matmul %4, %5, %cst {dimension_numbers = #tpu.dot_dimension_numbers<[1], [0], [0], [1], [0, 0, 1, 1], [], []>} : vector<80x512xbf16>, vector<512x256xbf16>, vector<80x256xf32> -> vector<80x256xf32>
    %7 = arith.addf %3, %6 : vector<80x256xf32>
    %c0_6 = arith.constant 0 : index
    %c0_7 = arith.constant 0 : index
    %8 = vector.load %arg7[%c0_6, %c0_7] : memref<80x256xf32, #tpu.memory_space<vmem>>, vector<80x256xf32>
    tpu.vector_store %arg7[%c0_6, %c0_7], %7 {strides = array<i32>} : memref<80x256xf32, #tpu.memory_space<vmem>>, vector<80x256xf32>,
    %c0_i32_8 = arith.constant 0 : i32
    %9 = arith.cmpi eq, %arg2, %c0_i32_8 : i32
    %10 = arith.extui %9 : i1 to i32
    %c0_i32_9 = arith.constant 0 : i32
    %11 = arith.cmpi ne, %10, %c0_i32_9 : i32
    scf.if %11 {
      %c0_10 = arith.constant 0 : index
      %c0_11 = arith.constant 0 : index
      %12 = vector.load %arg5[%c0_10, %c0_11] : memref<8x256xf32, #tpu.memory_space<vmem>>, vector<8x256xf32>
      %c0_12 = arith.constant 0 : index
      %c0_13 = arith.constant 0 : index
      %13 = vector.load %arg7[%c0_12, %c0_13] : memref<80x256xf32, #tpu.memory_space<vmem>>, vector<80x256xf32>
      %14 = vector.extract_strided_slice %12 {offsets = [0, 0], sizes = [1, 256], strides = [1, 1]} : vector<8x256xf32> to vector<1x256xf32>
      %15 = vector.broadcast %14 : vector<1x256xf32> to vector<80x256xf32>
      %16 = arith.mulf %13, %15 : vector<80x256xf32>
      %17 = vector.extract_strided_slice %12 {offsets = [1, 0], sizes = [1, 256], strides = [1, 1]} : vector<8x256xf32> to vector<1x256xf32>
      %18 = vector.broadcast %17 : vector<1x256xf32> to vector<80x256xf32>
      %19 = arith.addf %16, %18 : vector<80x256xf32>
      %c0_14 = arith.constant 0 : index
      %c0_15 = arith.constant 0 : index
      %20 = vector.load %arg6[%c0_14, %c0_15] : memref<80x256xf32, #tpu.memory_space<vmem>>, vector<80x256xf32>
      tpu.vector_store %arg6[%c0_14, %c0_15], %19 {strides = array<i32>} : memref<80x256xf32, #tpu.memory_space<vmem>>, vector<80x256xf32>,
    } else {
    }
    return
  }
  func.func @transform_0(%arg0: i32, %arg1: i32, %arg2: i32) -> (i32, i32) {
    %c0_i32 = arith.constant 0 : i32
    return %arg0, %arg2 : i32, i32
  }
  func.func @transform_1(%arg0: i32, %arg1: i32, %arg2: i32) -> (i32, i32) {
    %c0_i32 = arith.constant 0 : i32
    return %arg2, %arg1 : i32, i32
  }
  func.func @transform_2(%arg0: i32, %arg1: i32, %arg2: i32) -> (i32, i32) {
    %c0_i32 = arith.constant 0 : i32
    %c0_i32_0 = arith.constant 0 : i32
    return %c0_i32, %arg1 : i32, i32
  }
  func.func @transform_3(%arg0: i32, %arg1: i32, %arg2: i32) -> (i32, i32) {
    %c0_i32 = arith.constant 0 : i32
    return %arg0, %arg1 : i32, i32
  }
}

module attributes {stable_mosaic.version = 11 : i64} {
  func.func @kernel(%arg0: i32, %arg1: i32, %arg2: i32, %arg3: memref<128x256xbf16, #tpu.memory_space<vmem>>, %arg4: memref<256x256xbf16, #tpu.memory_space<vmem>>, %arg5: memref<8x256xf32, #tpu.memory_space<vmem>>, %arg6: memref<128x256xf32, #tpu.memory_space<vmem>>, %arg7: memref<128x256xf32, #tpu.memory_space<vmem>>) attributes {dimension_semantics = [#tpu.dimension_semantics<parallel>, #tpu.dimension_semantics<parallel>, #tpu.dimension_semantics<arbitrary>], iteration_bounds = array<i64: 3, 5, 1>, scalar_prefetch = 0 : i64, scratch_operands = 1 : i64, tpu.core_type = #tpu.core_type<tc>, window_params = [{transform_indices = @transform_0, window_bounds = array<i64: 128, 256>}, {transform_indices = @transform_1, window_bounds = array<i64: 256, 256>}, {transform_indices = @transform_2, window_bounds = array<i64: 8, 256>}, {transform_indices = @transform_3, window_bounds = array<i64: 128, 256>}]} {
    %c0_i32 = arith.constant 0 : i32
    %0 = arith.cmpi eq, %arg2, %c0_i32 : i32
    %1 = arith.extui %0 : i1 to i32
    %c0_i32_0 = arith.constant 0 : i32
    %2 = arith.cmpi ne, %1, %c0_i32_0 : i32
    scf.if %2 {
      %cst_10 = arith.constant 0.000000e+00 : f32
      %12 = vector.broadcast %cst_10 : f32 to vector<128x256xf32>
      %c0_11 = arith.constant 0 : index
      %c0_12 = arith.constant 0 : index
      %13 = vector.load %arg7[%c0_11, %c0_12] : memref<128x256xf32, #tpu.memory_space<vmem>>, vector<128x256xf32>
      tpu.vector_store %arg7[%c0_11, %c0_12], %12 {strides = array<i32>} : memref<128x256xf32, #tpu.memory_space<vmem>>, vector<128x256xf32>,
    } else {
    }
    %c0 = arith.constant 0 : index
    %c0_1 = arith.constant 0 : index
    %3 = vector.load %arg7[%c0, %c0_1] : memref<128x256xf32, #tpu.memory_space<vmem>>, vector<128x256xf32>
    %c0_2 = arith.constant 0 : index
    %c0_3 = arith.constant 0 : index
    %4 = vector.load %arg3[%c0_2, %c0_3] : memref<128x256xbf16, #tpu.memory_space<vmem>>, vector<128x256xbf16>
    %c0_4 = arith.constant 0 : index
    %c0_5 = arith.constant 0 : index
    %5 = vector.load %arg4[%c0_4, %c0_5] : memref<256x256xbf16, #tpu.memory_space<vmem>>, vector<256x256xbf16>
    %cst = arith.constant dense<0.000000e+00> : vector<128x256xf32>
    %6 = tpu.matmul %4, %5, %cst {dimension_numbers = #tpu.dot_dimension_numbers<[1], [0], [0], [1], [0, 0, 1, 1], [], []>} : vector<128x256xbf16>, vector<256x256xbf16>, vector<128x256xf32> -> vector<128x256xf32>
    %7 = arith.addf %3, %6 : vector<128x256xf32>
    %c0_6 = arith.constant 0 : index
    %c0_7 = arith.constant 0 : index
    %8 = vector.load %arg7[%c0_6, %c0_7] : memref<128x256xf32, #tpu.memory_space<vmem>>, vector<128x256xf32>
    tpu.vector_store %arg7[%c0_6, %c0_7], %7 {strides = array<i32>} : memref<128x256xf32, #tpu.memory_space<vmem>>, vector<128x256xf32>,
    %c0_i32_8 = arith.constant 0 : i32
    %9 = arith.cmpi eq, %arg2, %c0_i32_8 : i32
    %10 = arith.extui %9 : i1 to i32
    %c0_i32_9 = arith.constant 0 : i32
    %11 = arith.cmpi ne, %10, %c0_i32_9 : i32
    scf.if %11 {
      %c0_10 = arith.constant 0 : index
      %c0_11 = arith.constant 0 : index
      %12 = vector.load %arg5[%c0_10, %c0_11] : memref<8x256xf32, #tpu.memory_space<vmem>>, vector<8x256xf32>
      %c0_12 = arith.constant 0 : index
      %c0_13 = arith.constant 0 : index
      %13 = vector.load %arg7[%c0_12, %c0_13] : memref<128x256xf32, #tpu.memory_space<vmem>>, vector<128x256xf32>
      %14 = vector.extract_strided_slice %12 {offsets = [0, 0], sizes = [1, 256], strides = [1, 1]} : vector<8x256xf32> to vector<1x256xf32>
      %15 = vector.broadcast %14 : vector<1x256xf32> to vector<128x256xf32>
      %16 = arith.mulf %13, %15 : vector<128x256xf32>
      %17 = vector.extract_strided_slice %12 {offsets = [1, 0], sizes = [1, 256], strides = [1, 1]} : vector<8x256xf32> to vector<1x256xf32>
      %18 = vector.broadcast %17 : vector<1x256xf32> to vector<128x256xf32>
      %19 = arith.addf %16, %18 : vector<128x256xf32>
      %c0_14 = arith.constant 0 : index
      %c0_15 = arith.constant 0 : index
      %20 = vector.load %arg6[%c0_14, %c0_15] : memref<128x256xf32, #tpu.memory_space<vmem>>, vector<128x256xf32>
      tpu.vector_store %arg6[%c0_14, %c0_15], %19 {strides = array<i32>} : memref<128x256xf32, #tpu.memory_space<vmem>>, vector<128x256xf32>,
    } else {
    }
    return
  }
  func.func @transform_0(%arg0: i32, %arg1: i32, %arg2: i32) -> (i32, i32) {
    %c0_i32 = arith.constant 0 : i32
    return %arg0, %arg2 : i32, i32
  }
  func.func @transform_1(%arg0: i32, %arg1: i32, %arg2: i32) -> (i32, i32) {
    %c0_i32 = arith.constant 0 : i32
    return %arg2, %arg1 : i32, i32
  }
  func.func @transform_2(%arg0: i32, %arg1: i32, %arg2: i32) -> (i32, i32) {
    %c0_i32 = arith.constant 0 : i32
    %c0_i32_0 = arith.constant 0 : i32
    return %c0_i32, %arg1 : i32, i32
  }
  func.func @transform_3(%arg0: i32, %arg1: i32, %arg2: i32) -> (i32, i32) {
    %c0_i32 = arith.constant 0 : i32
    return %arg0, %arg1 : i32, i32
  }
}

module attributes {stable_mosaic.version = 11 : i64} {
  func.func @kernel(%arg0: i32, %arg1: i32, %arg2: i32, %arg3: memref<128x128xbf16, #tpu.memory_space<vmem>>, %arg4: memref<128x256xbf16, #tpu.memory_space<vmem>>, %arg5: memref<8x256xf32, #tpu.memory_space<vmem>>, %arg6: memref<128x256xf32, #tpu.memory_space<vmem>>, %arg7: memref<128x256xf32, #tpu.memory_space<vmem>>) attributes {dimension_semantics = [#tpu.dimension_semantics<parallel>, #tpu.dimension_semantics<parallel>, #tpu.dimension_semantics<arbitrary>], iteration_bounds = array<i64: 9, 3, 1>, scalar_prefetch = 0 : i64, scratch_operands = 1 : i64, tpu.core_type = #tpu.core_type<tc>, window_params = [{transform_indices = @transform_0, window_bounds = array<i64: 128, 128>}, {transform_indices = @transform_1, window_bounds = array<i64: 128, 256>}, {transform_indices = @transform_2, window_bounds = array<i64: 8, 256>}, {transform_indices = @transform_3, window_bounds = array<i64: 128, 256>}]} {
    %c0_i32 = arith.constant 0 : i32
    %0 = arith.cmpi eq, %arg2, %c0_i32 : i32
    %1 = arith.extui %0 : i1 to i32
    %c0_i32_0 = arith.constant 0 : i32
    %2 = arith.cmpi ne, %1, %c0_i32_0 : i32
    scf.if %2 {
      %cst_10 = arith.constant 0.000000e+00 : f32
      %12 = vector.broadcast %cst_10 : f32 to vector<128x256xf32>
      %c0_11 = arith.constant 0 : index
      %c0_12 = arith.constant 0 : index
      %13 = vector.load %arg7[%c0_11, %c0_12] : memref<128x256xf32, #tpu.memory_space<vmem>>, vector<128x256xf32>
      tpu.vector_store %arg7[%c0_11, %c0_12], %12 {strides = array<i32>} : memref<128x256xf32, #tpu.memory_space<vmem>>, vector<128x256xf32>,
    } else {
    }
    %c0 = arith.constant 0 : index
    %c0_1 = arith.constant 0 : index
    %3 = vector.load %arg7[%c0, %c0_1] : memref<128x256xf32, #tpu.memory_space<vmem>>, vector<128x256xf32>
    %c0_2 = arith.constant 0 : index
    %c0_3 = arith.constant 0 : index
    %4 = vector.load %arg3[%c0_2, %c0_3] : memref<128x128xbf16, #tpu.memory_space<vmem>>, vector<128x128xbf16>
    %c0_4 = arith.constant 0 : index
    %c0_5 = arith.constant 0 : index
    %5 = vector.load %arg4[%c0_4, %c0_5] : memref<128x256xbf16, #tpu.memory_space<vmem>>, vector<128x256xbf16>
    %cst = arith.constant dense<0.000000e+00> : vector<128x256xf32>
    %6 = tpu.matmul %4, %5, %cst {dimension_numbers = #tpu.dot_dimension_numbers<[1], [0], [0], [1], [0, 0, 1, 1], [], []>} : vector<128x128xbf16>, vector<128x256xbf16>, vector<128x256xf32> -> vector<128x256xf32>
    %7 = arith.addf %3, %6 : vector<128x256xf32>
    %c0_6 = arith.constant 0 : index
    %c0_7 = arith.constant 0 : index
    %8 = vector.load %arg7[%c0_6, %c0_7] : memref<128x256xf32, #tpu.memory_space<vmem>>, vector<128x256xf32>
    tpu.vector_store %arg7[%c0_6, %c0_7], %7 {strides = array<i32>} : memref<128x256xf32, #tpu.memory_space<vmem>>, vector<128x256xf32>,
    %c0_i32_8 = arith.constant 0 : i32
    %9 = arith.cmpi eq, %arg2, %c0_i32_8 : i32
    %10 = arith.extui %9 : i1 to i32
    %c0_i32_9 = arith.constant 0 : i32
    %11 = arith.cmpi ne, %10, %c0_i32_9 : i32
    scf.if %11 {
      %c0_10 = arith.constant 0 : index
      %c0_11 = arith.constant 0 : index
      %12 = vector.load %arg5[%c0_10, %c0_11] : memref<8x256xf32, #tpu.memory_space<vmem>>, vector<8x256xf32>
      %c0_12 = arith.constant 0 : index
      %c0_13 = arith.constant 0 : index
      %13 = vector.load %arg7[%c0_12, %c0_13] : memref<128x256xf32, #tpu.memory_space<vmem>>, vector<128x256xf32>
      %14 = vector.extract_strided_slice %12 {offsets = [0, 0], sizes = [1, 256], strides = [1, 1]} : vector<8x256xf32> to vector<1x256xf32>
      %15 = vector.broadcast %14 : vector<1x256xf32> to vector<128x256xf32>
      %16 = arith.mulf %13, %15 : vector<128x256xf32>
      %17 = vector.extract_strided_slice %12 {offsets = [1, 0], sizes = [1, 256], strides = [1, 1]} : vector<8x256xf32> to vector<1x256xf32>
      %18 = vector.broadcast %17 : vector<1x256xf32> to vector<128x256xf32>
      %19 = arith.addf %16, %18 : vector<128x256xf32>
      %c0_14 = arith.constant 0 : index
      %c0_15 = arith.constant 0 : index
      %20 = vector.load %arg6[%c0_14, %c0_15] : memref<128x256xf32, #tpu.memory_space<vmem>>, vector<128x256xf32>
      tpu.vector_store %arg6[%c0_14, %c0_15], %19 {strides = array<i32>} : memref<128x256xf32, #tpu.memory_space<vmem>>, vector<128x256xf32>,
    } else {
    }
    return
  }
  func.func @transform_0(%arg0: i32, %arg1: i32, %arg2: i32) -> (i32, i32) {
    %c0_i32 = arith.constant 0 : i32
    return %arg0, %arg2 : i32, i32
  }
  func.func @transform_1(%arg0: i32, %arg1: i32, %arg2: i32) -> (i32, i32) {
    %c0_i32 = arith.constant 0 : i32
    return %arg2, %arg1 : i32, i32
  }
  func.func @transform_2(%arg0: i32, %arg1: i32, %arg2: i32) -> (i32, i32) {
    %c0_i32 = arith.constant 0 : i32
    %c0_i32_0 = arith.constant 0 : i32
    return %c0_i32, %arg1 : i32, i32
  }
  func.func @transform_3(%arg0: i32, %arg1: i32, %arg2: i32) -> (i32, i32) {
    %c0_i32 = arith.constant 0 : i32
    return %arg0, %arg1 : i32, i32
  }
}

module attributes {stable_mosaic.version = 11 : i64} {
  func.func @kernel(%arg0: i32, %arg1: i32, %arg2: i32, %arg3: memref<256x128xbf16, #tpu.memory_space<vmem>>, %arg4: memref<128x128xbf16, #tpu.memory_space<vmem>>, %arg5: memref<8x128xf32, #tpu.memory_space<vmem>>, %arg6: memref<256x128xf32, #tpu.memory_space<vmem>>, %arg7: memref<256x128xf32, #tpu.memory_space<vmem>>) attributes {dimension_semantics = [#tpu.dimension_semantics<parallel>, #tpu.dimension_semantics<parallel>, #tpu.dimension_semantics<arbitrary>], iteration_bounds = array<i64: 15, 3, 1>, scalar_prefetch = 0 : i64, scratch_operands = 1 : i64, tpu.core_type = #tpu.core_type<tc>, window_params = [{transform_indices = @transform_0, window_bounds = array<i64: 256, 128>}, {transform_indices = @transform_1, window_bounds = array<i64: 128, 128>}, {transform_indices = @transform_2, window_bounds = array<i64: 8, 128>}, {transform_indices = @transform_3, window_bounds = array<i64: 256, 128>}]} {
    %c0_i32 = arith.constant 0 : i32
    %0 = arith.cmpi eq, %arg2, %c0_i32 : i32
    %1 = arith.extui %0 : i1 to i32
    %c0_i32_0 = arith.constant 0 : i32
    %2 = arith.cmpi ne, %1, %c0_i32_0 : i32
    scf.if %2 {
      %cst_10 = arith.constant 0.000000e+00 : f32
      %12 = vector.broadcast %cst_10 : f32 to vector<256x128xf32>
      %c0_11 = arith.constant 0 : index
      %c0_12 = arith.constant 0 : index
      %13 = vector.load %arg7[%c0_11, %c0_12] : memref<256x128xf32, #tpu.memory_space<vmem>>, vector<256x128xf32>
      tpu.vector_store %arg7[%c0_11, %c0_12], %12 {strides = array<i32>} : memref<256x128xf32, #tpu.memory_space<vmem>>, vector<256x128xf32>,
    } else {
    }
    %c0 = arith.constant 0 : index
    %c0_1 = arith.constant 0 : index
    %3 = vector.load %arg7[%c0, %c0_1] : memref<256x128xf32, #tpu.memory_space<vmem>>, vector<256x128xf32>
    %c0_2 = arith.constant 0 : index
    %c0_3 = arith.constant 0 : index
    %4 = vector.load %arg3[%c0_2, %c0_3] : memref<256x128xbf16, #tpu.memory_space<vmem>>, vector<256x128xbf16>
    %c0_4 = arith.constant 0 : index
    %c0_5 = arith.constant 0 : index
    %5 = vector.load %arg4[%c0_4, %c0_5] : memref<128x128xbf16, #tpu.memory_space<vmem>>, vector<128x128xbf16>
    %cst = arith.constant dense<0.000000e+00> : vector<256x128xf32>
    %6 = tpu.matmul %4, %5, %cst {dimension_numbers = #tpu.dot_dimension_numbers<[1], [0], [0], [1], [0, 0, 1, 1], [], []>} : vector<256x128xbf16>, vector<128x128xbf16>, vector<256x128xf32> -> vector<256x128xf32>
    %7 = arith.addf %3, %6 : vector<256x128xf32>
    %c0_6 = arith.constant 0 : index
    %c0_7 = arith.constant 0 : index
    %8 = vector.load %arg7[%c0_6, %c0_7] : memref<256x128xf32, #tpu.memory_space<vmem>>, vector<256x128xf32>
    tpu.vector_store %arg7[%c0_6, %c0_7], %7 {strides = array<i32>} : memref<256x128xf32, #tpu.memory_space<vmem>>, vector<256x128xf32>,
    %c0_i32_8 = arith.constant 0 : i32
    %9 = arith.cmpi eq, %arg2, %c0_i32_8 : i32
    %10 = arith.extui %9 : i1 to i32
    %c0_i32_9 = arith.constant 0 : i32
    %11 = arith.cmpi ne, %10, %c0_i32_9 : i32
    scf.if %11 {
      %c0_10 = arith.constant 0 : index
      %c0_11 = arith.constant 0 : index
      %12 = vector.load %arg5[%c0_10, %c0_11] : memref<8x128xf32, #tpu.memory_space<vmem>>, vector<8x128xf32>
      %c0_12 = arith.constant 0 : index
      %c0_13 = arith.constant 0 : index
      %13 = vector.load %arg7[%c0_12, %c0_13] : memref<256x128xf32, #tpu.memory_space<vmem>>, vector<256x128xf32>
      %14 = vector.extract_strided_slice %12 {offsets = [0, 0], sizes = [1, 128], strides = [1, 1]} : vector<8x128xf32> to vector<1x128xf32>
      %15 = vector.broadcast %14 : vector<1x128xf32> to vector<256x128xf32>
      %16 = arith.mulf %13, %15 : vector<256x128xf32>
      %17 = vector.extract_strided_slice %12 {offsets = [1, 0], sizes = [1, 128], strides = [1, 1]} : vector<8x128xf32> to vector<1x128xf32>
      %18 = vector.broadcast %17 : vector<1x128xf32> to vector<256x128xf32>
      %19 = arith.addf %16, %18 : vector<256x128xf32>
      %c0_14 = arith.constant 0 : index
      %c0_15 = arith.constant 0 : index
      %20 = vector.load %arg6[%c0_14, %c0_15] : memref<256x128xf32, #tpu.memory_space<vmem>>, vector<256x128xf32>
      tpu.vector_store %arg6[%c0_14, %c0_15], %19 {strides = array<i32>} : memref<256x128xf32, #tpu.memory_space<vmem>>, vector<256x128xf32>,
    } else {
    }
    return
  }
  func.func @transform_0(%arg0: i32, %arg1: i32, %arg2: i32) -> (i32, i32) {
    %c0_i32 = arith.constant 0 : i32
    return %arg0, %arg2 : i32, i32
  }
  func.func @transform_1(%arg0: i32, %arg1: i32, %arg2: i32) -> (i32, i32) {
    %c0_i32 = arith.constant 0 : i32
    return %arg2, %arg1 : i32, i32
  }
  func.func @transform_2(%arg0: i32, %arg1: i32, %arg2: i32) -> (i32, i32) {
    %c0_i32 = arith.constant 0 : i32
    %c0_i32_0 = arith.constant 0 : i32
    return %c0_i32, %arg1 : i32, i32
  }
  func.func @transform_3(%arg0: i32, %arg1: i32, %arg2: i32) -> (i32, i32) {
    %c0_i32 = arith.constant 0 : i32
    return %arg0, %arg1 : i32, i32
  }
}

module attributes {stable_mosaic.version = 11 : i64} {
  func.func @kernel(%arg0: i32, %arg1: i32, %arg2: i32, %arg3: memref<256x128xbf16, #tpu.memory_space<vmem>>, %arg4: memref<128x256xbf16, #tpu.memory_space<vmem>>, %arg5: memref<8x256xf32, #tpu.memory_space<vmem>>, %arg6: memref<256x256xf32, #tpu.memory_space<vmem>>, %arg7: memref<256x256xf32, #tpu.memory_space<vmem>>) attributes {dimension_semantics = [#tpu.dimension_semantics<parallel>, #tpu.dimension_semantics<parallel>, #tpu.dimension_semantics<arbitrary>], iteration_bounds = array<i64: 15, 1, 1>, scalar_prefetch = 0 : i64, scratch_operands = 1 : i64, tpu.core_type = #tpu.core_type<tc>, window_params = [{transform_indices = @transform_0, window_bounds = array<i64: 256, 128>}, {transform_indices = @transform_1, window_bounds = array<i64: 128, 256>}, {transform_indices = @transform_2, window_bounds = array<i64: 8, 256>}, {transform_indices = @transform_3, window_bounds = array<i64: 256, 256>}]} {
    %c0_i32 = arith.constant 0 : i32
    %0 = arith.cmpi eq, %arg2, %c0_i32 : i32
    %1 = arith.extui %0 : i1 to i32
    %c0_i32_0 = arith.constant 0 : i32
    %2 = arith.cmpi ne, %1, %c0_i32_0 : i32
    scf.if %2 {
      %cst_10 = arith.constant 0.000000e+00 : f32
      %12 = vector.broadcast %cst_10 : f32 to vector<256x256xf32>
      %c0_11 = arith.constant 0 : index
      %c0_12 = arith.constant 0 : index
      %13 = vector.load %arg7[%c0_11, %c0_12] : memref<256x256xf32, #tpu.memory_space<vmem>>, vector<256x256xf32>
      tpu.vector_store %arg7[%c0_11, %c0_12], %12 {strides = array<i32>} : memref<256x256xf32, #tpu.memory_space<vmem>>, vector<256x256xf32>,
    } else {
    }
    %c0 = arith.constant 0 : index
    %c0_1 = arith.constant 0 : index
    %3 = vector.load %arg7[%c0, %c0_1] : memref<256x256xf32, #tpu.memory_space<vmem>>, vector<256x256xf32>
    %c0_2 = arith.constant 0 : index
    %c0_3 = arith.constant 0 : index
    %4 = vector.load %arg3[%c0_2, %c0_3] : memref<256x128xbf16, #tpu.memory_space<vmem>>, vector<256x128xbf16>
    %c0_4 = arith.constant 0 : index
    %c0_5 = arith.constant 0 : index
    %5 = vector.load %arg4[%c0_4, %c0_5] : memref<128x256xbf16, #tpu.memory_space<vmem>>, vector<128x256xbf16>
    %cst = arith.constant dense<0.000000e+00> : vector<256x256xf32>
    %6 = tpu.matmul %4, %5, %cst {dimension_numbers = #tpu.dot_dimension_numbers<[1], [0], [0], [1], [0, 0, 1, 1], [], []>} : vector<256x128xbf16>, vector<128x256xbf16>, vector<256x256xf32> -> vector<256x256xf32>
    %7 = arith.addf %3, %6 : vector<256x256xf32>
    %c0_6 = arith.constant 0 : index
    %c0_7 = arith.constant 0 : index
    %8 = vector.load %arg7[%c0_6, %c0_7] : memref<256x256xf32, #tpu.memory_space<vmem>>, vector<256x256xf32>
    tpu.vector_store %arg7[%c0_6, %c0_7], %7 {strides = array<i32>} : memref<256x256xf32, #tpu.memory_space<vmem>>, vector<256x256xf32>,
    %c0_i32_8 = arith.constant 0 : i32
    %9 = arith.cmpi eq, %arg2, %c0_i32_8 : i32
    %10 = arith.extui %9 : i1 to i32
    %c0_i32_9 = arith.constant 0 : i32
    %11 = arith.cmpi ne, %10, %c0_i32_9 : i32
    scf.if %11 {
      %c0_10 = arith.constant 0 : index
      %c0_11 = arith.constant 0 : index
      %12 = vector.load %arg5[%c0_10, %c0_11] : memref<8x256xf32, #tpu.memory_space<vmem>>, vector<8x256xf32>
      %c0_12 = arith.constant 0 : index
      %c0_13 = arith.constant 0 : index
      %13 = vector.load %arg7[%c0_12, %c0_13] : memref<256x256xf32, #tpu.memory_space<vmem>>, vector<256x256xf32>
      %14 = vector.extract_strided_slice %12 {offsets = [0, 0], sizes = [1, 256], strides = [1, 1]} : vector<8x256xf32> to vector<1x256xf32>
      %15 = vector.broadcast %14 : vector<1x256xf32> to vector<256x256xf32>
      %16 = arith.mulf %13, %15 : vector<256x256xf32>
      %17 = vector.extract_strided_slice %12 {offsets = [1, 0], sizes = [1, 256], strides = [1, 1]} : vector<8x256xf32> to vector<1x256xf32>
      %18 = vector.broadcast %17 : vector<1x256xf32> to vector<256x256xf32>
      %19 = arith.addf %16, %18 : vector<256x256xf32>
      %c0_14 = arith.constant 0 : index
      %c0_15 = arith.constant 0 : index
      %20 = vector.load %arg6[%c0_14, %c0_15] : memref<256x256xf32, #tpu.memory_space<vmem>>, vector<256x256xf32>
      tpu.vector_store %arg6[%c0_14, %c0_15], %19 {strides = array<i32>} : memref<256x256xf32, #tpu.memory_space<vmem>>, vector<256x256xf32>,
    } else {
    }
    return
  }
  func.func @transform_0(%arg0: i32, %arg1: i32, %arg2: i32) -> (i32, i32) {
    %c0_i32 = arith.constant 0 : i32
    return %arg0, %arg2 : i32, i32
  }
  func.func @transform_1(%arg0: i32, %arg1: i32, %arg2: i32) -> (i32, i32) {
    %c0_i32 = arith.constant 0 : i32
    return %arg2, %arg1 : i32, i32
  }
  func.func @transform_2(%arg0: i32, %arg1: i32, %arg2: i32) -> (i32, i32) {
    %c0_i32 = arith.constant 0 : i32
    %c0_i32_0 = arith.constant 0 : i32
    return %c0_i32, %arg1 : i32, i32
  }
  func.func @transform_3(%arg0: i32, %arg1: i32, %arg2: i32) -> (i32, i32) {
    %c0_i32 = arith.constant 0 : i32
    return %arg0, %arg1 : i32, i32
  }
}

module attributes {stable_mosaic.version = 11 : i64} {
  func.func @kernel(%arg0: i32, %arg1: i32, %arg2: i32, %arg3: memref<256x128xbf16, #tpu.memory_space<vmem>>, %arg4: memref<128x128xbf16, #tpu.memory_space<vmem>>, %arg5: memref<8x128xf32, #tpu.memory_space<vmem>>, %arg6: memref<256x128xf32, #tpu.memory_space<vmem>>, %arg7: memref<256x128xf32, #tpu.memory_space<vmem>>) attributes {dimension_semantics = [#tpu.dimension_semantics<parallel>, #tpu.dimension_semantics<parallel>, #tpu.dimension_semantics<arbitrary>], iteration_bounds = array<i64: 16, 1, 1>, scalar_prefetch = 0 : i64, scratch_operands = 1 : i64, tpu.core_type = #tpu.core_type<tc>, window_params = [{transform_indices = @transform_0, window_bounds = array<i64: 256, 128>}, {transform_indices = @transform_1, window_bounds = array<i64: 128, 128>}, {transform_indices = @transform_2, window_bounds = array<i64: 8, 128>}, {transform_indices = @transform_3, window_bounds = array<i64: 256, 128>}]} {
    %c0_i32 = arith.constant 0 : i32
    %0 = arith.cmpi eq, %arg2, %c0_i32 : i32
    %1 = arith.extui %0 : i1 to i32
    %c0_i32_0 = arith.constant 0 : i32
    %2 = arith.cmpi ne, %1, %c0_i32_0 : i32
    scf.if %2 {
      %cst_10 = arith.constant 0.000000e+00 : f32
      %12 = vector.broadcast %cst_10 : f32 to vector<256x128xf32>
      %c0_11 = arith.constant 0 : index
      %c0_12 = arith.constant 0 : index
      %13 = vector.load %arg7[%c0_11, %c0_12] : memref<256x128xf32, #tpu.memory_space<vmem>>, vector<256x128xf32>
      tpu.vector_store %arg7[%c0_11, %c0_12], %12 {strides = array<i32>} : memref<256x128xf32, #tpu.memory_space<vmem>>, vector<256x128xf32>,
    } else {
    }
    %c0 = arith.constant 0 : index
    %c0_1 = arith.constant 0 : index
    %3 = vector.load %arg7[%c0, %c0_1] : memref<256x128xf32, #tpu.memory_space<vmem>>, vector<256x128xf32>
    %c0_2 = arith.constant 0 : index
    %c0_3 = arith.constant 0 : index
    %4 = vector.load %arg3[%c0_2, %c0_3] : memref<256x128xbf16, #tpu.memory_space<vmem>>, vector<256x128xbf16>
    %c0_4 = arith.constant 0 : index
    %c0_5 = arith.constant 0 : index
    %5 = vector.load %arg4[%c0_4, %c0_5] : memref<128x128xbf16, #tpu.memory_space<vmem>>, vector<128x128xbf16>
    %cst = arith.constant dense<0.000000e+00> : vector<256x128xf32>
    %6 = tpu.matmul %4, %5, %cst {dimension_numbers = #tpu.dot_dimension_numbers<[1], [0], [0], [1], [0, 0, 1, 1], [], []>} : vector<256x128xbf16>, vector<128x128xbf16>, vector<256x128xf32> -> vector<256x128xf32>
    %7 = arith.addf %3, %6 : vector<256x128xf32>
    %c0_6 = arith.constant 0 : index
    %c0_7 = arith.constant 0 : index
    %8 = vector.load %arg7[%c0_6, %c0_7] : memref<256x128xf32, #tpu.memory_space<vmem>>, vector<256x128xf32>
    tpu.vector_store %arg7[%c0_6, %c0_7], %7 {strides = array<i32>} : memref<256x128xf32, #tpu.memory_space<vmem>>, vector<256x128xf32>,
    %c0_i32_8 = arith.constant 0 : i32
    %9 = arith.cmpi eq, %arg2, %c0_i32_8 : i32
    %10 = arith.extui %9 : i1 to i32
    %c0_i32_9 = arith.constant 0 : i32
    %11 = arith.cmpi ne, %10, %c0_i32_9 : i32
    scf.if %11 {
      %c0_10 = arith.constant 0 : index
      %c0_11 = arith.constant 0 : index
      %12 = vector.load %arg5[%c0_10, %c0_11] : memref<8x128xf32, #tpu.memory_space<vmem>>, vector<8x128xf32>
      %c0_12 = arith.constant 0 : index
      %c0_13 = arith.constant 0 : index
      %13 = vector.load %arg7[%c0_12, %c0_13] : memref<256x128xf32, #tpu.memory_space<vmem>>, vector<256x128xf32>
      %14 = vector.extract_strided_slice %12 {offsets = [0, 0], sizes = [1, 128], strides = [1, 1]} : vector<8x128xf32> to vector<1x128xf32>
      %15 = vector.broadcast %14 : vector<1x128xf32> to vector<256x128xf32>
      %16 = arith.mulf %13, %15 : vector<256x128xf32>
      %17 = vector.extract_strided_slice %12 {offsets = [1, 0], sizes = [1, 128], strides = [1, 1]} : vector<8x128xf32> to vector<1x128xf32>
      %18 = vector.broadcast %17 : vector<1x128xf32> to vector<256x128xf32>
      %19 = arith.addf %16, %18 : vector<256x128xf32>
      %c0_14 = arith.constant 0 : index
      %c0_15 = arith.constant 0 : index
      %20 = vector.load %arg6[%c0_14, %c0_15] : memref<256x128xf32, #tpu.memory_space<vmem>>, vector<256x128xf32>
      tpu.vector_store %arg6[%c0_14, %c0_15], %19 {strides = array<i32>} : memref<256x128xf32, #tpu.memory_space<vmem>>, vector<256x128xf32>,
    } else {
    }
    return
  }
  func.func @transform_0(%arg0: i32, %arg1: i32, %arg2: i32) -> (i32, i32) {
    %c0_i32 = arith.constant 0 : i32
    return %arg0, %arg2 : i32, i32
  }
  func.func @transform_1(%arg0: i32, %arg1: i32, %arg2: i32) -> (i32, i32) {
    %c0_i32 = arith.constant 0 : i32
    return %arg2, %arg1 : i32, i32
  }
  func.func @transform_2(%arg0: i32, %arg1: i32, %arg2: i32) -> (i32, i32) {
    %c0_i32 = arith.constant 0 : i32
    %c0_i32_0 = arith.constant 0 : i32
    return %c0_i32, %arg1 : i32, i32
  }
  func.func @transform_3(%arg0: i32, %arg1: i32, %arg2: i32) -> (i32, i32) {
    %c0_i32 = arith.constant 0 : i32
    return %arg0, %arg1 : i32, i32
  }
}

module attributes {stable_mosaic.version = 11 : i64} {
  func.func @kernel(%arg0: i32, %arg1: i32, %arg2: i32, %arg3: memref<256x128xbf16, #tpu.memory_space<vmem>>, %arg4: memref<128x128xbf16, #tpu.memory_space<vmem>>, %arg5: memref<8x128xf32, #tpu.memory_space<vmem>>, %arg6: memref<256x128xf32, #tpu.memory_space<vmem>>, %arg7: memref<256x128xf32, #tpu.memory_space<vmem>>) attributes {dimension_semantics = [#tpu.dimension_semantics<parallel>, #tpu.dimension_semantics<parallel>, #tpu.dimension_semantics<arbitrary>], iteration_bounds = array<i64: 14, 1, 1>, scalar_prefetch = 0 : i64, scratch_operands = 1 : i64, tpu.core_type = #tpu.core_type<tc>, window_params = [{transform_indices = @transform_0, window_bounds = array<i64: 256, 128>}, {transform_indices = @transform_1, window_bounds = array<i64: 128, 128>}, {transform_indices = @transform_2, window_bounds = array<i64: 8, 128>}, {transform_indices = @transform_3, window_bounds = array<i64: 256, 128>}]} {
    %c0_i32 = arith.constant 0 : i32
    %0 = arith.cmpi eq, %arg2, %c0_i32 : i32
    %1 = arith.extui %0 : i1 to i32
    %c0_i32_0 = arith.constant 0 : i32
    %2 = arith.cmpi ne, %1, %c0_i32_0 : i32
    scf.if %2 {
      %cst_10 = arith.constant 0.000000e+00 : f32
      %12 = vector.broadcast %cst_10 : f32 to vector<256x128xf32>
      %c0_11 = arith.constant 0 : index
      %c0_12 = arith.constant 0 : index
      %13 = vector.load %arg7[%c0_11, %c0_12] : memref<256x128xf32, #tpu.memory_space<vmem>>, vector<256x128xf32>
      tpu.vector_store %arg7[%c0_11, %c0_12], %12 {strides = array<i32>} : memref<256x128xf32, #tpu.memory_space<vmem>>, vector<256x128xf32>,
    } else {
    }
    %c0 = arith.constant 0 : index
    %c0_1 = arith.constant 0 : index
    %3 = vector.load %arg7[%c0, %c0_1] : memref<256x128xf32, #tpu.memory_space<vmem>>, vector<256x128xf32>
    %c0_2 = arith.constant 0 : index
    %c0_3 = arith.constant 0 : index
    %4 = vector.load %arg3[%c0_2, %c0_3] : memref<256x128xbf16, #tpu.memory_space<vmem>>, vector<256x128xbf16>
    %c0_4 = arith.constant 0 : index
    %c0_5 = arith.constant 0 : index
    %5 = vector.load %arg4[%c0_4, %c0_5] : memref<128x128xbf16, #tpu.memory_space<vmem>>, vector<128x128xbf16>
    %cst = arith.constant dense<0.000000e+00> : vector<256x128xf32>
    %6 = tpu.matmul %4, %5, %cst {dimension_numbers = #tpu.dot_dimension_numbers<[1], [0], [0], [1], [0, 0, 1, 1], [], []>} : vector<256x128xbf16>, vector<128x128xbf16>, vector<256x128xf32> -> vector<256x128xf32>
    %7 = arith.addf %3, %6 : vector<256x128xf32>
    %c0_6 = arith.constant 0 : index
    %c0_7 = arith.constant 0 : index
    %8 = vector.load %arg7[%c0_6, %c0_7] : memref<256x128xf32, #tpu.memory_space<vmem>>, vector<256x128xf32>
    tpu.vector_store %arg7[%c0_6, %c0_7], %7 {strides = array<i32>} : memref<256x128xf32, #tpu.memory_space<vmem>>, vector<256x128xf32>,
    %c0_i32_8 = arith.constant 0 : i32
    %9 = arith.cmpi eq, %arg2, %c0_i32_8 : i32
    %10 = arith.extui %9 : i1 to i32
    %c0_i32_9 = arith.constant 0 : i32
    %11 = arith.cmpi ne, %10, %c0_i32_9 : i32
    scf.if %11 {
      %c0_10 = arith.constant 0 : index
      %c0_11 = arith.constant 0 : index
      %12 = vector.load %arg5[%c0_10, %c0_11] : memref<8x128xf32, #tpu.memory_space<vmem>>, vector<8x128xf32>
      %c0_12 = arith.constant 0 : index
      %c0_13 = arith.constant 0 : index
      %13 = vector.load %arg7[%c0_12, %c0_13] : memref<256x128xf32, #tpu.memory_space<vmem>>, vector<256x128xf32>
      %14 = vector.extract_strided_slice %12 {offsets = [0, 0], sizes = [1, 128], strides = [1, 1]} : vector<8x128xf32> to vector<1x128xf32>
      %15 = vector.broadcast %14 : vector<1x128xf32> to vector<256x128xf32>
      %16 = arith.mulf %13, %15 : vector<256x128xf32>
      %17 = vector.extract_strided_slice %12 {offsets = [1, 0], sizes = [1, 128], strides = [1, 1]} : vector<8x128xf32> to vector<1x128xf32>
      %18 = vector.broadcast %17 : vector<1x128xf32> to vector<256x128xf32>
      %19 = arith.addf %16, %18 : vector<256x128xf32>
      %c0_14 = arith.constant 0 : index
      %c0_15 = arith.constant 0 : index
      %20 = vector.load %arg6[%c0_14, %c0_15] : memref<256x128xf32, #tpu.memory_space<vmem>>, vector<256x128xf32>
      tpu.vector_store %arg6[%c0_14, %c0_15], %19 {strides = array<i32>} : memref<256x128xf32, #tpu.memory_space<vmem>>, vector<256x128xf32>,
    } else {
    }
    return
  }
  func.func @transform_0(%arg0: i32, %arg1: i32, %arg2: i32) -> (i32, i32) {
    %c0_i32 = arith.constant 0 : i32
    return %arg0, %arg2 : i32, i32
  }
  func.func @transform_1(%arg0: i32, %arg1: i32, %arg2: i32) -> (i32, i32) {
    %c0_i32 = arith.constant 0 : i32
    return %arg2, %arg1 : i32, i32
  }
  func.func @transform_2(%arg0: i32, %arg1: i32, %arg2: i32) -> (i32, i32) {
    %c0_i32 = arith.constant 0 : i32
    %c0_i32_0 = arith.constant 0 : i32
    return %c0_i32, %arg1 : i32, i32
  }
  func.func @transform_3(%arg0: i32, %arg1: i32, %arg2: i32) -> (i32, i32) {
    %c0_i32 = arith.constant 0 : i32
    return %arg0, %arg1 : i32, i32
  }
}

</mosaic_0001>

<bundles_post_ra>
// kernel: decoder_forward.10
= control target key start
LH: loop header
LB: loop body
LE: loop exit
PB: predicated region body
PF: predicated region fallthrough
CT: control target
= control target key end

     0   :  { %s1086_s12 = smov 0   ;;  %s1088_s13 = smov 0   ;;  %s1271_s0 = inlined_call_operand.vmem [shape: bf16[16,128], index: 0, kind: input, shape index: {}]   ;;  %s1272_s1 = inlined_call_operand.vmem [shape: bf16[128,1024], index: 1, kind: input, shape index: {}]   ;;  %s1273_s2 = inlined_call_operand.vmem [shape: f32[8,1024], index: 2, kind: input, shape index: {}]   ;;  %s1274_s3 = inlined_call_operand.vmem [shape: f32[16,1024], index: 3, kind: output, shape index: {}]  }
   0x1   :  { %s1090_s14 = smov 0   ;;  %s1092_s15 = smov 0  }
   0x2   :  { %s1094_s16 = smov 0  }
   0x3 LB: > { %s28_s17 = sadd.s32 1, %s1059_s15  ;;  %s882_s18 = sadd.s32 4294967295, %s1063_s16   ;;  %s1063_s16 = sphi %s1094_s16, %s13_s16   ;;  %s1059_s15 = sphi %s1092_s15, %s1279_s15   ;;  %s1055_s14 = sphi %s1090_s14, %s1278_s14   ;;  %s1051_s13 = sphi %s1088_s13, %s1277_s13   ;;  %s1047_s12 = sphi %s1086_s12, %s1276_s12  }
   0x4   : > { %p30_p0 = scmp.ge.s32.totalorder %s28_s17, 2  ;;  %p76_p1 = scmp.ne.s32.totalorder %s1051_s13, %s1047_s12 }
   0x5   : > { %p77_p2 = scmp.eq.s32.totalorder %s1063_s16, 0  ;;  %p134_p4 = scmp.eq.s32.totalorder %s882_s18, 1 }
   0x6   : > { %s1281_s17 = smov (%p30_p0, %s28_s17), 0  ;;  %s69_s20 = sadd.s32 1, %s1051_s13 }
   0x7   : > { %p78_p3 = por %p77_p2, %p76_p1  ;;  %s65_s19 = ssub.s32 %s1059_s15, %s1281_s17 }
   0x8   : > { %p67_p5 = scmp.eq.s32.totalorder %s65_s19, 0  ;;  %p1121_p6 = por %p134_p4, %p76_p1 }
   0x9   : > { %p886_p7 = scmp.ge.s32.totalorder %s1063_s16, 2 }
   0xa   : > { %s1126_s22 = scalar_select %p67_p5, %s1051_s13, %s69_s20  }
   0xb   : > { %168 = sbr.rel (%p886_p7) target bundleno = 38 (0x26), region = 20 }
  0x12   : > { %171 = sbr.rel (!%p78_p3) target bundleno = 38 (0x26), region = 24  ;;  %s173_s23 = sand.u32 (%p78_p3), 1, %s1051_s13  }
  0x13   : > { %s933_s24 = sshll.u32 (%p78_p3), %s1059_s15, 4  ;;  %s887_s25 = sshll.u32 (%p78_p3), %s173_s23, 8 }
  0x14   : > { %s1134_s28 = scalar_lea.vmem (%p78_p3), %s1272_s1, %s933_s24  ;;  %s1139_s29 = scalar_lea.vmem (%p78_p3), [#allocation3], %s887_s25 }
  0x15   : > { %v194_v0 = vld [vmem:[%s1134_s28] sm:$0xff] (%p78_p3)  ;;  %v196_v1 = vld [vmem:[%s1134_s28 + $0x8] sm:$0xff] (%p78_p3) }
  0x16   : > { %v198_v2 = vld [vmem:[%s1134_s28 + $0x20] sm:$0xff] (%p78_p3)  ;;  %195 = vst [vmem:[%s1139_s29] sm:$0xff] (%p78_p3), %v194_v0  ;;  %197 = vst [vmem:[%s1139_s29 + $0x8] sm:$0xff] (%p78_p3), %v196_v1  ;;  %v200_v3 = vld [vmem:[%s1134_s28 + $0x28] sm:$0xff] (%p78_p3) }
  0x17   : > { %199 = vst [vmem:[%s1139_s29 + $0x10] sm:$0xff] (%p78_p3), %v198_v2  ;;  %v202_v4 = vld [vmem:[%s1134_s28 + $0x40] sm:$0xff] (%p78_p3)  ;;  %v204_v5 = vld [vmem:[%s1134_s28 + $0x48] sm:$0xff] (%p78_p3)  ;;  %201 = vst [vmem:[%s1139_s29 + $0x18] sm:$0xff] (%p78_p3), %v200_v3 }
  0x18   : > { %203 = vst [vmem:[%s1139_s29 + $0x20] sm:$0xff] (%p78_p3), %v202_v4  ;;  %205 = vst [vmem:[%s1139_s29 + $0x28] sm:$0xff] (%p78_p3), %v204_v5  ;;  %v206_v6 = vld [vmem:[%s1134_s28 + $0x60] sm:$0xff] (%p78_p3)  ;;  %v208_v7 = vld [vmem:[%s1134_s28 + $0x68] sm:$0xff] (%p78_p3) }
  0x19   : > { %v210_v8 = vld [vmem:[%s1134_s28 + $0x80] sm:$0xff]  ;;  %207 = vst [vmem:[%s1139_s29 + $0x30] sm:$0xff] %v206_v6  ;;  %209 = vst [vmem:[%s1139_s29 + $0x38] sm:$0xff] %v208_v7  ;;  %v212_v9 = vld [vmem:[%s1134_s28 + $0x88] sm:$0xff] }
  0x1a   : > { %211 = vst [vmem:[%s1139_s29 + $0x40] sm:$0xff] %v210_v8  ;;  %v214_v10 = vld [vmem:[%s1134_s28 + $0xa0] sm:$0xff]  ;;  %v216_v11 = vld [vmem:[%s1134_s28 + $0xa8] sm:$0xff]  ;;  %213 = vst [vmem:[%s1139_s29 + $0x48] sm:$0xff] %v212_v9 }
  0x1b   : > { %215 = vst [vmem:[%s1139_s29 + $0x50] sm:$0xff] %v214_v10  ;;  %217 = vst [vmem:[%s1139_s29 + $0x58] sm:$0xff] %v216_v11  ;;  %v218_v12 = vld [vmem:[%s1134_s28 + $0xc0] sm:$0xff]  ;;  %v220_v13 = vld [vmem:[%s1134_s28 + $0xc8] sm:$0xff] }
  0x1c   : > { %v222_v14 = vld [vmem:[%s1134_s28 + $0xe0] sm:$0xff]  ;;  %219 = vst [vmem:[%s1139_s29 + $0x60] sm:$0xff] %v218_v12  ;;  %221 = vst [vmem:[%s1139_s29 + $0x68] sm:$0xff] %v220_v13  ;;  %v224_v15 = vld [vmem:[%s1134_s28 + $0xe8] sm:$0xff] }
  0x1d   : > { %223 = vst [vmem:[%s1139_s29 + $0x70] sm:$0xff] %v222_v14  ;;  %v226_v16 = vld [vmem:[%s1134_s28 + $0x100] sm:$0xff]  ;;  %v228_v17 = vld [vmem:[%s1134_s28 + $0x108] sm:$0xff]  ;;  %225 = vst [vmem:[%s1139_s29 + $0x78] sm:$0xff] %v224_v15 }
  0x1e   : > { %227 = vst [vmem:[%s1139_s29 + $0x80] sm:$0xff] %v226_v16  ;;  %229 = vst [vmem:[%s1139_s29 + $0x88] sm:$0xff] %v228_v17  ;;  %v230_v18 = vld [vmem:[%s1134_s28 + $0x120] sm:$0xff]  ;;  %v232_v19 = vld [vmem:[%s1134_s28 + $0x128] sm:$0xff] }
  0x1f   : > { %v234_v20 = vld [vmem:[%s1134_s28 + $0x140] sm:$0xff]  ;;  %231 = vst [vmem:[%s1139_s29 + $0x90] sm:$0xff] %v230_v18  ;;  %233 = vst [vmem:[%s1139_s29 + $0x98] sm:$0xff] %v232_v19  ;;  %v236_v21 = vld [vmem:[%s1134_s28 + $0x148] sm:$0xff] }
  0x20   : > { %235 = vst [vmem:[%s1139_s29 + $0xa0] sm:$0xff] %v234_v20  ;;  %v238_v22 = vld [vmem:[%s1134_s28 + $0x160] sm:$0xff]  ;;  %v240_v23 = vld [vmem:[%s1134_s28 + $0x168] sm:$0xff]  ;;  %237 = vst [vmem:[%s1139_s29 + $0xa8] sm:$0xff] %v236_v21 }
  0x21   : > { %239 = vst [vmem:[%s1139_s29 + $0xb0] sm:$0xff] %v238_v22  ;;  %241 = vst [vmem:[%s1139_s29 + $0xb8] sm:$0xff] %v240_v23  ;;  %v242_v24 = vld [vmem:[%s1134_s28 + $0x180] sm:$0xff]  ;;  %v244_v25 = vld [vmem:[%s1134_s28 + $0x188] sm:$0xff] }
  0x22   : > { %v246_v26 = vld [vmem:[%s1134_s28 + $0x1a0] sm:$0xff]  ;;  %243 = vst [vmem:[%s1139_s29 + $0xc0] sm:$0xff] %v242_v24  ;;  %245 = vst [vmem:[%s1139_s29 + $0xc8] sm:$0xff] %v244_v25  ;;  %v248_v27 = vld [vmem:[%s1134_s28 + $0x1a8] sm:$0xff] }
  0x23   : > { %247 = vst [vmem:[%s1139_s29 + $0xd0] sm:$0xff] %v246_v26  ;;  %v250_v28 = vld [vmem:[%s1134_s28 + $0x1c0] sm:$0xff]  ;;  %v252_v29 = vld [vmem:[%s1134_s28 + $0x1c8] sm:$0xff]  ;;  %249 = vst [vmem:[%s1139_s29 + $0xd8] sm:$0xff] %v248_v27 }
  0x24   : > { %251 = vst [vmem:[%s1139_s29 + $0xe0] sm:$0xff] %v250_v28  ;;  %253 = vst [vmem:[%s1139_s29 + $0xe8] sm:$0xff] %v252_v29  ;;  %v254_v30 = vld [vmem:[%s1134_s28 + $0x1e0] sm:$0xff]  ;;  %v256_v31 = vld [vmem:[%s1134_s28 + $0x1e8] sm:$0xff] }
  0x25   : > { %255 = vst [vmem:[%s1139_s29 + $0xf0] sm:$0xff] %v254_v30  ;;  %257 = vst [vmem:[%s1139_s29 + $0xf8] sm:$0xff] %v256_v31 }
  0x26 PF: > { %p890_p8 = scmp.ge.s32.totalorder %s1063_s16, 1  ;;  %p271_p9 = scmp.lt.s32.totalorder %s1063_s16, 3 }
  0x28   : > { %p272_p10 = pnand %p890_p8, %p271_p9 }
  0x29   : > { %s278_s30 = sand.u32 (!%p272_p10), 1, %s1047_s12   ;;  %v1065_v32 = vmov (!%p272_p10), 0   ;;  %v1024_v1 = vld [vmem:[%s1271_s0] sm:$0xff] (!%p272_p10)   ;;  %s893_s8 = sshll.u32 (!%p272_p10), %s1055_s14, 2  ;;  %v670_v2 = vlaneseq (!%p272_p10) }
  0x2a   : > { %275 = sbr.rel (%p272_p10) target bundleno = 307 (0x133), region = 51  ;;  %s891_s4 = sshll.u32 (!%p272_p10), %s278_s30, 8  ;;  %585 = vmatprep.mubr.bf16.mxu0 (!%p272_p10), %v1065_v32  ;;  %628 = vmatprep.mubr.bf16.mxu1 (!%p272_p10), %v1065_v32 }
  0x2b   : > { %s1207_s5 = scalar_lea.vmem (!%p272_p10), [#allocation3], %s891_s4  ;;  %p325_p11 = scmp.lt.s32.totalorder (!%p272_p10), %s893_s8, 7  ;;  %v671_v3 = vshrl.u32 (!%p272_p10), %v670_v2, 7 }
  0x2c   : > { %v976_v33 = vld [vmem:[%s1207_s5 + $0x4] ss:$16 sps:$4 sm:$0xff] (!%p272_p10)   ;;  %v978_v34 = vld [vmem:[%s1207_s5 + $0xc] ss:$16 sps:$4 sm:$0xff] (!%p272_p10)   ;;  %v980_v35 = vld [vmem:[%s1207_s5] ss:$16 sps:$4 sm:$0xff] (!%p272_p10)  }
  0x2d   : > { %553 = vmatprep.subr.bf16.mxu0 (!%p272_p10), %v976_v33  ;;  %v981_v36 = vld [vmem:[%s1207_s5 + $0x8] ss:$16 sps:$4 sm:$0xff] (!%p272_p10)   ;;  %596 = vmatprep.subr.bf16.mxu1 (!%p272_p10), %v978_v34  ;;  %v982_v37 = vld [vmem:[%s1207_s5 + $0x24] ss:$16 sps:$4 sm:$0xff] (!%p272_p10)   ;;  %v984_v38 = vld [vmem:[%s1207_s5 + $0x2c] ss:$16 sps:$4 sm:$0xff] (!%p272_p10)  }
  0x2e   : > { %554 = vmatpush1.bf16.msra.mxu0 (!%p272_p10), %v980_v35  ;;  %597 = vmatpush1.bf16.msra.mxu1 (!%p272_p10), %v981_v36  ;;  %v986_v39 = vld [vmem:[%s1207_s5 + $0x20] ss:$16 sps:$4 sm:$0xff] (!%p272_p10)   ;;  %v987_v40 = vld [vmem:[%s1207_s5 + $0x28] ss:$16 sps:$4 sm:$0xff] (!%p272_p10)   ;;  %v988_v41 = vld [vmem:[%s1207_s5 + $0x44] ss:$16 sps:$4 sm:$0xff] (!%p272_p10)  }
  0x2f   : > { %555 = vmatprep.subr.bf16.mxu0 (!%p272_p10), %v982_v37  ;;  %598 = vmatprep.subr.bf16.mxu1 (!%p272_p10), %v984_v38  ;;  %v990_v42 = vld [vmem:[%s1207_s5 + $0x4c] ss:$16 sps:$4 sm:$0xff] (!%p272_p10)   ;;  %v992_v43 = vld [vmem:[%s1207_s5 + $0x40] ss:$16 sps:$4 sm:$0xff] (!%p272_p10)   ;;  %v993_v44 = vld [vmem:[%s1207_s5 + $0x48] ss:$16 sps:$4 sm:$0xff] (!%p272_p10)  }
  0x30   : > { %v994_v45 = vld [vmem:[%s1207_s5 + $0x64] ss:$16 sps:$4 sm:$0xff] (!%p272_p10)   ;;  %v996_v46 = vld [vmem:[%s1207_s5 + $0x6c] ss:$16 sps:$4 sm:$0xff] (!%p272_p10)   ;;  %v998_v47 = vld [vmem:[%s1207_s5 + $0x60] ss:$16 sps:$4 sm:$0xff] (!%p272_p10)  }
  0x31   : > { %v999_v48 = vld [vmem:[%s1207_s5 + $0x68] ss:$16 sps:$4 sm:$0xff]   ;;  %v1000_v49 = vld [vmem:[%s1207_s5 + $0x84] ss:$16 sps:$4 sm:$0xff]   ;;  %v1002_v50 = vld [vmem:[%s1207_s5 + $0x8c] ss:$16 sps:$4 sm:$0xff]  }
  0x32   : > { %556 = vmatpush1.bf16.msra.mxu0 %v986_v39  ;;  %599 = vmatpush1.bf16.msra.mxu1 %v987_v40  ;;  %v1004_v51 = vld [vmem:[%s1207_s5 + $0x80] ss:$16 sps:$4 sm:$0xff]   ;;  %v1005_v52 = vld [vmem:[%s1207_s5 + $0x88] ss:$16 sps:$4 sm:$0xff]   ;;  %v1006_v53 = vld [vmem:[%s1207_s5 + $0xa4] ss:$16 sps:$4 sm:$0xff]  }
  0x33   : > { %557 = vmatprep.subr.bf16.mxu0 %v988_v41  ;;  %600 = vmatprep.subr.bf16.mxu1 %v990_v42  ;;  %v1008_v54 = vld [vmem:[%s1207_s5 + $0xac] ss:$16 sps:$4 sm:$0xff]   ;;  %v1010_v55 = vld [vmem:[%s1207_s5 + $0xa0] ss:$16 sps:$4 sm:$0xff]   ;;  %v1011_v56 = vld [vmem:[%s1207_s5 + $0xa8] ss:$16 sps:$4 sm:$0xff]  }
  0x34   : > { %v1012_v57 = vld [vmem:[%s1207_s5 + $0xc4] ss:$16 sps:$4 sm:$0xff]   ;;  %v1014_v58 = vld [vmem:[%s1207_s5 + $0xcc] ss:$16 sps:$4 sm:$0xff]   ;;  %v1016_v59 = vld [vmem:[%s1207_s5 + $0xc0] ss:$16 sps:$4 sm:$0xff]  }
  0x35   : > { %v1017_v60 = vld [vmem:[%s1207_s5 + $0xc8] ss:$16 sps:$4 sm:$0xff]   ;;  %v1018_v61 = vld [vmem:[%s1207_s5 + $0xe4] ss:$16 sps:$4 sm:$0xff]   ;;  %v1020_v62 = vld [vmem:[%s1207_s5 + $0xec] ss:$16 sps:$4 sm:$0xff]  }
  0x36   : > { %558 = vmatpush1.bf16.msra.mxu0 %v992_v43  ;;  %601 = vmatpush1.bf16.msra.mxu1 %v993_v44  ;;  %v1022_v63 = vld [vmem:[%s1207_s5 + $0xe0] ss:$16 sps:$4 sm:$0xff]   ;;  %v1023_v0 = vld [vmem:[%s1207_s5 + $0xe8] ss:$16 sps:$4 sm:$0xff]   ;;  %s1283_s8 = smov (!%p325_p11, %s893_s8), 7  ;;  %v672_v4 = vsub.s32 0, %v671_v3 }
  0x37   : > { %559 = vmatprep.subr.bf16.mxu0 %v994_v45  ;;  %602 = vmatprep.subr.bf16.mxu1 %v996_v46  ;;  %s894_s9 = sshll.u32 %s1283_s8, 3  ;;  %v696_v7 = vsub.s32 1, %v671_v3  ;;  %s892_s19 = sshll.u32 %s278_s30, 6 }
  0x38   : > { %s328_s18 = scalar_lea.vmem %s1273_s2, %s894_s9  ;;  %s312_s12 = scalar_lea.vmem [#allocation4], %s892_s19 }
  0x39   : > { %v658_v5 = vld [vmem:[%s328_s18] sm:$0xff]  ;;  %v660_v6 = vld [vmem:[%s328_s18 + $0x10] sm:$0xff]  ;;  %v659_v8 = vld [vmem:[%s328_s18 + $0x8] sm:$0xff]  ;;  %s934_s20 = sshll.u32 (%p1121_p6), %s1055_s14, 5 }
  0x3a   : > { %560 = vmatpush1.bf16.msra.mxu0 %v998_v47  ;;  %603 = vmatpush1.bf16.msra.mxu1 %v999_v48  ;;  %v661_v9 = vld [vmem:[%s328_s18 + $0x18] sm:$0xff]  ;;  %v673_v10 = vrot.slane %v658_v5, %v672_v4  ;;  %v681_v11 = vrot.slane %v660_v6, %v672_v4  ;;  %v677_v12 = vrot.slane %v659_v8, %v672_v4  ;;  %s746_s25 = scalar_lea.vmem (%p1121_p6), %s1274_s3, %s934_s20 }
  0x3b   : > { %561 = vmatprep.subr.bf16.mxu0 %v1000_v49  ;;  %604 = vmatprep.subr.bf16.mxu1 %v1002_v50  ;;  %v685_v13 = vrot.slane %v661_v9, %v672_v4  ;;  %v697_v14 = vrot.slane %v658_v5, %v696_v7  ;;  %v705_v15 = vrot.slane %v660_v6, %v696_v7 }
  0x3c   : > { %v701_v18 = vrot.slane %v659_v8, %v696_v7  ;;  %v709_v19 = vrot.slane %v661_v9, %v696_v7 }
  0x3e   : > { %562 = vmatpush1.bf16.msra.mxu0 %v1004_v51  ;;  %605 = vmatpush1.bf16.msra.mxu1 %v1005_v52 }
  0x3f   : > { %563 = vmatprep.subr.bf16.mxu0 %v1006_v53  ;;  %606 = vmatprep.subr.bf16.mxu1 %v1008_v54 }
  0x42   : > { %564 = vmatpush1.bf16.msra.mxu0 %v1010_v55  ;;  %607 = vmatpush1.bf16.msra.mxu1 %v1011_v56 }
  0x43   : > { %565 = vmatprep.subr.bf16.mxu0 %v1012_v57  ;;  %608 = vmatprep.subr.bf16.mxu1 %v1014_v58 }
  0x46   : > { %566 = vmatpush1.bf16.msra.mxu0 %v1016_v59  ;;  %609 = vmatpush1.bf16.msra.mxu1 %v1017_v60 }
  0x47   : > { %567 = vmatprep.subr.bf16.mxu0 %v1018_v61  ;;  %610 = vmatprep.subr.bf16.mxu1 %v1020_v62 }
  0x4a   : > { %568 = vmatpush1.bf16.msra.mxu0 %v1022_v63  ;;  %611 = vmatpush1.bf16.msra.mxu1 %v1023_v0 }
  0x4d   : > { %586 = vmatmul.mubr.bf16.vlgmr.msra.gmra.mrb[0].mxu0 %v1024_v1  ;;  %629 = vmatmul.mubr.bf16.vlgmr.msra.gmra.mrb[0].mxu1 %v1024_v1 }
 0x120   : > { %v587_v16 = vpop.f32.mrb[0].mxu0  ;;  %v630_v17 = vpop.f32.mrb[0].mxu1 }
 0x121   : > { %v686_v20 = vmul.f32 %v673_v10, %v587_v16  ;;  %v688_v21 = vmul.f32 %v681_v11, %v630_v17  ;;  %v589_v22 = vpop.f32.mrb[1].mxu0  ;;  %v632_v23 = vpop.f32.mrb[1].mxu1 }
 0x122   : > { %v687_v24 = vmul.f32 %v677_v12, %v589_v22  ;;  %v689_v25 = vmul.f32 %v685_v13, %v632_v23  ;;  %v591_v26 = vpop.f32.mrb[2].mxu0  ;;  %v634_v27 = vpop.f32.mrb[2].mxu1 }
 0x123   : > { %v710_v28 = vadd.f32 %v697_v14, %v686_v20  ;;  %v712_v29 = vadd.f32 %v705_v15, %v688_v21  ;;  %v690_v30 = vmul.f32 %v673_v10, %v591_v26  ;;  %v692_v31 = vmul.f32 %v681_v11, %v634_v27  ;;  %v593_v32 = vpop.f32.mrb[3].mxu0  ;;  %v636_v33 = vpop.f32.mrb[3].mxu1 }
 0x124   : > { %v711_v34 = vadd.f32 %v701_v18, %v687_v24  ;;  %v713_v35 = vadd.f32 %v709_v19, %v689_v25  ;;  %v691_v36 = vmul.f32 %v677_v12, %v593_v32  ;;  %v693_v37 = vmul.f32 %v685_v13, %v636_v33  ;;  %740 = sbr.rel (!%p1121_p6) target bundleno = 307 (0x133), region = 67 }
 0x125   : > { %v718_v38 = vmax.f32 %v710_v28, 0.0  ;;  %v720_v39 = vmax.f32 %v712_v29, 0.0  ;;  %v714_v40 = vadd.f32 %v697_v14, %v690_v30  ;;  %v716_v41 = vadd.f32 %v705_v15, %v692_v31 }
 0x126   : > { %v719_v42 = vmax.f32 %v711_v34, 0.0  ;;  %v721_v43 = vmax.f32 %v713_v35, 0.0  ;;  %v715_v44 = vadd.f32 %v701_v18, %v691_v36  ;;  %v717_v45 = vadd.f32 %v709_v19, %v693_v37 }
 0x127   : > { %726 = vst [vmem:[%s312_s12] sm:$0xff] %v718_v38  ;;  %728 = vst [vmem:[%s312_s12 + $0x10] sm:$0xff] %v720_v39  ;;  %v722_v46 = vmax.f32 %v714_v40, 0.0  ;;  %v724_v47 = vmax.f32 %v716_v41, 0.0 }
 0x128   : > { %727 = vst [vmem:[%s312_s12 + $0x8] sm:$0xff] %v719_v42  ;;  %729 = vst [vmem:[%s312_s12 + $0x18] sm:$0xff] %v721_v43  ;;  %v723_v48 = vmax.f32 %v715_v44, 0.0  ;;  %v725_v49 = vmax.f32 %v717_v45, 0.0 }
 0x129   : > { %730 = vst [vmem:[%s312_s12 + $0x20] sm:$0xff] %v722_v46  ;;  %732 = vst [vmem:[%s312_s12 + $0x30] sm:$0xff] %v724_v47 }
 0x12a   : > { %731 = vst [vmem:[%s312_s12 + $0x28] sm:$0xff] %v723_v48  ;;  %733 = vst [vmem:[%s312_s12 + $0x38] sm:$0xff] %v725_v49 }
 0x12e   : > { %v759_v50 = vld [vmem:[%s312_s12] sm:$0xff]  ;;  %v763_v52 = vld [vmem:[%s312_s12 + $0x10] sm:$0xff] }
 0x12f   : > { %v761_v51 = vld [vmem:[%s312_s12 + $0x8] sm:$0xff]  ;;  %v765_v53 = vld [vmem:[%s312_s12 + $0x18] sm:$0xff]  ;;  %760 = vst [vmem:[%s746_s25] sm:$0xff] %v759_v50  ;;  %764 = vst [vmem:[%s746_s25 + $0x10] sm:$0xff] %v763_v52 }
 0x130   : > { %v767_v54 = vld [vmem:[%s312_s12 + $0x20] sm:$0xff]  ;;  %762 = vst [vmem:[%s746_s25 + $0x8] sm:$0xff] %v761_v51  ;;  %766 = vst [vmem:[%s746_s25 + $0x18] sm:$0xff] %v765_v53  ;;  %v771_v56 = vld [vmem:[%s312_s12 + $0x30] sm:$0xff] }
 0x131   : > { %v769_v55 = vld [vmem:[%s312_s12 + $0x28] sm:$0xff]  ;;  %768 = vst [vmem:[%s746_s25 + $0x40] sm:$0xff] %v767_v54  ;;  %v773_v57 = vld [vmem:[%s312_s12 + $0x38] sm:$0xff]  ;;  %772 = vst [vmem:[%s746_s25 + $0x50] sm:$0xff] %v771_v56 }
 0x132   : > { %770 = vst [vmem:[%s746_s25 + $0x48] sm:$0xff] %v769_v55  ;;  %774 = vst [vmem:[%s746_s25 + $0x58] sm:$0xff] %v773_v57 }
 0x133 PF: > { %s13_s16 = sadd.s32 1, %s1063_s16   ;;  %s1276_s12 = smov %s1051_s13 }
 0x134   : > { %p10_p12 = scmp.ge.s32.totalorder %s13_s16, 4   ;;  %s1277_s13 = smov %s1126_s22 }
 0x135   : > { %s1278_s14 = smov %s1059_s15  ;;  %s1279_s15 = smov %s1281_s17 }
 0x136   :  { %12 = sbr.rel (!%p10_p12) target bundleno = 3 (0x3), region = 127 }

// kernel: decoder_forward.11
= control target key start
LH: loop header
LB: loop body
LE: loop exit
PB: predicated region body
PF: predicated region fallthrough
CT: control target
= control target key end

     0   :  { %s3774_s12 = smov 0   ;;  %s3776_s13 = smov 0   ;;  %s4680_s0 = inlined_call_operand.vmem [shape: bf16[16,1024], index: 0, kind: input, shape index: {}]   ;;  %s4681_s1 = inlined_call_operand.vmem [shape: bf16[1024,9216], index: 1, kind: input, shape index: {}]   ;;  %s4682_s2 = inlined_call_operand.vmem [shape: f32[8,9216], index: 2, kind: input, shape index: {}]   ;;  %s4683_s3 = inlined_call_operand.vmem [shape: f32[16,9216], index: 3, kind: output, shape index: {}]  }
   0x1   :  { %s3778_s14 = smov 0   ;;  %s3780_s15 = smov 0  }
   0x2   :  { %s3782_s16 = smov 0  }
   0x3 LB: > { %s28_s17 = sadd.s32 1, %s3748_s15  ;;  %s2982_s18 = sadd.s32 4294967295, %s3752_s16   ;;  %s3752_s16 = sphi %s3782_s16, %s13_s16   ;;  %s3748_s15 = sphi %s3780_s15, %s4688_s15   ;;  %s3744_s14 = sphi %s3778_s14, %s4687_s14   ;;  %s3740_s13 = sphi %s3776_s13, %s4686_s13   ;;  %s3736_s12 = sphi %s3774_s12, %s4685_s12  }
   0x4   : > { %p30_p0 = scmp.ge.s32.totalorder %s28_s17, 18  ;;  %p76_p1 = scmp.ne.s32.totalorder %s3740_s13, %s3736_s12 }
   0x5   : > { %p77_p2 = scmp.eq.s32.totalorder %s3752_s16, 0  ;;  %p134_p4 = scmp.eq.s32.totalorder %s2982_s18, 17 }
   0x6   : > { %s4690_s17 = smov (%p30_p0, %s28_s17), 0  ;;  %s69_s20 = sadd.s32 1, %s3740_s13 }
   0x7   : > { %p78_p3 = por %p77_p2, %p76_p1  ;;  %s65_s19 = ssub.s32 %s3748_s15, %s4690_s17 }
   0x8   : > { %p67_p5 = scmp.eq.s32.totalorder %s65_s19, 0  ;;  %p3809_p6 = por %p134_p4, %p76_p1 }
   0x9   : > { %p2986_p7 = scmp.ge.s32.totalorder %s3752_s16, 18 }
   0xa   : > { %s3814_s22 = scalar_select %p67_p5, %s3740_s13, %s69_s20  }
   0xb   : > { %171 = sbr.rel (%p2986_p7) target bundleno = 150 (0x96), region = 20 }
  0x12   : > { %174 = sbr.rel (!%p78_p3) target bundleno = 150 (0x96), region = 24  ;;  %s176_s23 = sand.u32 (%p78_p3), 1, %s3740_s13  }
  0x13   : > { %s3264_s24 = sshll.u32 (%p78_p3), %s3748_s15, 4  ;;  %s2987_s25 = sshll.u32 (%p78_p3), %s176_s23, 11 }
  0x14   : > { %s3822_s28 = scalar_lea.vmem (%p78_p3), %s4681_s1, %s3264_s24  ;;  %s3827_s29 = scalar_lea.vmem (%p78_p3), [#allocation3], %s2987_s25 }
  0x15   : > { %v197_v0 = vld [vmem:[%s3822_s28] sm:$0xff] (%p78_p3)  ;;  %v199_v1 = vld [vmem:[%s3822_s28 + $0x8] sm:$0xff] (%p78_p3) }
  0x16   : > { %v201_v2 = vld [vmem:[%s3822_s28 + $0x120] sm:$0xff] (%p78_p3)  ;;  %198 = vst [vmem:[%s3827_s29] sm:$0xff] (%p78_p3), %v197_v0  ;;  %200 = vst [vmem:[%s3827_s29 + $0x8] sm:$0xff] (%p78_p3), %v199_v1  ;;  %v203_v3 = vld [vmem:[%s3822_s28 + $0x128] sm:$0xff] (%p78_p3) }
  0x17   : > { %202 = vst [vmem:[%s3827_s29 + $0x10] sm:$0xff] (%p78_p3), %v201_v2  ;;  %v205_v4 = vld [vmem:[%s3822_s28 + $0x240] sm:$0xff] (%p78_p3)  ;;  %v207_v5 = vld [vmem:[%s3822_s28 + $0x248] sm:$0xff] (%p78_p3)  ;;  %204 = vst [vmem:[%s3827_s29 + $0x18] sm:$0xff] (%p78_p3), %v203_v3 }
  0x18   : > { %206 = vst [vmem:[%s3827_s29 + $0x20] sm:$0xff] (%p78_p3), %v205_v4  ;;  %208 = vst [vmem:[%s3827_s29 + $0x28] sm:$0xff] (%p78_p3), %v207_v5  ;;  %v209_v6 = vld [vmem:[%s3822_s28 + $0x360] sm:$0xff] (%p78_p3)  ;;  %v211_v7 = vld [vmem:[%s3822_s28 + $0x368] sm:$0xff] (%p78_p3) }
  0x19   : > { %v213_v8 = vld [vmem:[%s3822_s28 + $0x480] sm:$0xff]  ;;  %210 = vst [vmem:[%s3827_s29 + $0x30] sm:$0xff] %v209_v6  ;;  %212 = vst [vmem:[%s3827_s29 + $0x38] sm:$0xff] %v211_v7  ;;  %v215_v9 = vld [vmem:[%s3822_s28 + $0x488] sm:$0xff] }
  0x1a   : > { %214 = vst [vmem:[%s3827_s29 + $0x40] sm:$0xff] %v213_v8  ;;  %v217_v10 = vld [vmem:[%s3822_s28 + $0x5a0] sm:$0xff]  ;;  %v219_v11 = vld [vmem:[%s3822_s28 + $0x5a8] sm:$0xff]  ;;  %216 = vst [vmem:[%s3827_s29 + $0x48] sm:$0xff] %v215_v9 }
  0x1b   : > { %218 = vst [vmem:[%s3827_s29 + $0x50] sm:$0xff] %v217_v10  ;;  %220 = vst [vmem:[%s3827_s29 + $0x58] sm:$0xff] %v219_v11  ;;  %v221_v12 = vld [vmem:[%s3822_s28 + $0x6c0] sm:$0xff]  ;;  %v223_v13 = vld [vmem:[%s3822_s28 + $0x6c8] sm:$0xff] }
  0x1c   : > { %v225_v14 = vld [vmem:[%s3822_s28 + $0x7e0] sm:$0xff]  ;;  %222 = vst [vmem:[%s3827_s29 + $0x60] sm:$0xff] %v221_v12  ;;  %224 = vst [vmem:[%s3827_s29 + $0x68] sm:$0xff] %v223_v13  ;;  %v227_v15 = vld [vmem:[%s3822_s28 + $0x7e8] sm:$0xff] }
  0x1d   : > { %226 = vst [vmem:[%s3827_s29 + $0x70] sm:$0xff] %v225_v14  ;;  %v229_v16 = vld [vmem:[%s3822_s28 + $0x900] sm:$0xff]  ;;  %v231_v17 = vld [vmem:[%s3822_s28 + $0x908] sm:$0xff]  ;;  %228 = vst [vmem:[%s3827_s29 + $0x78] sm:$0xff] %v227_v15 }
  0x1e   : > { %230 = vst [vmem:[%s3827_s29 + $0x80] sm:$0xff] %v229_v16  ;;  %232 = vst [vmem:[%s3827_s29 + $0x88] sm:$0xff] %v231_v17  ;;  %v233_v18 = vld [vmem:[%s3822_s28 + $0xa20] sm:$0xff]  ;;  %v235_v19 = vld [vmem:[%s3822_s28 + $0xa28] sm:$0xff] }
  0x1f   : > { %v237_v20 = vld [vmem:[%s3822_s28 + $0xb40] sm:$0xff]  ;;  %234 = vst [vmem:[%s3827_s29 + $0x90] sm:$0xff] %v233_v18  ;;  %236 = vst [vmem:[%s3827_s29 + $0x98] sm:$0xff] %v235_v19  ;;  %v239_v21 = vld [vmem:[%s3822_s28 + $0xb48] sm:$0xff] }
  0x20   : > { %238 = vst [vmem:[%s3827_s29 + $0xa0] sm:$0xff] %v237_v20  ;;  %v241_v22 = vld [vmem:[%s3822_s28 + $0xc60] sm:$0xff]  ;;  %v243_v23 = vld [vmem:[%s3822_s28 + $0xc68] sm:$0xff]  ;;  %240 = vst [vmem:[%s3827_s29 + $0xa8] sm:$0xff] %v239_v21 }
  0x21   : > { %242 = vst [vmem:[%s3827_s29 + $0xb0] sm:$0xff] %v241_v22  ;;  %244 = vst [vmem:[%s3827_s29 + $0xb8] sm:$0xff] %v243_v23  ;;  %v245_v24 = vld [vmem:[%s3822_s28 + $0xd80] sm:$0xff]  ;;  %v247_v25 = vld [vmem:[%s3822_s28 + $0xd88] sm:$0xff] }
  0x22   : > { %v249_v26 = vld [vmem:[%s3822_s28 + $0xea0] sm:$0xff]  ;;  %246 = vst [vmem:[%s3827_s29 + $0xc0] sm:$0xff] %v245_v24  ;;  %248 = vst [vmem:[%s3827_s29 + $0xc8] sm:$0xff] %v247_v25  ;;  %v251_v27 = vld [vmem:[%s3822_s28 + $0xea8] sm:$0xff] }
  0x23   : > { %250 = vst [vmem:[%s3827_s29 + $0xd0] sm:$0xff] %v249_v26  ;;  %v253_v28 = vld [vmem:[%s3822_s28 + $0xfc0] sm:$0xff]  ;;  %v255_v29 = vld [vmem:[%s3822_s28 + $0xfc8] sm:$0xff]  ;;  %252 = vst [vmem:[%s3827_s29 + $0xd8] sm:$0xff] %v251_v27 }
  0x24   : > { %254 = vst [vmem:[%s3827_s29 + $0xe0] sm:$0xff] %v253_v28  ;;  %256 = vst [vmem:[%s3827_s29 + $0xe8] sm:$0xff] %v255_v29  ;;  %v257_v30 = vld [vmem:[%s3822_s28 + $0x10e0] sm:$0xff]  ;;  %v259_v31 = vld [vmem:[%s3822_s28 + $0x10e8] sm:$0xff] }
  0x25   : > { %v261_v32 = vld [vmem:[%s3822_s28 + $0x1200] sm:$0xff]  ;;  %258 = vst [vmem:[%s3827_s29 + $0xf0] sm:$0xff] %v257_v30  ;;  %260 = vst [vmem:[%s3827_s29 + $0xf8] sm:$0xff] %v259_v31  ;;  %v263_v33 = vld [vmem:[%s3822_s28 + $0x1208] sm:$0xff] }
  0x26   : > { %262 = vst [vmem:[%s3827_s29 + $0x100] sm:$0xff] %v261_v32  ;;  %v265_v34 = vld [vmem:[%s3822_s28 + $0x1320] sm:$0xff]  ;;  %v267_v35 = vld [vmem:[%s3822_s28 + $0x1328] sm:$0xff]  ;;  %264 = vst [vmem:[%s3827_s29 + $0x108] sm:$0xff] %v263_v33 }
  0x27   : > { %266 = vst [vmem:[%s3827_s29 + $0x110] sm:$0xff] %v265_v34  ;;  %268 = vst [vmem:[%s3827_s29 + $0x118] sm:$0xff] %v267_v35  ;;  %v269_v36 = vld [vmem:[%s3822_s28 + $0x1440] sm:$0xff]  ;;  %v271_v37 = vld [vmem:[%s3822_s28 + $0x1448] sm:$0xff] }
  0x28   : > { %v273_v38 = vld [vmem:[%s3822_s28 + $0x1560] sm:$0xff]  ;;  %270 = vst [vmem:[%s3827_s29 + $0x120] sm:$0xff] %v269_v36  ;;  %272 = vst [vmem:[%s3827_s29 + $0x128] sm:$0xff] %v271_v37  ;;  %v275_v39 = vld [vmem:[%s3822_s28 + $0x1568] sm:$0xff] }
  0x29   : > { %274 = vst [vmem:[%s3827_s29 + $0x130] sm:$0xff] %v273_v38  ;;  %v277_v40 = vld [vmem:[%s3822_s28 + $0x1680] sm:$0xff]  ;;  %v279_v41 = vld [vmem:[%s3822_s28 + $0x1688] sm:$0xff]  ;;  %276 = vst [vmem:[%s3827_s29 + $0x138] sm:$0xff] %v275_v39 }
  0x2a   : > { %278 = vst [vmem:[%s3827_s29 + $0x140] sm:$0xff] %v277_v40  ;;  %280 = vst [vmem:[%s3827_s29 + $0x148] sm:$0xff] %v279_v41  ;;  %v281_v42 = vld [vmem:[%s3822_s28 + $0x17a0] sm:$0xff]  ;;  %v283_v43 = vld [vmem:[%s3822_s28 + $0x17a8] sm:$0xff] }
  0x2b   : > { %v285_v44 = vld [vmem:[%s3822_s28 + $0x18c0] sm:$0xff]  ;;  %282 = vst [vmem:[%s3827_s29 + $0x150] sm:$0xff] %v281_v42  ;;  %284 = vst [vmem:[%s3827_s29 + $0x158] sm:$0xff] %v283_v43  ;;  %v287_v45 = vld [vmem:[%s3822_s28 + $0x18c8] sm:$0xff] }
  0x2c   : > { %286 = vst [vmem:[%s3827_s29 + $0x160] sm:$0xff] %v285_v44  ;;  %v289_v46 = vld [vmem:[%s3822_s28 + $0x19e0] sm:$0xff]  ;;  %v291_v47 = vld [vmem:[%s3822_s28 + $0x19e8] sm:$0xff]  ;;  %288 = vst [vmem:[%s3827_s29 + $0x168] sm:$0xff] %v287_v45 }
  0x2d   : > { %290 = vst [vmem:[%s3827_s29 + $0x170] sm:$0xff] %v289_v46  ;;  %292 = vst [vmem:[%s3827_s29 + $0x178] sm:$0xff] %v291_v47  ;;  %v293_v48 = vld [vmem:[%s3822_s28 + $0x1b00] sm:$0xff]  ;;  %v295_v49 = vld [vmem:[%s3822_s28 + $0x1b08] sm:$0xff] }
  0x2e   : > { %v297_v50 = vld [vmem:[%s3822_s28 + $0x1c20] sm:$0xff]  ;;  %294 = vst [vmem:[%s3827_s29 + $0x180] sm:$0xff] %v293_v48  ;;  %296 = vst [vmem:[%s3827_s29 + $0x188] sm:$0xff] %v295_v49  ;;  %v299_v51 = vld [vmem:[%s3822_s28 + $0x1c28] sm:$0xff] }
  0x2f   : > { %298 = vst [vmem:[%s3827_s29 + $0x190] sm:$0xff] %v297_v50  ;;  %v301_v52 = vld [vmem:[%s3822_s28 + $0x1d40] sm:$0xff]  ;;  %v303_v53 = vld [vmem:[%s3822_s28 + $0x1d48] sm:$0xff]  ;;  %300 = vst [vmem:[%s3827_s29 + $0x198] sm:$0xff] %v299_v51 }
  0x30   : > { %302 = vst [vmem:[%s3827_s29 + $0x1a0] sm:$0xff] %v301_v52  ;;  %304 = vst [vmem:[%s3827_s29 + $0x1a8] sm:$0xff] %v303_v53  ;;  %v305_v54 = vld [vmem:[%s3822_s28 + $0x1e60] sm:$0xff]  ;;  %v307_v55 = vld [vmem:[%s3822_s28 + $0x1e68] sm:$0xff] }
  0x31   : > { %v309_v56 = vld [vmem:[%s3822_s28 + $0x1f80] sm:$0xff]  ;;  %306 = vst [vmem:[%s3827_s29 + $0x1b0] sm:$0xff] %v305_v54  ;;  %308 = vst [vmem:[%s3827_s29 + $0x1b8] sm:$0xff] %v307_v55  ;;  %v311_v57 = vld [vmem:[%s3822_s28 + $0x1f88] sm:$0xff] }
  0x32   : > { %310 = vst [vmem:[%s3827_s29 + $0x1c0] sm:$0xff] %v309_v56  ;;  %v313_v58 = vld [vmem:[%s3822_s28 + $0x20a0] sm:$0xff]  ;;  %v315_v59 = vld [vmem:[%s3822_s28 + $0x20a8] sm:$0xff]  ;;  %312 = vst [vmem:[%s3827_s29 + $0x1c8] sm:$0xff] %v311_v57 }
  0x33   : > { %314 = vst [vmem:[%s3827_s29 + $0x1d0] sm:$0xff] %v313_v58  ;;  %316 = vst [vmem:[%s3827_s29 + $0x1d8] sm:$0xff] %v315_v59  ;;  %v317_v60 = vld [vmem:[%s3822_s28 + $0x21c0] sm:$0xff]  ;;  %v319_v61 = vld [vmem:[%s3822_s28 + $0x21c8] sm:$0xff] }
  0x34   : > { %v321_v62 = vld [vmem:[%s3822_s28 + $0x22e0] sm:$0xff]  ;;  %318 = vst [vmem:[%s3827_s29 + $0x1e0] sm:$0xff] %v317_v60  ;;  %320 = vst [vmem:[%s3827_s29 + $0x1e8] sm:$0xff] %v319_v61  ;;  %v323_v63 = vld [vmem:[%s3822_s28 + $0x22e8] sm:$0xff] }
  0x35   : > { %322 = vst [vmem:[%s3827_s29 + $0x1f0] sm:$0xff] %v321_v62  ;;  %v325_v0 = vld [vmem:[%s3822_s28 + $0x2400] sm:$0xff]  ;;  %v327_v1 = vld [vmem:[%s3822_s28 + $0x2408] sm:$0xff]  ;;  %324 = vst [vmem:[%s3827_s29 + $0x1f8] sm:$0xff] %v323_v63 }
  0x36   : > { %326 = vst [vmem:[%s3827_s29 + $0x200] sm:$0xff] %v325_v0  ;;  %328 = vst [vmem:[%s3827_s29 + $0x208] sm:$0xff] %v327_v1  ;;  %v329_v2 = vld [vmem:[%s3822_s28 + $0x2520] sm:$0xff]  ;;  %v331_v3 = vld [vmem:[%s3822_s28 + $0x2528] sm:$0xff] }
  0x37   : > { %v333_v4 = vld [vmem:[%s3822_s28 + $0x2640] sm:$0xff]  ;;  %330 = vst [vmem:[%s3827_s29 + $0x210] sm:$0xff] %v329_v2  ;;  %332 = vst [vmem:[%s3827_s29 + $0x218] sm:$0xff] %v331_v3  ;;  %v335_v5 = vld [vmem:[%s3822_s28 + $0x2648] sm:$0xff] }
  0x38   : > { %334 = vst [vmem:[%s3827_s29 + $0x220] sm:$0xff] %v333_v4  ;;  %v337_v6 = vld [vmem:[%s3822_s28 + $0x2760] sm:$0xff]  ;;  %v339_v7 = vld [vmem:[%s3822_s28 + $0x2768] sm:$0xff]  ;;  %336 = vst [vmem:[%s3827_s29 + $0x228] sm:$0xff] %v335_v5 }
  0x39   : > { %338 = vst [vmem:[%s3827_s29 + $0x230] sm:$0xff] %v337_v6  ;;  %340 = vst [vmem:[%s3827_s29 + $0x238] sm:$0xff] %v339_v7  ;;  %v341_v8 = vld [vmem:[%s3822_s28 + $0x2880] sm:$0xff]  ;;  %v343_v9 = vld [vmem:[%s3822_s28 + $0x2888] sm:$0xff] }
  0x3a   : > { %v345_v10 = vld [vmem:[%s3822_s28 + $0x29a0] sm:$0xff]  ;;  %342 = vst [vmem:[%s3827_s29 + $0x240] sm:$0xff] %v341_v8  ;;  %344 = vst [vmem:[%s3827_s29 + $0x248] sm:$0xff] %v343_v9  ;;  %v347_v11 = vld [vmem:[%s3822_s28 + $0x29a8] sm:$0xff] }
  0x3b   : > { %346 = vst [vmem:[%s3827_s29 + $0x250] sm:$0xff] %v345_v10  ;;  %v349_v12 = vld [vmem:[%s3822_s28 + $0x2ac0] sm:$0xff]  ;;  %v351_v13 = vld [vmem:[%s3822_s28 + $0x2ac8] sm:$0xff]  ;;  %348 = vst [vmem:[%s3827_s29 + $0x258] sm:$0xff] %v347_v11 }
  0x3c   : > { %350 = vst [vmem:[%s3827_s29 + $0x260] sm:$0xff] %v349_v12  ;;  %352 = vst [vmem:[%s3827_s29 + $0x268] sm:$0xff] %v351_v13  ;;  %v353_v14 = vld [vmem:[%s3822_s28 + $0x2be0] sm:$0xff]  ;;  %v355_v15 = vld [vmem:[%s3822_s28 + $0x2be8] sm:$0xff] }
  0x3d   : > { %v357_v16 = vld [vmem:[%s3822_s28 + $0x2d00] sm:$0xff]  ;;  %354 = vst [vmem:[%s3827_s29 + $0x270] sm:$0xff] %v353_v14  ;;  %356 = vst [vmem:[%s3827_s29 + $0x278] sm:$0xff] %v355_v15  ;;  %v359_v17 = vld [vmem:[%s3822_s28 + $0x2d08] sm:$0xff] }
  0x3e   : > { %358 = vst [vmem:[%s3827_s29 + $0x280] sm:$0xff] %v357_v16  ;;  %v361_v18 = vld [vmem:[%s3822_s28 + $0x2e20] sm:$0xff]  ;;  %v363_v19 = vld [vmem:[%s3822_s28 + $0x2e28] sm:$0xff]  ;;  %360 = vst [vmem:[%s3827_s29 + $0x288] sm:$0xff] %v359_v17 }
  0x3f   : > { %362 = vst [vmem:[%s3827_s29 + $0x290] sm:$0xff] %v361_v18  ;;  %364 = vst [vmem:[%s3827_s29 + $0x298] sm:$0xff] %v363_v19  ;;  %v365_v20 = vld [vmem:[%s3822_s28 + $0x2f40] sm:$0xff]  ;;  %v367_v21 = vld [vmem:[%s3822_s28 + $0x2f48] sm:$0xff] }
  0x40   : > { %v369_v22 = vld [vmem:[%s3822_s28 + $0x3060] sm:$0xff]  ;;  %366 = vst [vmem:[%s3827_s29 + $0x2a0] sm:$0xff] %v365_v20  ;;  %368 = vst [vmem:[%s3827_s29 + $0x2a8] sm:$0xff] %v367_v21  ;;  %v371_v23 = vld [vmem:[%s3822_s28 + $0x3068] sm:$0xff] }
  0x41   : > { %370 = vst [vmem:[%s3827_s29 + $0x2b0] sm:$0xff] %v369_v22  ;;  %v373_v24 = vld [vmem:[%s3822_s28 + $0x3180] sm:$0xff]  ;;  %v375_v25 = vld [vmem:[%s3822_s28 + $0x3188] sm:$0xff]  ;;  %372 = vst [vmem:[%s3827_s29 + $0x2b8] sm:$0xff] %v371_v23 }
  0x42   : > { %374 = vst [vmem:[%s3827_s29 + $0x2c0] sm:$0xff] %v373_v24  ;;  %376 = vst [vmem:[%s3827_s29 + $0x2c8] sm:$0xff] %v375_v25  ;;  %v377_v26 = vld [vmem:[%s3822_s28 + $0x32a0] sm:$0xff]  ;;  %v379_v27 = vld [vmem:[%s3822_s28 + $0x32a8] sm:$0xff] }
  0x43   : > { %v381_v28 = vld [vmem:[%s3822_s28 + $0x33c0] sm:$0xff]  ;;  %378 = vst [vmem:[%s3827_s29 + $0x2d0] sm:$0xff] %v377_v26  ;;  %380 = vst [vmem:[%s3827_s29 + $0x2d8] sm:$0xff] %v379_v27  ;;  %v383_v29 = vld [vmem:[%s3822_s28 + $0x33c8] sm:$0xff] }
  0x44   : > { %382 = vst [vmem:[%s3827_s29 + $0x2e0] sm:$0xff] %v381_v28  ;;  %v385_v30 = vld [vmem:[%s3822_s28 + $0x34e0] sm:$0xff]  ;;  %v387_v31 = vld [vmem:[%s3822_s28 + $0x34e8] sm:$0xff]  ;;  %384 = vst [vmem:[%s3827_s29 + $0x2e8] sm:$0xff] %v383_v29 }
  0x45   : > { %386 = vst [vmem:[%s3827_s29 + $0x2f0] sm:$0xff] %v385_v30  ;;  %388 = vst [vmem:[%s3827_s29 + $0x2f8] sm:$0xff] %v387_v31  ;;  %v389_v32 = vld [vmem:[%s3822_s28 + $0x3600] sm:$0xff]  ;;  %v391_v33 = vld [vmem:[%s3822_s28 + $0x3608] sm:$0xff] }
  0x46   : > { %v393_v34 = vld [vmem:[%s3822_s28 + $0x3720] sm:$0xff]  ;;  %390 = vst [vmem:[%s3827_s29 + $0x300] sm:$0xff] %v389_v32  ;;  %392 = vst [vmem:[%s3827_s29 + $0x308] sm:$0xff] %v391_v33  ;;  %v395_v35 = vld [vmem:[%s3822_s28 + $0x3728] sm:$0xff] }
  0x47   : > { %394 = vst [vmem:[%s3827_s29 + $0x310] sm:$0xff] %v393_v34  ;;  %v397_v36 = vld [vmem:[%s3822_s28 + $0x3840] sm:$0xff]  ;;  %v399_v37 = vld [vmem:[%s3822_s28 + $0x3848] sm:$0xff]  ;;  %396 = vst [vmem:[%s3827_s29 + $0x318] sm:$0xff] %v395_v35 }
  0x48   : > { %398 = vst [vmem:[%s3827_s29 + $0x320] sm:$0xff] %v397_v36  ;;  %400 = vst [vmem:[%s3827_s29 + $0x328] sm:$0xff] %v399_v37  ;;  %v401_v38 = vld [vmem:[%s3822_s28 + $0x3960] sm:$0xff]  ;;  %v403_v39 = vld [vmem:[%s3822_s28 + $0x3968] sm:$0xff] }
  0x49   : > { %v405_v40 = vld [vmem:[%s3822_s28 + $0x3a80] sm:$0xff]  ;;  %402 = vst [vmem:[%s3827_s29 + $0x330] sm:$0xff] %v401_v38  ;;  %404 = vst [vmem:[%s3827_s29 + $0x338] sm:$0xff] %v403_v39  ;;  %v407_v41 = vld [vmem:[%s3822_s28 + $0x3a88] sm:$0xff] }
  0x4a   : > { %406 = vst [vmem:[%s3827_s29 + $0x340] sm:$0xff] %v405_v40  ;;  %v409_v42 = vld [vmem:[%s3822_s28 + $0x3ba0] sm:$0xff]  ;;  %v411_v43 = vld [vmem:[%s3822_s28 + $0x3ba8] sm:$0xff]  ;;  %408 = vst [vmem:[%s3827_s29 + $0x348] sm:$0xff] %v407_v41 }
  0x4b   : > { %410 = vst [vmem:[%s3827_s29 + $0x350] sm:$0xff] %v409_v42  ;;  %412 = vst [vmem:[%s3827_s29 + $0x358] sm:$0xff] %v411_v43  ;;  %v413_v44 = vld [vmem:[%s3822_s28 + $0x3cc0] sm:$0xff]  ;;  %v415_v45 = vld [vmem:[%s3822_s28 + $0x3cc8] sm:$0xff] }
  0x4c   : > { %v417_v46 = vld [vmem:[%s3822_s28 + $0x3de0] sm:$0xff]  ;;  %414 = vst [vmem:[%s3827_s29 + $0x360] sm:$0xff] %v413_v44  ;;  %416 = vst [vmem:[%s3827_s29 + $0x368] sm:$0xff] %v415_v45  ;;  %v419_v47 = vld [vmem:[%s3822_s28 + $0x3de8] sm:$0xff] }
  0x4d   : > { %418 = vst [vmem:[%s3827_s29 + $0x370] sm:$0xff] %v417_v46  ;;  %v421_v48 = vld [vmem:[%s3822_s28 + $0x3f00] sm:$0xff]  ;;  %v423_v49 = vld [vmem:[%s3822_s28 + $0x3f08] sm:$0xff]  ;;  %420 = vst [vmem:[%s3827_s29 + $0x378] sm:$0xff] %v419_v47 }
  0x4e   : > { %422 = vst [vmem:[%s3827_s29 + $0x380] sm:$0xff] %v421_v48  ;;  %424 = vst [vmem:[%s3827_s29 + $0x388] sm:$0xff] %v423_v49  ;;  %v425_v50 = vld [vmem:[%s3822_s28 + $0x4020] sm:$0xff]  ;;  %v427_v51 = vld [vmem:[%s3822_s28 + $0x4028] sm:$0xff] }
  0x4f   : > { %v429_v52 = vld [vmem:[%s3822_s28 + $0x4140] sm:$0xff]  ;;  %426 = vst [vmem:[%s3827_s29 + $0x390] sm:$0xff] %v425_v50  ;;  %428 = vst [vmem:[%s3827_s29 + $0x398] sm:$0xff] %v427_v51  ;;  %v431_v53 = vld [vmem:[%s3822_s28 + $0x4148] sm:$0xff] }
  0x50   : > { %430 = vst [vmem:[%s3827_s29 + $0x3a0] sm:$0xff] %v429_v52  ;;  %v433_v54 = vld [vmem:[%s3822_s28 + $0x4260] sm:$0xff]  ;;  %v435_v55 = vld [vmem:[%s3822_s28 + $0x4268] sm:$0xff]  ;;  %432 = vst [vmem:[%s3827_s29 + $0x3a8] sm:$0xff] %v431_v53 }
  0x51   : > { %434 = vst [vmem:[%s3827_s29 + $0x3b0] sm:$0xff] %v433_v54  ;;  %436 = vst [vmem:[%s3827_s29 + $0x3b8] sm:$0xff] %v435_v55  ;;  %v437_v56 = vld [vmem:[%s3822_s28 + $0x4380] sm:$0xff]  ;;  %v439_v57 = vld [vmem:[%s3822_s28 + $0x4388] sm:$0xff] }
  0x52   : > { %v441_v58 = vld [vmem:[%s3822_s28 + $0x44a0] sm:$0xff]  ;;  %438 = vst [vmem:[%s3827_s29 + $0x3c0] sm:$0xff] %v437_v56  ;;  %440 = vst [vmem:[%s3827_s29 + $0x3c8] sm:$0xff] %v439_v57  ;;  %v443_v59 = vld [vmem:[%s3822_s28 + $0x44a8] sm:$0xff] }
  0x53   : > { %442 = vst [vmem:[%s3827_s29 + $0x3d0] sm:$0xff] %v441_v58  ;;  %v445_v60 = vld [vmem:[%s3822_s28 + $0x45c0] sm:$0xff]  ;;  %v447_v61 = vld [vmem:[%s3822_s28 + $0x45c8] sm:$0xff]  ;;  %444 = vst [vmem:[%s3827_s29 + $0x3d8] sm:$0xff] %v443_v59 }
  0x54   : > { %446 = vst [vmem:[%s3827_s29 + $0x3e0] sm:$0xff] %v445_v60  ;;  %448 = vst [vmem:[%s3827_s29 + $0x3e8] sm:$0xff] %v447_v61  ;;  %v449_v62 = vld [vmem:[%s3822_s28 + $0x46e0] sm:$0xff]  ;;  %v451_v63 = vld [vmem:[%s3822_s28 + $0x46e8] sm:$0xff] }
  0x55   : > { %v453_v0 = vld [vmem:[%s3822_s28 + $0x4800] sm:$0xff]  ;;  %450 = vst [vmem:[%s3827_s29 + $0x3f0] sm:$0xff] %v449_v62  ;;  %452 = vst [vmem:[%s3827_s29 + $0x3f8] sm:$0xff] %v451_v63  ;;  %v455_v1 = vld [vmem:[%s3822_s28 + $0x4808] sm:$0xff] }
  0x56   : > { %454 = vst [vmem:[%s3827_s29 + $0x400] sm:$0xff] %v453_v0  ;;  %v457_v2 = vld [vmem:[%s3822_s28 + $0x4920] sm:$0xff]  ;;  %v459_v3 = vld [vmem:[%s3822_s28 + $0x4928] sm:$0xff]  ;;  %456 = vst [vmem:[%s3827_s29 + $0x408] sm:$0xff] %v455_v1 }
  0x57   : > { %458 = vst [vmem:[%s3827_s29 + $0x410] sm:$0xff] %v457_v2  ;;  %460 = vst [vmem:[%s3827_s29 + $0x418] sm:$0xff] %v459_v3  ;;  %v461_v4 = vld [vmem:[%s3822_s28 + $0x4a40] sm:$0xff]  ;;  %v463_v5 = vld [vmem:[%s3822_s28 + $0x4a48] sm:$0xff] }
  0x58   : > { %v465_v6 = vld [vmem:[%s3822_s28 + $0x4b60] sm:$0xff]  ;;  %462 = vst [vmem:[%s3827_s29 + $0x420] sm:$0xff] %v461_v4  ;;  %464 = vst [vmem:[%s3827_s29 + $0x428] sm:$0xff] %v463_v5  ;;  %v467_v7 = vld [vmem:[%s3822_s28 + $0x4b68] sm:$0xff] }
  0x59   : > { %466 = vst [vmem:[%s3827_s29 + $0x430] sm:$0xff] %v465_v6  ;;  %v469_v8 = vld [vmem:[%s3822_s28 + $0x4c80] sm:$0xff]  ;;  %v471_v9 = vld [vmem:[%s3822_s28 + $0x4c88] sm:$0xff]  ;;  %468 = vst [vmem:[%s3827_s29 + $0x438] sm:$0xff] %v467_v7 }
  0x5a   : > { %470 = vst [vmem:[%s3827_s29 + $0x440] sm:$0xff] %v469_v8  ;;  %472 = vst [vmem:[%s3827_s29 + $0x448] sm:$0xff] %v471_v9  ;;  %v473_v10 = vld [vmem:[%s3822_s28 + $0x4da0] sm:$0xff]  ;;  %v475_v11 = vld [vmem:[%s3822_s28 + $0x4da8] sm:$0xff] }
  0x5b   : > { %v477_v12 = vld [vmem:[%s3822_s28 + $0x4ec0] sm:$0xff]  ;;  %474 = vst [vmem:[%s3827_s29 + $0x450] sm:$0xff] %v473_v10  ;;  %476 = vst [vmem:[%s3827_s29 + $0x458] sm:$0xff] %v475_v11  ;;  %v479_v13 = vld [vmem:[%s3822_s28 + $0x4ec8] sm:$0xff] }
  0x5c   : > { %478 = vst [vmem:[%s3827_s29 + $0x460] sm:$0xff] %v477_v12  ;;  %v481_v14 = vld [vmem:[%s3822_s28 + $0x4fe0] sm:$0xff]  ;;  %v483_v15 = vld [vmem:[%s3822_s28 + $0x4fe8] sm:$0xff]  ;;  %480 = vst [vmem:[%s3827_s29 + $0x468] sm:$0xff] %v479_v13 }
  0x5d   : > { %482 = vst [vmem:[%s3827_s29 + $0x470] sm:$0xff] %v481_v14  ;;  %484 = vst [vmem:[%s3827_s29 + $0x478] sm:$0xff] %v483_v15  ;;  %v485_v16 = vld [vmem:[%s3822_s28 + $0x5100] sm:$0xff]  ;;  %v487_v17 = vld [vmem:[%s3822_s28 + $0x5108] sm:$0xff] }
  0x5e   : > { %v489_v18 = vld [vmem:[%s3822_s28 + $0x5220] sm:$0xff]  ;;  %486 = vst [vmem:[%s3827_s29 + $0x480] sm:$0xff] %v485_v16  ;;  %488 = vst [vmem:[%s3827_s29 + $0x488] sm:$0xff] %v487_v17  ;;  %v491_v19 = vld [vmem:[%s3822_s28 + $0x5228] sm:$0xff] }
  0x5f   : > { %490 = vst [vmem:[%s3827_s29 + $0x490] sm:$0xff] %v489_v18  ;;  %v493_v20 = vld [vmem:[%s3822_s28 + $0x5340] sm:$0xff]  ;;  %v495_v21 = vld [vmem:[%s3822_s28 + $0x5348] sm:$0xff]  ;;  %492 = vst [vmem:[%s3827_s29 + $0x498] sm:$0xff] %v491_v19 }
  0x60   : > { %494 = vst [vmem:[%s3827_s29 + $0x4a0] sm:$0xff] %v493_v20  ;;  %496 = vst [vmem:[%s3827_s29 + $0x4a8] sm:$0xff] %v495_v21  ;;  %v497_v22 = vld [vmem:[%s3822_s28 + $0x5460] sm:$0xff]  ;;  %v499_v23 = vld [vmem:[%s3822_s28 + $0x5468] sm:$0xff] }
  0x61   : > { %v501_v24 = vld [vmem:[%s3822_s28 + $0x5580] sm:$0xff]  ;;  %498 = vst [vmem:[%s3827_s29 + $0x4b0] sm:$0xff] %v497_v22  ;;  %500 = vst [vmem:[%s3827_s29 + $0x4b8] sm:$0xff] %v499_v23  ;;  %v503_v25 = vld [vmem:[%s3822_s28 + $0x5588] sm:$0xff] }
  0x62   : > { %502 = vst [vmem:[%s3827_s29 + $0x4c0] sm:$0xff] %v501_v24  ;;  %v505_v26 = vld [vmem:[%s3822_s28 + $0x56a0] sm:$0xff]  ;;  %v507_v27 = vld [vmem:[%s3822_s28 + $0x56a8] sm:$0xff]  ;;  %504 = vst [vmem:[%s3827_s29 + $0x4c8] sm:$0xff] %v503_v25 }
  0x63   : > { %506 = vst [vmem:[%s3827_s29 + $0x4d0] sm:$0xff] %v505_v26  ;;  %508 = vst [vmem:[%s3827_s29 + $0x4d8] sm:$0xff] %v507_v27  ;;  %v509_v28 = vld [vmem:[%s3822_s28 + $0x57c0] sm:$0xff]  ;;  %v511_v29 = vld [vmem:[%s3822_s28 + $0x57c8] sm:$0xff] }
  0x64   : > { %v513_v30 = vld [vmem:[%s3822_s28 + $0x58e0] sm:$0xff]  ;;  %510 = vst [vmem:[%s3827_s29 + $0x4e0] sm:$0xff] %v509_v28  ;;  %512 = vst [vmem:[%s3827_s29 + $0x4e8] sm:$0xff] %v511_v29  ;;  %v515_v31 = vld [vmem:[%s3822_s28 + $0x58e8] sm:$0xff] }
  0x65   : > { %514 = vst [vmem:[%s3827_s29 + $0x4f0] sm:$0xff] %v513_v30  ;;  %v517_v32 = vld [vmem:[%s3822_s28 + $0x5a00] sm:$0xff]  ;;  %v519_v33 = vld [vmem:[%s3822_s28 + $0x5a08] sm:$0xff]  ;;  %516 = vst [vmem:[%s3827_s29 + $0x4f8] sm:$0xff] %v515_v31 }
  0x66   : > { %518 = vst [vmem:[%s3827_s29 + $0x500] sm:$0xff] %v517_v32  ;;  %520 = vst [vmem:[%s3827_s29 + $0x508] sm:$0xff] %v519_v33  ;;  %v521_v34 = vld [vmem:[%s3822_s28 + $0x5b20] sm:$0xff]  ;;  %v523_v35 = vld [vmem:[%s3822_s28 + $0x5b28] sm:$0xff] }
  0x67   : > { %v525_v36 = vld [vmem:[%s3822_s28 + $0x5c40] sm:$0xff]  ;;  %522 = vst [vmem:[%s3827_s29 + $0x510] sm:$0xff] %v521_v34  ;;  %524 = vst [vmem:[%s3827_s29 + $0x518] sm:$0xff] %v523_v35  ;;  %v527_v37 = vld [vmem:[%s3822_s28 + $0x5c48] sm:$0xff] }
  0x68   : > { %526 = vst [vmem:[%s3827_s29 + $0x520] sm:$0xff] %v525_v36  ;;  %v529_v38 = vld [vmem:[%s3822_s28 + $0x5d60] sm:$0xff]  ;;  %v531_v39 = vld [vmem:[%s3822_s28 + $0x5d68] sm:$0xff]  ;;  %528 = vst [vmem:[%s3827_s29 + $0x528] sm:$0xff] %v527_v37 }
  0x69   : > { %530 = vst [vmem:[%s3827_s29 + $0x530] sm:$0xff] %v529_v38  ;;  %532 = vst [vmem:[%s3827_s29 + $0x538] sm:$0xff] %v531_v39  ;;  %v533_v40 = vld [vmem:[%s3822_s28 + $0x5e80] sm:$0xff]  ;;  %v535_v41 = vld [vmem:[%s3822_s28 + $0x5e88] sm:$0xff] }
  0x6a   : > { %v537_v42 = vld [vmem:[%s3822_s28 + $0x5fa0] sm:$0xff]  ;;  %534 = vst [vmem:[%s3827_s29 + $0x540] sm:$0xff] %v533_v40  ;;  %536 = vst [vmem:[%s3827_s29 + $0x548] sm:$0xff] %v535_v41  ;;  %v539_v43 = vld [vmem:[%s3822_s28 + $0x5fa8] sm:$0xff] }
  0x6b   : > { %538 = vst [vmem:[%s3827_s29 + $0x550] sm:$0xff] %v537_v42  ;;  %v541_v44 = vld [vmem:[%s3822_s28 + $0x60c0] sm:$0xff]  ;;  %v543_v45 = vld [vmem:[%s3822_s28 + $0x60c8] sm:$0xff]  ;;  %540 = vst [vmem:[%s3827_s29 + $0x558] sm:$0xff] %v539_v43 }
  0x6c   : > { %542 = vst [vmem:[%s3827_s29 + $0x560] sm:$0xff] %v541_v44  ;;  %544 = vst [vmem:[%s3827_s29 + $0x568] sm:$0xff] %v543_v45  ;;  %v545_v46 = vld [vmem:[%s3822_s28 + $0x61e0] sm:$0xff]  ;;  %v547_v47 = vld [vmem:[%s3822_s28 + $0x61e8] sm:$0xff] }
  0x6d   : > { %v549_v48 = vld [vmem:[%s3822_s28 + $0x6300] sm:$0xff]  ;;  %546 = vst [vmem:[%s3827_s29 + $0x570] sm:$0xff] %v545_v46  ;;  %548 = vst [vmem:[%s3827_s29 + $0x578] sm:$0xff] %v547_v47  ;;  %v551_v49 = vld [vmem:[%s3822_s28 + $0x6308] sm:$0xff] }
  0x6e   : > { %550 = vst [vmem:[%s3827_s29 + $0x580] sm:$0xff] %v549_v48  ;;  %v553_v50 = vld [vmem:[%s3822_s28 + $0x6420] sm:$0xff]  ;;  %v555_v51 = vld [vmem:[%s3822_s28 + $0x6428] sm:$0xff]  ;;  %552 = vst [vmem:[%s3827_s29 + $0x588] sm:$0xff] %v551_v49 }
  0x6f   : > { %554 = vst [vmem:[%s3827_s29 + $0x590] sm:$0xff] %v553_v50  ;;  %556 = vst [vmem:[%s3827_s29 + $0x598] sm:$0xff] %v555_v51  ;;  %v557_v52 = vld [vmem:[%s3822_s28 + $0x6540] sm:$0xff]  ;;  %v559_v53 = vld [vmem:[%s3822_s28 + $0x6548] sm:$0xff] }
  0x70   : > { %v561_v54 = vld [vmem:[%s3822_s28 + $0x6660] sm:$0xff]  ;;  %558 = vst [vmem:[%s3827_s29 + $0x5a0] sm:$0xff] %v557_v52  ;;  %560 = vst [vmem:[%s3827_s29 + $0x5a8] sm:$0xff] %v559_v53  ;;  %v563_v55 = vld [vmem:[%s3822_s28 + $0x6668] sm:$0xff] }
  0x71   : > { %562 = vst [vmem:[%s3827_s29 + $0x5b0] sm:$0xff] %v561_v54  ;;  %v565_v56 = vld [vmem:[%s3822_s28 + $0x6780] sm:$0xff]  ;;  %v567_v57 = vld [vmem:[%s3822_s28 + $0x6788] sm:$0xff]  ;;  %564 = vst [vmem:[%s3827_s29 + $0x5b8] sm:$0xff] %v563_v55 }
  0x72   : > { %566 = vst [vmem:[%s3827_s29 + $0x5c0] sm:$0xff] %v565_v56  ;;  %568 = vst [vmem:[%s3827_s29 + $0x5c8] sm:$0xff] %v567_v57  ;;  %v569_v58 = vld [vmem:[%s3822_s28 + $0x68a0] sm:$0xff]  ;;  %v571_v59 = vld [vmem:[%s3822_s28 + $0x68a8] sm:$0xff] }
  0x73   : > { %v573_v60 = vld [vmem:[%s3822_s28 + $0x69c0] sm:$0xff]  ;;  %570 = vst [vmem:[%s3827_s29 + $0x5d0] sm:$0xff] %v569_v58  ;;  %572 = vst [vmem:[%s3827_s29 + $0x5d8] sm:$0xff] %v571_v59  ;;  %v575_v61 = vld [vmem:[%s3822_s28 + $0x69c8] sm:$0xff] }
  0x74   : > { %574 = vst [vmem:[%s3827_s29 + $0x5e0] sm:$0xff] %v573_v60  ;;  %v577_v62 = vld [vmem:[%s3822_s28 + $0x6ae0] sm:$0xff]  ;;  %v579_v63 = vld [vmem:[%s3822_s28 + $0x6ae8] sm:$0xff]  ;;  %576 = vst [vmem:[%s3827_s29 + $0x5e8] sm:$0xff] %v575_v61 }
  0x75   : > { %578 = vst [vmem:[%s3827_s29 + $0x5f0] sm:$0xff] %v577_v62  ;;  %580 = vst [vmem:[%s3827_s29 + $0x5f8] sm:$0xff] %v579_v63  ;;  %v581_v0 = vld [vmem:[%s3822_s28 + $0x6c00] sm:$0xff]  ;;  %v583_v1 = vld [vmem:[%s3822_s28 + $0x6c08] sm:$0xff] }
  0x76   : > { %v585_v2 = vld [vmem:[%s3822_s28 + $0x6d20] sm:$0xff]  ;;  %582 = vst [vmem:[%s3827_s29 + $0x600] sm:$0xff] %v581_v0  ;;  %584 = vst [vmem:[%s3827_s29 + $0x608] sm:$0xff] %v583_v1  ;;  %v587_v3 = vld [vmem:[%s3822_s28 + $0x6d28] sm:$0xff] }
  0x77   : > { %586 = vst [vmem:[%s3827_s29 + $0x610] sm:$0xff] %v585_v2  ;;  %v589_v4 = vld [vmem:[%s3822_s28 + $0x6e40] sm:$0xff]  ;;  %v591_v5 = vld [vmem:[%s3822_s28 + $0x6e48] sm:$0xff]  ;;  %588 = vst [vmem:[%s3827_s29 + $0x618] sm:$0xff] %v587_v3 }
  0x78   : > { %590 = vst [vmem:[%s3827_s29 + $0x620] sm:$0xff] %v589_v4  ;;  %592 = vst [vmem:[%s3827_s29 + $0x628] sm:$0xff] %v591_v5  ;;  %v593_v6 = vld [vmem:[%s3822_s28 + $0x6f60] sm:$0xff]  ;;  %v595_v7 = vld [vmem:[%s3822_s28 + $0x6f68] sm:$0xff] }
  0x79   : > { %v597_v8 = vld [vmem:[%s3822_s28 + $0x7080] sm:$0xff]  ;;  %594 = vst [vmem:[%s3827_s29 + $0x630] sm:$0xff] %v593_v6  ;;  %596 = vst [vmem:[%s3827_s29 + $0x638] sm:$0xff] %v595_v7  ;;  %v599_v9 = vld [vmem:[%s3822_s28 + $0x7088] sm:$0xff] }
  0x7a   : > { %598 = vst [vmem:[%s3827_s29 + $0x640] sm:$0xff] %v597_v8  ;;  %v601_v10 = vld [vmem:[%s3822_s28 + $0x71a0] sm:$0xff]  ;;  %v603_v11 = vld [vmem:[%s3822_s28 + $0x71a8] sm:$0xff]  ;;  %600 = vst [vmem:[%s3827_s29 + $0x648] sm:$0xff] %v599_v9 }
  0x7b   : > { %602 = vst [vmem:[%s3827_s29 + $0x650] sm:$0xff] %v601_v10  ;;  %604 = vst [vmem:[%s3827_s29 + $0x658] sm:$0xff] %v603_v11  ;;  %v605_v12 = vld [vmem:[%s3822_s28 + $0x72c0] sm:$0xff]  ;;  %v607_v13 = vld [vmem:[%s3822_s28 + $0x72c8] sm:$0xff] }
  0x7c   : > { %v609_v14 = vld [vmem:[%s3822_s28 + $0x73e0] sm:$0xff]  ;;  %606 = vst [vmem:[%s3827_s29 + $0x660] sm:$0xff] %v605_v12  ;;  %608 = vst [vmem:[%s3827_s29 + $0x668] sm:$0xff] %v607_v13  ;;  %v611_v15 = vld [vmem:[%s3822_s28 + $0x73e8] sm:$0xff] }
  0x7d   : > { %610 = vst [vmem:[%s3827_s29 + $0x670] sm:$0xff] %v609_v14  ;;  %v613_v16 = vld [vmem:[%s3822_s28 + $0x7500] sm:$0xff]  ;;  %v615_v17 = vld [vmem:[%s3822_s28 + $0x7508] sm:$0xff]  ;;  %612 = vst [vmem:[%s3827_s29 + $0x678] sm:$0xff] %v611_v15 }
  0x7e   : > { %614 = vst [vmem:[%s3827_s29 + $0x680] sm:$0xff] %v613_v16  ;;  %616 = vst [vmem:[%s3827_s29 + $0x688] sm:$0xff] %v615_v17  ;;  %v617_v18 = vld [vmem:[%s3822_s28 + $0x7620] sm:$0xff]  ;;  %v619_v19 = vld [vmem:[%s3822_s28 + $0x7628] sm:$0xff] }
  0x7f   : > { %v621_v20 = vld [vmem:[%s3822_s28 + $0x7740] sm:$0xff]  ;;  %618 = vst [vmem:[%s3827_s29 + $0x690] sm:$0xff] %v617_v18  ;;  %620 = vst [vmem:[%s3827_s29 + $0x698] sm:$0xff] %v619_v19  ;;  %v623_v21 = vld [vmem:[%s3822_s28 + $0x7748] sm:$0xff] }
  0x80   : > { %622 = vst [vmem:[%s3827_s29 + $0x6a0] sm:$0xff] %v621_v20  ;;  %v625_v22 = vld [vmem:[%s3822_s28 + $0x7860] sm:$0xff]  ;;  %v627_v23 = vld [vmem:[%s3822_s28 + $0x7868] sm:$0xff]  ;;  %624 = vst [vmem:[%s3827_s29 + $0x6a8] sm:$0xff] %v623_v21 }
  0x81   : > { %626 = vst [vmem:[%s3827_s29 + $0x6b0] sm:$0xff] %v625_v22  ;;  %628 = vst [vmem:[%s3827_s29 + $0x6b8] sm:$0xff] %v627_v23  ;;  %v629_v24 = vld [vmem:[%s3822_s28 + $0x7980] sm:$0xff]  ;;  %v631_v25 = vld [vmem:[%s3822_s28 + $0x7988] sm:$0xff] }
  0x82   : > { %v633_v26 = vld [vmem:[%s3822_s28 + $0x7aa0] sm:$0xff]  ;;  %630 = vst [vmem:[%s3827_s29 + $0x6c0] sm:$0xff] %v629_v24  ;;  %632 = vst [vmem:[%s3827_s29 + $0x6c8] sm:$0xff] %v631_v25  ;;  %v635_v27 = vld [vmem:[%s3822_s28 + $0x7aa8] sm:$0xff] }
  0x83   : > { %634 = vst [vmem:[%s3827_s29 + $0x6d0] sm:$0xff] %v633_v26  ;;  %v637_v28 = vld [vmem:[%s3822_s28 + $0x7bc0] sm:$0xff]  ;;  %v639_v29 = vld [vmem:[%s3822_s28 + $0x7bc8] sm:$0xff]  ;;  %636 = vst [vmem:[%s3827_s29 + $0x6d8] sm:$0xff] %v635_v27 }
  0x84   : > { %638 = vst [vmem:[%s3827_s29 + $0x6e0] sm:$0xff] %v637_v28  ;;  %640 = vst [vmem:[%s3827_s29 + $0x6e8] sm:$0xff] %v639_v29  ;;  %v641_v30 = vld [vmem:[%s3822_s28 + $0x7ce0] sm:$0xff]  ;;  %v643_v31 = vld [vmem:[%s3822_s28 + $0x7ce8] sm:$0xff] }
  0x85   : > { %v645_v32 = vld [vmem:[%s3822_s28 + $0x7e00] sm:$0xff]  ;;  %642 = vst [vmem:[%s3827_s29 + $0x6f0] sm:$0xff] %v641_v30  ;;  %644 = vst [vmem:[%s3827_s29 + $0x6f8] sm:$0xff] %v643_v31  ;;  %v647_v33 = vld [vmem:[%s3822_s28 + $0x7e08] sm:$0xff] }
  0x86   : > { %646 = vst [vmem:[%s3827_s29 + $0x700] sm:$0xff] %v645_v32  ;;  %v649_v34 = vld [vmem:[%s3822_s28 + $0x7f20] sm:$0xff]  ;;  %v651_v35 = vld [vmem:[%s3822_s28 + $0x7f28] sm:$0xff]  ;;  %648 = vst [vmem:[%s3827_s29 + $0x708] sm:$0xff] %v647_v33 }
  0x87   : > { %650 = vst [vmem:[%s3827_s29 + $0x710] sm:$0xff] %v649_v34  ;;  %652 = vst [vmem:[%s3827_s29 + $0x718] sm:$0xff] %v651_v35  ;;  %v653_v36 = vld [vmem:[%s3822_s28 + $0x8040] sm:$0xff]  ;;  %v655_v37 = vld [vmem:[%s3822_s28 + $0x8048] sm:$0xff] }
  0x88   : > { %v657_v38 = vld [vmem:[%s3822_s28 + $0x8160] sm:$0xff]  ;;  %654 = vst [vmem:[%s3827_s29 + $0x720] sm:$0xff] %v653_v36  ;;  %656 = vst [vmem:[%s3827_s29 + $0x728] sm:$0xff] %v655_v37  ;;  %v659_v39 = vld [vmem:[%s3822_s28 + $0x8168] sm:$0xff] }
  0x89   : > { %658 = vst [vmem:[%s3827_s29 + $0x730] sm:$0xff] %v657_v38  ;;  %v661_v40 = vld [vmem:[%s3822_s28 + $0x8280] sm:$0xff]  ;;  %v663_v41 = vld [vmem:[%s3822_s28 + $0x8288] sm:$0xff]  ;;  %660 = vst [vmem:[%s3827_s29 + $0x738] sm:$0xff] %v659_v39 }
  0x8a   : > { %662 = vst [vmem:[%s3827_s29 + $0x740] sm:$0xff] %v661_v40  ;;  %664 = vst [vmem:[%s3827_s29 + $0x748] sm:$0xff] %v663_v41  ;;  %v665_v42 = vld [vmem:[%s3822_s28 + $0x83a0] sm:$0xff]  ;;  %v667_v43 = vld [vmem:[%s3822_s28 + $0x83a8] sm:$0xff] }
  0x8b   : > { %v669_v44 = vld [vmem:[%s3822_s28 + $0x84c0] sm:$0xff]  ;;  %666 = vst [vmem:[%s3827_s29 + $0x750] sm:$0xff] %v665_v42  ;;  %668 = vst [vmem:[%s3827_s29 + $0x758] sm:$0xff] %v667_v43  ;;  %v671_v45 = vld [vmem:[%s3822_s28 + $0x84c8] sm:$0xff] }
  0x8c   : > { %670 = vst [vmem:[%s3827_s29 + $0x760] sm:$0xff] %v669_v44  ;;  %v673_v46 = vld [vmem:[%s3822_s28 + $0x85e0] sm:$0xff]  ;;  %v675_v47 = vld [vmem:[%s3822_s28 + $0x85e8] sm:$0xff]  ;;  %672 = vst [vmem:[%s3827_s29 + $0x768] sm:$0xff] %v671_v45 }
  0x8d   : > { %674 = vst [vmem:[%s3827_s29 + $0x770] sm:$0xff] %v673_v46  ;;  %676 = vst [vmem:[%s3827_s29 + $0x778] sm:$0xff] %v675_v47  ;;  %v677_v48 = vld [vmem:[%s3822_s28 + $0x8700] sm:$0xff]  ;;  %v679_v49 = vld [vmem:[%s3822_s28 + $0x8708] sm:$0xff] }
  0x8e   : > { %v681_v50 = vld [vmem:[%s3822_s28 + $0x8820] sm:$0xff]  ;;  %678 = vst [vmem:[%s3827_s29 + $0x780] sm:$0xff] %v677_v48  ;;  %680 = vst [vmem:[%s3827_s29 + $0x788] sm:$0xff] %v679_v49  ;;  %v683_v51 = vld [vmem:[%s3822_s28 + $0x8828] sm:$0xff] }
  0x8f   : > { %682 = vst [vmem:[%s3827_s29 + $0x790] sm:$0xff] %v681_v50  ;;  %v685_v52 = vld [vmem:[%s3822_s28 + $0x8940] sm:$0xff]  ;;  %v687_v53 = vld [vmem:[%s3822_s28 + $0x8948] sm:$0xff]  ;;  %684 = vst [vmem:[%s3827_s29 + $0x798] sm:$0xff] %v683_v51 }
  0x90   : > { %686 = vst [vmem:[%s3827_s29 + $0x7a0] sm:$0xff] %v685_v52  ;;  %688 = vst [vmem:[%s3827_s29 + $0x7a8] sm:$0xff] %v687_v53  ;;  %v689_v54 = vld [vmem:[%s3822_s28 + $0x8a60] sm:$0xff]  ;;  %v691_v55 = vld [vmem:[%s3822_s28 + $0x8a68] sm:$0xff] }
  0x91   : > { %v693_v56 = vld [vmem:[%s3822_s28 + $0x8b80] sm:$0xff]  ;;  %690 = vst [vmem:[%s3827_s29 + $0x7b0] sm:$0xff] %v689_v54  ;;  %692 = vst [vmem:[%s3827_s29 + $0x7b8] sm:$0xff] %v691_v55  ;;  %v695_v57 = vld [vmem:[%s3822_s28 + $0x8b88] sm:$0xff] }
  0x92   : > { %694 = vst [vmem:[%s3827_s29 + $0x7c0] sm:$0xff] %v693_v56  ;;  %v697_v58 = vld [vmem:[%s3822_s28 + $0x8ca0] sm:$0xff]  ;;  %v699_v59 = vld [vmem:[%s3822_s28 + $0x8ca8] sm:$0xff]  ;;  %696 = vst [vmem:[%s3827_s29 + $0x7c8] sm:$0xff] %v695_v57 }
  0x93   : > { %698 = vst [vmem:[%s3827_s29 + $0x7d0] sm:$0xff] %v697_v58  ;;  %700 = vst [vmem:[%s3827_s29 + $0x7d8] sm:$0xff] %v699_v59  ;;  %v701_v60 = vld [vmem:[%s3822_s28 + $0x8dc0] sm:$0xff]  ;;  %v703_v61 = vld [vmem:[%s3822_s28 + $0x8dc8] sm:$0xff] }
  0x94   : > { %v705_v62 = vld [vmem:[%s3822_s28 + $0x8ee0] sm:$0xff]  ;;  %702 = vst [vmem:[%s3827_s29 + $0x7e0] sm:$0xff] %v701_v60  ;;  %704 = vst [vmem:[%s3827_s29 + $0x7e8] sm:$0xff] %v703_v61  ;;  %v707_v63 = vld [vmem:[%s3822_s28 + $0x8ee8] sm:$0xff] }
  0x95   : > { %706 = vst [vmem:[%s3827_s29 + $0x7f0] sm:$0xff] %v705_v62  ;;  %708 = vst [vmem:[%s3827_s29 + $0x7f8] sm:$0xff] %v707_v63 }
  0x96 PF: > { %p2990_p8 = scmp.ge.s32.totalorder %s3752_s16, 1  ;;  %p722_p9 = scmp.lt.s32.totalorder %s3752_s16, 19 }
  0x98   : > { %p723_p10 = pnand %p2990_p8, %p722_p9 }
  0x99   : > { %s729_s30 = sand.u32 (!%p723_p10), 1, %s3736_s12   ;;  %v808_v0 = vld [vmem:[%s4680_s0] sm:$0xff] (!%p723_p10)  ;;  %s2993_s4 = sshll.u32 (!%p723_p10), %s3744_s14, 2 }
  0x9a   : > { %726 = sbr.rel (%p723_p10) target bundleno = 644 (0x284), region = 51  ;;  %v812_v1 = vld [vmem:[%s4680_s0 + $0x20] sm:$0xff] (!%p723_p10)  ;;  %s2991_s8 = sshll.u32 (!%p723_p10), %s729_s30, 11 }
  0x9b   : > { %v4349_v2 = vcombine.low (!%p723_p10), %v808_v0, %v812_v1  ;;  %v2996_v3 = vcombine.high (!%p723_p10), %v808_v0, %v812_v1  ;;  %s4351_s9 = scalar_lea.vmem (!%p723_p10), [#allocation3], %s2991_s8  ;;  %p781_p11 = scmp.lt.s32.totalorder (!%p723_p10), %s2993_s4, 71 }
  0x9c   : > { %v3330_v4 = vld [vmem:[%s4351_s9 + $0x4] ss:$16 sps:$4 sm:$0xff] (!%p723_p10)   ;;  %v3332_v5 = vld [vmem:[%s4351_s9 + $0xc] ss:$16 sps:$4 sm:$0xff] (!%p723_p10)   ;;  %v3334_v6 = vld [vmem:[%s4351_s9] ss:$16 sps:$4 sm:$0xff] (!%p723_p10)  }
  0x9d   : > { %2424 = vmatprep.mubr.bf16.mxu0 (!%p723_p10), %v2996_v3  ;;  %2596 = vmatprep.mubr.bf16.mxu1 (!%p723_p10), %v2996_v3  ;;  %v3335_v7 = vld [vmem:[%s4351_s9 + $0x8] ss:$16 sps:$4 sm:$0xff] (!%p723_p10)   ;;  %v3336_v8 = vld [vmem:[%s4351_s9 + $0x24] ss:$16 sps:$4 sm:$0xff] (!%p723_p10)   ;;  %v3338_v9 = vld [vmem:[%s4351_s9 + $0x2c] ss:$16 sps:$4 sm:$0xff] (!%p723_p10)  }
  0x9e   : > { %2392 = vmatprep.subr.bf16.mxu0 (!%p723_p10), %v3330_v4  ;;  %2564 = vmatprep.subr.bf16.mxu1 (!%p723_p10), %v3332_v5  ;;  %v3340_v10 = vld [vmem:[%s4351_s9 + $0x20] ss:$16 sps:$4 sm:$0xff] (!%p723_p10)   ;;  %v3341_v11 = vld [vmem:[%s4351_s9 + $0x28] ss:$16 sps:$4 sm:$0xff] (!%p723_p10)   ;;  %v3342_v12 = vld [vmem:[%s4351_s9 + $0x44] ss:$16 sps:$4 sm:$0xff] (!%p723_p10)  }
  0x9f   : > { %2393 = vmatpush1.bf16.msra.mxu0 (!%p723_p10), %v3334_v6  ;;  %2565 = vmatpush1.bf16.msra.mxu1 (!%p723_p10), %v3335_v7  ;;  %v3344_v13 = vld [vmem:[%s4351_s9 + $0x4c] ss:$16 sps:$4 sm:$0xff] (!%p723_p10)   ;;  %v3346_v14 = vld [vmem:[%s4351_s9 + $0x40] ss:$16 sps:$4 sm:$0xff] (!%p723_p10)   ;;  %v3347_v15 = vld [vmem:[%s4351_s9 + $0x48] ss:$16 sps:$4 sm:$0xff] (!%p723_p10)  }
  0xa0   : > { %2394 = vmatprep.subr.bf16.mxu0 (!%p723_p10), %v3336_v8  ;;  %2566 = vmatprep.subr.bf16.mxu1 (!%p723_p10), %v3338_v9  ;;  %v3348_v16 = vld [vmem:[%s4351_s9 + $0x64] ss:$16 sps:$4 sm:$0xff] (!%p723_p10)   ;;  %v3350_v17 = vld [vmem:[%s4351_s9 + $0x6c] ss:$16 sps:$4 sm:$0xff] (!%p723_p10)   ;;  %v3352_v18 = vld [vmem:[%s4351_s9 + $0x60] ss:$16 sps:$4 sm:$0xff] (!%p723_p10)  }
  0xa1   : > { %v3353_v19 = vld [vmem:[%s4351_s9 + $0x68] ss:$16 sps:$4 sm:$0xff]   ;;  %v3354_v20 = vld [vmem:[%s4351_s9 + $0x84] ss:$16 sps:$4 sm:$0xff]   ;;  %v3356_v21 = vld [vmem:[%s4351_s9 + $0x8c] ss:$16 sps:$4 sm:$0xff]  }
  0xa2   : > { %v3358_v22 = vld [vmem:[%s4351_s9 + $0x80] ss:$16 sps:$4 sm:$0xff]   ;;  %v3359_v23 = vld [vmem:[%s4351_s9 + $0x88] ss:$16 sps:$4 sm:$0xff]   ;;  %v3360_v24 = vld [vmem:[%s4351_s9 + $0xa4] ss:$16 sps:$4 sm:$0xff]  }
  0xa3   : > { %2395 = vmatpush1.bf16.msra.mxu0 %v3340_v10  ;;  %2567 = vmatpush1.bf16.msra.mxu1 %v3341_v11  ;;  %v3362_v25 = vld [vmem:[%s4351_s9 + $0xac] ss:$16 sps:$4 sm:$0xff]   ;;  %v3364_v26 = vld [vmem:[%s4351_s9 + $0xa0] ss:$16 sps:$4 sm:$0xff]   ;;  %v3365_v27 = vld [vmem:[%s4351_s9 + $0xa8] ss:$16 sps:$4 sm:$0xff]  }
  0xa4   : > { %2396 = vmatprep.subr.bf16.mxu0 %v3342_v12  ;;  %2568 = vmatprep.subr.bf16.mxu1 %v3344_v13  ;;  %v3366_v28 = vld [vmem:[%s4351_s9 + $0xc4] ss:$16 sps:$4 sm:$0xff]   ;;  %v3368_v29 = vld [vmem:[%s4351_s9 + $0xcc] ss:$16 sps:$4 sm:$0xff]   ;;  %v3370_v30 = vld [vmem:[%s4351_s9 + $0xc0] ss:$16 sps:$4 sm:$0xff]  }
  0xa5   : > { %v3371_v31 = vld [vmem:[%s4351_s9 + $0xc8] ss:$16 sps:$4 sm:$0xff]   ;;  %v3372_v32 = vld [vmem:[%s4351_s9 + $0xe4] ss:$16 sps:$4 sm:$0xff]   ;;  %v3374_v33 = vld [vmem:[%s4351_s9 + $0xec] ss:$16 sps:$4 sm:$0xff]  }
  0xa6   : > { %v3376_v34 = vld [vmem:[%s4351_s9 + $0xe0] ss:$16 sps:$4 sm:$0xff]   ;;  %v3377_v35 = vld [vmem:[%s4351_s9 + $0xe8] ss:$16 sps:$4 sm:$0xff]   ;;  %v3378_v36 = vld [vmem:[%s4351_s9 + $0x104] ss:$16 sps:$4 sm:$0xff]  }
  0xa7   : > { %2397 = vmatpush1.bf16.msra.mxu0 %v3346_v14  ;;  %2569 = vmatpush1.bf16.msra.mxu1 %v3347_v15  ;;  %v3380_v37 = vld [vmem:[%s4351_s9 + $0x10c] ss:$16 sps:$4 sm:$0xff]   ;;  %v3382_v38 = vld [vmem:[%s4351_s9 + $0x100] ss:$16 sps:$4 sm:$0xff]   ;;  %v3383_v39 = vld [vmem:[%s4351_s9 + $0x108] ss:$16 sps:$4 sm:$0xff]  }
  0xa8   : > { %2398 = vmatprep.subr.bf16.mxu0 %v3348_v16  ;;  %2570 = vmatprep.subr.bf16.mxu1 %v3350_v17  ;;  %v3384_v40 = vld [vmem:[%s4351_s9 + $0x124] ss:$16 sps:$4 sm:$0xff]   ;;  %v3386_v41 = vld [vmem:[%s4351_s9 + $0x12c] ss:$16 sps:$4 sm:$0xff]   ;;  %v3388_v42 = vld [vmem:[%s4351_s9 + $0x120] ss:$16 sps:$4 sm:$0xff]  }
  0xa9   : > { %v3389_v43 = vld [vmem:[%s4351_s9 + $0x128] ss:$16 sps:$4 sm:$0xff]   ;;  %v3390_v44 = vld [vmem:[%s4351_s9 + $0x144] ss:$16 sps:$4 sm:$0xff]   ;;  %v3392_v45 = vld [vmem:[%s4351_s9 + $0x14c] ss:$16 sps:$4 sm:$0xff]  }
  0xaa   : > { %v3394_v46 = vld [vmem:[%s4351_s9 + $0x140] ss:$16 sps:$4 sm:$0xff]   ;;  %v3395_v47 = vld [vmem:[%s4351_s9 + $0x148] ss:$16 sps:$4 sm:$0xff]   ;;  %v3396_v48 = vld [vmem:[%s4351_s9 + $0x164] ss:$16 sps:$4 sm:$0xff]  }
  0xab   : > { %2399 = vmatpush1.bf16.msra.mxu0 %v3352_v18  ;;  %2571 = vmatpush1.bf16.msra.mxu1 %v3353_v19  ;;  %v3398_v49 = vld [vmem:[%s4351_s9 + $0x16c] ss:$16 sps:$4 sm:$0xff]   ;;  %v3400_v50 = vld [vmem:[%s4351_s9 + $0x160] ss:$16 sps:$4 sm:$0xff]   ;;  %v3401_v51 = vld [vmem:[%s4351_s9 + $0x168] ss:$16 sps:$4 sm:$0xff]  }
  0xac   : > { %2400 = vmatprep.subr.bf16.mxu0 %v3354_v20  ;;  %2572 = vmatprep.subr.bf16.mxu1 %v3356_v21  ;;  %v3402_v52 = vld [vmem:[%s4351_s9 + $0x184] ss:$16 sps:$4 sm:$0xff]   ;;  %v3404_v53 = vld [vmem:[%s4351_s9 + $0x18c] ss:$16 sps:$4 sm:$0xff]   ;;  %v3406_v54 = vld [vmem:[%s4351_s9 + $0x180] ss:$16 sps:$4 sm:$0xff]  }
  0xad   : > { %v3407_v55 = vld [vmem:[%s4351_s9 + $0x188] ss:$16 sps:$4 sm:$0xff]   ;;  %v3408_v56 = vld [vmem:[%s4351_s9 + $0x1a4] ss:$16 sps:$4 sm:$0xff]   ;;  %v3410_v57 = vld [vmem:[%s4351_s9 + $0x1ac] ss:$16 sps:$4 sm:$0xff]  }
  0xae   : > { %v3412_v58 = vld [vmem:[%s4351_s9 + $0x1a0] ss:$16 sps:$4 sm:$0xff]   ;;  %v3413_v59 = vld [vmem:[%s4351_s9 + $0x1a8] ss:$16 sps:$4 sm:$0xff]   ;;  %v3414_v60 = vld [vmem:[%s4351_s9 + $0x1c4] ss:$16 sps:$4 sm:$0xff]  }
  0xaf   : > { %2401 = vmatpush1.bf16.msra.mxu0 %v3358_v22  ;;  %2573 = vmatpush1.bf16.msra.mxu1 %v3359_v23  ;;  %v3416_v61 = vld [vmem:[%s4351_s9 + $0x1cc] ss:$16 sps:$4 sm:$0xff]   ;;  %v3418_v62 = vld [vmem:[%s4351_s9 + $0x1c0] ss:$16 sps:$4 sm:$0xff]   ;;  %v3419_v63 = vld [vmem:[%s4351_s9 + $0x1c8] ss:$16 sps:$4 sm:$0xff]  }
  0xb0   : > { %2402 = vmatprep.subr.bf16.mxu0 %v3360_v24  ;;  %2574 = vmatprep.subr.bf16.mxu1 %v3362_v25  ;;  %v3420_v0 = vld [vmem:[%s4351_s9 + $0x1e4] ss:$16 sps:$4 sm:$0xff]   ;;  %v3422_v1 = vld [vmem:[%s4351_s9 + $0x1ec] ss:$16 sps:$4 sm:$0xff]   ;;  %v3424_v3 = vld [vmem:[%s4351_s9 + $0x1e0] ss:$16 sps:$4 sm:$0xff]  }
  0xb1   : > { %v3425_v4 = vld [vmem:[%s4351_s9 + $0x1e8] ss:$16 sps:$4 sm:$0xff]   ;;  %v3428_v5 = vld [vmem:[%s4351_s9 + $0x204] ss:$16 sps:$4 sm:$0xff]   ;;  %v3431_v6 = vld [vmem:[%s4351_s9 + $0x20c] ss:$16 sps:$4 sm:$0xff]  }
  0xb2   : > { %v3426_v7 = vld [vmem:[%s4351_s9 + $0x200] ss:$16 sps:$4 sm:$0xff]   ;;  %v3429_v8 = vld [vmem:[%s4351_s9 + $0x208] ss:$16 sps:$4 sm:$0xff]   ;;  %v3434_v9 = vld [vmem:[%s4351_s9 + $0x224] ss:$16 sps:$4 sm:$0xff]  }
  0xb3   : > { %2403 = vmatpush1.bf16.msra.mxu0 %v3364_v26  ;;  %2575 = vmatpush1.bf16.msra.mxu1 %v3365_v27  ;;  %v3437_v10 = vld [vmem:[%s4351_s9 + $0x22c] ss:$16 sps:$4 sm:$0xff]   ;;  %v3432_v11 = vld [vmem:[%s4351_s9 + $0x220] ss:$16 sps:$4 sm:$0xff]   ;;  %v3435_v12 = vld [vmem:[%s4351_s9 + $0x228] ss:$16 sps:$4 sm:$0xff]  }
  0xb4   : > { %2404 = vmatprep.subr.bf16.mxu0 %v3366_v28  ;;  %2576 = vmatprep.subr.bf16.mxu1 %v3368_v29  ;;  %v3440_v13 = vld [vmem:[%s4351_s9 + $0x244] ss:$16 sps:$4 sm:$0xff]   ;;  %v3443_v14 = vld [vmem:[%s4351_s9 + $0x24c] ss:$16 sps:$4 sm:$0xff]   ;;  %v3438_v15 = vld [vmem:[%s4351_s9 + $0x240] ss:$16 sps:$4 sm:$0xff]  }
  0xb5   : > { %v3441_v16 = vld [vmem:[%s4351_s9 + $0x248] ss:$16 sps:$4 sm:$0xff]   ;;  %v3449_v17 = vld [vmem:[%s4351_s9 + $0x26c] ss:$16 sps:$4 sm:$0xff]   ;;  %v3444_v18 = vld [vmem:[%s4351_s9 + $0x260] ss:$16 sps:$4 sm:$0xff]  }
  0xb6   : > { %v3447_v19 = vld [vmem:[%s4351_s9 + $0x268] ss:$16 sps:$4 sm:$0xff]   ;;  %v3452_v20 = vld [vmem:[%s4351_s9 + $0x284] ss:$16 sps:$4 sm:$0xff]   ;;  %v3455_v21 = vld [vmem:[%s4351_s9 + $0x28c] ss:$16 sps:$4 sm:$0xff]  }
  0xb7   : > { %2405 = vmatpush1.bf16.msra.mxu0 %v3370_v30  ;;  %2577 = vmatpush1.bf16.msra.mxu1 %v3371_v31  ;;  %v3450_v22 = vld [vmem:[%s4351_s9 + $0x280] ss:$16 sps:$4 sm:$0xff]   ;;  %v3453_v23 = vld [vmem:[%s4351_s9 + $0x288] ss:$16 sps:$4 sm:$0xff]   ;;  %v3458_v24 = vld [vmem:[%s4351_s9 + $0x2a4] ss:$16 sps:$4 sm:$0xff]  }
  0xb8   : > { %2406 = vmatprep.subr.bf16.mxu0 %v3372_v32  ;;  %2578 = vmatprep.subr.bf16.mxu1 %v3374_v33  ;;  %v3461_v25 = vld [vmem:[%s4351_s9 + $0x2ac] ss:$16 sps:$4 sm:$0xff]   ;;  %v3456_v26 = vld [vmem:[%s4351_s9 + $0x2a0] ss:$16 sps:$4 sm:$0xff]   ;;  %v3459_v27 = vld [vmem:[%s4351_s9 + $0x2a8] ss:$16 sps:$4 sm:$0xff]  }
  0xb9   : > { %v3464_v28 = vld [vmem:[%s4351_s9 + $0x2c4] ss:$16 sps:$4 sm:$0xff]   ;;  %v3467_v29 = vld [vmem:[%s4351_s9 + $0x2cc] ss:$16 sps:$4 sm:$0xff]   ;;  %v3462_v33 = vld [vmem:[%s4351_s9 + $0x2c0] ss:$16 sps:$4 sm:$0xff]  }
  0xba   : > { %v4448_v30 = vld [vmem:[%s4680_s0 + $0x8] sm:$0xff]  ;;  %s4692_s4 = smov (!%p781_p11, %s2993_s4), 71 }
  0xbb   : > { %2407 = vmatpush1.bf16.msra.mxu0 %v3376_v34  ;;  %2579 = vmatpush1.bf16.msra.mxu1 %v3377_v35  ;;  %v4453_v31 = vld [vmem:[%s4680_s0 + $0x28] sm:$0xff]  ;;  %v3470_v35 = vld [vmem:[%s4351_s9 + $0x2e4] ss:$16 sps:$4 sm:$0xff]   ;;  %s2994_s5 = sshll.u32 %s4692_s4, 3 }
  0xbc   : > { %2408 = vmatprep.subr.bf16.mxu0 %v3378_v36  ;;  %2580 = vmatprep.subr.bf16.mxu1 %v3380_v37  ;;  %v2998_v32 = vcombine.high %v4448_v30, %v4453_v31  ;;  %v3465_v34 = vld [vmem:[%s4351_s9 + $0x2c8] ss:$16 sps:$4 sm:$0xff]   ;;  %v3473_v36 = vld [vmem:[%s4351_s9 + $0x2ec] ss:$16 sps:$4 sm:$0xff]   ;;  %v3468_v37 = vld [vmem:[%s4351_s9 + $0x2e0] ss:$16 sps:$4 sm:$0xff]   ;;  %s784_s8 = scalar_lea.vmem %s4682_s2, %s2994_s5 }
  0xbf   : > { %2409 = vmatpush1.bf16.msra.mxu0 %v3382_v38  ;;  %2581 = vmatpush1.bf16.msra.mxu1 %v3383_v39  ;;  %v3471_v38 = vld [vmem:[%s4351_s9 + $0x2e8] ss:$16 sps:$4 sm:$0xff]   ;;  %v3476_v39 = vld [vmem:[%s4351_s9 + $0x304] ss:$16 sps:$4 sm:$0xff]  }
  0xc0   : > { %2410 = vmatprep.subr.bf16.mxu0 %v3384_v40  ;;  %2582 = vmatprep.subr.bf16.mxu1 %v3386_v41  ;;  %v3479_v40 = vld [vmem:[%s4351_s9 + $0x30c] ss:$16 sps:$4 sm:$0xff]   ;;  %v3474_v41 = vld [vmem:[%s4351_s9 + $0x300] ss:$16 sps:$4 sm:$0xff]  }
  0xc3   : > { %2411 = vmatpush1.bf16.msra.mxu0 %v3388_v42  ;;  %2583 = vmatpush1.bf16.msra.mxu1 %v3389_v43  ;;  %v3477_v42 = vld [vmem:[%s4351_s9 + $0x308] ss:$16 sps:$4 sm:$0xff]   ;;  %v3482_v43 = vld [vmem:[%s4351_s9 + $0x324] ss:$16 sps:$4 sm:$0xff]  }
  0xc4   : > { %2412 = vmatprep.subr.bf16.mxu0 %v3390_v44  ;;  %2584 = vmatprep.subr.bf16.mxu1 %v3392_v45  ;;  %v3485_v44 = vld [vmem:[%s4351_s9 + $0x32c] ss:$16 sps:$4 sm:$0xff]   ;;  %v3480_v45 = vld [vmem:[%s4351_s9 + $0x320] ss:$16 sps:$4 sm:$0xff]  }
  0xc7   : > { %2413 = vmatpush1.bf16.msra.mxu0 %v3394_v46  ;;  %2585 = vmatpush1.bf16.msra.mxu1 %v3395_v47  ;;  %v3483_v46 = vld [vmem:[%s4351_s9 + $0x328] ss:$16 sps:$4 sm:$0xff]   ;;  %v3488_v47 = vld [vmem:[%s4351_s9 + $0x344] ss:$16 sps:$4 sm:$0xff]  }
  0xc8   : > { %2414 = vmatprep.subr.bf16.mxu0 %v3396_v48  ;;  %2586 = vmatprep.subr.bf16.mxu1 %v3398_v49  ;;  %v3491_v48 = vld [vmem:[%s4351_s9 + $0x34c] ss:$16 sps:$4 sm:$0xff]   ;;  %v3486_v49 = vld [vmem:[%s4351_s9 + $0x340] ss:$16 sps:$4 sm:$0xff]  }
  0xcb   : > { %2415 = vmatpush1.bf16.msra.mxu0 %v3400_v50  ;;  %2587 = vmatpush1.bf16.msra.mxu1 %v3401_v51  ;;  %v3489_v50 = vld [vmem:[%s4351_s9 + $0x348] ss:$16 sps:$4 sm:$0xff]   ;;  %v3494_v51 = vld [vmem:[%s4351_s9 + $0x364] ss:$16 sps:$4 sm:$0xff]  }
  0xcc   : > { %2416 = vmatprep.subr.bf16.mxu0 %v3402_v52  ;;  %2588 = vmatprep.subr.bf16.mxu1 %v3404_v53  ;;  %v3497_v52 = vld [vmem:[%s4351_s9 + $0x36c] ss:$16 sps:$4 sm:$0xff]   ;;  %v3492_v53 = vld [vmem:[%s4351_s9 + $0x360] ss:$16 sps:$4 sm:$0xff]  }
  0xcf   : > { %2417 = vmatpush1.bf16.msra.mxu0 %v3406_v54  ;;  %2589 = vmatpush1.bf16.msra.mxu1 %v3407_v55  ;;  %v3495_v54 = vld [vmem:[%s4351_s9 + $0x368] ss:$16 sps:$4 sm:$0xff]   ;;  %v3500_v55 = vld [vmem:[%s4351_s9 + $0x384] ss:$16 sps:$4 sm:$0xff]  }
  0xd0   : > { %2418 = vmatprep.subr.bf16.mxu0 %v3408_v56  ;;  %2590 = vmatprep.subr.bf16.mxu1 %v3410_v57  ;;  %v3503_v56 = vld [vmem:[%s4351_s9 + $0x38c] ss:$16 sps:$4 sm:$0xff]   ;;  %v3498_v57 = vld [vmem:[%s4351_s9 + $0x380] ss:$16 sps:$4 sm:$0xff]  }
  0xd3   : > { %2419 = vmatpush1.bf16.msra.mxu0 %v3412_v58  ;;  %2591 = vmatpush1.bf16.msra.mxu1 %v3413_v59  ;;  %v3501_v58 = vld [vmem:[%s4351_s9 + $0x388] ss:$16 sps:$4 sm:$0xff]   ;;  %v3506_v59 = vld [vmem:[%s4351_s9 + $0x3a4] ss:$16 sps:$4 sm:$0xff]  }
  0xd4   : > { %2420 = vmatprep.subr.bf16.mxu0 %v3414_v60  ;;  %2592 = vmatprep.subr.bf16.mxu1 %v3416_v61  ;;  %v3509_v60 = vld [vmem:[%s4351_s9 + $0x3ac] ss:$16 sps:$4 sm:$0xff]   ;;  %v3504_v61 = vld [vmem:[%s4351_s9 + $0x3a0] ss:$16 sps:$4 sm:$0xff]  }
  0xd7   : > { %2421 = vmatpush1.bf16.msra.mxu0 %v3418_v62  ;;  %2593 = vmatpush1.bf16.msra.mxu1 %v3419_v63  ;;  %v3507_v62 = vld [vmem:[%s4351_s9 + $0x3a8] ss:$16 sps:$4 sm:$0xff]   ;;  %v3512_v63 = vld [vmem:[%s4351_s9 + $0x3c4] ss:$16 sps:$4 sm:$0xff]  }
  0xd8   : > { %2422 = vmatprep.subr.bf16.mxu0 %v3420_v0  ;;  %2594 = vmatprep.subr.bf16.mxu1 %v3422_v1  ;;  %v3515_v0 = vld [vmem:[%s4351_s9 + $0x3cc] ss:$16 sps:$4 sm:$0xff]   ;;  %v3510_v1 = vld [vmem:[%s4351_s9 + $0x3c0] ss:$16 sps:$4 sm:$0xff]  }
  0xdb   : > { %2423 = vmatpush1.bf16.msra.mxu0 %v3424_v3  ;;  %2595 = vmatpush1.bf16.msra.mxu1 %v3425_v4  ;;  %v3513_v3 = vld [vmem:[%s4351_s9 + $0x3c8] ss:$16 sps:$4 sm:$0xff]   ;;  %v3518_v4 = vld [vmem:[%s4351_s9 + $0x3e4] ss:$16 sps:$4 sm:$0xff]  }
  0xdc   : > { %2435 = vmatprep.subr.bf16.mxu0 %v3428_v5  ;;  %2607 = vmatprep.subr.bf16.mxu1 %v3431_v6  ;;  %v3521_v5 = vld [vmem:[%s4351_s9 + $0x3ec] ss:$16 sps:$4 sm:$0xff]   ;;  %v3516_v6 = vld [vmem:[%s4351_s9 + $0x3e0] ss:$16 sps:$4 sm:$0xff]  }
  0xde   : > { %2425 = vmatmul.mubr.bf16.vlgmr.msra.gmra.mrb[0].mxu0 %v4349_v2  ;;  %2597 = vmatmul.mubr.bf16.vlgmr.msra.gmra.mrb[0].mxu1 %v4349_v2  ;;  %v3446_v2 = vld [vmem:[%s4351_s9 + $0x264] ss:$16 sps:$4 sm:$0xff]  }
  0xdf   : > { %2436 = vmatpush1.bf16.msra.mxu0 %v3426_v7  ;;  %2608 = vmatpush1.bf16.msra.mxu1 %v3429_v8  ;;  %v3519_v7 = vld [vmem:[%s4351_s9 + $0x3e8] ss:$16 sps:$4 sm:$0xff]   ;;  %v3524_v8 = vld [vmem:[%s4351_s9 + $0x404] ss:$16 sps:$4 sm:$0xff]  }
  0xe0   : > { %2437 = vmatprep.subr.bf16.mxu0 %v3434_v9  ;;  %2609 = vmatprep.subr.bf16.mxu1 %v3437_v10  ;;  %v3527_v9 = vld [vmem:[%s4351_s9 + $0x40c] ss:$16 sps:$4 sm:$0xff]   ;;  %v3522_v10 = vld [vmem:[%s4351_s9 + $0x400] ss:$16 sps:$4 sm:$0xff]  }
  0xe1   : > { %2467 = vmatprep.mubr.bf16.mxu0 %v2998_v32  ;;  %2639 = vmatprep.mubr.bf16.mxu1 %v2998_v32  ;;  %v3557_v32 = vld [vmem:[%s4351_s9 + $0x4ac] ss:$16 sps:$4 sm:$0xff]  }
  0xe3   : > { %2438 = vmatpush1.bf16.msra.mxu0 %v3432_v11  ;;  %2610 = vmatpush1.bf16.msra.mxu1 %v3435_v12  ;;  %v2997_v11 = vcombine.low %v4448_v30, %v4453_v31  ;;  %v3525_v12 = vld [vmem:[%s4351_s9 + $0x408] ss:$16 sps:$4 sm:$0xff]   ;;  %v3554_v31 = vld [vmem:[%s4351_s9 + $0x4a4] ss:$16 sps:$4 sm:$0xff]  }
  0xe4   : > { %2439 = vmatprep.subr.bf16.mxu0 %v3440_v13  ;;  %2611 = vmatprep.subr.bf16.mxu1 %v3443_v14  ;;  %v3530_v13 = vld [vmem:[%s4351_s9 + $0x424] ss:$16 sps:$4 sm:$0xff]   ;;  %v3533_v14 = vld [vmem:[%s4351_s9 + $0x42c] ss:$16 sps:$4 sm:$0xff]   ;;  %v3549_v30 = vld [vmem:[%s4351_s9 + $0x488] ss:$16 sps:$4 sm:$0xff]  }
  0xe7   : > { %2440 = vmatpush1.bf16.msra.mxu0 %v3438_v15  ;;  %2612 = vmatpush1.bf16.msra.mxu1 %v3441_v16  ;;  %v4506_v15 = vld [vmem:[%s4680_s0 + $0x10] sm:$0xff] }
  0xe8   : > { %2441 = vmatprep.subr.bf16.mxu0 %v3446_v2  ;;  %2613 = vmatprep.subr.bf16.mxu1 %v3449_v17  ;;  %v4511_v16 = vld [vmem:[%s4680_s0 + $0x30] sm:$0xff] }
  0xe9   : > { %v3000_v2 = vcombine.high %v4506_v15, %v4511_v16  ;;  %v3528_v17 = vld [vmem:[%s4351_s9 + $0x420] ss:$16 sps:$4 sm:$0xff]  }
  0xeb   : > { %2442 = vmatpush1.bf16.msra.mxu0 %v3444_v18  ;;  %2614 = vmatpush1.bf16.msra.mxu1 %v3447_v19  ;;  %v3531_v18 = vld [vmem:[%s4351_s9 + $0x428] ss:$16 sps:$4 sm:$0xff]   ;;  %v3536_v19 = vld [vmem:[%s4351_s9 + $0x444] ss:$16 sps:$4 sm:$0xff]  }
  0xec   : > { %2443 = vmatprep.subr.bf16.mxu0 %v3452_v20  ;;  %2615 = vmatprep.subr.bf16.mxu1 %v3455_v21  ;;  %v3539_v20 = vld [vmem:[%s4351_s9 + $0x44c] ss:$16 sps:$4 sm:$0xff]   ;;  %v3534_v21 = vld [vmem:[%s4351_s9 + $0x440] ss:$16 sps:$4 sm:$0xff]  }
  0xef   : > { %2444 = vmatpush1.bf16.msra.mxu0 %v3450_v22  ;;  %2616 = vmatpush1.bf16.msra.mxu1 %v3453_v23  ;;  %v3537_v22 = vld [vmem:[%s4351_s9 + $0x448] ss:$16 sps:$4 sm:$0xff]   ;;  %v3542_v23 = vld [vmem:[%s4351_s9 + $0x464] ss:$16 sps:$4 sm:$0xff]  }
  0xf0   : > { %2445 = vmatprep.subr.bf16.mxu0 %v3458_v24  ;;  %2617 = vmatprep.subr.bf16.mxu1 %v3461_v25  ;;  %v3545_v24 = vld [vmem:[%s4351_s9 + $0x46c] ss:$16 sps:$4 sm:$0xff]   ;;  %v3540_v25 = vld [vmem:[%s4351_s9 + $0x460] ss:$16 sps:$4 sm:$0xff]  }
  0xf3   : > { %2446 = vmatpush1.bf16.msra.mxu0 %v3456_v26  ;;  %2618 = vmatpush1.bf16.msra.mxu1 %v3459_v27  ;;  %v3543_v26 = vld [vmem:[%s4351_s9 + $0x468] ss:$16 sps:$4 sm:$0xff]   ;;  %v3548_v27 = vld [vmem:[%s4351_s9 + $0x484] ss:$16 sps:$4 sm:$0xff]  }
  0xf4   : > { %2447 = vmatprep.subr.bf16.mxu0 %v3464_v28  ;;  %2619 = vmatprep.subr.bf16.mxu1 %v3467_v29  ;;  %v3551_v28 = vld [vmem:[%s4351_s9 + $0x48c] ss:$16 sps:$4 sm:$0xff]   ;;  %v3546_v29 = vld [vmem:[%s4351_s9 + $0x480] ss:$16 sps:$4 sm:$0xff]  }
  0xf7   : > { %2448 = vmatpush1.bf16.msra.mxu0 %v3462_v33  ;;  %2620 = vmatpush1.bf16.msra.mxu1 %v3465_v34  ;;  %v3552_v33 = vld [vmem:[%s4351_s9 + $0x4a0] ss:$16 sps:$4 sm:$0xff]   ;;  %v3555_v34 = vld [vmem:[%s4351_s9 + $0x4a8] ss:$16 sps:$4 sm:$0xff]  }
  0xf8   : > { %2449 = vmatprep.subr.bf16.mxu0 %v3470_v35  ;;  %2621 = vmatprep.subr.bf16.mxu1 %v3473_v36  ;;  %v3560_v35 = vld [vmem:[%s4351_s9 + $0x4c4] ss:$16 sps:$4 sm:$0xff]   ;;  %v3563_v36 = vld [vmem:[%s4351_s9 + $0x4cc] ss:$16 sps:$4 sm:$0xff]  }
  0xfb   : > { %2450 = vmatpush1.bf16.msra.mxu0 %v3468_v37  ;;  %2622 = vmatpush1.bf16.msra.mxu1 %v3471_v38  ;;  %v3558_v37 = vld [vmem:[%s4351_s9 + $0x4c0] ss:$16 sps:$4 sm:$0xff]   ;;  %v3561_v38 = vld [vmem:[%s4351_s9 + $0x4c8] ss:$16 sps:$4 sm:$0xff]  }
  0xfc   : > { %2451 = vmatprep.subr.bf16.mxu0 %v3476_v39  ;;  %2623 = vmatprep.subr.bf16.mxu1 %v3479_v40  ;;  %v3566_v39 = vld [vmem:[%s4351_s9 + $0x4e4] ss:$16 sps:$4 sm:$0xff]   ;;  %v3569_v40 = vld [vmem:[%s4351_s9 + $0x4ec] ss:$16 sps:$4 sm:$0xff]  }
  0xff   : > { %2452 = vmatpush1.bf16.msra.mxu0 %v3474_v41  ;;  %2624 = vmatpush1.bf16.msra.mxu1 %v3477_v42  ;;  %v3564_v41 = vld [vmem:[%s4351_s9 + $0x4e0] ss:$16 sps:$4 sm:$0xff]   ;;  %v3567_v42 = vld [vmem:[%s4351_s9 + $0x4e8] ss:$16 sps:$4 sm:$0xff]  }
 0x100   : > { %2453 = vmatprep.subr.bf16.mxu0 %v3482_v43  ;;  %2625 = vmatprep.subr.bf16.mxu1 %v3485_v44  ;;  %v3572_v43 = vld [vmem:[%s4351_s9 + $0x504] ss:$16 sps:$4 sm:$0xff]   ;;  %v3575_v44 = vld [vmem:[%s4351_s9 + $0x50c] ss:$16 sps:$4 sm:$0xff]  }
 0x103   : > { %2454 = vmatpush1.bf16.msra.mxu0 %v3480_v45  ;;  %2626 = vmatpush1.bf16.msra.mxu1 %v3483_v46  ;;  %v3570_v45 = vld [vmem:[%s4351_s9 + $0x500] ss:$16 sps:$4 sm:$0xff]   ;;  %v3573_v46 = vld [vmem:[%s4351_s9 + $0x508] ss:$16 sps:$4 sm:$0xff]  }
 0x104   : > { %2455 = vmatprep.subr.bf16.mxu0 %v3488_v47  ;;  %2627 = vmatprep.subr.bf16.mxu1 %v3491_v48  ;;  %v3578_v47 = vld [vmem:[%s4351_s9 + $0x524] ss:$16 sps:$4 sm:$0xff]   ;;  %v3581_v48 = vld [vmem:[%s4351_s9 + $0x52c] ss:$16 sps:$4 sm:$0xff]  }
 0x107   : > { %2456 = vmatpush1.bf16.msra.mxu0 %v3486_v49  ;;  %2628 = vmatpush1.bf16.msra.mxu1 %v3489_v50  ;;  %v3576_v49 = vld [vmem:[%s4351_s9 + $0x520] ss:$16 sps:$4 sm:$0xff]   ;;  %v3579_v50 = vld [vmem:[%s4351_s9 + $0x528] ss:$16 sps:$4 sm:$0xff]  }
 0x108   : > { %2457 = vmatprep.subr.bf16.mxu0 %v3494_v51  ;;  %2629 = vmatprep.subr.bf16.mxu1 %v3497_v52  ;;  %v3584_v51 = vld [vmem:[%s4351_s9 + $0x544] ss:$16 sps:$4 sm:$0xff]   ;;  %v3587_v52 = vld [vmem:[%s4351_s9 + $0x54c] ss:$16 sps:$4 sm:$0xff]  }
 0x10b   : > { %2458 = vmatpush1.bf16.msra.mxu0 %v3492_v53  ;;  %2630 = vmatpush1.bf16.msra.mxu1 %v3495_v54  ;;  %v3582_v53 = vld [vmem:[%s4351_s9 + $0x540] ss:$16 sps:$4 sm:$0xff]   ;;  %v3585_v54 = vld [vmem:[%s4351_s9 + $0x548] ss:$16 sps:$4 sm:$0xff]  }
 0x10c   : > { %2459 = vmatprep.subr.bf16.mxu0 %v3500_v55  ;;  %2631 = vmatprep.subr.bf16.mxu1 %v3503_v56  ;;  %v3590_v55 = vld [vmem:[%s4351_s9 + $0x564] ss:$16 sps:$4 sm:$0xff]   ;;  %v3593_v56 = vld [vmem:[%s4351_s9 + $0x56c] ss:$16 sps:$4 sm:$0xff]  }
 0x10f   : > { %2460 = vmatpush1.bf16.msra.mxu0 %v3498_v57  ;;  %2632 = vmatpush1.bf16.msra.mxu1 %v3501_v58  ;;  %v3588_v57 = vld [vmem:[%s4351_s9 + $0x560] ss:$16 sps:$4 sm:$0xff]   ;;  %v3591_v58 = vld [vmem:[%s4351_s9 + $0x568] ss:$16 sps:$4 sm:$0xff]  }
 0x110   : > { %2461 = vmatprep.subr.bf16.mxu0 %v3506_v59  ;;  %2633 = vmatprep.subr.bf16.mxu1 %v3509_v60  ;;  %v3596_v59 = vld [vmem:[%s4351_s9 + $0x584] ss:$16 sps:$4 sm:$0xff]   ;;  %v3599_v60 = vld [vmem:[%s4351_s9 + $0x58c] ss:$16 sps:$4 sm:$0xff]  }
 0x113   : > { %2462 = vmatpush1.bf16.msra.mxu0 %v3504_v61  ;;  %2634 = vmatpush1.bf16.msra.mxu1 %v3507_v62  ;;  %v3594_v61 = vld [vmem:[%s4351_s9 + $0x580] ss:$16 sps:$4 sm:$0xff]   ;;  %v3597_v62 = vld [vmem:[%s4351_s9 + $0x588] ss:$16 sps:$4 sm:$0xff]  }
 0x114   : > { %2463 = vmatprep.subr.bf16.mxu0 %v3512_v63  ;;  %2635 = vmatprep.subr.bf16.mxu1 %v3515_v0  ;;  %v3602_v63 = vld [vmem:[%s4351_s9 + $0x5a4] ss:$16 sps:$4 sm:$0xff]   ;;  %v3605_v0 = vld [vmem:[%s4351_s9 + $0x5ac] ss:$16 sps:$4 sm:$0xff]  }
 0x117   : > { %2464 = vmatpush1.bf16.msra.mxu0 %v3510_v1  ;;  %2636 = vmatpush1.bf16.msra.mxu1 %v3513_v3  ;;  %v3600_v1 = vld [vmem:[%s4351_s9 + $0x5a0] ss:$16 sps:$4 sm:$0xff]   ;;  %v3603_v3 = vld [vmem:[%s4351_s9 + $0x5a8] ss:$16 sps:$4 sm:$0xff]  }
 0x118   : > { %2465 = vmatprep.subr.bf16.mxu0 %v3518_v4  ;;  %2637 = vmatprep.subr.bf16.mxu1 %v3521_v5  ;;  %v3608_v4 = vld [vmem:[%s4351_s9 + $0x5c4] ss:$16 sps:$4 sm:$0xff]   ;;  %v3611_v5 = vld [vmem:[%s4351_s9 + $0x5cc] ss:$16 sps:$4 sm:$0xff]  }
 0x11b   : > { %2466 = vmatpush1.bf16.msra.mxu0 %v3516_v6  ;;  %2638 = vmatpush1.bf16.msra.mxu1 %v3519_v7  ;;  %v3606_v6 = vld [vmem:[%s4351_s9 + $0x5c0] ss:$16 sps:$4 sm:$0xff]   ;;  %v3609_v7 = vld [vmem:[%s4351_s9 + $0x5c8] ss:$16 sps:$4 sm:$0xff]  }
 0x11c   : > { %2478 = vmatprep.subr.bf16.mxu0 %v3524_v8  ;;  %2650 = vmatprep.subr.bf16.mxu1 %v3527_v9  ;;  %v3614_v8 = vld [vmem:[%s4351_s9 + $0x5e4] ss:$16 sps:$4 sm:$0xff]   ;;  %v3617_v9 = vld [vmem:[%s4351_s9 + $0x5ec] ss:$16 sps:$4 sm:$0xff]  }
 0x11e   : > { %2468 = vmatmul.mubr.bf16.vlgmr.msra.gmra.mrb[0].mxu0 %v2997_v11  ;;  %2640 = vmatmul.mubr.bf16.vlgmr.msra.gmra.mrb[0].mxu1 %v2997_v11  ;;  %v3615_v11 = vld [vmem:[%s4351_s9 + $0x5e8] ss:$16 sps:$4 sm:$0xff]  }
 0x11f   : > { %2479 = vmatpush1.bf16.msra.mxu0 %v3522_v10  ;;  %2651 = vmatpush1.bf16.msra.mxu1 %v3525_v12  ;;  %v3612_v10 = vld [vmem:[%s4351_s9 + $0x5e0] ss:$16 sps:$4 sm:$0xff]   ;;  %v3620_v12 = vld [vmem:[%s4351_s9 + $0x604] ss:$16 sps:$4 sm:$0xff]  }
 0x120   : > { %2480 = vmatprep.subr.bf16.mxu0 %v3530_v13  ;;  %2652 = vmatprep.subr.bf16.mxu1 %v3533_v14  ;;  %v3623_v13 = vld [vmem:[%s4351_s9 + $0x60c] ss:$16 sps:$4 sm:$0xff]   ;;  %v2999_v14 = vcombine.low %v4506_v15, %v4511_v16  ;;  %v3626_v15 = vld [vmem:[%s4351_s9 + $0x624] ss:$16 sps:$4 sm:$0xff]  }
 0x121   : > { %2510 = vmatprep.mubr.bf16.mxu0 %v3000_v2  ;;  %2682 = vmatprep.mubr.bf16.mxu1 %v3000_v2  ;;  %v4580_v2 = vld [vmem:[%s4680_s0 + $0x18] sm:$0xff] }
 0x122   : > { %v3629_v16 = vld [vmem:[%s4351_s9 + $0x62c] ss:$16 sps:$4 sm:$0xff]  }
 0x123   : > { %2481 = vmatpush1.bf16.msra.mxu0 %v3528_v17  ;;  %2653 = vmatpush1.bf16.msra.mxu1 %v3531_v18  ;;  %v4585_v17 = vld [vmem:[%s4680_s0 + $0x38] sm:$0xff]  ;;  %v3618_v18 = vld [vmem:[%s4351_s9 + $0x600] ss:$16 sps:$4 sm:$0xff]  }
 0x124   : > { %2482 = vmatprep.subr.bf16.mxu0 %v3536_v19  ;;  %2654 = vmatprep.subr.bf16.mxu1 %v3539_v20  ;;  %v3621_v19 = vld [vmem:[%s4351_s9 + $0x608] ss:$16 sps:$4 sm:$0xff]   ;;  %v3002_v20 = vcombine.high %v4580_v2, %v4585_v17 }
 0x127   : > { %2483 = vmatpush1.bf16.msra.mxu0 %v3534_v21  ;;  %2655 = vmatpush1.bf16.msra.mxu1 %v3537_v22  ;;  %v3624_v21 = vld [vmem:[%s4351_s9 + $0x620] ss:$16 sps:$4 sm:$0xff]   ;;  %v3627_v22 = vld [vmem:[%s4351_s9 + $0x628] ss:$16 sps:$4 sm:$0xff]  }
 0x128   : > { %2484 = vmatprep.subr.bf16.mxu0 %v3542_v23  ;;  %2656 = vmatprep.subr.bf16.mxu1 %v3545_v24  ;;  %v3632_v23 = vld [vmem:[%s4351_s9 + $0x644] ss:$16 sps:$4 sm:$0xff]   ;;  %v3635_v24 = vld [vmem:[%s4351_s9 + $0x64c] ss:$16 sps:$4 sm:$0xff]  }
 0x12b   : > { %2485 = vmatpush1.bf16.msra.mxu0 %v3540_v25  ;;  %2657 = vmatpush1.bf16.msra.mxu1 %v3543_v26  ;;  %v3630_v25 = vld [vmem:[%s4351_s9 + $0x640] ss:$16 sps:$4 sm:$0xff]   ;;  %v3633_v26 = vld [vmem:[%s4351_s9 + $0x648] ss:$16 sps:$4 sm:$0xff]  }
 0x12c   : > { %2486 = vmatprep.subr.bf16.mxu0 %v3548_v27  ;;  %2658 = vmatprep.subr.bf16.mxu1 %v3551_v28  ;;  %v3638_v27 = vld [vmem:[%s4351_s9 + $0x664] ss:$16 sps:$4 sm:$0xff]   ;;  %v3641_v28 = vld [vmem:[%s4351_s9 + $0x66c] ss:$16 sps:$4 sm:$0xff]  }
 0x12f   : > { %2487 = vmatpush1.bf16.msra.mxu0 %v3546_v29  ;;  %2659 = vmatpush1.bf16.msra.mxu1 %v3549_v30  ;;  %v3636_v29 = vld [vmem:[%s4351_s9 + $0x660] ss:$16 sps:$4 sm:$0xff]   ;;  %v3639_v30 = vld [vmem:[%s4351_s9 + $0x668] ss:$16 sps:$4 sm:$0xff]  }
 0x130   : > { %2488 = vmatprep.subr.bf16.mxu0 %v3554_v31  ;;  %2660 = vmatprep.subr.bf16.mxu1 %v3557_v32  ;;  %v3644_v31 = vld [vmem:[%s4351_s9 + $0x684] ss:$16 sps:$4 sm:$0xff]   ;;  %v3647_v32 = vld [vmem:[%s4351_s9 + $0x68c] ss:$16 sps:$4 sm:$0xff]  }
 0x133   : > { %2489 = vmatpush1.bf16.msra.mxu0 %v3552_v33  ;;  %2661 = vmatpush1.bf16.msra.mxu1 %v3555_v34  ;;  %v3642_v33 = vld [vmem:[%s4351_s9 + $0x680] ss:$16 sps:$4 sm:$0xff]   ;;  %v3645_v34 = vld [vmem:[%s4351_s9 + $0x688] ss:$16 sps:$4 sm:$0xff]  }
 0x134   : > { %2490 = vmatprep.subr.bf16.mxu0 %v3560_v35  ;;  %2662 = vmatprep.subr.bf16.mxu1 %v3563_v36  ;;  %v3650_v35 = vld [vmem:[%s4351_s9 + $0x6a4] ss:$16 sps:$4 sm:$0xff]   ;;  %v3653_v36 = vld [vmem:[%s4351_s9 + $0x6ac] ss:$16 sps:$4 sm:$0xff]  }
 0x137   : > { %2491 = vmatpush1.bf16.msra.mxu0 %v3558_v37  ;;  %2663 = vmatpush1.bf16.msra.mxu1 %v3561_v38  ;;  %v3648_v37 = vld [vmem:[%s4351_s9 + $0x6a0] ss:$16 sps:$4 sm:$0xff]   ;;  %v3651_v38 = vld [vmem:[%s4351_s9 + $0x6a8] ss:$16 sps:$4 sm:$0xff]  }
 0x138   : > { %2492 = vmatprep.subr.bf16.mxu0 %v3566_v39  ;;  %2664 = vmatprep.subr.bf16.mxu1 %v3569_v40  ;;  %v3656_v39 = vld [vmem:[%s4351_s9 + $0x6c4] ss:$16 sps:$4 sm:$0xff]   ;;  %v3659_v40 = vld [vmem:[%s4351_s9 + $0x6cc] ss:$16 sps:$4 sm:$0xff]  }
 0x13b   : > { %2493 = vmatpush1.bf16.msra.mxu0 %v3564_v41  ;;  %2665 = vmatpush1.bf16.msra.mxu1 %v3567_v42  ;;  %v3654_v41 = vld [vmem:[%s4351_s9 + $0x6c0] ss:$16 sps:$4 sm:$0xff]   ;;  %v3657_v42 = vld [vmem:[%s4351_s9 + $0x6c8] ss:$16 sps:$4 sm:$0xff]  }
 0x13c   : > { %2494 = vmatprep.subr.bf16.mxu0 %v3572_v43  ;;  %2666 = vmatprep.subr.bf16.mxu1 %v3575_v44  ;;  %v3662_v43 = vld [vmem:[%s4351_s9 + $0x6e4] ss:$16 sps:$4 sm:$0xff]   ;;  %v3665_v44 = vld [vmem:[%s4351_s9 + $0x6ec] ss:$16 sps:$4 sm:$0xff]  }
 0x13f   : > { %2495 = vmatpush1.bf16.msra.mxu0 %v3570_v45  ;;  %2667 = vmatpush1.bf16.msra.mxu1 %v3573_v46  ;;  %v3660_v45 = vld [vmem:[%s4351_s9 + $0x6e0] ss:$16 sps:$4 sm:$0xff]   ;;  %v3663_v46 = vld [vmem:[%s4351_s9 + $0x6e8] ss:$16 sps:$4 sm:$0xff]  }
 0x140   : > { %2496 = vmatprep.subr.bf16.mxu0 %v3578_v47  ;;  %2668 = vmatprep.subr.bf16.mxu1 %v3581_v48  ;;  %v3668_v47 = vld [vmem:[%s4351_s9 + $0x704] ss:$16 sps:$4 sm:$0xff]   ;;  %v3671_v48 = vld [vmem:[%s4351_s9 + $0x70c] ss:$16 sps:$4 sm:$0xff]  }
 0x143   : > { %2497 = vmatpush1.bf16.msra.mxu0 %v3576_v49  ;;  %2669 = vmatpush1.bf16.msra.mxu1 %v3579_v50  ;;  %v3666_v49 = vld [vmem:[%s4351_s9 + $0x700] ss:$16 sps:$4 sm:$0xff]   ;;  %v3669_v50 = vld [vmem:[%s4351_s9 + $0x708] ss:$16 sps:$4 sm:$0xff]  }
 0x144   : > { %2498 = vmatprep.subr.bf16.mxu0 %v3584_v51  ;;  %2670 = vmatprep.subr.bf16.mxu1 %v3587_v52  ;;  %v3674_v51 = vld [vmem:[%s4351_s9 + $0x724] ss:$16 sps:$4 sm:$0xff]   ;;  %v3677_v52 = vld [vmem:[%s4351_s9 + $0x72c] ss:$16 sps:$4 sm:$0xff]  }
 0x147   : > { %2499 = vmatpush1.bf16.msra.mxu0 %v3582_v53  ;;  %2671 = vmatpush1.bf16.msra.mxu1 %v3585_v54  ;;  %v3672_v53 = vld [vmem:[%s4351_s9 + $0x720] ss:$16 sps:$4 sm:$0xff]   ;;  %v3675_v54 = vld [vmem:[%s4351_s9 + $0x728] ss:$16 sps:$4 sm:$0xff]  }
 0x148   : > { %2500 = vmatprep.subr.bf16.mxu0 %v3590_v55  ;;  %2672 = vmatprep.subr.bf16.mxu1 %v3593_v56  ;;  %v3680_v55 = vld [vmem:[%s4351_s9 + $0x744] ss:$16 sps:$4 sm:$0xff]   ;;  %v3683_v56 = vld [vmem:[%s4351_s9 + $0x74c] ss:$16 sps:$4 sm:$0xff]  }
 0x14b   : > { %2501 = vmatpush1.bf16.msra.mxu0 %v3588_v57  ;;  %2673 = vmatpush1.bf16.msra.mxu1 %v3591_v58  ;;  %v3678_v57 = vld [vmem:[%s4351_s9 + $0x740] ss:$16 sps:$4 sm:$0xff]   ;;  %v3681_v58 = vld [vmem:[%s4351_s9 + $0x748] ss:$16 sps:$4 sm:$0xff]  }
 0x14c   : > { %2502 = vmatprep.subr.bf16.mxu0 %v3596_v59  ;;  %2674 = vmatprep.subr.bf16.mxu1 %v3599_v60  ;;  %v3686_v59 = vld [vmem:[%s4351_s9 + $0x764] ss:$16 sps:$4 sm:$0xff]   ;;  %v3689_v60 = vld [vmem:[%s4351_s9 + $0x76c] ss:$16 sps:$4 sm:$0xff]  }
 0x14f   : > { %2503 = vmatpush1.bf16.msra.mxu0 %v3594_v61  ;;  %2675 = vmatpush1.bf16.msra.mxu1 %v3597_v62  ;;  %v3684_v61 = vld [vmem:[%s4351_s9 + $0x760] ss:$16 sps:$4 sm:$0xff]   ;;  %v3687_v62 = vld [vmem:[%s4351_s9 + $0x768] ss:$16 sps:$4 sm:$0xff]  }
 0x150   : > { %2504 = vmatprep.subr.bf16.mxu0 %v3602_v63  ;;  %2676 = vmatprep.subr.bf16.mxu1 %v3605_v0  ;;  %v3692_v63 = vld [vmem:[%s4351_s9 + $0x784] ss:$16 sps:$4 sm:$0xff]   ;;  %v3695_v0 = vld [vmem:[%s4351_s9 + $0x78c] ss:$16 sps:$4 sm:$0xff]  }
 0x153   : > { %2505 = vmatpush1.bf16.msra.mxu0 %v3600_v1  ;;  %2677 = vmatpush1.bf16.msra.mxu1 %v3603_v3  ;;  %v3690_v1 = vld [vmem:[%s4351_s9 + $0x780] ss:$16 sps:$4 sm:$0xff]   ;;  %v3693_v3 = vld [vmem:[%s4351_s9 + $0x788] ss:$16 sps:$4 sm:$0xff]  }
 0x154   : > { %2506 = vmatprep.subr.bf16.mxu0 %v3608_v4  ;;  %2678 = vmatprep.subr.bf16.mxu1 %v3611_v5  ;;  %v3698_v4 = vld [vmem:[%s4351_s9 + $0x7a4] ss:$16 sps:$4 sm:$0xff]   ;;  %v3701_v5 = vld [vmem:[%s4351_s9 + $0x7ac] ss:$16 sps:$4 sm:$0xff]  }
 0x157   : > { %2507 = vmatpush1.bf16.msra.mxu0 %v3606_v6  ;;  %2679 = vmatpush1.bf16.msra.mxu1 %v3609_v7  ;;  %v3696_v6 = vld [vmem:[%s4351_s9 + $0x7a0] ss:$16 sps:$4 sm:$0xff]   ;;  %v3699_v7 = vld [vmem:[%s4351_s9 + $0x7a8] ss:$16 sps:$4 sm:$0xff]  }
 0x158   : > { %2508 = vmatprep.subr.bf16.mxu0 %v3614_v8  ;;  %2680 = vmatprep.subr.bf16.mxu1 %v3617_v9  ;;  %v3704_v8 = vld [vmem:[%s4351_s9 + $0x7c4] ss:$16 sps:$4 sm:$0xff]   ;;  %v3707_v9 = vld [vmem:[%s4351_s9 + $0x7cc] ss:$16 sps:$4 sm:$0xff]  }
 0x15b   : > { %2509 = vmatpush1.bf16.msra.mxu0 %v3612_v10  ;;  %2681 = vmatpush1.bf16.msra.mxu1 %v3615_v11  ;;  %v3702_v10 = vld [vmem:[%s4351_s9 + $0x7c0] ss:$16 sps:$4 sm:$0xff]   ;;  %v3705_v11 = vld [vmem:[%s4351_s9 + $0x7c8] ss:$16 sps:$4 sm:$0xff]  }
 0x15c   : > { %2521 = vmatprep.subr.bf16.mxu0 %v3620_v12  ;;  %2693 = vmatprep.subr.bf16.mxu1 %v3623_v13  ;;  %v3710_v12 = vld [vmem:[%s4351_s9 + $0x7e4] ss:$16 sps:$4 sm:$0xff]   ;;  %v3713_v13 = vld [vmem:[%s4351_s9 + $0x7ec] ss:$16 sps:$4 sm:$0xff]  }
 0x15e   : > { %2511 = vmatmul.mubr.bf16.vlgmr.msra.gmra.mrb[0].mxu0 %v2999_v14  ;;  %2683 = vmatmul.mubr.bf16.vlgmr.msra.gmra.mrb[0].mxu1 %v2999_v14  ;;  %v3708_v14 = vld [vmem:[%s4351_s9 + $0x7e0] ss:$16 sps:$4 sm:$0xff]  }
 0x15f   : > { %2522 = vmatpush1.bf16.msra.mxu0 %v3618_v18  ;;  %2694 = vmatpush1.bf16.msra.mxu1 %v3621_v19  ;;  %v3711_v18 = vld [vmem:[%s4351_s9 + $0x7e8] ss:$16 sps:$4 sm:$0xff]   ;;  %v3001_v19 = vcombine.low %v4580_v2, %v4585_v17  ;;  %s2992_s9 = sshll.u32 %s729_s30, 6  ;;  %s3265_s30 = sshll.u32 (%p3809_p6), %s3744_s14, 5 }
 0x160   : > { %2523 = vmatprep.subr.bf16.mxu0 %v3626_v15  ;;  %2695 = vmatprep.subr.bf16.mxu1 %v3629_v16  ;;  %v2767_v15 = vlaneseq  ;;  %v2756_v2 = vld [vmem:[%s784_s8 + $0x8] sm:$0xff]  ;;  %v2758_v17 = vld [vmem:[%s784_s8 + $0x18] sm:$0xff]  ;;  %s765_s12 = scalar_lea.vmem [#allocation4], %s2992_s9  ;;  %s2843_s18 = scalar_lea.vmem (%p3809_p6), %s4683_s3, %s3265_s30 }
 0x161   : > { %2553 = vmatprep.mubr.bf16.mxu0 %v3002_v20  ;;  %2725 = vmatprep.mubr.bf16.mxu1 %v3002_v20 }
 0x162   : > { %v2768_v16 = vshrl.u32 %v2767_v15, 7 }
 0x163   : > { %2524 = vmatpush1.bf16.msra.mxu0 %v3624_v21  ;;  %2696 = vmatpush1.bf16.msra.mxu1 %v3627_v22  ;;  %v2755_v21 = vld [vmem:[%s784_s8] sm:$0xff]  ;;  %v2757_v22 = vld [vmem:[%s784_s8 + $0x10] sm:$0xff] }
 0x164   : > { %2525 = vmatprep.subr.bf16.mxu0 %v3632_v23  ;;  %2697 = vmatprep.subr.bf16.mxu1 %v3635_v24  ;;  %v2769_v20 = vsub.s32 0, %v2768_v16  ;;  %v2793_v23 = vsub.s32 1, %v2768_v16 }
 0x166   : > { %v2770_v24 = vrot.slane %v2755_v21, %v2769_v20 }
 0x167   : > { %2526 = vmatpush1.bf16.msra.mxu0 %v3630_v25  ;;  %2698 = vmatpush1.bf16.msra.mxu1 %v3633_v26  ;;  %v2778_v25 = vrot.slane %v2757_v22, %v2769_v20  ;;  %v2774_v26 = vrot.slane %v2756_v2, %v2769_v20 }
 0x168   : > { %2527 = vmatprep.subr.bf16.mxu0 %v3638_v27  ;;  %2699 = vmatprep.subr.bf16.mxu1 %v3641_v28  ;;  %v2782_v27 = vrot.slane %v2758_v17, %v2769_v20  ;;  %v2794_v28 = vrot.slane %v2755_v21, %v2793_v23 }
 0x16b   : > { %2528 = vmatpush1.bf16.msra.mxu0 %v3636_v29  ;;  %2700 = vmatpush1.bf16.msra.mxu1 %v3639_v30  ;;  %v2802_v29 = vrot.slane %v2757_v22, %v2793_v23 }
 0x16c   : > { %2529 = vmatprep.subr.bf16.mxu0 %v3644_v31  ;;  %2701 = vmatprep.subr.bf16.mxu1 %v3647_v32  ;;  %v2798_v32 = vrot.slane %v2756_v2, %v2793_v23 }
 0x16f   : > { %2530 = vmatpush1.bf16.msra.mxu0 %v3642_v33  ;;  %2702 = vmatpush1.bf16.msra.mxu1 %v3645_v34  ;;  %v2806_v33 = vrot.slane %v2758_v17, %v2793_v23 }
 0x170   : > { %2531 = vmatprep.subr.bf16.mxu0 %v3650_v35  ;;  %2703 = vmatprep.subr.bf16.mxu1 %v3653_v36 }
 0x173   : > { %2532 = vmatpush1.bf16.msra.mxu0 %v3648_v37  ;;  %2704 = vmatpush1.bf16.msra.mxu1 %v3651_v38 }
 0x174   : > { %2533 = vmatprep.subr.bf16.mxu0 %v3656_v39  ;;  %2705 = vmatprep.subr.bf16.mxu1 %v3659_v40 }
 0x177   : > { %2534 = vmatpush1.bf16.msra.mxu0 %v3654_v41  ;;  %2706 = vmatpush1.bf16.msra.mxu1 %v3657_v42 }
 0x178   : > { %2535 = vmatprep.subr.bf16.mxu0 %v3662_v43  ;;  %2707 = vmatprep.subr.bf16.mxu1 %v3665_v44 }
 0x17b   : > { %2536 = vmatpush1.bf16.msra.mxu0 %v3660_v45  ;;  %2708 = vmatpush1.bf16.msra.mxu1 %v3663_v46 }
 0x17c   : > { %2537 = vmatprep.subr.bf16.mxu0 %v3668_v47  ;;  %2709 = vmatprep.subr.bf16.mxu1 %v3671_v48 }
 0x17f   : > { %2538 = vmatpush1.bf16.msra.mxu0 %v3666_v49  ;;  %2710 = vmatpush1.bf16.msra.mxu1 %v3669_v50 }
 0x180   : > { %2539 = vmatprep.subr.bf16.mxu0 %v3674_v51  ;;  %2711 = vmatprep.subr.bf16.mxu1 %v3677_v52 }
 0x183   : > { %2540 = vmatpush1.bf16.msra.mxu0 %v3672_v53  ;;  %2712 = vmatpush1.bf16.msra.mxu1 %v3675_v54 }
 0x184   : > { %2541 = vmatprep.subr.bf16.mxu0 %v3680_v55  ;;  %2713 = vmatprep.subr.bf16.mxu1 %v3683_v56 }
 0x187   : > { %2542 = vmatpush1.bf16.msra.mxu0 %v3678_v57  ;;  %2714 = vmatpush1.bf16.msra.mxu1 %v3681_v58 }
 0x188   : > { %2543 = vmatprep.subr.bf16.mxu0 %v3686_v59  ;;  %2715 = vmatprep.subr.bf16.mxu1 %v3689_v60 }
 0x18b   : > { %2544 = vmatpush1.bf16.msra.mxu0 %v3684_v61  ;;  %2716 = vmatpush1.bf16.msra.mxu1 %v3687_v62 }
 0x18c   : > { %2545 = vmatprep.subr.bf16.mxu0 %v3692_v63  ;;  %2717 = vmatprep.subr.bf16.mxu1 %v3695_v0 }
 0x18f   : > { %2546 = vmatpush1.bf16.msra.mxu0 %v3690_v1  ;;  %2718 = vmatpush1.bf16.msra.mxu1 %v3693_v3 }
 0x190   : > { %2547 = vmatprep.subr.bf16.mxu0 %v3698_v4  ;;  %2719 = vmatprep.subr.bf16.mxu1 %v3701_v5 }
 0x193   : > { %2548 = vmatpush1.bf16.msra.mxu0 %v3696_v6  ;;  %2720 = vmatpush1.bf16.msra.mxu1 %v3699_v7 }
 0x194   : > { %2549 = vmatprep.subr.bf16.mxu0 %v3704_v8  ;;  %2721 = vmatprep.subr.bf16.mxu1 %v3707_v9 }
 0x197   : > { %2550 = vmatpush1.bf16.msra.mxu0 %v3702_v10  ;;  %2722 = vmatpush1.bf16.msra.mxu1 %v3705_v11 }
 0x198   : > { %2551 = vmatprep.subr.bf16.mxu0 %v3710_v12  ;;  %2723 = vmatprep.subr.bf16.mxu1 %v3713_v13 }
 0x19b   : > { %2552 = vmatpush1.bf16.msra.mxu0 %v3708_v14  ;;  %2724 = vmatpush1.bf16.msra.mxu1 %v3711_v18 }
 0x19e   : > { %2554 = vmatmul.mubr.bf16.vlgmr.msra.gmra.mrb[0].mxu0 %v3001_v19  ;;  %2726 = vmatmul.mubr.bf16.vlgmr.msra.gmra.mrb[0].mxu1 %v3001_v19 }
 0x271   : > { %v2555_v30 = vpop.f32.mrb[0].mxu0  ;;  %v2727_v31 = vpop.f32.mrb[0].mxu1 }
 0x272   : > { %v2783_v34 = vmul.f32 %v2770_v24, %v2555_v30  ;;  %v2785_v35 = vmul.f32 %v2778_v25, %v2727_v31  ;;  %v2557_v36 = vpop.f32.mrb[1].mxu0  ;;  %v2729_v37 = vpop.f32.mrb[1].mxu1 }
 0x273   : > { %v2784_v38 = vmul.f32 %v2774_v26, %v2557_v36  ;;  %v2786_v39 = vmul.f32 %v2782_v27, %v2729_v37  ;;  %v2559_v40 = vpop.f32.mrb[2].mxu0  ;;  %v2731_v41 = vpop.f32.mrb[2].mxu1 }
 0x274   : > { %v2807_v42 = vadd.f32 %v2794_v28, %v2783_v34  ;;  %v2809_v43 = vadd.f32 %v2802_v29, %v2785_v35  ;;  %v2787_v44 = vmul.f32 %v2770_v24, %v2559_v40  ;;  %v2789_v45 = vmul.f32 %v2778_v25, %v2731_v41  ;;  %v2561_v46 = vpop.f32.mrb[3].mxu0  ;;  %v2733_v47 = vpop.f32.mrb[3].mxu1 }
 0x275   : > { %v2808_v48 = vadd.f32 %v2798_v32, %v2784_v38  ;;  %v2810_v49 = vadd.f32 %v2806_v33, %v2786_v39  ;;  %v2788_v50 = vmul.f32 %v2774_v26, %v2561_v46  ;;  %v2790_v51 = vmul.f32 %v2782_v27, %v2733_v47  ;;  %2837 = sbr.rel (!%p3809_p6) target bundleno = 644 (0x284), region = 67 }
 0x276   : > { %v2815_v52 = vmax.f32 %v2807_v42, 0.0  ;;  %v2817_v53 = vmax.f32 %v2809_v43, 0.0  ;;  %v2811_v54 = vadd.f32 %v2794_v28, %v2787_v44  ;;  %v2813_v55 = vadd.f32 %v2802_v29, %v2789_v45 }
 0x277   : > { %v2816_v56 = vmax.f32 %v2808_v48, 0.0  ;;  %v2818_v57 = vmax.f32 %v2810_v49, 0.0  ;;  %v2812_v58 = vadd.f32 %v2798_v32, %v2788_v50  ;;  %v2814_v59 = vadd.f32 %v2806_v33, %v2790_v51 }
 0x278   : > { %2823 = vst [vmem:[%s765_s12] sm:$0xff] %v2815_v52  ;;  %2825 = vst [vmem:[%s765_s12 + $0x10] sm:$0xff] %v2817_v53  ;;  %v2819_v60 = vmax.f32 %v2811_v54, 0.0  ;;  %v2821_v61 = vmax.f32 %v2813_v55, 0.0 }
 0x279   : > { %2824 = vst [vmem:[%s765_s12 + $0x8] sm:$0xff] %v2816_v56  ;;  %2826 = vst [vmem:[%s765_s12 + $0x18] sm:$0xff] %v2818_v57  ;;  %v2820_v62 = vmax.f32 %v2812_v58, 0.0  ;;  %v2822_v63 = vmax.f32 %v2814_v59, 0.0 }
 0x27a   : > { %2827 = vst [vmem:[%s765_s12 + $0x20] sm:$0xff] %v2819_v60  ;;  %2829 = vst [vmem:[%s765_s12 + $0x30] sm:$0xff] %v2821_v61 }
 0x27b   : > { %2828 = vst [vmem:[%s765_s12 + $0x28] sm:$0xff] %v2820_v62  ;;  %2830 = vst [vmem:[%s765_s12 + $0x38] sm:$0xff] %v2822_v63 }
 0x27f   : > { %v2856_v0 = vld [vmem:[%s765_s12] sm:$0xff]  ;;  %v2860_v3 = vld [vmem:[%s765_s12 + $0x10] sm:$0xff] }
 0x280   : > { %v2858_v1 = vld [vmem:[%s765_s12 + $0x8] sm:$0xff]  ;;  %v2862_v4 = vld [vmem:[%s765_s12 + $0x18] sm:$0xff]  ;;  %2857 = vst [vmem:[%s2843_s18] sm:$0xff] %v2856_v0  ;;  %2861 = vst [vmem:[%s2843_s18 + $0x10] sm:$0xff] %v2860_v3 }
 0x281   : > { %v2864_v5 = vld [vmem:[%s765_s12 + $0x20] sm:$0xff]  ;;  %2859 = vst [vmem:[%s2843_s18 + $0x8] sm:$0xff] %v2858_v1  ;;  %2863 = vst [vmem:[%s2843_s18 + $0x18] sm:$0xff] %v2862_v4  ;;  %v2868_v7 = vld [vmem:[%s765_s12 + $0x30] sm:$0xff] }
 0x282   : > { %v2866_v6 = vld [vmem:[%s765_s12 + $0x28] sm:$0xff]  ;;  %2865 = vst [vmem:[%s2843_s18 + $0x240] sm:$0xff] %v2864_v5  ;;  %v2870_v8 = vld [vmem:[%s765_s12 + $0x38] sm:$0xff]  ;;  %2869 = vst [vmem:[%s2843_s18 + $0x250] sm:$0xff] %v2868_v7 }
 0x283   : > { %2867 = vst [vmem:[%s2843_s18 + $0x248] sm:$0xff] %v2866_v6  ;;  %2871 = vst [vmem:[%s2843_s18 + $0x258] sm:$0xff] %v2870_v8 }
 0x284 PF: > { %s13_s16 = sadd.s32 1, %s3752_s16   ;;  %s4685_s12 = smov %s3740_s13 }
 0x285   : > { %p10_p12 = scmp.ge.s32.totalorder %s13_s16, 20   ;;  %s4686_s13 = smov %s3814_s22 }
 0x286   : > { %s4687_s14 = smov %s3748_s15  ;;  %s4688_s15 = smov %s4690_s17 }
 0x287   :  { %12 = sbr.rel (!%p10_p12) target bundleno = 3 (0x3), region = 127 }

// kernel: decoder_forward.12
= control target key start
LH: loop header
LB: loop body
LE: loop exit
PB: predicated region body
PF: predicated region fallthrough
CT: control target
= control target key end

     0   :  { %s4006_s12 = smov 0   ;;  %s4008_s13 = smov 0   ;;  %s4970_s0 = inlined_call_operand.vmem [shape: bf16[32,1024], index: 0, kind: input, shape index: {}]   ;;  %s4971_s1 = inlined_call_operand.vmem [shape: bf16[1024,4608], index: 1, kind: input, shape index: {}]   ;;  %s4972_s2 = inlined_call_operand.vmem [shape: f32[8,4608], index: 2, kind: input, shape index: {}]   ;;  %s4973_s3 = inlined_call_operand.vmem [shape: f32[32,4608], index: 3, kind: output, shape index: {}]  }
   0x1   :  { %s4010_s14 = smov 0   ;;  %s4012_s15 = smov 0  }
   0x2   :  { %s4014_s16 = smov 0  }
   0x3 LB: > { %s28_s17 = sadd.s32 1, %s3980_s15  ;;  %s3182_s18 = sadd.s32 4294967295, %s3984_s16   ;;  %s3984_s16 = sphi %s4014_s16, %s13_s16   ;;  %s3980_s15 = sphi %s4012_s15, %s4978_s15   ;;  %s3976_s14 = sphi %s4010_s14, %s4977_s14   ;;  %s3972_s13 = sphi %s4008_s13, %s4976_s13   ;;  %s3968_s12 = sphi %s4006_s12, %s4975_s12  }
   0x4   : > { %p30_p0 = scmp.ge.s32.totalorder %s28_s17, 9  ;;  %p76_p1 = scmp.ne.s32.totalorder %s3972_s13, %s3968_s12 }
   0x5   : > { %p77_p2 = scmp.eq.s32.totalorder %s3984_s16, 0  ;;  %p134_p4 = scmp.eq.s32.totalorder %s3182_s18, 8 }
   0x6   : > { %s4980_s17 = smov (%p30_p0, %s28_s17), 0  ;;  %s69_s20 = sadd.s32 1, %s3972_s13 }
   0x7   : > { %p78_p3 = por %p77_p2, %p76_p1  ;;  %s65_s19 = ssub.s32 %s3980_s15, %s4980_s17 }
   0x8   : > { %p67_p5 = scmp.eq.s32.totalorder %s65_s19, 0  ;;  %p4041_p6 = por %p134_p4, %p76_p1 }
   0x9   : > { %p3186_p7 = scmp.ge.s32.totalorder %s3984_s16, 9 }
   0xa   : > { %s4046_s22 = scalar_select %p67_p5, %s3972_s13, %s69_s20  }
   0xb   : > { %171 = sbr.rel (%p3186_p7) target bundleno = 150 (0x96), region = 20 }
  0x12   : > { %174 = sbr.rel (!%p78_p3) target bundleno = 150 (0x96), region = 24  ;;  %s176_s23 = sand.u32 (%p78_p3), 1, %s3972_s13  }
  0x13   : > { %s3472_s24 = sshll.u32 (%p78_p3), %s3980_s15, 4  ;;  %s3187_s25 = sshll.u32 (%p78_p3), %s176_s23, 11 }
  0x14   : > { %s4054_s28 = scalar_lea.vmem (%p78_p3), %s4971_s1, %s3472_s24  ;;  %s4059_s29 = scalar_lea.vmem (%p78_p3), [#allocation3], %s3187_s25 }
  0x15   : > { %v197_v0 = vld [vmem:[%s4054_s28] sm:$0xff] (%p78_p3)  ;;  %v199_v1 = vld [vmem:[%s4054_s28 + $0x8] sm:$0xff] (%p78_p3)  ;;  %v201_v2 = vld [vmem:[%s4054_s28 + $0x90] sm:$0xff] (%p78_p3) }
  0x16   : > { %198 = vst [vmem:[%s4059_s29] sm:$0xff] (%p78_p3), %v197_v0  ;;  %200 = vst [vmem:[%s4059_s29 + $0x8] sm:$0xff] (%p78_p3), %v199_v1  ;;  %v203_v3 = vld [vmem:[%s4054_s28 + $0x98] sm:$0xff] (%p78_p3)  ;;  %v205_v4 = vld [vmem:[%s4054_s28 + $0x120] sm:$0xff] (%p78_p3) }
  0x17   : > { %202 = vst [vmem:[%s4059_s29 + $0x10] sm:$0xff] (%p78_p3), %v201_v2  ;;  %v207_v5 = vld [vmem:[%s4054_s28 + $0x128] sm:$0xff] (%p78_p3)  ;;  %204 = vst [vmem:[%s4059_s29 + $0x18] sm:$0xff] (%p78_p3), %v203_v3  ;;  %v209_v6 = vld [vmem:[%s4054_s28 + $0x1b0] sm:$0xff] (%p78_p3) }
  0x18   : > { %206 = vst [vmem:[%s4059_s29 + $0x20] sm:$0xff] (%p78_p3), %v205_v4  ;;  %208 = vst [vmem:[%s4059_s29 + $0x28] sm:$0xff] (%p78_p3), %v207_v5  ;;  %v211_v7 = vld [vmem:[%s4054_s28 + $0x1b8] sm:$0xff] (%p78_p3)  ;;  %v213_v8 = vld [vmem:[%s4054_s28 + $0x240] sm:$0xff] (%p78_p3) }
  0x19   : > { %210 = vst [vmem:[%s4059_s29 + $0x30] sm:$0xff] %v209_v6  ;;  %212 = vst [vmem:[%s4059_s29 + $0x38] sm:$0xff] %v211_v7  ;;  %v215_v9 = vld [vmem:[%s4054_s28 + $0x248] sm:$0xff]  ;;  %v217_v10 = vld [vmem:[%s4054_s28 + $0x2d0] sm:$0xff] }
  0x1a   : > { %214 = vst [vmem:[%s4059_s29 + $0x40] sm:$0xff] %v213_v8  ;;  %v219_v11 = vld [vmem:[%s4054_s28 + $0x2d8] sm:$0xff]  ;;  %216 = vst [vmem:[%s4059_s29 + $0x48] sm:$0xff] %v215_v9  ;;  %v221_v12 = vld [vmem:[%s4054_s28 + $0x360] sm:$0xff] }
  0x1b   : > { %218 = vst [vmem:[%s4059_s29 + $0x50] sm:$0xff] %v217_v10  ;;  %220 = vst [vmem:[%s4059_s29 + $0x58] sm:$0xff] %v219_v11  ;;  %v223_v13 = vld [vmem:[%s4054_s28 + $0x368] sm:$0xff]  ;;  %v225_v14 = vld [vmem:[%s4054_s28 + $0x3f0] sm:$0xff] }
  0x1c   : > { %222 = vst [vmem:[%s4059_s29 + $0x60] sm:$0xff] %v221_v12  ;;  %224 = vst [vmem:[%s4059_s29 + $0x68] sm:$0xff] %v223_v13  ;;  %v227_v15 = vld [vmem:[%s4054_s28 + $0x3f8] sm:$0xff]  ;;  %v229_v16 = vld [vmem:[%s4054_s28 + $0x480] sm:$0xff] }
  0x1d   : > { %226 = vst [vmem:[%s4059_s29 + $0x70] sm:$0xff] %v225_v14  ;;  %v231_v17 = vld [vmem:[%s4054_s28 + $0x488] sm:$0xff]  ;;  %228 = vst [vmem:[%s4059_s29 + $0x78] sm:$0xff] %v227_v15  ;;  %v233_v18 = vld [vmem:[%s4054_s28 + $0x510] sm:$0xff] }
  0x1e   : > { %230 = vst [vmem:[%s4059_s29 + $0x80] sm:$0xff] %v229_v16  ;;  %232 = vst [vmem:[%s4059_s29 + $0x88] sm:$0xff] %v231_v17  ;;  %v235_v19 = vld [vmem:[%s4054_s28 + $0x518] sm:$0xff]  ;;  %v237_v20 = vld [vmem:[%s4054_s28 + $0x5a0] sm:$0xff] }
  0x1f   : > { %234 = vst [vmem:[%s4059_s29 + $0x90] sm:$0xff] %v233_v18  ;;  %236 = vst [vmem:[%s4059_s29 + $0x98] sm:$0xff] %v235_v19  ;;  %v239_v21 = vld [vmem:[%s4054_s28 + $0x5a8] sm:$0xff]  ;;  %v241_v22 = vld [vmem:[%s4054_s28 + $0x630] sm:$0xff] }
  0x20   : > { %238 = vst [vmem:[%s4059_s29 + $0xa0] sm:$0xff] %v237_v20  ;;  %v243_v23 = vld [vmem:[%s4054_s28 + $0x638] sm:$0xff]  ;;  %240 = vst [vmem:[%s4059_s29 + $0xa8] sm:$0xff] %v239_v21  ;;  %v245_v24 = vld [vmem:[%s4054_s28 + $0x6c0] sm:$0xff] }
  0x21   : > { %242 = vst [vmem:[%s4059_s29 + $0xb0] sm:$0xff] %v241_v22  ;;  %244 = vst [vmem:[%s4059_s29 + $0xb8] sm:$0xff] %v243_v23  ;;  %v247_v25 = vld [vmem:[%s4054_s28 + $0x6c8] sm:$0xff]  ;;  %v249_v26 = vld [vmem:[%s4054_s28 + $0x750] sm:$0xff] }
  0x22   : > { %246 = vst [vmem:[%s4059_s29 + $0xc0] sm:$0xff] %v245_v24  ;;  %248 = vst [vmem:[%s4059_s29 + $0xc8] sm:$0xff] %v247_v25  ;;  %v251_v27 = vld [vmem:[%s4054_s28 + $0x758] sm:$0xff]  ;;  %v253_v28 = vld [vmem:[%s4054_s28 + $0x7e0] sm:$0xff] }
  0x23   : > { %250 = vst [vmem:[%s4059_s29 + $0xd0] sm:$0xff] %v249_v26  ;;  %v255_v29 = vld [vmem:[%s4054_s28 + $0x7e8] sm:$0xff]  ;;  %252 = vst [vmem:[%s4059_s29 + $0xd8] sm:$0xff] %v251_v27  ;;  %v257_v30 = vld [vmem:[%s4054_s28 + $0x870] sm:$0xff] }
  0x24   : > { %254 = vst [vmem:[%s4059_s29 + $0xe0] sm:$0xff] %v253_v28  ;;  %256 = vst [vmem:[%s4059_s29 + $0xe8] sm:$0xff] %v255_v29  ;;  %v259_v31 = vld [vmem:[%s4054_s28 + $0x878] sm:$0xff]  ;;  %v261_v32 = vld [vmem:[%s4054_s28 + $0x900] sm:$0xff] }
  0x25   : > { %258 = vst [vmem:[%s4059_s29 + $0xf0] sm:$0xff] %v257_v30  ;;  %260 = vst [vmem:[%s4059_s29 + $0xf8] sm:$0xff] %v259_v31  ;;  %v263_v33 = vld [vmem:[%s4054_s28 + $0x908] sm:$0xff]  ;;  %v265_v34 = vld [vmem:[%s4054_s28 + $0x990] sm:$0xff] }
  0x26   : > { %262 = vst [vmem:[%s4059_s29 + $0x100] sm:$0xff] %v261_v32  ;;  %v267_v35 = vld [vmem:[%s4054_s28 + $0x998] sm:$0xff]  ;;  %264 = vst [vmem:[%s4059_s29 + $0x108] sm:$0xff] %v263_v33  ;;  %v269_v36 = vld [vmem:[%s4054_s28 + $0xa20] sm:$0xff] }
  0x27   : > { %266 = vst [vmem:[%s4059_s29 + $0x110] sm:$0xff] %v265_v34  ;;  %268 = vst [vmem:[%s4059_s29 + $0x118] sm:$0xff] %v267_v35  ;;  %v271_v37 = vld [vmem:[%s4054_s28 + $0xa28] sm:$0xff]  ;;  %v273_v38 = vld [vmem:[%s4054_s28 + $0xab0] sm:$0xff] }
  0x28   : > { %270 = vst [vmem:[%s4059_s29 + $0x120] sm:$0xff] %v269_v36  ;;  %272 = vst [vmem:[%s4059_s29 + $0x128] sm:$0xff] %v271_v37  ;;  %v275_v39 = vld [vmem:[%s4054_s28 + $0xab8] sm:$0xff]  ;;  %v277_v40 = vld [vmem:[%s4054_s28 + $0xb40] sm:$0xff] }
  0x29   : > { %274 = vst [vmem:[%s4059_s29 + $0x130] sm:$0xff] %v273_v38  ;;  %v279_v41 = vld [vmem:[%s4054_s28 + $0xb48] sm:$0xff]  ;;  %276 = vst [vmem:[%s4059_s29 + $0x138] sm:$0xff] %v275_v39  ;;  %v281_v42 = vld [vmem:[%s4054_s28 + $0xbd0] sm:$0xff] }
  0x2a   : > { %278 = vst [vmem:[%s4059_s29 + $0x140] sm:$0xff] %v277_v40  ;;  %280 = vst [vmem:[%s4059_s29 + $0x148] sm:$0xff] %v279_v41  ;;  %v283_v43 = vld [vmem:[%s4054_s28 + $0xbd8] sm:$0xff]  ;;  %v285_v44 = vld [vmem:[%s4054_s28 + $0xc60] sm:$0xff] }
  0x2b   : > { %282 = vst [vmem:[%s4059_s29 + $0x150] sm:$0xff] %v281_v42  ;;  %284 = vst [vmem:[%s4059_s29 + $0x158] sm:$0xff] %v283_v43  ;;  %v287_v45 = vld [vmem:[%s4054_s28 + $0xc68] sm:$0xff]  ;;  %v289_v46 = vld [vmem:[%s4054_s28 + $0xcf0] sm:$0xff] }
  0x2c   : > { %286 = vst [vmem:[%s4059_s29 + $0x160] sm:$0xff] %v285_v44  ;;  %v291_v47 = vld [vmem:[%s4054_s28 + $0xcf8] sm:$0xff]  ;;  %288 = vst [vmem:[%s4059_s29 + $0x168] sm:$0xff] %v287_v45  ;;  %v293_v48 = vld [vmem:[%s4054_s28 + $0xd80] sm:$0xff] }
  0x2d   : > { %290 = vst [vmem:[%s4059_s29 + $0x170] sm:$0xff] %v289_v46  ;;  %292 = vst [vmem:[%s4059_s29 + $0x178] sm:$0xff] %v291_v47  ;;  %v295_v49 = vld [vmem:[%s4054_s28 + $0xd88] sm:$0xff]  ;;  %v297_v50 = vld [vmem:[%s4054_s28 + $0xe10] sm:$0xff] }
  0x2e   : > { %294 = vst [vmem:[%s4059_s29 + $0x180] sm:$0xff] %v293_v48  ;;  %296 = vst [vmem:[%s4059_s29 + $0x188] sm:$0xff] %v295_v49  ;;  %v299_v51 = vld [vmem:[%s4054_s28 + $0xe18] sm:$0xff]  ;;  %v301_v52 = vld [vmem:[%s4054_s28 + $0xea0] sm:$0xff] }
  0x2f   : > { %298 = vst [vmem:[%s4059_s29 + $0x190] sm:$0xff] %v297_v50  ;;  %v303_v53 = vld [vmem:[%s4054_s28 + $0xea8] sm:$0xff]  ;;  %300 = vst [vmem:[%s4059_s29 + $0x198] sm:$0xff] %v299_v51  ;;  %v305_v54 = vld [vmem:[%s4054_s28 + $0xf30] sm:$0xff] }
  0x30   : > { %302 = vst [vmem:[%s4059_s29 + $0x1a0] sm:$0xff] %v301_v52  ;;  %304 = vst [vmem:[%s4059_s29 + $0x1a8] sm:$0xff] %v303_v53  ;;  %v307_v55 = vld [vmem:[%s4054_s28 + $0xf38] sm:$0xff]  ;;  %v309_v56 = vld [vmem:[%s4054_s28 + $0xfc0] sm:$0xff] }
  0x31   : > { %306 = vst [vmem:[%s4059_s29 + $0x1b0] sm:$0xff] %v305_v54  ;;  %308 = vst [vmem:[%s4059_s29 + $0x1b8] sm:$0xff] %v307_v55  ;;  %v311_v57 = vld [vmem:[%s4054_s28 + $0xfc8] sm:$0xff]  ;;  %v313_v58 = vld [vmem:[%s4054_s28 + $0x1050] sm:$0xff] }
  0x32   : > { %310 = vst [vmem:[%s4059_s29 + $0x1c0] sm:$0xff] %v309_v56  ;;  %v315_v59 = vld [vmem:[%s4054_s28 + $0x1058] sm:$0xff]  ;;  %312 = vst [vmem:[%s4059_s29 + $0x1c8] sm:$0xff] %v311_v57  ;;  %v317_v60 = vld [vmem:[%s4054_s28 + $0x10e0] sm:$0xff] }
  0x33   : > { %314 = vst [vmem:[%s4059_s29 + $0x1d0] sm:$0xff] %v313_v58  ;;  %316 = vst [vmem:[%s4059_s29 + $0x1d8] sm:$0xff] %v315_v59  ;;  %v319_v61 = vld [vmem:[%s4054_s28 + $0x10e8] sm:$0xff]  ;;  %v321_v62 = vld [vmem:[%s4054_s28 + $0x1170] sm:$0xff] }
  0x34   : > { %318 = vst [vmem:[%s4059_s29 + $0x1e0] sm:$0xff] %v317_v60  ;;  %320 = vst [vmem:[%s4059_s29 + $0x1e8] sm:$0xff] %v319_v61  ;;  %v323_v63 = vld [vmem:[%s4054_s28 + $0x1178] sm:$0xff]  ;;  %v325_v0 = vld [vmem:[%s4054_s28 + $0x1200] sm:$0xff] }
  0x35   : > { %322 = vst [vmem:[%s4059_s29 + $0x1f0] sm:$0xff] %v321_v62  ;;  %v327_v1 = vld [vmem:[%s4054_s28 + $0x1208] sm:$0xff]  ;;  %324 = vst [vmem:[%s4059_s29 + $0x1f8] sm:$0xff] %v323_v63  ;;  %v329_v2 = vld [vmem:[%s4054_s28 + $0x1290] sm:$0xff] }
  0x36   : > { %326 = vst [vmem:[%s4059_s29 + $0x200] sm:$0xff] %v325_v0  ;;  %328 = vst [vmem:[%s4059_s29 + $0x208] sm:$0xff] %v327_v1  ;;  %v331_v3 = vld [vmem:[%s4054_s28 + $0x1298] sm:$0xff]  ;;  %v333_v4 = vld [vmem:[%s4054_s28 + $0x1320] sm:$0xff] }
  0x37   : > { %330 = vst [vmem:[%s4059_s29 + $0x210] sm:$0xff] %v329_v2  ;;  %332 = vst [vmem:[%s4059_s29 + $0x218] sm:$0xff] %v331_v3  ;;  %v335_v5 = vld [vmem:[%s4054_s28 + $0x1328] sm:$0xff]  ;;  %v337_v6 = vld [vmem:[%s4054_s28 + $0x13b0] sm:$0xff] }
  0x38   : > { %334 = vst [vmem:[%s4059_s29 + $0x220] sm:$0xff] %v333_v4  ;;  %v339_v7 = vld [vmem:[%s4054_s28 + $0x13b8] sm:$0xff]  ;;  %336 = vst [vmem:[%s4059_s29 + $0x228] sm:$0xff] %v335_v5  ;;  %v341_v8 = vld [vmem:[%s4054_s28 + $0x1440] sm:$0xff] }
  0x39   : > { %338 = vst [vmem:[%s4059_s29 + $0x230] sm:$0xff] %v337_v6  ;;  %340 = vst [vmem:[%s4059_s29 + $0x238] sm:$0xff] %v339_v7  ;;  %v343_v9 = vld [vmem:[%s4054_s28 + $0x1448] sm:$0xff]  ;;  %v345_v10 = vld [vmem:[%s4054_s28 + $0x14d0] sm:$0xff] }
  0x3a   : > { %342 = vst [vmem:[%s4059_s29 + $0x240] sm:$0xff] %v341_v8  ;;  %344 = vst [vmem:[%s4059_s29 + $0x248] sm:$0xff] %v343_v9  ;;  %v347_v11 = vld [vmem:[%s4054_s28 + $0x14d8] sm:$0xff]  ;;  %v349_v12 = vld [vmem:[%s4054_s28 + $0x1560] sm:$0xff] }
  0x3b   : > { %346 = vst [vmem:[%s4059_s29 + $0x250] sm:$0xff] %v345_v10  ;;  %v351_v13 = vld [vmem:[%s4054_s28 + $0x1568] sm:$0xff]  ;;  %348 = vst [vmem:[%s4059_s29 + $0x258] sm:$0xff] %v347_v11  ;;  %v353_v14 = vld [vmem:[%s4054_s28 + $0x15f0] sm:$0xff] }
  0x3c   : > { %350 = vst [vmem:[%s4059_s29 + $0x260] sm:$0xff] %v349_v12  ;;  %352 = vst [vmem:[%s4059_s29 + $0x268] sm:$0xff] %v351_v13  ;;  %v355_v15 = vld [vmem:[%s4054_s28 + $0x15f8] sm:$0xff]  ;;  %v357_v16 = vld [vmem:[%s4054_s28 + $0x1680] sm:$0xff] }
  0x3d   : > { %354 = vst [vmem:[%s4059_s29 + $0x270] sm:$0xff] %v353_v14  ;;  %356 = vst [vmem:[%s4059_s29 + $0x278] sm:$0xff] %v355_v15  ;;  %v359_v17 = vld [vmem:[%s4054_s28 + $0x1688] sm:$0xff]  ;;  %v361_v18 = vld [vmem:[%s4054_s28 + $0x1710] sm:$0xff] }
  0x3e   : > { %358 = vst [vmem:[%s4059_s29 + $0x280] sm:$0xff] %v357_v16  ;;  %v363_v19 = vld [vmem:[%s4054_s28 + $0x1718] sm:$0xff]  ;;  %360 = vst [vmem:[%s4059_s29 + $0x288] sm:$0xff] %v359_v17  ;;  %v365_v20 = vld [vmem:[%s4054_s28 + $0x17a0] sm:$0xff] }
  0x3f   : > { %362 = vst [vmem:[%s4059_s29 + $0x290] sm:$0xff] %v361_v18  ;;  %364 = vst [vmem:[%s4059_s29 + $0x298] sm:$0xff] %v363_v19  ;;  %v367_v21 = vld [vmem:[%s4054_s28 + $0x17a8] sm:$0xff]  ;;  %v369_v22 = vld [vmem:[%s4054_s28 + $0x1830] sm:$0xff] }
  0x40   : > { %366 = vst [vmem:[%s4059_s29 + $0x2a0] sm:$0xff] %v365_v20  ;;  %368 = vst [vmem:[%s4059_s29 + $0x2a8] sm:$0xff] %v367_v21  ;;  %v371_v23 = vld [vmem:[%s4054_s28 + $0x1838] sm:$0xff]  ;;  %v373_v24 = vld [vmem:[%s4054_s28 + $0x18c0] sm:$0xff] }
  0x41   : > { %370 = vst [vmem:[%s4059_s29 + $0x2b0] sm:$0xff] %v369_v22  ;;  %v375_v25 = vld [vmem:[%s4054_s28 + $0x18c8] sm:$0xff]  ;;  %372 = vst [vmem:[%s4059_s29 + $0x2b8] sm:$0xff] %v371_v23  ;;  %v377_v26 = vld [vmem:[%s4054_s28 + $0x1950] sm:$0xff] }
  0x42   : > { %374 = vst [vmem:[%s4059_s29 + $0x2c0] sm:$0xff] %v373_v24  ;;  %376 = vst [vmem:[%s4059_s29 + $0x2c8] sm:$0xff] %v375_v25  ;;  %v379_v27 = vld [vmem:[%s4054_s28 + $0x1958] sm:$0xff]  ;;  %v381_v28 = vld [vmem:[%s4054_s28 + $0x19e0] sm:$0xff] }
  0x43   : > { %378 = vst [vmem:[%s4059_s29 + $0x2d0] sm:$0xff] %v377_v26  ;;  %380 = vst [vmem:[%s4059_s29 + $0x2d8] sm:$0xff] %v379_v27  ;;  %v383_v29 = vld [vmem:[%s4054_s28 + $0x19e8] sm:$0xff]  ;;  %v385_v30 = vld [vmem:[%s4054_s28 + $0x1a70] sm:$0xff] }
  0x44   : > { %382 = vst [vmem:[%s4059_s29 + $0x2e0] sm:$0xff] %v381_v28  ;;  %v387_v31 = vld [vmem:[%s4054_s28 + $0x1a78] sm:$0xff]  ;;  %384 = vst [vmem:[%s4059_s29 + $0x2e8] sm:$0xff] %v383_v29  ;;  %v389_v32 = vld [vmem:[%s4054_s28 + $0x1b00] sm:$0xff] }
  0x45   : > { %386 = vst [vmem:[%s4059_s29 + $0x2f0] sm:$0xff] %v385_v30  ;;  %388 = vst [vmem:[%s4059_s29 + $0x2f8] sm:$0xff] %v387_v31  ;;  %v391_v33 = vld [vmem:[%s4054_s28 + $0x1b08] sm:$0xff]  ;;  %v393_v34 = vld [vmem:[%s4054_s28 + $0x1b90] sm:$0xff] }
  0x46   : > { %390 = vst [vmem:[%s4059_s29 + $0x300] sm:$0xff] %v389_v32  ;;  %392 = vst [vmem:[%s4059_s29 + $0x308] sm:$0xff] %v391_v33  ;;  %v395_v35 = vld [vmem:[%s4054_s28 + $0x1b98] sm:$0xff]  ;;  %v397_v36 = vld [vmem:[%s4054_s28 + $0x1c20] sm:$0xff] }
  0x47   : > { %394 = vst [vmem:[%s4059_s29 + $0x310] sm:$0xff] %v393_v34  ;;  %v399_v37 = vld [vmem:[%s4054_s28 + $0x1c28] sm:$0xff]  ;;  %396 = vst [vmem:[%s4059_s29 + $0x318] sm:$0xff] %v395_v35  ;;  %v401_v38 = vld [vmem:[%s4054_s28 + $0x1cb0] sm:$0xff] }
  0x48   : > { %398 = vst [vmem:[%s4059_s29 + $0x320] sm:$0xff] %v397_v36  ;;  %400 = vst [vmem:[%s4059_s29 + $0x328] sm:$0xff] %v399_v37  ;;  %v403_v39 = vld [vmem:[%s4054_s28 + $0x1cb8] sm:$0xff]  ;;  %v405_v40 = vld [vmem:[%s4054_s28 + $0x1d40] sm:$0xff] }
  0x49   : > { %402 = vst [vmem:[%s4059_s29 + $0x330] sm:$0xff] %v401_v38  ;;  %404 = vst [vmem:[%s4059_s29 + $0x338] sm:$0xff] %v403_v39  ;;  %v407_v41 = vld [vmem:[%s4054_s28 + $0x1d48] sm:$0xff]  ;;  %v409_v42 = vld [vmem:[%s4054_s28 + $0x1dd0] sm:$0xff] }
  0x4a   : > { %406 = vst [vmem:[%s4059_s29 + $0x340] sm:$0xff] %v405_v40  ;;  %v411_v43 = vld [vmem:[%s4054_s28 + $0x1dd8] sm:$0xff]  ;;  %408 = vst [vmem:[%s4059_s29 + $0x348] sm:$0xff] %v407_v41  ;;  %v413_v44 = vld [vmem:[%s4054_s28 + $0x1e60] sm:$0xff] }
  0x4b   : > { %410 = vst [vmem:[%s4059_s29 + $0x350] sm:$0xff] %v409_v42  ;;  %412 = vst [vmem:[%s4059_s29 + $0x358] sm:$0xff] %v411_v43  ;;  %v415_v45 = vld [vmem:[%s4054_s28 + $0x1e68] sm:$0xff]  ;;  %v417_v46 = vld [vmem:[%s4054_s28 + $0x1ef0] sm:$0xff] }
  0x4c   : > { %414 = vst [vmem:[%s4059_s29 + $0x360] sm:$0xff] %v413_v44  ;;  %416 = vst [vmem:[%s4059_s29 + $0x368] sm:$0xff] %v415_v45  ;;  %v419_v47 = vld [vmem:[%s4054_s28 + $0x1ef8] sm:$0xff]  ;;  %v421_v48 = vld [vmem:[%s4054_s28 + $0x1f80] sm:$0xff] }
  0x4d   : > { %418 = vst [vmem:[%s4059_s29 + $0x370] sm:$0xff] %v417_v46  ;;  %v423_v49 = vld [vmem:[%s4054_s28 + $0x1f88] sm:$0xff]  ;;  %420 = vst [vmem:[%s4059_s29 + $0x378] sm:$0xff] %v419_v47  ;;  %v425_v50 = vld [vmem:[%s4054_s28 + $0x2010] sm:$0xff] }
  0x4e   : > { %422 = vst [vmem:[%s4059_s29 + $0x380] sm:$0xff] %v421_v48  ;;  %424 = vst [vmem:[%s4059_s29 + $0x388] sm:$0xff] %v423_v49  ;;  %v427_v51 = vld [vmem:[%s4054_s28 + $0x2018] sm:$0xff]  ;;  %v429_v52 = vld [vmem:[%s4054_s28 + $0x20a0] sm:$0xff] }
  0x4f   : > { %426 = vst [vmem:[%s4059_s29 + $0x390] sm:$0xff] %v425_v50  ;;  %428 = vst [vmem:[%s4059_s29 + $0x398] sm:$0xff] %v427_v51  ;;  %v431_v53 = vld [vmem:[%s4054_s28 + $0x20a8] sm:$0xff]  ;;  %v433_v54 = vld [vmem:[%s4054_s28 + $0x2130] sm:$0xff] }
  0x50   : > { %430 = vst [vmem:[%s4059_s29 + $0x3a0] sm:$0xff] %v429_v52  ;;  %v435_v55 = vld [vmem:[%s4054_s28 + $0x2138] sm:$0xff]  ;;  %432 = vst [vmem:[%s4059_s29 + $0x3a8] sm:$0xff] %v431_v53  ;;  %v437_v56 = vld [vmem:[%s4054_s28 + $0x21c0] sm:$0xff] }
  0x51   : > { %434 = vst [vmem:[%s4059_s29 + $0x3b0] sm:$0xff] %v433_v54  ;;  %436 = vst [vmem:[%s4059_s29 + $0x3b8] sm:$0xff] %v435_v55  ;;  %v439_v57 = vld [vmem:[%s4054_s28 + $0x21c8] sm:$0xff]  ;;  %v441_v58 = vld [vmem:[%s4054_s28 + $0x2250] sm:$0xff] }
  0x52   : > { %438 = vst [vmem:[%s4059_s29 + $0x3c0] sm:$0xff] %v437_v56  ;;  %440 = vst [vmem:[%s4059_s29 + $0x3c8] sm:$0xff] %v439_v57  ;;  %v443_v59 = vld [vmem:[%s4054_s28 + $0x2258] sm:$0xff]  ;;  %v445_v60 = vld [vmem:[%s4054_s28 + $0x22e0] sm:$0xff] }
  0x53   : > { %442 = vst [vmem:[%s4059_s29 + $0x3d0] sm:$0xff] %v441_v58  ;;  %v447_v61 = vld [vmem:[%s4054_s28 + $0x22e8] sm:$0xff]  ;;  %444 = vst [vmem:[%s4059_s29 + $0x3d8] sm:$0xff] %v443_v59  ;;  %v449_v62 = vld [vmem:[%s4054_s28 + $0x2370] sm:$0xff] }
  0x54   : > { %446 = vst [vmem:[%s4059_s29 + $0x3e0] sm:$0xff] %v445_v60  ;;  %448 = vst [vmem:[%s4059_s29 + $0x3e8] sm:$0xff] %v447_v61  ;;  %v451_v63 = vld [vmem:[%s4054_s28 + $0x2378] sm:$0xff]  ;;  %v453_v0 = vld [vmem:[%s4054_s28 + $0x2400] sm:$0xff] }
  0x55   : > { %450 = vst [vmem:[%s4059_s29 + $0x3f0] sm:$0xff] %v449_v62  ;;  %452 = vst [vmem:[%s4059_s29 + $0x3f8] sm:$0xff] %v451_v63  ;;  %v455_v1 = vld [vmem:[%s4054_s28 + $0x2408] sm:$0xff]  ;;  %v457_v2 = vld [vmem:[%s4054_s28 + $0x2490] sm:$0xff] }
  0x56   : > { %454 = vst [vmem:[%s4059_s29 + $0x400] sm:$0xff] %v453_v0  ;;  %v459_v3 = vld [vmem:[%s4054_s28 + $0x2498] sm:$0xff]  ;;  %456 = vst [vmem:[%s4059_s29 + $0x408] sm:$0xff] %v455_v1  ;;  %v461_v4 = vld [vmem:[%s4054_s28 + $0x2520] sm:$0xff] }
  0x57   : > { %458 = vst [vmem:[%s4059_s29 + $0x410] sm:$0xff] %v457_v2  ;;  %460 = vst [vmem:[%s4059_s29 + $0x418] sm:$0xff] %v459_v3  ;;  %v463_v5 = vld [vmem:[%s4054_s28 + $0x2528] sm:$0xff]  ;;  %v465_v6 = vld [vmem:[%s4054_s28 + $0x25b0] sm:$0xff] }
  0x58   : > { %462 = vst [vmem:[%s4059_s29 + $0x420] sm:$0xff] %v461_v4  ;;  %464 = vst [vmem:[%s4059_s29 + $0x428] sm:$0xff] %v463_v5  ;;  %v467_v7 = vld [vmem:[%s4054_s28 + $0x25b8] sm:$0xff]  ;;  %v469_v8 = vld [vmem:[%s4054_s28 + $0x2640] sm:$0xff] }
  0x59   : > { %466 = vst [vmem:[%s4059_s29 + $0x430] sm:$0xff] %v465_v6  ;;  %v471_v9 = vld [vmem:[%s4054_s28 + $0x2648] sm:$0xff]  ;;  %468 = vst [vmem:[%s4059_s29 + $0x438] sm:$0xff] %v467_v7  ;;  %v473_v10 = vld [vmem:[%s4054_s28 + $0x26d0] sm:$0xff] }
  0x5a   : > { %470 = vst [vmem:[%s4059_s29 + $0x440] sm:$0xff] %v469_v8  ;;  %472 = vst [vmem:[%s4059_s29 + $0x448] sm:$0xff] %v471_v9  ;;  %v475_v11 = vld [vmem:[%s4054_s28 + $0x26d8] sm:$0xff]  ;;  %v477_v12 = vld [vmem:[%s4054_s28 + $0x2760] sm:$0xff] }
  0x5b   : > { %474 = vst [vmem:[%s4059_s29 + $0x450] sm:$0xff] %v473_v10  ;;  %476 = vst [vmem:[%s4059_s29 + $0x458] sm:$0xff] %v475_v11  ;;  %v479_v13 = vld [vmem:[%s4054_s28 + $0x2768] sm:$0xff]  ;;  %v481_v14 = vld [vmem:[%s4054_s28 + $0x27f0] sm:$0xff] }
  0x5c   : > { %478 = vst [vmem:[%s4059_s29 + $0x460] sm:$0xff] %v477_v12  ;;  %v483_v15 = vld [vmem:[%s4054_s28 + $0x27f8] sm:$0xff]  ;;  %480 = vst [vmem:[%s4059_s29 + $0x468] sm:$0xff] %v479_v13  ;;  %v485_v16 = vld [vmem:[%s4054_s28 + $0x2880] sm:$0xff] }
  0x5d   : > { %482 = vst [vmem:[%s4059_s29 + $0x470] sm:$0xff] %v481_v14  ;;  %484 = vst [vmem:[%s4059_s29 + $0x478] sm:$0xff] %v483_v15  ;;  %v487_v17 = vld [vmem:[%s4054_s28 + $0x2888] sm:$0xff]  ;;  %v489_v18 = vld [vmem:[%s4054_s28 + $0x2910] sm:$0xff] }
  0x5e   : > { %486 = vst [vmem:[%s4059_s29 + $0x480] sm:$0xff] %v485_v16  ;;  %488 = vst [vmem:[%s4059_s29 + $0x488] sm:$0xff] %v487_v17  ;;  %v491_v19 = vld [vmem:[%s4054_s28 + $0x2918] sm:$0xff]  ;;  %v493_v20 = vld [vmem:[%s4054_s28 + $0x29a0] sm:$0xff] }
  0x5f   : > { %490 = vst [vmem:[%s4059_s29 + $0x490] sm:$0xff] %v489_v18  ;;  %v495_v21 = vld [vmem:[%s4054_s28 + $0x29a8] sm:$0xff]  ;;  %492 = vst [vmem:[%s4059_s29 + $0x498] sm:$0xff] %v491_v19  ;;  %v497_v22 = vld [vmem:[%s4054_s28 + $0x2a30] sm:$0xff] }
  0x60   : > { %494 = vst [vmem:[%s4059_s29 + $0x4a0] sm:$0xff] %v493_v20  ;;  %496 = vst [vmem:[%s4059_s29 + $0x4a8] sm:$0xff] %v495_v21  ;;  %v499_v23 = vld [vmem:[%s4054_s28 + $0x2a38] sm:$0xff]  ;;  %v501_v24 = vld [vmem:[%s4054_s28 + $0x2ac0] sm:$0xff] }
  0x61   : > { %498 = vst [vmem:[%s4059_s29 + $0x4b0] sm:$0xff] %v497_v22  ;;  %500 = vst [vmem:[%s4059_s29 + $0x4b8] sm:$0xff] %v499_v23  ;;  %v503_v25 = vld [vmem:[%s4054_s28 + $0x2ac8] sm:$0xff]  ;;  %v505_v26 = vld [vmem:[%s4054_s28 + $0x2b50] sm:$0xff] }
  0x62   : > { %502 = vst [vmem:[%s4059_s29 + $0x4c0] sm:$0xff] %v501_v24  ;;  %v507_v27 = vld [vmem:[%s4054_s28 + $0x2b58] sm:$0xff]  ;;  %504 = vst [vmem:[%s4059_s29 + $0x4c8] sm:$0xff] %v503_v25  ;;  %v509_v28 = vld [vmem:[%s4054_s28 + $0x2be0] sm:$0xff] }
  0x63   : > { %506 = vst [vmem:[%s4059_s29 + $0x4d0] sm:$0xff] %v505_v26  ;;  %508 = vst [vmem:[%s4059_s29 + $0x4d8] sm:$0xff] %v507_v27  ;;  %v511_v29 = vld [vmem:[%s4054_s28 + $0x2be8] sm:$0xff]  ;;  %v513_v30 = vld [vmem:[%s4054_s28 + $0x2c70] sm:$0xff] }
  0x64   : > { %510 = vst [vmem:[%s4059_s29 + $0x4e0] sm:$0xff] %v509_v28  ;;  %512 = vst [vmem:[%s4059_s29 + $0x4e8] sm:$0xff] %v511_v29  ;;  %v515_v31 = vld [vmem:[%s4054_s28 + $0x2c78] sm:$0xff]  ;;  %v517_v32 = vld [vmem:[%s4054_s28 + $0x2d00] sm:$0xff] }
  0x65   : > { %514 = vst [vmem:[%s4059_s29 + $0x4f0] sm:$0xff] %v513_v30  ;;  %v519_v33 = vld [vmem:[%s4054_s28 + $0x2d08] sm:$0xff]  ;;  %516 = vst [vmem:[%s4059_s29 + $0x4f8] sm:$0xff] %v515_v31  ;;  %v521_v34 = vld [vmem:[%s4054_s28 + $0x2d90] sm:$0xff] }
  0x66   : > { %518 = vst [vmem:[%s4059_s29 + $0x500] sm:$0xff] %v517_v32  ;;  %520 = vst [vmem:[%s4059_s29 + $0x508] sm:$0xff] %v519_v33  ;;  %v523_v35 = vld [vmem:[%s4054_s28 + $0x2d98] sm:$0xff]  ;;  %v525_v36 = vld [vmem:[%s4054_s28 + $0x2e20] sm:$0xff] }
  0x67   : > { %522 = vst [vmem:[%s4059_s29 + $0x510] sm:$0xff] %v521_v34  ;;  %524 = vst [vmem:[%s4059_s29 + $0x518] sm:$0xff] %v523_v35  ;;  %v527_v37 = vld [vmem:[%s4054_s28 + $0x2e28] sm:$0xff]  ;;  %v529_v38 = vld [vmem:[%s4054_s28 + $0x2eb0] sm:$0xff] }
  0x68   : > { %526 = vst [vmem:[%s4059_s29 + $0x520] sm:$0xff] %v525_v36  ;;  %v531_v39 = vld [vmem:[%s4054_s28 + $0x2eb8] sm:$0xff]  ;;  %528 = vst [vmem:[%s4059_s29 + $0x528] sm:$0xff] %v527_v37  ;;  %v533_v40 = vld [vmem:[%s4054_s28 + $0x2f40] sm:$0xff] }
  0x69   : > { %530 = vst [vmem:[%s4059_s29 + $0x530] sm:$0xff] %v529_v38  ;;  %532 = vst [vmem:[%s4059_s29 + $0x538] sm:$0xff] %v531_v39  ;;  %v535_v41 = vld [vmem:[%s4054_s28 + $0x2f48] sm:$0xff]  ;;  %v537_v42 = vld [vmem:[%s4054_s28 + $0x2fd0] sm:$0xff] }
  0x6a   : > { %534 = vst [vmem:[%s4059_s29 + $0x540] sm:$0xff] %v533_v40  ;;  %536 = vst [vmem:[%s4059_s29 + $0x548] sm:$0xff] %v535_v41  ;;  %v539_v43 = vld [vmem:[%s4054_s28 + $0x2fd8] sm:$0xff]  ;;  %v541_v44 = vld [vmem:[%s4054_s28 + $0x3060] sm:$0xff] }
  0x6b   : > { %538 = vst [vmem:[%s4059_s29 + $0x550] sm:$0xff] %v537_v42  ;;  %v543_v45 = vld [vmem:[%s4054_s28 + $0x3068] sm:$0xff]  ;;  %540 = vst [vmem:[%s4059_s29 + $0x558] sm:$0xff] %v539_v43  ;;  %v545_v46 = vld [vmem:[%s4054_s28 + $0x30f0] sm:$0xff] }
  0x6c   : > { %542 = vst [vmem:[%s4059_s29 + $0x560] sm:$0xff] %v541_v44  ;;  %544 = vst [vmem:[%s4059_s29 + $0x568] sm:$0xff] %v543_v45  ;;  %v547_v47 = vld [vmem:[%s4054_s28 + $0x30f8] sm:$0xff]  ;;  %v549_v48 = vld [vmem:[%s4054_s28 + $0x3180] sm:$0xff] }
  0x6d   : > { %546 = vst [vmem:[%s4059_s29 + $0x570] sm:$0xff] %v545_v46  ;;  %548 = vst [vmem:[%s4059_s29 + $0x578] sm:$0xff] %v547_v47  ;;  %v551_v49 = vld [vmem:[%s4054_s28 + $0x3188] sm:$0xff]  ;;  %v553_v50 = vld [vmem:[%s4054_s28 + $0x3210] sm:$0xff] }
  0x6e   : > { %550 = vst [vmem:[%s4059_s29 + $0x580] sm:$0xff] %v549_v48  ;;  %v555_v51 = vld [vmem:[%s4054_s28 + $0x3218] sm:$0xff]  ;;  %552 = vst [vmem:[%s4059_s29 + $0x588] sm:$0xff] %v551_v49  ;;  %v557_v52 = vld [vmem:[%s4054_s28 + $0x32a0] sm:$0xff] }
  0x6f   : > { %554 = vst [vmem:[%s4059_s29 + $0x590] sm:$0xff] %v553_v50  ;;  %556 = vst [vmem:[%s4059_s29 + $0x598] sm:$0xff] %v555_v51  ;;  %v559_v53 = vld [vmem:[%s4054_s28 + $0x32a8] sm:$0xff]  ;;  %v561_v54 = vld [vmem:[%s4054_s28 + $0x3330] sm:$0xff] }
  0x70   : > { %558 = vst [vmem:[%s4059_s29 + $0x5a0] sm:$0xff] %v557_v52  ;;  %560 = vst [vmem:[%s4059_s29 + $0x5a8] sm:$0xff] %v559_v53  ;;  %v563_v55 = vld [vmem:[%s4054_s28 + $0x3338] sm:$0xff]  ;;  %v565_v56 = vld [vmem:[%s4054_s28 + $0x33c0] sm:$0xff] }
  0x71   : > { %562 = vst [vmem:[%s4059_s29 + $0x5b0] sm:$0xff] %v561_v54  ;;  %v567_v57 = vld [vmem:[%s4054_s28 + $0x33c8] sm:$0xff]  ;;  %564 = vst [vmem:[%s4059_s29 + $0x5b8] sm:$0xff] %v563_v55  ;;  %v569_v58 = vld [vmem:[%s4054_s28 + $0x3450] sm:$0xff] }
  0x72   : > { %566 = vst [vmem:[%s4059_s29 + $0x5c0] sm:$0xff] %v565_v56  ;;  %568 = vst [vmem:[%s4059_s29 + $0x5c8] sm:$0xff] %v567_v57  ;;  %v571_v59 = vld [vmem:[%s4054_s28 + $0x3458] sm:$0xff]  ;;  %v573_v60 = vld [vmem:[%s4054_s28 + $0x34e0] sm:$0xff] }
  0x73   : > { %570 = vst [vmem:[%s4059_s29 + $0x5d0] sm:$0xff] %v569_v58  ;;  %572 = vst [vmem:[%s4059_s29 + $0x5d8] sm:$0xff] %v571_v59  ;;  %v575_v61 = vld [vmem:[%s4054_s28 + $0x34e8] sm:$0xff]  ;;  %v577_v62 = vld [vmem:[%s4054_s28 + $0x3570] sm:$0xff] }
  0x74   : > { %574 = vst [vmem:[%s4059_s29 + $0x5e0] sm:$0xff] %v573_v60  ;;  %v579_v63 = vld [vmem:[%s4054_s28 + $0x3578] sm:$0xff]  ;;  %576 = vst [vmem:[%s4059_s29 + $0x5e8] sm:$0xff] %v575_v61  ;;  %v581_v0 = vld [vmem:[%s4054_s28 + $0x3600] sm:$0xff] }
  0x75   : > { %578 = vst [vmem:[%s4059_s29 + $0x5f0] sm:$0xff] %v577_v62  ;;  %580 = vst [vmem:[%s4059_s29 + $0x5f8] sm:$0xff] %v579_v63  ;;  %v583_v1 = vld [vmem:[%s4054_s28 + $0x3608] sm:$0xff]  ;;  %v585_v2 = vld [vmem:[%s4054_s28 + $0x3690] sm:$0xff] }
  0x76   : > { %582 = vst [vmem:[%s4059_s29 + $0x600] sm:$0xff] %v581_v0  ;;  %584 = vst [vmem:[%s4059_s29 + $0x608] sm:$0xff] %v583_v1  ;;  %v587_v3 = vld [vmem:[%s4054_s28 + $0x3698] sm:$0xff]  ;;  %v589_v4 = vld [vmem:[%s4054_s28 + $0x3720] sm:$0xff] }
  0x77   : > { %586 = vst [vmem:[%s4059_s29 + $0x610] sm:$0xff] %v585_v2  ;;  %v591_v5 = vld [vmem:[%s4054_s28 + $0x3728] sm:$0xff]  ;;  %588 = vst [vmem:[%s4059_s29 + $0x618] sm:$0xff] %v587_v3  ;;  %v593_v6 = vld [vmem:[%s4054_s28 + $0x37b0] sm:$0xff] }
  0x78   : > { %590 = vst [vmem:[%s4059_s29 + $0x620] sm:$0xff] %v589_v4  ;;  %592 = vst [vmem:[%s4059_s29 + $0x628] sm:$0xff] %v591_v5  ;;  %v595_v7 = vld [vmem:[%s4054_s28 + $0x37b8] sm:$0xff]  ;;  %v597_v8 = vld [vmem:[%s4054_s28 + $0x3840] sm:$0xff] }
  0x79   : > { %594 = vst [vmem:[%s4059_s29 + $0x630] sm:$0xff] %v593_v6  ;;  %596 = vst [vmem:[%s4059_s29 + $0x638] sm:$0xff] %v595_v7  ;;  %v599_v9 = vld [vmem:[%s4054_s28 + $0x3848] sm:$0xff]  ;;  %v601_v10 = vld [vmem:[%s4054_s28 + $0x38d0] sm:$0xff] }
  0x7a   : > { %598 = vst [vmem:[%s4059_s29 + $0x640] sm:$0xff] %v597_v8  ;;  %v603_v11 = vld [vmem:[%s4054_s28 + $0x38d8] sm:$0xff]  ;;  %600 = vst [vmem:[%s4059_s29 + $0x648] sm:$0xff] %v599_v9  ;;  %v605_v12 = vld [vmem:[%s4054_s28 + $0x3960] sm:$0xff] }
  0x7b   : > { %602 = vst [vmem:[%s4059_s29 + $0x650] sm:$0xff] %v601_v10  ;;  %604 = vst [vmem:[%s4059_s29 + $0x658] sm:$0xff] %v603_v11  ;;  %v607_v13 = vld [vmem:[%s4054_s28 + $0x3968] sm:$0xff]  ;;  %v609_v14 = vld [vmem:[%s4054_s28 + $0x39f0] sm:$0xff] }
  0x7c   : > { %606 = vst [vmem:[%s4059_s29 + $0x660] sm:$0xff] %v605_v12  ;;  %608 = vst [vmem:[%s4059_s29 + $0x668] sm:$0xff] %v607_v13  ;;  %v611_v15 = vld [vmem:[%s4054_s28 + $0x39f8] sm:$0xff]  ;;  %v613_v16 = vld [vmem:[%s4054_s28 + $0x3a80] sm:$0xff] }
  0x7d   : > { %610 = vst [vmem:[%s4059_s29 + $0x670] sm:$0xff] %v609_v14  ;;  %v615_v17 = vld [vmem:[%s4054_s28 + $0x3a88] sm:$0xff]  ;;  %612 = vst [vmem:[%s4059_s29 + $0x678] sm:$0xff] %v611_v15  ;;  %v617_v18 = vld [vmem:[%s4054_s28 + $0x3b10] sm:$0xff] }
  0x7e   : > { %614 = vst [vmem:[%s4059_s29 + $0x680] sm:$0xff] %v613_v16  ;;  %616 = vst [vmem:[%s4059_s29 + $0x688] sm:$0xff] %v615_v17  ;;  %v619_v19 = vld [vmem:[%s4054_s28 + $0x3b18] sm:$0xff]  ;;  %v621_v20 = vld [vmem:[%s4054_s28 + $0x3ba0] sm:$0xff] }
  0x7f   : > { %618 = vst [vmem:[%s4059_s29 + $0x690] sm:$0xff] %v617_v18  ;;  %620 = vst [vmem:[%s4059_s29 + $0x698] sm:$0xff] %v619_v19  ;;  %v623_v21 = vld [vmem:[%s4054_s28 + $0x3ba8] sm:$0xff]  ;;  %v625_v22 = vld [vmem:[%s4054_s28 + $0x3c30] sm:$0xff] }
  0x80   : > { %622 = vst [vmem:[%s4059_s29 + $0x6a0] sm:$0xff] %v621_v20  ;;  %v627_v23 = vld [vmem:[%s4054_s28 + $0x3c38] sm:$0xff]  ;;  %624 = vst [vmem:[%s4059_s29 + $0x6a8] sm:$0xff] %v623_v21  ;;  %v629_v24 = vld [vmem:[%s4054_s28 + $0x3cc0] sm:$0xff] }
  0x81   : > { %626 = vst [vmem:[%s4059_s29 + $0x6b0] sm:$0xff] %v625_v22  ;;  %628 = vst [vmem:[%s4059_s29 + $0x6b8] sm:$0xff] %v627_v23  ;;  %v631_v25 = vld [vmem:[%s4054_s28 + $0x3cc8] sm:$0xff]  ;;  %v633_v26 = vld [vmem:[%s4054_s28 + $0x3d50] sm:$0xff] }
  0x82   : > { %630 = vst [vmem:[%s4059_s29 + $0x6c0] sm:$0xff] %v629_v24  ;;  %632 = vst [vmem:[%s4059_s29 + $0x6c8] sm:$0xff] %v631_v25  ;;  %v635_v27 = vld [vmem:[%s4054_s28 + $0x3d58] sm:$0xff]  ;;  %v637_v28 = vld [vmem:[%s4054_s28 + $0x3de0] sm:$0xff] }
  0x83   : > { %634 = vst [vmem:[%s4059_s29 + $0x6d0] sm:$0xff] %v633_v26  ;;  %v639_v29 = vld [vmem:[%s4054_s28 + $0x3de8] sm:$0xff]  ;;  %636 = vst [vmem:[%s4059_s29 + $0x6d8] sm:$0xff] %v635_v27  ;;  %v641_v30 = vld [vmem:[%s4054_s28 + $0x3e70] sm:$0xff] }
  0x84   : > { %638 = vst [vmem:[%s4059_s29 + $0x6e0] sm:$0xff] %v637_v28  ;;  %640 = vst [vmem:[%s4059_s29 + $0x6e8] sm:$0xff] %v639_v29  ;;  %v643_v31 = vld [vmem:[%s4054_s28 + $0x3e78] sm:$0xff]  ;;  %v645_v32 = vld [vmem:[%s4054_s28 + $0x3f00] sm:$0xff] }
  0x85   : > { %642 = vst [vmem:[%s4059_s29 + $0x6f0] sm:$0xff] %v641_v30  ;;  %644 = vst [vmem:[%s4059_s29 + $0x6f8] sm:$0xff] %v643_v31  ;;  %v647_v33 = vld [vmem:[%s4054_s28 + $0x3f08] sm:$0xff]  ;;  %v649_v34 = vld [vmem:[%s4054_s28 + $0x3f90] sm:$0xff] }
  0x86   : > { %646 = vst [vmem:[%s4059_s29 + $0x700] sm:$0xff] %v645_v32  ;;  %v651_v35 = vld [vmem:[%s4054_s28 + $0x3f98] sm:$0xff]  ;;  %648 = vst [vmem:[%s4059_s29 + $0x708] sm:$0xff] %v647_v33  ;;  %v653_v36 = vld [vmem:[%s4054_s28 + $0x4020] sm:$0xff] }
  0x87   : > { %650 = vst [vmem:[%s4059_s29 + $0x710] sm:$0xff] %v649_v34  ;;  %652 = vst [vmem:[%s4059_s29 + $0x718] sm:$0xff] %v651_v35  ;;  %v655_v37 = vld [vmem:[%s4054_s28 + $0x4028] sm:$0xff]  ;;  %v657_v38 = vld [vmem:[%s4054_s28 + $0x40b0] sm:$0xff] }
  0x88   : > { %654 = vst [vmem:[%s4059_s29 + $0x720] sm:$0xff] %v653_v36  ;;  %656 = vst [vmem:[%s4059_s29 + $0x728] sm:$0xff] %v655_v37  ;;  %v659_v39 = vld [vmem:[%s4054_s28 + $0x40b8] sm:$0xff]  ;;  %v661_v40 = vld [vmem:[%s4054_s28 + $0x4140] sm:$0xff] }
  0x89   : > { %658 = vst [vmem:[%s4059_s29 + $0x730] sm:$0xff] %v657_v38  ;;  %v663_v41 = vld [vmem:[%s4054_s28 + $0x4148] sm:$0xff]  ;;  %660 = vst [vmem:[%s4059_s29 + $0x738] sm:$0xff] %v659_v39  ;;  %v665_v42 = vld [vmem:[%s4054_s28 + $0x41d0] sm:$0xff] }
  0x8a   : > { %662 = vst [vmem:[%s4059_s29 + $0x740] sm:$0xff] %v661_v40  ;;  %664 = vst [vmem:[%s4059_s29 + $0x748] sm:$0xff] %v663_v41  ;;  %v667_v43 = vld [vmem:[%s4054_s28 + $0x41d8] sm:$0xff]  ;;  %v669_v44 = vld [vmem:[%s4054_s28 + $0x4260] sm:$0xff] }
  0x8b   : > { %666 = vst [vmem:[%s4059_s29 + $0x750] sm:$0xff] %v665_v42  ;;  %668 = vst [vmem:[%s4059_s29 + $0x758] sm:$0xff] %v667_v43  ;;  %v671_v45 = vld [vmem:[%s4054_s28 + $0x4268] sm:$0xff]  ;;  %v673_v46 = vld [vmem:[%s4054_s28 + $0x42f0] sm:$0xff] }
  0x8c   : > { %670 = vst [vmem:[%s4059_s29 + $0x760] sm:$0xff] %v669_v44  ;;  %v675_v47 = vld [vmem:[%s4054_s28 + $0x42f8] sm:$0xff]  ;;  %672 = vst [vmem:[%s4059_s29 + $0x768] sm:$0xff] %v671_v45  ;;  %v677_v48 = vld [vmem:[%s4054_s28 + $0x4380] sm:$0xff] }
  0x8d   : > { %674 = vst [vmem:[%s4059_s29 + $0x770] sm:$0xff] %v673_v46  ;;  %676 = vst [vmem:[%s4059_s29 + $0x778] sm:$0xff] %v675_v47  ;;  %v679_v49 = vld [vmem:[%s4054_s28 + $0x4388] sm:$0xff]  ;;  %v681_v50 = vld [vmem:[%s4054_s28 + $0x4410] sm:$0xff] }
  0x8e   : > { %678 = vst [vmem:[%s4059_s29 + $0x780] sm:$0xff] %v677_v48  ;;  %680 = vst [vmem:[%s4059_s29 + $0x788] sm:$0xff] %v679_v49  ;;  %v683_v51 = vld [vmem:[%s4054_s28 + $0x4418] sm:$0xff]  ;;  %v685_v52 = vld [vmem:[%s4054_s28 + $0x44a0] sm:$0xff] }
  0x8f   : > { %682 = vst [vmem:[%s4059_s29 + $0x790] sm:$0xff] %v681_v50  ;;  %v687_v53 = vld [vmem:[%s4054_s28 + $0x44a8] sm:$0xff]  ;;  %684 = vst [vmem:[%s4059_s29 + $0x798] sm:$0xff] %v683_v51  ;;  %v689_v54 = vld [vmem:[%s4054_s28 + $0x4530] sm:$0xff] }
  0x90   : > { %686 = vst [vmem:[%s4059_s29 + $0x7a0] sm:$0xff] %v685_v52  ;;  %688 = vst [vmem:[%s4059_s29 + $0x7a8] sm:$0xff] %v687_v53  ;;  %v691_v55 = vld [vmem:[%s4054_s28 + $0x4538] sm:$0xff]  ;;  %v693_v56 = vld [vmem:[%s4054_s28 + $0x45c0] sm:$0xff] }
  0x91   : > { %690 = vst [vmem:[%s4059_s29 + $0x7b0] sm:$0xff] %v689_v54  ;;  %692 = vst [vmem:[%s4059_s29 + $0x7b8] sm:$0xff] %v691_v55  ;;  %v695_v57 = vld [vmem:[%s4054_s28 + $0x45c8] sm:$0xff]  ;;  %v697_v58 = vld [vmem:[%s4054_s28 + $0x4650] sm:$0xff] }
  0x92   : > { %694 = vst [vmem:[%s4059_s29 + $0x7c0] sm:$0xff] %v693_v56  ;;  %v699_v59 = vld [vmem:[%s4054_s28 + $0x4658] sm:$0xff]  ;;  %696 = vst [vmem:[%s4059_s29 + $0x7c8] sm:$0xff] %v695_v57  ;;  %v701_v60 = vld [vmem:[%s4054_s28 + $0x46e0] sm:$0xff] }
  0x93   : > { %698 = vst [vmem:[%s4059_s29 + $0x7d0] sm:$0xff] %v697_v58  ;;  %700 = vst [vmem:[%s4059_s29 + $0x7d8] sm:$0xff] %v699_v59  ;;  %v703_v61 = vld [vmem:[%s4054_s28 + $0x46e8] sm:$0xff]  ;;  %v705_v62 = vld [vmem:[%s4054_s28 + $0x4770] sm:$0xff] }
  0x94   : > { %702 = vst [vmem:[%s4059_s29 + $0x7e0] sm:$0xff] %v701_v60  ;;  %704 = vst [vmem:[%s4059_s29 + $0x7e8] sm:$0xff] %v703_v61  ;;  %v707_v63 = vld [vmem:[%s4054_s28 + $0x4778] sm:$0xff] }
  0x95   : > { %706 = vst [vmem:[%s4059_s29 + $0x7f0] sm:$0xff] %v705_v62  ;;  %708 = vst [vmem:[%s4059_s29 + $0x7f8] sm:$0xff] %v707_v63 }
  0x96 PF: > { %p3190_p8 = scmp.ge.s32.totalorder %s3984_s16, 1  ;;  %p722_p9 = scmp.lt.s32.totalorder %s3984_s16, 10 }
  0x98   : > { %p723_p10 = pnand %p3190_p8, %p722_p9 }
  0x99   : > { %s729_s30 = sand.u32 (!%p723_p10), 1, %s3968_s12   ;;  %v824_v0 = vld [vmem:[%s4970_s0] sm:$0xff] (!%p723_p10) }
  0x9a   : > { %726 = sbr.rel (%p723_p10) target bundleno = 650 (0x28a), region = 51  ;;  %v828_v1 = vld [vmem:[%s4970_s0 + $0x20] sm:$0xff] (!%p723_p10)  ;;  %s3191_s8 = sshll.u32 (!%p723_p10), %s729_s30, 11 }
  0x9b   : > { %v4581_v2 = vcombine.low (!%p723_p10), %v824_v0, %v828_v1  ;;  %v3196_v3 = vcombine.high (!%p723_p10), %v824_v0, %v828_v1  ;;  %s4583_s9 = scalar_lea.vmem (!%p723_p10), [#allocation3], %s3191_s8  ;;  %s3192_s7 = sshll.u32 (!%p723_p10), %s729_s30, 7 }
  0x9c   : > { %v3562_v4 = vld [vmem:[%s4583_s9 + $0x4] ss:$16 sps:$4 sm:$0xff] (!%p723_p10)   ;;  %v3564_v5 = vld [vmem:[%s4583_s9 + $0xc] ss:$16 sps:$4 sm:$0xff] (!%p723_p10)   ;;  %v3566_v6 = vld [vmem:[%s4583_s9] ss:$16 sps:$4 sm:$0xff] (!%p723_p10)  }
  0x9d   : > { %2488 = vmatprep.mubr.bf16.mxu0 (!%p723_p10), %v3196_v3  ;;  %2700 = vmatprep.mubr.bf16.mxu1 (!%p723_p10), %v3196_v3  ;;  %v3567_v7 = vld [vmem:[%s4583_s9 + $0x8] ss:$16 sps:$4 sm:$0xff] (!%p723_p10)   ;;  %v3568_v8 = vld [vmem:[%s4583_s9 + $0x24] ss:$16 sps:$4 sm:$0xff] (!%p723_p10)   ;;  %v3570_v9 = vld [vmem:[%s4583_s9 + $0x2c] ss:$16 sps:$4 sm:$0xff] (!%p723_p10)  }
  0x9e   : > { %2456 = vmatprep.subr.bf16.mxu0 (!%p723_p10), %v3562_v4  ;;  %2668 = vmatprep.subr.bf16.mxu1 (!%p723_p10), %v3564_v5  ;;  %v3572_v10 = vld [vmem:[%s4583_s9 + $0x20] ss:$16 sps:$4 sm:$0xff] (!%p723_p10)   ;;  %v3573_v11 = vld [vmem:[%s4583_s9 + $0x28] ss:$16 sps:$4 sm:$0xff] (!%p723_p10)   ;;  %v3574_v12 = vld [vmem:[%s4583_s9 + $0x44] ss:$16 sps:$4 sm:$0xff] (!%p723_p10)  }
  0x9f   : > { %2457 = vmatpush1.bf16.msra.mxu0 (!%p723_p10), %v3566_v6  ;;  %2669 = vmatpush1.bf16.msra.mxu1 (!%p723_p10), %v3567_v7  ;;  %v3576_v13 = vld [vmem:[%s4583_s9 + $0x4c] ss:$16 sps:$4 sm:$0xff] (!%p723_p10)   ;;  %v3578_v14 = vld [vmem:[%s4583_s9 + $0x40] ss:$16 sps:$4 sm:$0xff] (!%p723_p10)   ;;  %v3579_v15 = vld [vmem:[%s4583_s9 + $0x48] ss:$16 sps:$4 sm:$0xff] (!%p723_p10)  }
  0xa0   : > { %2458 = vmatprep.subr.bf16.mxu0 (!%p723_p10), %v3568_v8  ;;  %2670 = vmatprep.subr.bf16.mxu1 (!%p723_p10), %v3570_v9  ;;  %v3580_v16 = vld [vmem:[%s4583_s9 + $0x64] ss:$16 sps:$4 sm:$0xff] (!%p723_p10)   ;;  %v3582_v17 = vld [vmem:[%s4583_s9 + $0x6c] ss:$16 sps:$4 sm:$0xff] (!%p723_p10)   ;;  %v3584_v18 = vld [vmem:[%s4583_s9 + $0x60] ss:$16 sps:$4 sm:$0xff] (!%p723_p10)  }
  0xa1   : > { %v3585_v19 = vld [vmem:[%s4583_s9 + $0x68] ss:$16 sps:$4 sm:$0xff]   ;;  %v3586_v20 = vld [vmem:[%s4583_s9 + $0x84] ss:$16 sps:$4 sm:$0xff]   ;;  %v3588_v21 = vld [vmem:[%s4583_s9 + $0x8c] ss:$16 sps:$4 sm:$0xff]  }
  0xa2   : > { %v3590_v22 = vld [vmem:[%s4583_s9 + $0x80] ss:$16 sps:$4 sm:$0xff]   ;;  %v3591_v23 = vld [vmem:[%s4583_s9 + $0x88] ss:$16 sps:$4 sm:$0xff]   ;;  %v3592_v24 = vld [vmem:[%s4583_s9 + $0xa4] ss:$16 sps:$4 sm:$0xff]  }
  0xa3   : > { %2459 = vmatpush1.bf16.msra.mxu0 %v3572_v10  ;;  %2671 = vmatpush1.bf16.msra.mxu1 %v3573_v11  ;;  %v3594_v25 = vld [vmem:[%s4583_s9 + $0xac] ss:$16 sps:$4 sm:$0xff]   ;;  %v3596_v26 = vld [vmem:[%s4583_s9 + $0xa0] ss:$16 sps:$4 sm:$0xff]   ;;  %v3597_v27 = vld [vmem:[%s4583_s9 + $0xa8] ss:$16 sps:$4 sm:$0xff]  }
  0xa4   : > { %2460 = vmatprep.subr.bf16.mxu0 %v3574_v12  ;;  %2672 = vmatprep.subr.bf16.mxu1 %v3576_v13  ;;  %v3598_v28 = vld [vmem:[%s4583_s9 + $0xc4] ss:$16 sps:$4 sm:$0xff]   ;;  %v3600_v29 = vld [vmem:[%s4583_s9 + $0xcc] ss:$16 sps:$4 sm:$0xff]   ;;  %v3602_v30 = vld [vmem:[%s4583_s9 + $0xc0] ss:$16 sps:$4 sm:$0xff]  }
  0xa5   : > { %v3603_v31 = vld [vmem:[%s4583_s9 + $0xc8] ss:$16 sps:$4 sm:$0xff]   ;;  %v3604_v32 = vld [vmem:[%s4583_s9 + $0xe4] ss:$16 sps:$4 sm:$0xff]   ;;  %v3606_v33 = vld [vmem:[%s4583_s9 + $0xec] ss:$16 sps:$4 sm:$0xff]  }
  0xa6   : > { %v3608_v34 = vld [vmem:[%s4583_s9 + $0xe0] ss:$16 sps:$4 sm:$0xff]   ;;  %v3609_v35 = vld [vmem:[%s4583_s9 + $0xe8] ss:$16 sps:$4 sm:$0xff]   ;;  %v3610_v36 = vld [vmem:[%s4583_s9 + $0x104] ss:$16 sps:$4 sm:$0xff]  }
  0xa7   : > { %2461 = vmatpush1.bf16.msra.mxu0 %v3578_v14  ;;  %2673 = vmatpush1.bf16.msra.mxu1 %v3579_v15  ;;  %v3612_v37 = vld [vmem:[%s4583_s9 + $0x10c] ss:$16 sps:$4 sm:$0xff]   ;;  %v3614_v38 = vld [vmem:[%s4583_s9 + $0x100] ss:$16 sps:$4 sm:$0xff]   ;;  %v3615_v39 = vld [vmem:[%s4583_s9 + $0x108] ss:$16 sps:$4 sm:$0xff]  }
  0xa8   : > { %2462 = vmatprep.subr.bf16.mxu0 %v3580_v16  ;;  %2674 = vmatprep.subr.bf16.mxu1 %v3582_v17  ;;  %v3616_v40 = vld [vmem:[%s4583_s9 + $0x124] ss:$16 sps:$4 sm:$0xff]   ;;  %v3618_v41 = vld [vmem:[%s4583_s9 + $0x12c] ss:$16 sps:$4 sm:$0xff]   ;;  %v3620_v42 = vld [vmem:[%s4583_s9 + $0x120] ss:$16 sps:$4 sm:$0xff]  }
  0xa9   : > { %v3621_v43 = vld [vmem:[%s4583_s9 + $0x128] ss:$16 sps:$4 sm:$0xff]   ;;  %v3622_v44 = vld [vmem:[%s4583_s9 + $0x144] ss:$16 sps:$4 sm:$0xff]   ;;  %v3624_v45 = vld [vmem:[%s4583_s9 + $0x14c] ss:$16 sps:$4 sm:$0xff]  }
  0xaa   : > { %v3626_v46 = vld [vmem:[%s4583_s9 + $0x140] ss:$16 sps:$4 sm:$0xff]   ;;  %v3627_v47 = vld [vmem:[%s4583_s9 + $0x148] ss:$16 sps:$4 sm:$0xff]   ;;  %v3628_v48 = vld [vmem:[%s4583_s9 + $0x164] ss:$16 sps:$4 sm:$0xff]  }
  0xab   : > { %2463 = vmatpush1.bf16.msra.mxu0 %v3584_v18  ;;  %2675 = vmatpush1.bf16.msra.mxu1 %v3585_v19  ;;  %v3630_v49 = vld [vmem:[%s4583_s9 + $0x16c] ss:$16 sps:$4 sm:$0xff]   ;;  %v3632_v50 = vld [vmem:[%s4583_s9 + $0x160] ss:$16 sps:$4 sm:$0xff]   ;;  %v3633_v51 = vld [vmem:[%s4583_s9 + $0x168] ss:$16 sps:$4 sm:$0xff]  }
  0xac   : > { %2464 = vmatprep.subr.bf16.mxu0 %v3586_v20  ;;  %2676 = vmatprep.subr.bf16.mxu1 %v3588_v21  ;;  %v3634_v52 = vld [vmem:[%s4583_s9 + $0x184] ss:$16 sps:$4 sm:$0xff]   ;;  %v3636_v53 = vld [vmem:[%s4583_s9 + $0x18c] ss:$16 sps:$4 sm:$0xff]   ;;  %v3638_v54 = vld [vmem:[%s4583_s9 + $0x180] ss:$16 sps:$4 sm:$0xff]  }
  0xad   : > { %v3639_v55 = vld [vmem:[%s4583_s9 + $0x188] ss:$16 sps:$4 sm:$0xff]   ;;  %v3640_v56 = vld [vmem:[%s4583_s9 + $0x1a4] ss:$16 sps:$4 sm:$0xff]   ;;  %v3642_v57 = vld [vmem:[%s4583_s9 + $0x1ac] ss:$16 sps:$4 sm:$0xff]  }
  0xae   : > { %v3644_v58 = vld [vmem:[%s4583_s9 + $0x1a0] ss:$16 sps:$4 sm:$0xff]   ;;  %v3645_v59 = vld [vmem:[%s4583_s9 + $0x1a8] ss:$16 sps:$4 sm:$0xff]   ;;  %v3646_v60 = vld [vmem:[%s4583_s9 + $0x1c4] ss:$16 sps:$4 sm:$0xff]  }
  0xaf   : > { %2465 = vmatpush1.bf16.msra.mxu0 %v3590_v22  ;;  %2677 = vmatpush1.bf16.msra.mxu1 %v3591_v23  ;;  %v3648_v61 = vld [vmem:[%s4583_s9 + $0x1cc] ss:$16 sps:$4 sm:$0xff]   ;;  %v3650_v62 = vld [vmem:[%s4583_s9 + $0x1c0] ss:$16 sps:$4 sm:$0xff]   ;;  %v3651_v63 = vld [vmem:[%s4583_s9 + $0x1c8] ss:$16 sps:$4 sm:$0xff]  }
  0xb0   : > { %2466 = vmatprep.subr.bf16.mxu0 %v3592_v24  ;;  %2678 = vmatprep.subr.bf16.mxu1 %v3594_v25  ;;  %v3652_v0 = vld [vmem:[%s4583_s9 + $0x1e4] ss:$16 sps:$4 sm:$0xff]   ;;  %v3654_v1 = vld [vmem:[%s4583_s9 + $0x1ec] ss:$16 sps:$4 sm:$0xff]   ;;  %v3656_v3 = vld [vmem:[%s4583_s9 + $0x1e0] ss:$16 sps:$4 sm:$0xff]  }
  0xb1   : > { %v3657_v4 = vld [vmem:[%s4583_s9 + $0x1e8] ss:$16 sps:$4 sm:$0xff]   ;;  %v3660_v5 = vld [vmem:[%s4583_s9 + $0x204] ss:$16 sps:$4 sm:$0xff]   ;;  %v3663_v6 = vld [vmem:[%s4583_s9 + $0x20c] ss:$16 sps:$4 sm:$0xff]  }
  0xb2   : > { %v832_v7 = vld [vmem:[%s4970_s0 + $0x40] sm:$0xff]  ;;  %v3661_v10 = vld [vmem:[%s4583_s9 + $0x208] ss:$16 sps:$4 sm:$0xff]   ;;  %v3669_v12 = vld [vmem:[%s4583_s9 + $0x22c] ss:$16 sps:$4 sm:$0xff]   ;;  %s4915_s12 = scalar_lea.vmem [#allocation4], %s3192_s7 }
  0xb3   : > { %2467 = vmatpush1.bf16.msra.mxu0 %v3596_v26  ;;  %2679 = vmatpush1.bf16.msra.mxu1 %v3597_v27  ;;  %v836_v8 = vld [vmem:[%s4970_s0 + $0x60] sm:$0xff]  ;;  %v3667_v15 = vld [vmem:[%s4583_s9 + $0x228] ss:$16 sps:$4 sm:$0xff]   ;;  %v3675_v17 = vld [vmem:[%s4583_s9 + $0x24c] ss:$16 sps:$4 sm:$0xff]   ;;  %s3473_s30 = sshll.u32 (%p4041_p6), %s3976_s14, 5 }
  0xb4   : > { %2468 = vmatprep.subr.bf16.mxu0 %v3598_v28  ;;  %2680 = vmatprep.subr.bf16.mxu1 %v3600_v29  ;;  %v3658_v9 = vld [vmem:[%s4583_s9 + $0x200] ss:$16 sps:$4 sm:$0xff]   ;;  %v3666_v11 = vld [vmem:[%s4583_s9 + $0x224] ss:$16 sps:$4 sm:$0xff]   ;;  %v3204_v13 = vcombine.high %v832_v7, %v836_v8  ;;  %v3673_v19 = vld [vmem:[%s4583_s9 + $0x248] ss:$16 sps:$4 sm:$0xff]   ;;  %v3203_v20 = vcombine.low %v832_v7, %v836_v8  ;;  %s3027_s11 = scalar_lea.vmem (%p4041_p6), %s4973_s3, %s3473_s30 }
  0xb5   : > { %v3664_v14 = vld [vmem:[%s4583_s9 + $0x220] ss:$16 sps:$4 sm:$0xff]   ;;  %v3672_v16 = vld [vmem:[%s4583_s9 + $0x244] ss:$16 sps:$4 sm:$0xff]   ;;  %v3681_v21 = vld [vmem:[%s4583_s9 + $0x26c] ss:$16 sps:$4 sm:$0xff]  }
  0xb6   : > { %v3670_v18 = vld [vmem:[%s4583_s9 + $0x240] ss:$16 sps:$4 sm:$0xff]   ;;  %v3679_v23 = vld [vmem:[%s4583_s9 + $0x268] ss:$16 sps:$4 sm:$0xff]   ;;  %v3684_v24 = vld [vmem:[%s4583_s9 + $0x284] ss:$16 sps:$4 sm:$0xff]  }
  0xb7   : > { %2469 = vmatpush1.bf16.msra.mxu0 %v3602_v30  ;;  %2681 = vmatpush1.bf16.msra.mxu1 %v3603_v31  ;;  %v3676_v22 = vld [vmem:[%s4583_s9 + $0x260] ss:$16 sps:$4 sm:$0xff]   ;;  %v3687_v25 = vld [vmem:[%s4583_s9 + $0x28c] ss:$16 sps:$4 sm:$0xff]   ;;  %v3685_v27 = vld [vmem:[%s4583_s9 + $0x288] ss:$16 sps:$4 sm:$0xff]  }
  0xb8   : > { %2470 = vmatprep.subr.bf16.mxu0 %v3604_v32  ;;  %2682 = vmatprep.subr.bf16.mxu1 %v3606_v33  ;;  %v3682_v26 = vld [vmem:[%s4583_s9 + $0x280] ss:$16 sps:$4 sm:$0xff]   ;;  %v3690_v28 = vld [vmem:[%s4583_s9 + $0x2a4] ss:$16 sps:$4 sm:$0xff]   ;;  %v3693_v29 = vld [vmem:[%s4583_s9 + $0x2ac] ss:$16 sps:$4 sm:$0xff]  }
  0xb9   : > { %v3688_v30 = vld [vmem:[%s4583_s9 + $0x2a0] ss:$16 sps:$4 sm:$0xff]   ;;  %v3691_v31 = vld [vmem:[%s4583_s9 + $0x2a8] ss:$16 sps:$4 sm:$0xff]   ;;  %v3696_v32 = vld [vmem:[%s4583_s9 + $0x2c4] ss:$16 sps:$4 sm:$0xff]  }
  0xba   : > { %v3699_v33 = vld [vmem:[%s4583_s9 + $0x2cc] ss:$16 sps:$4 sm:$0xff]   ;;  %v3745_v7 = vld [vmem:[%s4583_s9 + $0x3c8] ss:$16 sps:$4 sm:$0xff]   ;;  %v3750_v8 = vld [vmem:[%s4583_s9 + $0x3e4] ss:$16 sps:$4 sm:$0xff]  }
  0xbb   : > { %2471 = vmatpush1.bf16.msra.mxu0 %v3608_v34  ;;  %2683 = vmatpush1.bf16.msra.mxu1 %v3609_v35  ;;  %v4686_v34 = vld [vmem:[%s4970_s0 + $0x8] sm:$0xff] }
  0xbc   : > { %2472 = vmatprep.subr.bf16.mxu0 %v3610_v36  ;;  %2684 = vmatprep.subr.bf16.mxu1 %v3612_v37  ;;  %v4691_v35 = vld [vmem:[%s4970_s0 + $0x28] sm:$0xff]  ;;  %v3694_v37 = vld [vmem:[%s4583_s9 + $0x2c0] ss:$16 sps:$4 sm:$0xff]  }
  0xbd   : > { %v3198_v36 = vcombine.high %v4686_v34, %v4691_v35 }
  0xbf   : > { %2473 = vmatpush1.bf16.msra.mxu0 %v3614_v38  ;;  %2685 = vmatpush1.bf16.msra.mxu1 %v3615_v39  ;;  %v3697_v38 = vld [vmem:[%s4583_s9 + $0x2c8] ss:$16 sps:$4 sm:$0xff]   ;;  %v3702_v39 = vld [vmem:[%s4583_s9 + $0x2e4] ss:$16 sps:$4 sm:$0xff]  }
  0xc0   : > { %2474 = vmatprep.subr.bf16.mxu0 %v3616_v40  ;;  %2686 = vmatprep.subr.bf16.mxu1 %v3618_v41  ;;  %v3705_v40 = vld [vmem:[%s4583_s9 + $0x2ec] ss:$16 sps:$4 sm:$0xff]   ;;  %v3700_v41 = vld [vmem:[%s4583_s9 + $0x2e0] ss:$16 sps:$4 sm:$0xff]  }
  0xc3   : > { %2475 = vmatpush1.bf16.msra.mxu0 %v3620_v42  ;;  %2687 = vmatpush1.bf16.msra.mxu1 %v3621_v43  ;;  %v3703_v42 = vld [vmem:[%s4583_s9 + $0x2e8] ss:$16 sps:$4 sm:$0xff]   ;;  %v3708_v43 = vld [vmem:[%s4583_s9 + $0x304] ss:$16 sps:$4 sm:$0xff]  }
  0xc4   : > { %2476 = vmatprep.subr.bf16.mxu0 %v3622_v44  ;;  %2688 = vmatprep.subr.bf16.mxu1 %v3624_v45  ;;  %v3711_v44 = vld [vmem:[%s4583_s9 + $0x30c] ss:$16 sps:$4 sm:$0xff]   ;;  %v3706_v45 = vld [vmem:[%s4583_s9 + $0x300] ss:$16 sps:$4 sm:$0xff]  }
  0xc7   : > { %2477 = vmatpush1.bf16.msra.mxu0 %v3626_v46  ;;  %2689 = vmatpush1.bf16.msra.mxu1 %v3627_v47  ;;  %v3709_v46 = vld [vmem:[%s4583_s9 + $0x308] ss:$16 sps:$4 sm:$0xff]   ;;  %v3714_v47 = vld [vmem:[%s4583_s9 + $0x324] ss:$16 sps:$4 sm:$0xff]  }
  0xc8   : > { %2478 = vmatprep.subr.bf16.mxu0 %v3628_v48  ;;  %2690 = vmatprep.subr.bf16.mxu1 %v3630_v49  ;;  %v3717_v48 = vld [vmem:[%s4583_s9 + $0x32c] ss:$16 sps:$4 sm:$0xff]   ;;  %v3712_v49 = vld [vmem:[%s4583_s9 + $0x320] ss:$16 sps:$4 sm:$0xff]  }
  0xcb   : > { %2479 = vmatpush1.bf16.msra.mxu0 %v3632_v50  ;;  %2691 = vmatpush1.bf16.msra.mxu1 %v3633_v51  ;;  %v3715_v50 = vld [vmem:[%s4583_s9 + $0x328] ss:$16 sps:$4 sm:$0xff]   ;;  %v3720_v51 = vld [vmem:[%s4583_s9 + $0x344] ss:$16 sps:$4 sm:$0xff]  }
  0xcc   : > { %2480 = vmatprep.subr.bf16.mxu0 %v3634_v52  ;;  %2692 = vmatprep.subr.bf16.mxu1 %v3636_v53  ;;  %v3723_v52 = vld [vmem:[%s4583_s9 + $0x34c] ss:$16 sps:$4 sm:$0xff]   ;;  %v3718_v53 = vld [vmem:[%s4583_s9 + $0x340] ss:$16 sps:$4 sm:$0xff]  }
  0xcf   : > { %2481 = vmatpush1.bf16.msra.mxu0 %v3638_v54  ;;  %2693 = vmatpush1.bf16.msra.mxu1 %v3639_v55  ;;  %v3721_v54 = vld [vmem:[%s4583_s9 + $0x348] ss:$16 sps:$4 sm:$0xff]   ;;  %v3726_v55 = vld [vmem:[%s4583_s9 + $0x364] ss:$16 sps:$4 sm:$0xff]  }
  0xd0   : > { %2482 = vmatprep.subr.bf16.mxu0 %v3640_v56  ;;  %2694 = vmatprep.subr.bf16.mxu1 %v3642_v57  ;;  %v3729_v56 = vld [vmem:[%s4583_s9 + $0x36c] ss:$16 sps:$4 sm:$0xff]   ;;  %v3724_v57 = vld [vmem:[%s4583_s9 + $0x360] ss:$16 sps:$4 sm:$0xff]  }
  0xd3   : > { %2483 = vmatpush1.bf16.msra.mxu0 %v3644_v58  ;;  %2695 = vmatpush1.bf16.msra.mxu1 %v3645_v59  ;;  %v3727_v58 = vld [vmem:[%s4583_s9 + $0x368] ss:$16 sps:$4 sm:$0xff]   ;;  %v3732_v59 = vld [vmem:[%s4583_s9 + $0x384] ss:$16 sps:$4 sm:$0xff]  }
  0xd4   : > { %2484 = vmatprep.subr.bf16.mxu0 %v3646_v60  ;;  %2696 = vmatprep.subr.bf16.mxu1 %v3648_v61  ;;  %v3735_v60 = vld [vmem:[%s4583_s9 + $0x38c] ss:$16 sps:$4 sm:$0xff]   ;;  %v3730_v61 = vld [vmem:[%s4583_s9 + $0x380] ss:$16 sps:$4 sm:$0xff]  }
  0xd7   : > { %2485 = vmatpush1.bf16.msra.mxu0 %v3650_v62  ;;  %2697 = vmatpush1.bf16.msra.mxu1 %v3651_v63  ;;  %v3733_v62 = vld [vmem:[%s4583_s9 + $0x388] ss:$16 sps:$4 sm:$0xff]   ;;  %v3738_v63 = vld [vmem:[%s4583_s9 + $0x3a4] ss:$16 sps:$4 sm:$0xff]  }
  0xd8   : > { %2486 = vmatprep.subr.bf16.mxu0 %v3652_v0  ;;  %2698 = vmatprep.subr.bf16.mxu1 %v3654_v1  ;;  %v3741_v0 = vld [vmem:[%s4583_s9 + $0x3ac] ss:$16 sps:$4 sm:$0xff]   ;;  %v3736_v1 = vld [vmem:[%s4583_s9 + $0x3a0] ss:$16 sps:$4 sm:$0xff]  }
  0xdb   : > { %2487 = vmatpush1.bf16.msra.mxu0 %v3656_v3  ;;  %2699 = vmatpush1.bf16.msra.mxu1 %v3657_v4  ;;  %v3739_v3 = vld [vmem:[%s4583_s9 + $0x3a8] ss:$16 sps:$4 sm:$0xff]   ;;  %v3744_v4 = vld [vmem:[%s4583_s9 + $0x3c4] ss:$16 sps:$4 sm:$0xff]  }
  0xdc   : > { %2509 = vmatprep.subr.bf16.mxu0 %v3660_v5  ;;  %2721 = vmatprep.subr.bf16.mxu1 %v3663_v6  ;;  %v3747_v5 = vld [vmem:[%s4583_s9 + $0x3cc] ss:$16 sps:$4 sm:$0xff]   ;;  %v3742_v6 = vld [vmem:[%s4583_s9 + $0x3c0] ss:$16 sps:$4 sm:$0xff]  }
  0xde   : > { %2489 = vmatmul.mubr.bf16.vlgmr.msra.gmra.mrb[0].mxu0 %v4581_v2  ;;  %2701 = vmatmul.mubr.bf16.vlgmr.msra.gmra.mrb[0].mxu1 %v4581_v2  ;;  %v3678_v2 = vld [vmem:[%s4583_s9 + $0x264] ss:$16 sps:$4 sm:$0xff]  }
  0xdf   : > { %2510 = vmatpush1.bf16.msra.mxu0 %v3658_v9  ;;  %2722 = vmatpush1.bf16.msra.mxu1 %v3661_v10  ;;  %v3753_v9 = vld [vmem:[%s4583_s9 + $0x3ec] ss:$16 sps:$4 sm:$0xff]   ;;  %v3748_v10 = vld [vmem:[%s4583_s9 + $0x3e0] ss:$16 sps:$4 sm:$0xff]  }
  0xe0   : > { %2511 = vmatprep.subr.bf16.mxu0 %v3666_v11  ;;  %2723 = vmatprep.subr.bf16.mxu1 %v3669_v12  ;;  %v3751_v11 = vld [vmem:[%s4583_s9 + $0x3e8] ss:$16 sps:$4 sm:$0xff]   ;;  %v3756_v12 = vld [vmem:[%s4583_s9 + $0x404] ss:$16 sps:$4 sm:$0xff]  }
  0xe1   : > { %2498 = vmatprep.mubr.bf16.mxu0 %v3204_v13  ;;  %2710 = vmatprep.mubr.bf16.mxu1 %v3204_v13  ;;  %v3759_v13 = vld [vmem:[%s4583_s9 + $0x40c] ss:$16 sps:$4 sm:$0xff]  }
  0xe3   : > { %2512 = vmatpush1.bf16.msra.mxu0 %v3664_v14  ;;  %2724 = vmatpush1.bf16.msra.mxu1 %v3667_v15  ;;  %v3754_v14 = vld [vmem:[%s4583_s9 + $0x400] ss:$16 sps:$4 sm:$0xff]   ;;  %v3197_v15 = vcombine.low %v4686_v34, %v4691_v35  ;;  %v3775_v34 = vld [vmem:[%s4583_s9 + $0x468] ss:$16 sps:$4 sm:$0xff]   ;;  %v3780_v35 = vld [vmem:[%s4583_s9 + $0x484] ss:$16 sps:$4 sm:$0xff]  }
  0xe4   : > { %2513 = vmatprep.subr.bf16.mxu0 %v3672_v16  ;;  %2725 = vmatprep.subr.bf16.mxu1 %v3675_v17  ;;  %v833_v16 = vld [vmem:[%s4970_s0 + $0x48] sm:$0xff] }
  0xe5   : > { %v837_v17 = vld [vmem:[%s4970_s0 + $0x68] sm:$0xff] }
  0xe6   : > { %2499 = vmatmul.mubr.bf16.gmra.mrb[4].mxu0 %v3203_v20  ;;  %2711 = vmatmul.mubr.bf16.gmra.mrb[4].mxu1 %v3203_v20  ;;  %v3765_v20 = vld [vmem:[%s4583_s9 + $0x42c] ss:$16 sps:$4 sm:$0xff]  }
  0xe7   : > { %2514 = vmatpush1.bf16.msra.mxu0 %v3670_v18  ;;  %2726 = vmatpush1.bf16.msra.mxu1 %v3673_v19  ;;  %v3757_v18 = vld [vmem:[%s4583_s9 + $0x408] ss:$16 sps:$4 sm:$0xff]   ;;  %v3762_v19 = vld [vmem:[%s4583_s9 + $0x424] ss:$16 sps:$4 sm:$0xff]  }
  0xe8   : > { %2515 = vmatprep.subr.bf16.mxu0 %v3678_v2  ;;  %2727 = vmatprep.subr.bf16.mxu1 %v3681_v21  ;;  %v3206_v2 = vcombine.high %v833_v16, %v837_v17  ;;  %v3760_v21 = vld [vmem:[%s4583_s9 + $0x420] ss:$16 sps:$4 sm:$0xff]  }
  0xe9   : > { %2541 = vmatprep.mubr.bf16.mxu0 %v3198_v36  ;;  %2753 = vmatprep.mubr.bf16.mxu1 %v3198_v36  ;;  %v3783_v36 = vld [vmem:[%s4583_s9 + $0x48c] ss:$16 sps:$4 sm:$0xff]  }
  0xeb   : > { %2516 = vmatpush1.bf16.msra.mxu0 %v3676_v22  ;;  %2728 = vmatpush1.bf16.msra.mxu1 %v3679_v23  ;;  %v3763_v22 = vld [vmem:[%s4583_s9 + $0x428] ss:$16 sps:$4 sm:$0xff]   ;;  %v3768_v23 = vld [vmem:[%s4583_s9 + $0x444] ss:$16 sps:$4 sm:$0xff]  }
  0xec   : > { %2517 = vmatprep.subr.bf16.mxu0 %v3684_v24  ;;  %2729 = vmatprep.subr.bf16.mxu1 %v3687_v25  ;;  %v3771_v24 = vld [vmem:[%s4583_s9 + $0x44c] ss:$16 sps:$4 sm:$0xff]   ;;  %v4754_v25 = vld [vmem:[%s4970_s0 + $0x10] sm:$0xff] }
  0xef   : > { %2518 = vmatpush1.bf16.msra.mxu0 %v3682_v26  ;;  %2730 = vmatpush1.bf16.msra.mxu1 %v3685_v27  ;;  %v3205_v26 = vcombine.low %v833_v16, %v837_v17  ;;  %v4759_v27 = vld [vmem:[%s4970_s0 + $0x30] sm:$0xff]  ;;  %v3849_v17 = vld [vmem:[%s4583_s9 + $0x5ec] ss:$16 sps:$4 sm:$0xff]  }
  0xf0   : > { %2519 = vmatprep.subr.bf16.mxu0 %v3690_v28  ;;  %2731 = vmatprep.subr.bf16.mxu1 %v3693_v29  ;;  %v3766_v28 = vld [vmem:[%s4583_s9 + $0x440] ss:$16 sps:$4 sm:$0xff]   ;;  %v3769_v29 = vld [vmem:[%s4583_s9 + $0x448] ss:$16 sps:$4 sm:$0xff]   ;;  %v3846_v16 = vld [vmem:[%s4583_s9 + $0x5e4] ss:$16 sps:$4 sm:$0xff]  }
  0xf3   : > { %2520 = vmatpush1.bf16.msra.mxu0 %v3688_v30  ;;  %2732 = vmatpush1.bf16.msra.mxu1 %v3691_v31  ;;  %v3774_v30 = vld [vmem:[%s4583_s9 + $0x464] ss:$16 sps:$4 sm:$0xff]   ;;  %v3777_v31 = vld [vmem:[%s4583_s9 + $0x46c] ss:$16 sps:$4 sm:$0xff]  }
  0xf4   : > { %2521 = vmatprep.subr.bf16.mxu0 %v3696_v32  ;;  %2733 = vmatprep.subr.bf16.mxu1 %v3699_v33  ;;  %v3200_v32 = vcombine.high %v4754_v25, %v4759_v27  ;;  %v3772_v33 = vld [vmem:[%s4583_s9 + $0x460] ss:$16 sps:$4 sm:$0xff]  }
  0xf7   : > { %2522 = vmatpush1.bf16.msra.mxu0 %v3694_v37  ;;  %2734 = vmatpush1.bf16.msra.mxu1 %v3697_v38  ;;  %v3778_v37 = vld [vmem:[%s4583_s9 + $0x480] ss:$16 sps:$4 sm:$0xff]   ;;  %v3781_v38 = vld [vmem:[%s4583_s9 + $0x488] ss:$16 sps:$4 sm:$0xff]  }
  0xf8   : > { %2523 = vmatprep.subr.bf16.mxu0 %v3702_v39  ;;  %2735 = vmatprep.subr.bf16.mxu1 %v3705_v40  ;;  %v3786_v39 = vld [vmem:[%s4583_s9 + $0x4a4] ss:$16 sps:$4 sm:$0xff]   ;;  %v3789_v40 = vld [vmem:[%s4583_s9 + $0x4ac] ss:$16 sps:$4 sm:$0xff]  }
  0xfb   : > { %2524 = vmatpush1.bf16.msra.mxu0 %v3700_v41  ;;  %2736 = vmatpush1.bf16.msra.mxu1 %v3703_v42  ;;  %v3784_v41 = vld [vmem:[%s4583_s9 + $0x4a0] ss:$16 sps:$4 sm:$0xff]   ;;  %v3787_v42 = vld [vmem:[%s4583_s9 + $0x4a8] ss:$16 sps:$4 sm:$0xff]  }
  0xfc   : > { %2525 = vmatprep.subr.bf16.mxu0 %v3708_v43  ;;  %2737 = vmatprep.subr.bf16.mxu1 %v3711_v44  ;;  %v3792_v43 = vld [vmem:[%s4583_s9 + $0x4c4] ss:$16 sps:$4 sm:$0xff]   ;;  %v3795_v44 = vld [vmem:[%s4583_s9 + $0x4cc] ss:$16 sps:$4 sm:$0xff]  }
  0xff   : > { %2526 = vmatpush1.bf16.msra.mxu0 %v3706_v45  ;;  %2738 = vmatpush1.bf16.msra.mxu1 %v3709_v46  ;;  %v3790_v45 = vld [vmem:[%s4583_s9 + $0x4c0] ss:$16 sps:$4 sm:$0xff]   ;;  %v3793_v46 = vld [vmem:[%s4583_s9 + $0x4c8] ss:$16 sps:$4 sm:$0xff]  }
 0x100   : > { %2527 = vmatprep.subr.bf16.mxu0 %v3714_v47  ;;  %2739 = vmatprep.subr.bf16.mxu1 %v3717_v48  ;;  %v3798_v47 = vld [vmem:[%s4583_s9 + $0x4e4] ss:$16 sps:$4 sm:$0xff]   ;;  %v3801_v48 = vld [vmem:[%s4583_s9 + $0x4ec] ss:$16 sps:$4 sm:$0xff]  }
 0x103   : > { %2528 = vmatpush1.bf16.msra.mxu0 %v3712_v49  ;;  %2740 = vmatpush1.bf16.msra.mxu1 %v3715_v50  ;;  %v3796_v49 = vld [vmem:[%s4583_s9 + $0x4e0] ss:$16 sps:$4 sm:$0xff]   ;;  %v3799_v50 = vld [vmem:[%s4583_s9 + $0x4e8] ss:$16 sps:$4 sm:$0xff]  }
 0x104   : > { %2529 = vmatprep.subr.bf16.mxu0 %v3720_v51  ;;  %2741 = vmatprep.subr.bf16.mxu1 %v3723_v52  ;;  %v3804_v51 = vld [vmem:[%s4583_s9 + $0x504] ss:$16 sps:$4 sm:$0xff]   ;;  %v3807_v52 = vld [vmem:[%s4583_s9 + $0x50c] ss:$16 sps:$4 sm:$0xff]  }
 0x107   : > { %2530 = vmatpush1.bf16.msra.mxu0 %v3718_v53  ;;  %2742 = vmatpush1.bf16.msra.mxu1 %v3721_v54  ;;  %v3802_v53 = vld [vmem:[%s4583_s9 + $0x500] ss:$16 sps:$4 sm:$0xff]   ;;  %v3805_v54 = vld [vmem:[%s4583_s9 + $0x508] ss:$16 sps:$4 sm:$0xff]  }
 0x108   : > { %2531 = vmatprep.subr.bf16.mxu0 %v3726_v55  ;;  %2743 = vmatprep.subr.bf16.mxu1 %v3729_v56  ;;  %v3810_v55 = vld [vmem:[%s4583_s9 + $0x524] ss:$16 sps:$4 sm:$0xff]   ;;  %v3813_v56 = vld [vmem:[%s4583_s9 + $0x52c] ss:$16 sps:$4 sm:$0xff]  }
 0x10b   : > { %2532 = vmatpush1.bf16.msra.mxu0 %v3724_v57  ;;  %2744 = vmatpush1.bf16.msra.mxu1 %v3727_v58  ;;  %v3808_v57 = vld [vmem:[%s4583_s9 + $0x520] ss:$16 sps:$4 sm:$0xff]   ;;  %v3811_v58 = vld [vmem:[%s4583_s9 + $0x528] ss:$16 sps:$4 sm:$0xff]  }
 0x10c   : > { %2533 = vmatprep.subr.bf16.mxu0 %v3732_v59  ;;  %2745 = vmatprep.subr.bf16.mxu1 %v3735_v60  ;;  %v3816_v59 = vld [vmem:[%s4583_s9 + $0x544] ss:$16 sps:$4 sm:$0xff]   ;;  %v3819_v60 = vld [vmem:[%s4583_s9 + $0x54c] ss:$16 sps:$4 sm:$0xff]  }
 0x10f   : > { %2534 = vmatpush1.bf16.msra.mxu0 %v3730_v61  ;;  %2746 = vmatpush1.bf16.msra.mxu1 %v3733_v62  ;;  %v3814_v61 = vld [vmem:[%s4583_s9 + $0x540] ss:$16 sps:$4 sm:$0xff]   ;;  %v3817_v62 = vld [vmem:[%s4583_s9 + $0x548] ss:$16 sps:$4 sm:$0xff]  }
 0x110   : > { %2535 = vmatprep.subr.bf16.mxu0 %v3738_v63  ;;  %2747 = vmatprep.subr.bf16.mxu1 %v3741_v0  ;;  %v3822_v63 = vld [vmem:[%s4583_s9 + $0x564] ss:$16 sps:$4 sm:$0xff]   ;;  %v3825_v0 = vld [vmem:[%s4583_s9 + $0x56c] ss:$16 sps:$4 sm:$0xff]  }
 0x113   : > { %2536 = vmatpush1.bf16.msra.mxu0 %v3736_v1  ;;  %2748 = vmatpush1.bf16.msra.mxu1 %v3739_v3  ;;  %v3820_v1 = vld [vmem:[%s4583_s9 + $0x560] ss:$16 sps:$4 sm:$0xff]   ;;  %v3823_v3 = vld [vmem:[%s4583_s9 + $0x568] ss:$16 sps:$4 sm:$0xff]  }
 0x114   : > { %2537 = vmatprep.subr.bf16.mxu0 %v3744_v4  ;;  %2749 = vmatprep.subr.bf16.mxu1 %v3747_v5  ;;  %v3828_v4 = vld [vmem:[%s4583_s9 + $0x584] ss:$16 sps:$4 sm:$0xff]   ;;  %v3831_v5 = vld [vmem:[%s4583_s9 + $0x58c] ss:$16 sps:$4 sm:$0xff]  }
 0x117   : > { %2538 = vmatpush1.bf16.msra.mxu0 %v3742_v6  ;;  %2750 = vmatpush1.bf16.msra.mxu1 %v3745_v7  ;;  %v3826_v6 = vld [vmem:[%s4583_s9 + $0x580] ss:$16 sps:$4 sm:$0xff]   ;;  %v3829_v7 = vld [vmem:[%s4583_s9 + $0x588] ss:$16 sps:$4 sm:$0xff]  }
 0x118   : > { %2539 = vmatprep.subr.bf16.mxu0 %v3750_v8  ;;  %2751 = vmatprep.subr.bf16.mxu1 %v3753_v9  ;;  %v3834_v8 = vld [vmem:[%s4583_s9 + $0x5a4] ss:$16 sps:$4 sm:$0xff]   ;;  %v3837_v9 = vld [vmem:[%s4583_s9 + $0x5ac] ss:$16 sps:$4 sm:$0xff]  }
 0x11b   : > { %2540 = vmatpush1.bf16.msra.mxu0 %v3748_v10  ;;  %2752 = vmatpush1.bf16.msra.mxu1 %v3751_v11  ;;  %v3832_v10 = vld [vmem:[%s4583_s9 + $0x5a0] ss:$16 sps:$4 sm:$0xff]   ;;  %v3835_v11 = vld [vmem:[%s4583_s9 + $0x5a8] ss:$16 sps:$4 sm:$0xff]  }
 0x11c   : > { %2562 = vmatprep.subr.bf16.mxu0 %v3756_v12  ;;  %2774 = vmatprep.subr.bf16.mxu1 %v3759_v13  ;;  %v3840_v12 = vld [vmem:[%s4583_s9 + $0x5c4] ss:$16 sps:$4 sm:$0xff]   ;;  %v3843_v13 = vld [vmem:[%s4583_s9 + $0x5cc] ss:$16 sps:$4 sm:$0xff]  }
 0x11e   : > { %2542 = vmatmul.mubr.bf16.vlgmr.msra.gmra.mrb[0].mxu0 %v3197_v15  ;;  %2754 = vmatmul.mubr.bf16.vlgmr.msra.gmra.mrb[0].mxu1 %v3197_v15  ;;  %v3841_v15 = vld [vmem:[%s4583_s9 + $0x5c8] ss:$16 sps:$4 sm:$0xff]  }
 0x11f   : > { %2563 = vmatpush1.bf16.msra.mxu0 %v3754_v14  ;;  %2775 = vmatpush1.bf16.msra.mxu1 %v3757_v18  ;;  %v3838_v14 = vld [vmem:[%s4583_s9 + $0x5c0] ss:$16 sps:$4 sm:$0xff]  }
 0x120   : > { %2564 = vmatprep.subr.bf16.mxu0 %v3762_v19  ;;  %2776 = vmatprep.subr.bf16.mxu1 %v3765_v20  ;;  %v3844_v18 = vld [vmem:[%s4583_s9 + $0x5e0] ss:$16 sps:$4 sm:$0xff]   ;;  %v3847_v19 = vld [vmem:[%s4583_s9 + $0x5e8] ss:$16 sps:$4 sm:$0xff]   ;;  %v3852_v20 = vld [vmem:[%s4583_s9 + $0x604] ss:$16 sps:$4 sm:$0xff]  }
 0x121   : > { %2551 = vmatprep.mubr.bf16.mxu0 %v3206_v2  ;;  %2763 = vmatprep.mubr.bf16.mxu1 %v3206_v2  ;;  %v3855_v2 = vld [vmem:[%s4583_s9 + $0x60c] ss:$16 sps:$4 sm:$0xff]  }
 0x123   : > { %2565 = vmatpush1.bf16.msra.mxu0 %v3760_v21  ;;  %2777 = vmatpush1.bf16.msra.mxu1 %v3763_v22  ;;  %v3199_v21 = vcombine.low %v4754_v25, %v4759_v27  ;;  %v834_v22 = vld [vmem:[%s4970_s0 + $0x50] sm:$0xff]  ;;  %v3861_v25 = vld [vmem:[%s4583_s9 + $0x62c] ss:$16 sps:$4 sm:$0xff]  }
 0x124   : > { %2566 = vmatprep.subr.bf16.mxu0 %v3768_v23  ;;  %2778 = vmatprep.subr.bf16.mxu1 %v3771_v24  ;;  %v838_v23 = vld [vmem:[%s4970_s0 + $0x70] sm:$0xff] }
 0x125   : > { %v3850_v24 = vld [vmem:[%s4583_s9 + $0x600] ss:$16 sps:$4 sm:$0xff]   ;;  %v3208_v27 = vcombine.high %v834_v22, %v838_v23 }
 0x126   : > { %2552 = vmatmul.mubr.bf16.gmra.mrb[4].mxu0 %v3205_v26  ;;  %2764 = vmatmul.mubr.bf16.gmra.mrb[4].mxu1 %v3205_v26  ;;  %v3853_v26 = vld [vmem:[%s4583_s9 + $0x608] ss:$16 sps:$4 sm:$0xff]  }
 0x127   : > { %2567 = vmatpush1.bf16.msra.mxu0 %v3766_v28  ;;  %2779 = vmatpush1.bf16.msra.mxu1 %v3769_v29  ;;  %v3858_v28 = vld [vmem:[%s4583_s9 + $0x624] ss:$16 sps:$4 sm:$0xff]   ;;  %v3856_v29 = vld [vmem:[%s4583_s9 + $0x620] ss:$16 sps:$4 sm:$0xff]  }
 0x128   : > { %2568 = vmatprep.subr.bf16.mxu0 %v3774_v30  ;;  %2780 = vmatprep.subr.bf16.mxu1 %v3777_v31  ;;  %v3859_v30 = vld [vmem:[%s4583_s9 + $0x628] ss:$16 sps:$4 sm:$0xff]   ;;  %v3864_v31 = vld [vmem:[%s4583_s9 + $0x644] ss:$16 sps:$4 sm:$0xff]  }
 0x129   : > { %2594 = vmatprep.mubr.bf16.mxu0 %v3200_v32  ;;  %2806 = vmatprep.mubr.bf16.mxu1 %v3200_v32  ;;  %v3867_v32 = vld [vmem:[%s4583_s9 + $0x64c] ss:$16 sps:$4 sm:$0xff]  }
 0x12b   : > { %2569 = vmatpush1.bf16.msra.mxu0 %v3772_v33  ;;  %2781 = vmatpush1.bf16.msra.mxu1 %v3775_v34  ;;  %v3207_v33 = vcombine.low %v834_v22, %v838_v23  ;;  %v4838_v34 = vld [vmem:[%s4970_s0 + $0x18] sm:$0xff]  ;;  %v3942_v23 = vld [vmem:[%s4583_s9 + $0x7e4] ss:$16 sps:$4 sm:$0xff]  }
 0x12c   : > { %2570 = vmatprep.subr.bf16.mxu0 %v3780_v35  ;;  %2782 = vmatprep.subr.bf16.mxu1 %v3783_v36  ;;  %v4843_v35 = vld [vmem:[%s4970_s0 + $0x38] sm:$0xff]  ;;  %v3862_v36 = vld [vmem:[%s4583_s9 + $0x640] ss:$16 sps:$4 sm:$0xff]  }
 0x12d   : > { %v3937_v22 = vld [vmem:[%s4583_s9 + $0x7c8] ss:$16 sps:$4 sm:$0xff]  }
 0x12f   : > { %2571 = vmatpush1.bf16.msra.mxu0 %v3778_v37  ;;  %2783 = vmatpush1.bf16.msra.mxu1 %v3781_v38  ;;  %v3865_v37 = vld [vmem:[%s4583_s9 + $0x648] ss:$16 sps:$4 sm:$0xff]   ;;  %v3870_v38 = vld [vmem:[%s4583_s9 + $0x664] ss:$16 sps:$4 sm:$0xff]  }
 0x130   : > { %2572 = vmatprep.subr.bf16.mxu0 %v3786_v39  ;;  %2784 = vmatprep.subr.bf16.mxu1 %v3789_v40  ;;  %v3873_v39 = vld [vmem:[%s4583_s9 + $0x66c] ss:$16 sps:$4 sm:$0xff]   ;;  %v3202_v40 = vcombine.high %v4838_v34, %v4843_v35 }
 0x133   : > { %2573 = vmatpush1.bf16.msra.mxu0 %v3784_v41  ;;  %2785 = vmatpush1.bf16.msra.mxu1 %v3787_v42  ;;  %v3868_v41 = vld [vmem:[%s4583_s9 + $0x660] ss:$16 sps:$4 sm:$0xff]   ;;  %v3871_v42 = vld [vmem:[%s4583_s9 + $0x668] ss:$16 sps:$4 sm:$0xff]  }
 0x134   : > { %2574 = vmatprep.subr.bf16.mxu0 %v3792_v43  ;;  %2786 = vmatprep.subr.bf16.mxu1 %v3795_v44  ;;  %v3876_v43 = vld [vmem:[%s4583_s9 + $0x684] ss:$16 sps:$4 sm:$0xff]   ;;  %v3879_v44 = vld [vmem:[%s4583_s9 + $0x68c] ss:$16 sps:$4 sm:$0xff]  }
 0x137   : > { %2575 = vmatpush1.bf16.msra.mxu0 %v3790_v45  ;;  %2787 = vmatpush1.bf16.msra.mxu1 %v3793_v46  ;;  %v3874_v45 = vld [vmem:[%s4583_s9 + $0x680] ss:$16 sps:$4 sm:$0xff]   ;;  %v3877_v46 = vld [vmem:[%s4583_s9 + $0x688] ss:$16 sps:$4 sm:$0xff]  }
 0x138   : > { %2576 = vmatprep.subr.bf16.mxu0 %v3798_v47  ;;  %2788 = vmatprep.subr.bf16.mxu1 %v3801_v48  ;;  %v3882_v47 = vld [vmem:[%s4583_s9 + $0x6a4] ss:$16 sps:$4 sm:$0xff]   ;;  %v3885_v48 = vld [vmem:[%s4583_s9 + $0x6ac] ss:$16 sps:$4 sm:$0xff]  }
 0x13b   : > { %2577 = vmatpush1.bf16.msra.mxu0 %v3796_v49  ;;  %2789 = vmatpush1.bf16.msra.mxu1 %v3799_v50  ;;  %v3880_v49 = vld [vmem:[%s4583_s9 + $0x6a0] ss:$16 sps:$4 sm:$0xff]   ;;  %v3883_v50 = vld [vmem:[%s4583_s9 + $0x6a8] ss:$16 sps:$4 sm:$0xff]  }
 0x13c   : > { %2578 = vmatprep.subr.bf16.mxu0 %v3804_v51  ;;  %2790 = vmatprep.subr.bf16.mxu1 %v3807_v52  ;;  %v3888_v51 = vld [vmem:[%s4583_s9 + $0x6c4] ss:$16 sps:$4 sm:$0xff]   ;;  %v3891_v52 = vld [vmem:[%s4583_s9 + $0x6cc] ss:$16 sps:$4 sm:$0xff]  }
 0x13f   : > { %2579 = vmatpush1.bf16.msra.mxu0 %v3802_v53  ;;  %2791 = vmatpush1.bf16.msra.mxu1 %v3805_v54  ;;  %v3886_v53 = vld [vmem:[%s4583_s9 + $0x6c0] ss:$16 sps:$4 sm:$0xff]   ;;  %v3889_v54 = vld [vmem:[%s4583_s9 + $0x6c8] ss:$16 sps:$4 sm:$0xff]  }
 0x140   : > { %2580 = vmatprep.subr.bf16.mxu0 %v3810_v55  ;;  %2792 = vmatprep.subr.bf16.mxu1 %v3813_v56  ;;  %v3894_v55 = vld [vmem:[%s4583_s9 + $0x6e4] ss:$16 sps:$4 sm:$0xff]   ;;  %v3897_v56 = vld [vmem:[%s4583_s9 + $0x6ec] ss:$16 sps:$4 sm:$0xff]  }
 0x143   : > { %2581 = vmatpush1.bf16.msra.mxu0 %v3808_v57  ;;  %2793 = vmatpush1.bf16.msra.mxu1 %v3811_v58  ;;  %v3892_v57 = vld [vmem:[%s4583_s9 + $0x6e0] ss:$16 sps:$4 sm:$0xff]   ;;  %v3895_v58 = vld [vmem:[%s4583_s9 + $0x6e8] ss:$16 sps:$4 sm:$0xff]  }
 0x144   : > { %2582 = vmatprep.subr.bf16.mxu0 %v3816_v59  ;;  %2794 = vmatprep.subr.bf16.mxu1 %v3819_v60  ;;  %v3900_v59 = vld [vmem:[%s4583_s9 + $0x704] ss:$16 sps:$4 sm:$0xff]   ;;  %v3903_v60 = vld [vmem:[%s4583_s9 + $0x70c] ss:$16 sps:$4 sm:$0xff]  }
 0x147   : > { %2583 = vmatpush1.bf16.msra.mxu0 %v3814_v61  ;;  %2795 = vmatpush1.bf16.msra.mxu1 %v3817_v62  ;;  %v3898_v61 = vld [vmem:[%s4583_s9 + $0x700] ss:$16 sps:$4 sm:$0xff]   ;;  %v3901_v62 = vld [vmem:[%s4583_s9 + $0x708] ss:$16 sps:$4 sm:$0xff]  }
 0x148   : > { %2584 = vmatprep.subr.bf16.mxu0 %v3822_v63  ;;  %2796 = vmatprep.subr.bf16.mxu1 %v3825_v0  ;;  %v3906_v63 = vld [vmem:[%s4583_s9 + $0x724] ss:$16 sps:$4 sm:$0xff]   ;;  %v3909_v0 = vld [vmem:[%s4583_s9 + $0x72c] ss:$16 sps:$4 sm:$0xff]  }
 0x14b   : > { %2585 = vmatpush1.bf16.msra.mxu0 %v3820_v1  ;;  %2797 = vmatpush1.bf16.msra.mxu1 %v3823_v3  ;;  %v3904_v1 = vld [vmem:[%s4583_s9 + $0x720] ss:$16 sps:$4 sm:$0xff]   ;;  %v3907_v3 = vld [vmem:[%s4583_s9 + $0x728] ss:$16 sps:$4 sm:$0xff]  }
 0x14c   : > { %2586 = vmatprep.subr.bf16.mxu0 %v3828_v4  ;;  %2798 = vmatprep.subr.bf16.mxu1 %v3831_v5  ;;  %v3912_v4 = vld [vmem:[%s4583_s9 + $0x744] ss:$16 sps:$4 sm:$0xff]   ;;  %v3915_v5 = vld [vmem:[%s4583_s9 + $0x74c] ss:$16 sps:$4 sm:$0xff]  }
 0x14f   : > { %2587 = vmatpush1.bf16.msra.mxu0 %v3826_v6  ;;  %2799 = vmatpush1.bf16.msra.mxu1 %v3829_v7  ;;  %v3910_v6 = vld [vmem:[%s4583_s9 + $0x740] ss:$16 sps:$4 sm:$0xff]   ;;  %v3913_v7 = vld [vmem:[%s4583_s9 + $0x748] ss:$16 sps:$4 sm:$0xff]  }
 0x150   : > { %2588 = vmatprep.subr.bf16.mxu0 %v3834_v8  ;;  %2800 = vmatprep.subr.bf16.mxu1 %v3837_v9  ;;  %v3918_v8 = vld [vmem:[%s4583_s9 + $0x764] ss:$16 sps:$4 sm:$0xff]   ;;  %v3921_v9 = vld [vmem:[%s4583_s9 + $0x76c] ss:$16 sps:$4 sm:$0xff]  }
 0x153   : > { %2589 = vmatpush1.bf16.msra.mxu0 %v3832_v10  ;;  %2801 = vmatpush1.bf16.msra.mxu1 %v3835_v11  ;;  %v3916_v10 = vld [vmem:[%s4583_s9 + $0x760] ss:$16 sps:$4 sm:$0xff]   ;;  %v3919_v11 = vld [vmem:[%s4583_s9 + $0x768] ss:$16 sps:$4 sm:$0xff]  }
 0x154   : > { %2590 = vmatprep.subr.bf16.mxu0 %v3840_v12  ;;  %2802 = vmatprep.subr.bf16.mxu1 %v3843_v13  ;;  %v3924_v12 = vld [vmem:[%s4583_s9 + $0x784] ss:$16 sps:$4 sm:$0xff]   ;;  %v3927_v13 = vld [vmem:[%s4583_s9 + $0x78c] ss:$16 sps:$4 sm:$0xff]  }
 0x157   : > { %2591 = vmatpush1.bf16.msra.mxu0 %v3838_v14  ;;  %2803 = vmatpush1.bf16.msra.mxu1 %v3841_v15  ;;  %v3922_v14 = vld [vmem:[%s4583_s9 + $0x780] ss:$16 sps:$4 sm:$0xff]   ;;  %v3925_v15 = vld [vmem:[%s4583_s9 + $0x788] ss:$16 sps:$4 sm:$0xff]  }
 0x158   : > { %2592 = vmatprep.subr.bf16.mxu0 %v3846_v16  ;;  %2804 = vmatprep.subr.bf16.mxu1 %v3849_v17  ;;  %v3930_v16 = vld [vmem:[%s4583_s9 + $0x7a4] ss:$16 sps:$4 sm:$0xff]   ;;  %v3933_v17 = vld [vmem:[%s4583_s9 + $0x7ac] ss:$16 sps:$4 sm:$0xff]  }
 0x15b   : > { %2593 = vmatpush1.bf16.msra.mxu0 %v3844_v18  ;;  %2805 = vmatpush1.bf16.msra.mxu1 %v3847_v19  ;;  %v3928_v18 = vld [vmem:[%s4583_s9 + $0x7a0] ss:$16 sps:$4 sm:$0xff]   ;;  %v3931_v19 = vld [vmem:[%s4583_s9 + $0x7a8] ss:$16 sps:$4 sm:$0xff]  }
 0x15c   : > { %2615 = vmatprep.subr.bf16.mxu0 %v3852_v20  ;;  %2827 = vmatprep.subr.bf16.mxu1 %v3855_v2  ;;  %v3936_v20 = vld [vmem:[%s4583_s9 + $0x7c4] ss:$16 sps:$4 sm:$0xff]   ;;  %v3939_v2 = vld [vmem:[%s4583_s9 + $0x7cc] ss:$16 sps:$4 sm:$0xff]  }
 0x15e   : > { %2595 = vmatmul.mubr.bf16.vlgmr.msra.gmra.mrb[0].mxu0 %v3199_v21  ;;  %2807 = vmatmul.mubr.bf16.vlgmr.msra.gmra.mrb[0].mxu1 %v3199_v21  ;;  %v3934_v21 = vld [vmem:[%s4583_s9 + $0x7c0] ss:$16 sps:$4 sm:$0xff]  }
 0x15f   : > { %2616 = vmatpush1.bf16.msra.mxu0 %v3850_v24  ;;  %2828 = vmatpush1.bf16.msra.mxu1 %v3853_v26  ;;  %v3945_v24 = vld [vmem:[%s4583_s9 + $0x7ec] ss:$16 sps:$4 sm:$0xff]   ;;  %v3940_v26 = vld [vmem:[%s4583_s9 + $0x7e0] ss:$16 sps:$4 sm:$0xff]  }
 0x160   : > { %2617 = vmatprep.subr.bf16.mxu0 %v3858_v28  ;;  %2829 = vmatprep.subr.bf16.mxu1 %v3861_v25  ;;  %v3943_v28 = vld [vmem:[%s4583_s9 + $0x7e8] ss:$16 sps:$4 sm:$0xff]   ;;  %s3193_s9 = sshll.u32 %s3976_s14, 2 }
 0x161   : > { %2604 = vmatprep.mubr.bf16.mxu0 %v3208_v27  ;;  %2816 = vmatprep.mubr.bf16.mxu1 %v3208_v27  ;;  %v835_v25 = vld [vmem:[%s4970_s0 + $0x58] sm:$0xff]  ;;  %p781_p11 = scmp.lt.s32.totalorder %s3193_s9, 35 }
 0x162   : > { %v839_v27 = vld [vmem:[%s4970_s0 + $0x78] sm:$0xff] }
 0x163   : > { %2618 = vmatpush1.bf16.msra.mxu0 %v3856_v29  ;;  %2830 = vmatpush1.bf16.msra.mxu1 %v3859_v30  ;;  %v3201_v29 = vcombine.low %v4838_v34, %v4843_v35  ;;  %v3210_v30 = vcombine.high %v835_v25, %v839_v27  ;;  %s4982_s9 = smov (!%p781_p11, %s3193_s9), 35 }
 0x164   : > { %2619 = vmatprep.subr.bf16.mxu0 %v3864_v31  ;;  %2831 = vmatprep.subr.bf16.mxu1 %v3867_v32  ;;  %v3209_v31 = vcombine.low %v835_v25, %v839_v27  ;;  %v2935_v32 = vlaneseq  ;;  %s3194_s29 = sshll.u32 %s4982_s9, 3 }
 0x165   : > { %s784_s6 = scalar_lea.vmem %s4972_s2, %s3194_s29 }
 0x166   : > { %2605 = vmatmul.mubr.bf16.gmra.mrb[4].mxu0 %v3207_v33  ;;  %2817 = vmatmul.mubr.bf16.gmra.mrb[4].mxu1 %v3207_v33  ;;  %v2936_v33 = vshrl.u32 %v2935_v32, 7  ;;  %v2915_v35 = vld [vmem:[%s784_s6] sm:$0xff] }
 0x167   : > { %2620 = vmatpush1.bf16.msra.mxu0 %v3862_v36  ;;  %2832 = vmatpush1.bf16.msra.mxu1 %v3865_v37  ;;  %v2917_v36 = vld [vmem:[%s784_s6 + $0x10] sm:$0xff] }
 0x168   : > { %2621 = vmatprep.subr.bf16.mxu0 %v3870_v38  ;;  %2833 = vmatprep.subr.bf16.mxu1 %v3873_v39  ;;  %v2937_v34 = vsub.s32 0, %v2936_v33  ;;  %v2969_v37 = vsub.s32 1, %v2936_v33  ;;  %v2916_v38 = vld [vmem:[%s784_s6 + $0x8] sm:$0xff]  ;;  %v2918_v39 = vld [vmem:[%s784_s6 + $0x18] sm:$0xff] }
 0x169   : > { %2647 = vmatprep.mubr.bf16.mxu0 %v3202_v40  ;;  %2859 = vmatprep.mubr.bf16.mxu1 %v3202_v40 }
 0x16a   : > { %v2938_v40 = vrot.slane %v2915_v35, %v2937_v34 }
 0x16b   : > { %2622 = vmatpush1.bf16.msra.mxu0 %v3868_v41  ;;  %2834 = vmatpush1.bf16.msra.mxu1 %v3871_v42  ;;  %v2946_v41 = vrot.slane %v2917_v36, %v2937_v34  ;;  %v2942_v42 = vrot.slane %v2916_v38, %v2937_v34 }
 0x16c   : > { %2623 = vmatprep.subr.bf16.mxu0 %v3876_v43  ;;  %2835 = vmatprep.subr.bf16.mxu1 %v3879_v44  ;;  %v2950_v43 = vrot.slane %v2918_v39, %v2937_v34  ;;  %v2970_v44 = vrot.slane %v2915_v35, %v2969_v37 }
 0x16f   : > { %2624 = vmatpush1.bf16.msra.mxu0 %v3874_v45  ;;  %2836 = vmatpush1.bf16.msra.mxu1 %v3877_v46  ;;  %v2978_v45 = vrot.slane %v2917_v36, %v2969_v37 }
 0x170   : > { %2625 = vmatprep.subr.bf16.mxu0 %v3882_v47  ;;  %2837 = vmatprep.subr.bf16.mxu1 %v3885_v48  ;;  %v2974_v48 = vrot.slane %v2916_v38, %v2969_v37 }
 0x173   : > { %2626 = vmatpush1.bf16.msra.mxu0 %v3880_v49  ;;  %2838 = vmatpush1.bf16.msra.mxu1 %v3883_v50  ;;  %v2982_v49 = vrot.slane %v2918_v39, %v2969_v37 }
 0x174   : > { %2627 = vmatprep.subr.bf16.mxu0 %v3888_v51  ;;  %2839 = vmatprep.subr.bf16.mxu1 %v3891_v52 }
 0x177   : > { %2628 = vmatpush1.bf16.msra.mxu0 %v3886_v53  ;;  %2840 = vmatpush1.bf16.msra.mxu1 %v3889_v54 }
 0x178   : > { %2629 = vmatprep.subr.bf16.mxu0 %v3894_v55  ;;  %2841 = vmatprep.subr.bf16.mxu1 %v3897_v56 }
 0x17b   : > { %2630 = vmatpush1.bf16.msra.mxu0 %v3892_v57  ;;  %2842 = vmatpush1.bf16.msra.mxu1 %v3895_v58 }
 0x17c   : > { %2631 = vmatprep.subr.bf16.mxu0 %v3900_v59  ;;  %2843 = vmatprep.subr.bf16.mxu1 %v3903_v60 }
 0x17f   : > { %2632 = vmatpush1.bf16.msra.mxu0 %v3898_v61  ;;  %2844 = vmatpush1.bf16.msra.mxu1 %v3901_v62 }
 0x180   : > { %2633 = vmatprep.subr.bf16.mxu0 %v3906_v63  ;;  %2845 = vmatprep.subr.bf16.mxu1 %v3909_v0 }
 0x183   : > { %2634 = vmatpush1.bf16.msra.mxu0 %v3904_v1  ;;  %2846 = vmatpush1.bf16.msra.mxu1 %v3907_v3 }
 0x184   : > { %2635 = vmatprep.subr.bf16.mxu0 %v3912_v4  ;;  %2847 = vmatprep.subr.bf16.mxu1 %v3915_v5 }
 0x187   : > { %2636 = vmatpush1.bf16.msra.mxu0 %v3910_v6  ;;  %2848 = vmatpush1.bf16.msra.mxu1 %v3913_v7 }
 0x188   : > { %2637 = vmatprep.subr.bf16.mxu0 %v3918_v8  ;;  %2849 = vmatprep.subr.bf16.mxu1 %v3921_v9 }
 0x18b   : > { %2638 = vmatpush1.bf16.msra.mxu0 %v3916_v10  ;;  %2850 = vmatpush1.bf16.msra.mxu1 %v3919_v11 }
 0x18c   : > { %2639 = vmatprep.subr.bf16.mxu0 %v3924_v12  ;;  %2851 = vmatprep.subr.bf16.mxu1 %v3927_v13 }
 0x18f   : > { %2640 = vmatpush1.bf16.msra.mxu0 %v3922_v14  ;;  %2852 = vmatpush1.bf16.msra.mxu1 %v3925_v15 }
 0x190   : > { %2641 = vmatprep.subr.bf16.mxu0 %v3930_v16  ;;  %2853 = vmatprep.subr.bf16.mxu1 %v3933_v17 }
 0x193   : > { %2642 = vmatpush1.bf16.msra.mxu0 %v3928_v18  ;;  %2854 = vmatpush1.bf16.msra.mxu1 %v3931_v19 }
 0x194   : > { %2643 = vmatprep.subr.bf16.mxu0 %v3936_v20  ;;  %2855 = vmatprep.subr.bf16.mxu1 %v3939_v2 }
 0x197   : > { %2644 = vmatpush1.bf16.msra.mxu0 %v3934_v21  ;;  %2856 = vmatpush1.bf16.msra.mxu1 %v3937_v22 }
 0x198   : > { %2645 = vmatprep.subr.bf16.mxu0 %v3942_v23  ;;  %2857 = vmatprep.subr.bf16.mxu1 %v3945_v24 }
 0x19b   : > { %2646 = vmatpush1.bf16.msra.mxu0 %v3940_v26  ;;  %2858 = vmatpush1.bf16.msra.mxu1 %v3943_v28 }
 0x19e   : > { %2648 = vmatmul.mubr.bf16.vlgmr.msra.gmra.mrb[0].mxu0 %v3201_v29  ;;  %2860 = vmatmul.mubr.bf16.vlgmr.msra.gmra.mrb[0].mxu1 %v3201_v29 }
 0x19f   : > { %2657 = vmatprep.mubr.bf16.mxu0 %v3210_v30  ;;  %2869 = vmatprep.mubr.bf16.mxu1 %v3210_v30 }
 0x1a6   : > { %2658 = vmatmul.mubr.bf16.gmra.mrb[4].mxu0 %v3209_v31  ;;  %2870 = vmatmul.mubr.bf16.gmra.mrb[4].mxu1 %v3209_v31 }
 0x271   : > { %v2649_v46 = vpop.f32.mrb[0].mxu0  ;;  %v2861_v47 = vpop.f32.mrb[0].mxu1 }
 0x272   : > { %v2951_v50 = vmul.f32 %v2938_v40, %v2649_v46  ;;  %v2953_v51 = vmul.f32 %v2946_v41, %v2861_v47  ;;  %v2651_v52 = vpop.f32.mrb[1].mxu0  ;;  %v2863_v53 = vpop.f32.mrb[1].mxu1 }
 0x273   : > { %v2952_v54 = vmul.f32 %v2942_v42, %v2651_v52  ;;  %v2954_v55 = vmul.f32 %v2950_v43, %v2863_v53  ;;  %v2653_v56 = vpop.f32.mrb[2].mxu0  ;;  %v2865_v57 = vpop.f32.mrb[2].mxu1 }
 0x274   : > { %v2983_v58 = vadd.f32 %v2970_v44, %v2951_v50  ;;  %v2985_v59 = vadd.f32 %v2978_v45, %v2953_v51  ;;  %v2955_v60 = vmul.f32 %v2938_v40, %v2653_v56  ;;  %v2957_v61 = vmul.f32 %v2946_v41, %v2865_v57  ;;  %v2655_v62 = vpop.f32.mrb[3].mxu0  ;;  %v2867_v63 = vpop.f32.mrb[3].mxu1 }
 0x275   : > { %v2984_v0 = vadd.f32 %v2974_v48, %v2952_v54  ;;  %v2986_v1 = vadd.f32 %v2982_v49, %v2954_v55  ;;  %v2956_v3 = vmul.f32 %v2942_v42, %v2655_v62  ;;  %v2958_v4 = vmul.f32 %v2950_v43, %v2867_v63 }
 0x276   : > { %2999 = vst [vmem:[%s4915_s12] sm:$0xff] %v2983_v58  ;;  %3001 = vst [vmem:[%s4915_s12 + $0x10] sm:$0xff] %v2985_v59  ;;  %v2987_v5 = vadd.f32 %v2970_v44, %v2955_v60  ;;  %v2989_v6 = vadd.f32 %v2978_v45, %v2957_v61 }
 0x277   : > { %3000 = vst [vmem:[%s4915_s12 + $0x8] sm:$0xff] %v2984_v0  ;;  %3002 = vst [vmem:[%s4915_s12 + $0x18] sm:$0xff] %v2986_v1  ;;  %v2988_v7 = vadd.f32 %v2974_v48, %v2956_v3  ;;  %v2990_v8 = vadd.f32 %v2982_v49, %v2958_v4 }
 0x278   : > { %3003 = vst [vmem:[%s4915_s12 + $0x20] sm:$0xff] %v2987_v5  ;;  %3005 = vst [vmem:[%s4915_s12 + $0x30] sm:$0xff] %v2989_v6 }
 0x279   : > { %3004 = vst [vmem:[%s4915_s12 + $0x28] sm:$0xff] %v2988_v7  ;;  %3006 = vst [vmem:[%s4915_s12 + $0x38] sm:$0xff] %v2990_v8  ;;  %v2659_v9 = vpop.f32.mrb[4].mxu0  ;;  %v2871_v10 = vpop.f32.mrb[4].mxu1 }
 0x27a   : > { %v2959_v11 = vmul.f32 %v2938_v40, %v2659_v9  ;;  %v2961_v12 = vmul.f32 %v2946_v41, %v2871_v10  ;;  %v2661_v13 = vpop.f32.mrb[5].mxu0  ;;  %v2873_v14 = vpop.f32.mrb[5].mxu1 }
 0x27b   : > { %v2960_v15 = vmul.f32 %v2942_v42, %v2661_v13  ;;  %v2962_v16 = vmul.f32 %v2950_v43, %v2873_v14  ;;  %v2663_v17 = vpop.f32.mrb[6].mxu0  ;;  %v2875_v18 = vpop.f32.mrb[6].mxu1  ;;  %3021 = sbr.rel (!%p4041_p6) target bundleno = 650 (0x28a), region = 67 }
 0x27c   : > { %v2991_v19 = vadd.f32 %v2970_v44, %v2959_v11  ;;  %v2993_v20 = vadd.f32 %v2978_v45, %v2961_v12  ;;  %v2963_v2 = vmul.f32 %v2938_v40, %v2663_v17  ;;  %v2965_v21 = vmul.f32 %v2946_v41, %v2875_v18  ;;  %v2665_v22 = vpop.f32.mrb[7].mxu0  ;;  %v2877_v23 = vpop.f32.mrb[7].mxu1 }
 0x27d   : > { %v2992_v24 = vadd.f32 %v2974_v48, %v2960_v15  ;;  %v2994_v26 = vadd.f32 %v2982_v49, %v2962_v16  ;;  %v2964_v28 = vmul.f32 %v2942_v42, %v2665_v22  ;;  %v2966_v25 = vmul.f32 %v2950_v43, %v2877_v23  ;;  %v3040_v32 = vld [vmem:[%s4915_s12] sm:$0xff] (%p4041_p6)  ;;  %v3044_v34 = vld [vmem:[%s4915_s12 + $0x10] sm:$0xff] (%p4041_p6) }
 0x27e   : > { %3007 = vst [vmem:[%s4915_s12 + $0x40] sm:$0xff] %v2991_v19  ;;  %3009 = vst [vmem:[%s4915_s12 + $0x50] sm:$0xff] %v2993_v20  ;;  %v2995_v27 = vadd.f32 %v2970_v44, %v2963_v2  ;;  %v2997_v29 = vadd.f32 %v2978_v45, %v2965_v21  ;;  %v3042_v33 = vld [vmem:[%s4915_s12 + $0x8] sm:$0xff] (%p4041_p6)  ;;  %v3046_v35 = vld [vmem:[%s4915_s12 + $0x18] sm:$0xff] (%p4041_p6) }
 0x27f   : > { %3008 = vst [vmem:[%s4915_s12 + $0x48] sm:$0xff] %v2992_v24  ;;  %3010 = vst [vmem:[%s4915_s12 + $0x58] sm:$0xff] %v2994_v26  ;;  %v2996_v30 = vadd.f32 %v2974_v48, %v2964_v28  ;;  %v2998_v31 = vadd.f32 %v2982_v49, %v2966_v25  ;;  %v3048_v36 = vld [vmem:[%s4915_s12 + $0x20] sm:$0xff] (%p4041_p6)  ;;  %v3052_v38 = vld [vmem:[%s4915_s12 + $0x30] sm:$0xff] (%p4041_p6) }
 0x280   : > { %3011 = vst [vmem:[%s4915_s12 + $0x60] sm:$0xff] %v2995_v27  ;;  %3013 = vst [vmem:[%s4915_s12 + $0x70] sm:$0xff] %v2997_v29  ;;  %v3050_v37 = vld [vmem:[%s4915_s12 + $0x28] sm:$0xff] (%p4041_p6)  ;;  %v3054_v39 = vld [vmem:[%s4915_s12 + $0x38] sm:$0xff] (%p4041_p6) }
 0x281   : > { %3012 = vst [vmem:[%s4915_s12 + $0x68] sm:$0xff] %v2996_v30  ;;  %3014 = vst [vmem:[%s4915_s12 + $0x78] sm:$0xff] %v2998_v31 }
 0x282   : > { %3041 = vst [vmem:[%s3027_s11] sm:$0xff] %v3040_v32  ;;  %3043 = vst [vmem:[%s3027_s11 + $0x8] sm:$0xff] %v3042_v33 }
 0x283   : > { %3045 = vst [vmem:[%s3027_s11 + $0x10] sm:$0xff] %v3044_v34  ;;  %3047 = vst [vmem:[%s3027_s11 + $0x18] sm:$0xff] %v3046_v35 }
 0x284   : > { %3049 = vst [vmem:[%s3027_s11 + $0x120] sm:$0xff] %v3048_v36  ;;  %3051 = vst [vmem:[%s3027_s11 + $0x128] sm:$0xff] %v3050_v37 }
 0x285   : > { %v3056_v40 = vld [vmem:[%s4915_s12 + $0x40] sm:$0xff]  ;;  %3053 = vst [vmem:[%s3027_s11 + $0x130] sm:$0xff] %v3052_v38  ;;  %3055 = vst [vmem:[%s3027_s11 + $0x138] sm:$0xff] %v3054_v39  ;;  %v3060_v42 = vld [vmem:[%s4915_s12 + $0x50] sm:$0xff] }
 0x286   : > { %3057 = vst [vmem:[%s3027_s11 + $0x240] sm:$0xff] %v3056_v40  ;;  %v3058_v41 = vld [vmem:[%s4915_s12 + $0x48] sm:$0xff]  ;;  %v3062_v43 = vld [vmem:[%s4915_s12 + $0x58] sm:$0xff]  ;;  %3061 = vst [vmem:[%s3027_s11 + $0x250] sm:$0xff] %v3060_v42 }
 0x287   : > { %3059 = vst [vmem:[%s3027_s11 + $0x248] sm:$0xff] %v3058_v41  ;;  %3063 = vst [vmem:[%s3027_s11 + $0x258] sm:$0xff] %v3062_v43  ;;  %v3064_v44 = vld [vmem:[%s4915_s12 + $0x60] sm:$0xff]  ;;  %v3068_v46 = vld [vmem:[%s4915_s12 + $0x70] sm:$0xff] }
 0x288   : > { %v3066_v45 = vld [vmem:[%s4915_s12 + $0x68] sm:$0xff]  ;;  %3065 = vst [vmem:[%s3027_s11 + $0x360] sm:$0xff] %v3064_v44  ;;  %3069 = vst [vmem:[%s3027_s11 + $0x370] sm:$0xff] %v3068_v46  ;;  %v3070_v47 = vld [vmem:[%s4915_s12 + $0x78] sm:$0xff] }
 0x289   : > { %3067 = vst [vmem:[%s3027_s11 + $0x368] sm:$0xff] %v3066_v45  ;;  %3071 = vst [vmem:[%s3027_s11 + $0x378] sm:$0xff] %v3070_v47 }
 0x28a PF: > { %s13_s16 = sadd.s32 1, %s3984_s16   ;;  %s4975_s12 = smov %s3972_s13 }
 0x28b   : > { %p10_p12 = scmp.ge.s32.totalorder %s13_s16, 11   ;;  %s4976_s13 = smov %s4046_s22 }
 0x28c   : > { %s4977_s14 = smov %s3980_s15  ;;  %s4978_s15 = smov %s4980_s17 }
 0x28d   :  { %12 = sbr.rel (!%p10_p12) target bundleno = 3 (0x3), region = 127 }

// kernel: decoder_forward.13
= control target key start
LH: loop header
LB: loop body
LE: loop exit
PB: predicated region body
PF: predicated region fallthrough
CT: control target
= control target key end

     0   :  { %s1924_s12 = smov 0   ;;  %s1926_s13 = smov 0   ;;  %s2374_s0 = inlined_call_operand.vmem [shape: bf16[80,512], index: 0, kind: input, shape index: {}]   ;;  %s2375_s1 = inlined_call_operand.vmem [shape: bf16[512,2304], index: 1, kind: input, shape index: {}]   ;;  %s2376_s2 = inlined_call_operand.vmem [shape: f32[8,2304], index: 2, kind: input, shape index: {}]   ;;  %s2377_s3 = inlined_call_operand.vmem [shape: f32[80,2304], index: 3, kind: output, shape index: {}]  }
   0x1   :  { %s1928_s14 = smov 0   ;;  %s1930_s15 = smov 0  }
   0x2   :  { %s1932_s16 = smov 0  }
   0x3 LB: > { %s28_s17 = sadd.s32 1, %s1898_s15  ;;  %s1575_s18 = sadd.s32 4294967295, %s1902_s16   ;;  %s1902_s16 = sphi %s1932_s16, %s13_s16   ;;  %s1898_s15 = sphi %s1930_s15, %s2382_s15   ;;  %s1894_s14 = sphi %s1928_s14, %s2381_s14   ;;  %s1890_s13 = sphi %s1926_s13, %s2380_s13   ;;  %s1886_s12 = sphi %s1924_s12, %s2379_s12  }
   0x4   : > { %p30_p0 = scmp.ge.s32.totalorder %s28_s17, 9  ;;  %p76_p1 = scmp.ne.s32.totalorder %s1890_s13, %s1886_s12 }
   0x5   : > { %p77_p2 = scmp.eq.s32.totalorder %s1902_s16, 0  ;;  %p134_p4 = scmp.eq.s32.totalorder %s1575_s18, 8 }
   0x6   : > { %s2384_s17 = smov (%p30_p0, %s28_s17), 0  ;;  %s69_s20 = sadd.s32 1, %s1890_s13 }
   0x7   : > { %p78_p3 = por %p77_p2, %p76_p1  ;;  %s65_s19 = ssub.s32 %s1898_s15, %s2384_s17 }
   0x8   : > { %p67_p5 = scmp.eq.s32.totalorder %s65_s19, 0  ;;  %p1959_p6 = por %p134_p4, %p76_p1 }
   0x9   : > { %p1579_p7 = scmp.ge.s32.totalorder %s1902_s16, 9 }
   0xa   : > { %s1964_s22 = scalar_select %p67_p5, %s1890_s13, %s69_s20  }
   0xb   : > { %171 = sbr.rel (%p1579_p7) target bundleno = 54 (0x36), region = 20 }
  0x12   : > { %174 = sbr.rel (!%p78_p3) target bundleno = 54 (0x36), region = 24  ;;  %s176_s23 = sand.u32 (%p78_p3), 1, %s1890_s13  }
  0x13   : > { %s1675_s24 = sshll.u32 (%p78_p3), %s1898_s15, 3  ;;  %s1580_s25 = sshll.u32 (%p78_p3), %s176_s23, 9 }
  0x14   : > { %s1972_s28 = scalar_lea.vmem (%p78_p3), %s2375_s1, %s1675_s24  ;;  %s1977_s29 = scalar_lea.vmem (%p78_p3), [#allocation3], %s1580_s25 }
  0x15   : > { %v338_v0 = vld [vmem:[%s1972_s28] sm:$0xff] (%p78_p3)  ;;  %v340_v1 = vld [vmem:[%s1972_s28 + $0x48] sm:$0xff] (%p78_p3)  ;;  %v342_v2 = vld [vmem:[%s1972_s28 + $0x90] sm:$0xff] (%p78_p3) }
  0x16   : > { %339 = vst [vmem:[%s1977_s29] sm:$0xff] (%p78_p3), %v338_v0  ;;  %341 = vst [vmem:[%s1977_s29 + $0x8] sm:$0xff] (%p78_p3), %v340_v1  ;;  %v344_v3 = vld [vmem:[%s1972_s28 + $0xd8] sm:$0xff] (%p78_p3)  ;;  %v346_v4 = vld [vmem:[%s1972_s28 + $0x120] sm:$0xff] (%p78_p3) }
  0x17   : > { %343 = vst [vmem:[%s1977_s29 + $0x10] sm:$0xff] (%p78_p3), %v342_v2  ;;  %v348_v5 = vld [vmem:[%s1972_s28 + $0x168] sm:$0xff] (%p78_p3)  ;;  %345 = vst [vmem:[%s1977_s29 + $0x18] sm:$0xff] (%p78_p3), %v344_v3  ;;  %v350_v6 = vld [vmem:[%s1972_s28 + $0x1b0] sm:$0xff] (%p78_p3) }
  0x18   : > { %347 = vst [vmem:[%s1977_s29 + $0x20] sm:$0xff] (%p78_p3), %v346_v4  ;;  %349 = vst [vmem:[%s1977_s29 + $0x28] sm:$0xff] (%p78_p3), %v348_v5  ;;  %v352_v7 = vld [vmem:[%s1972_s28 + $0x1f8] sm:$0xff] (%p78_p3)  ;;  %v354_v8 = vld [vmem:[%s1972_s28 + $0x240] sm:$0xff] (%p78_p3) }
  0x19   : > { %351 = vst [vmem:[%s1977_s29 + $0x30] sm:$0xff] %v350_v6  ;;  %353 = vst [vmem:[%s1977_s29 + $0x38] sm:$0xff] %v352_v7  ;;  %v356_v9 = vld [vmem:[%s1972_s28 + $0x288] sm:$0xff]  ;;  %v358_v10 = vld [vmem:[%s1972_s28 + $0x2d0] sm:$0xff] }
  0x1a   : > { %355 = vst [vmem:[%s1977_s29 + $0x40] sm:$0xff] %v354_v8  ;;  %v360_v11 = vld [vmem:[%s1972_s28 + $0x318] sm:$0xff]  ;;  %357 = vst [vmem:[%s1977_s29 + $0x48] sm:$0xff] %v356_v9  ;;  %v362_v12 = vld [vmem:[%s1972_s28 + $0x360] sm:$0xff] }
  0x1b   : > { %359 = vst [vmem:[%s1977_s29 + $0x50] sm:$0xff] %v358_v10  ;;  %361 = vst [vmem:[%s1977_s29 + $0x58] sm:$0xff] %v360_v11  ;;  %v364_v13 = vld [vmem:[%s1972_s28 + $0x3a8] sm:$0xff]  ;;  %v366_v14 = vld [vmem:[%s1972_s28 + $0x3f0] sm:$0xff] }
  0x1c   : > { %363 = vst [vmem:[%s1977_s29 + $0x60] sm:$0xff] %v362_v12  ;;  %365 = vst [vmem:[%s1977_s29 + $0x68] sm:$0xff] %v364_v13  ;;  %v368_v15 = vld [vmem:[%s1972_s28 + $0x438] sm:$0xff]  ;;  %v370_v16 = vld [vmem:[%s1972_s28 + $0x480] sm:$0xff] }
  0x1d   : > { %367 = vst [vmem:[%s1977_s29 + $0x70] sm:$0xff] %v366_v14  ;;  %v372_v17 = vld [vmem:[%s1972_s28 + $0x4c8] sm:$0xff]  ;;  %369 = vst [vmem:[%s1977_s29 + $0x78] sm:$0xff] %v368_v15  ;;  %v374_v18 = vld [vmem:[%s1972_s28 + $0x510] sm:$0xff] }
  0x1e   : > { %371 = vst [vmem:[%s1977_s29 + $0x80] sm:$0xff] %v370_v16  ;;  %373 = vst [vmem:[%s1977_s29 + $0x88] sm:$0xff] %v372_v17  ;;  %v376_v19 = vld [vmem:[%s1972_s28 + $0x558] sm:$0xff]  ;;  %v378_v20 = vld [vmem:[%s1972_s28 + $0x5a0] sm:$0xff] }
  0x1f   : > { %375 = vst [vmem:[%s1977_s29 + $0x90] sm:$0xff] %v374_v18  ;;  %377 = vst [vmem:[%s1977_s29 + $0x98] sm:$0xff] %v376_v19  ;;  %v380_v21 = vld [vmem:[%s1972_s28 + $0x5e8] sm:$0xff]  ;;  %v382_v22 = vld [vmem:[%s1972_s28 + $0x630] sm:$0xff] }
  0x20   : > { %379 = vst [vmem:[%s1977_s29 + $0xa0] sm:$0xff] %v378_v20  ;;  %v384_v23 = vld [vmem:[%s1972_s28 + $0x678] sm:$0xff]  ;;  %381 = vst [vmem:[%s1977_s29 + $0xa8] sm:$0xff] %v380_v21  ;;  %v386_v24 = vld [vmem:[%s1972_s28 + $0x6c0] sm:$0xff] }
  0x21   : > { %383 = vst [vmem:[%s1977_s29 + $0xb0] sm:$0xff] %v382_v22  ;;  %385 = vst [vmem:[%s1977_s29 + $0xb8] sm:$0xff] %v384_v23  ;;  %v388_v25 = vld [vmem:[%s1972_s28 + $0x708] sm:$0xff]  ;;  %v390_v26 = vld [vmem:[%s1972_s28 + $0x750] sm:$0xff] }
  0x22   : > { %387 = vst [vmem:[%s1977_s29 + $0xc0] sm:$0xff] %v386_v24  ;;  %389 = vst [vmem:[%s1977_s29 + $0xc8] sm:$0xff] %v388_v25  ;;  %v392_v27 = vld [vmem:[%s1972_s28 + $0x798] sm:$0xff]  ;;  %v394_v28 = vld [vmem:[%s1972_s28 + $0x7e0] sm:$0xff] }
  0x23   : > { %391 = vst [vmem:[%s1977_s29 + $0xd0] sm:$0xff] %v390_v26  ;;  %v396_v29 = vld [vmem:[%s1972_s28 + $0x828] sm:$0xff]  ;;  %393 = vst [vmem:[%s1977_s29 + $0xd8] sm:$0xff] %v392_v27  ;;  %v398_v30 = vld [vmem:[%s1972_s28 + $0x870] sm:$0xff] }
  0x24   : > { %395 = vst [vmem:[%s1977_s29 + $0xe0] sm:$0xff] %v394_v28  ;;  %397 = vst [vmem:[%s1977_s29 + $0xe8] sm:$0xff] %v396_v29  ;;  %v400_v31 = vld [vmem:[%s1972_s28 + $0x8b8] sm:$0xff]  ;;  %v402_v32 = vld [vmem:[%s1972_s28 + $0x900] sm:$0xff] }
  0x25   : > { %399 = vst [vmem:[%s1977_s29 + $0xf0] sm:$0xff] %v398_v30  ;;  %401 = vst [vmem:[%s1977_s29 + $0xf8] sm:$0xff] %v400_v31  ;;  %v404_v33 = vld [vmem:[%s1972_s28 + $0x948] sm:$0xff]  ;;  %v406_v34 = vld [vmem:[%s1972_s28 + $0x990] sm:$0xff] }
  0x26   : > { %403 = vst [vmem:[%s1977_s29 + $0x100] sm:$0xff] %v402_v32  ;;  %v408_v35 = vld [vmem:[%s1972_s28 + $0x9d8] sm:$0xff]  ;;  %405 = vst [vmem:[%s1977_s29 + $0x108] sm:$0xff] %v404_v33  ;;  %v410_v36 = vld [vmem:[%s1972_s28 + $0xa20] sm:$0xff] }
  0x27   : > { %407 = vst [vmem:[%s1977_s29 + $0x110] sm:$0xff] %v406_v34  ;;  %409 = vst [vmem:[%s1977_s29 + $0x118] sm:$0xff] %v408_v35  ;;  %v412_v37 = vld [vmem:[%s1972_s28 + $0xa68] sm:$0xff]  ;;  %v414_v38 = vld [vmem:[%s1972_s28 + $0xab0] sm:$0xff] }
  0x28   : > { %411 = vst [vmem:[%s1977_s29 + $0x120] sm:$0xff] %v410_v36  ;;  %413 = vst [vmem:[%s1977_s29 + $0x128] sm:$0xff] %v412_v37  ;;  %v416_v39 = vld [vmem:[%s1972_s28 + $0xaf8] sm:$0xff]  ;;  %v418_v40 = vld [vmem:[%s1972_s28 + $0xb40] sm:$0xff] }
  0x29   : > { %415 = vst [vmem:[%s1977_s29 + $0x130] sm:$0xff] %v414_v38  ;;  %v420_v41 = vld [vmem:[%s1972_s28 + $0xb88] sm:$0xff]  ;;  %417 = vst [vmem:[%s1977_s29 + $0x138] sm:$0xff] %v416_v39  ;;  %v422_v42 = vld [vmem:[%s1972_s28 + $0xbd0] sm:$0xff] }
  0x2a   : > { %419 = vst [vmem:[%s1977_s29 + $0x140] sm:$0xff] %v418_v40  ;;  %421 = vst [vmem:[%s1977_s29 + $0x148] sm:$0xff] %v420_v41  ;;  %v424_v43 = vld [vmem:[%s1972_s28 + $0xc18] sm:$0xff]  ;;  %v426_v44 = vld [vmem:[%s1972_s28 + $0xc60] sm:$0xff] }
  0x2b   : > { %423 = vst [vmem:[%s1977_s29 + $0x150] sm:$0xff] %v422_v42  ;;  %425 = vst [vmem:[%s1977_s29 + $0x158] sm:$0xff] %v424_v43  ;;  %v428_v45 = vld [vmem:[%s1972_s28 + $0xca8] sm:$0xff]  ;;  %v430_v46 = vld [vmem:[%s1972_s28 + $0xcf0] sm:$0xff] }
  0x2c   : > { %427 = vst [vmem:[%s1977_s29 + $0x160] sm:$0xff] %v426_v44  ;;  %v432_v47 = vld [vmem:[%s1972_s28 + $0xd38] sm:$0xff]  ;;  %429 = vst [vmem:[%s1977_s29 + $0x168] sm:$0xff] %v428_v45  ;;  %v434_v48 = vld [vmem:[%s1972_s28 + $0xd80] sm:$0xff] }
  0x2d   : > { %431 = vst [vmem:[%s1977_s29 + $0x170] sm:$0xff] %v430_v46  ;;  %433 = vst [vmem:[%s1977_s29 + $0x178] sm:$0xff] %v432_v47  ;;  %v436_v49 = vld [vmem:[%s1972_s28 + $0xdc8] sm:$0xff]  ;;  %v438_v50 = vld [vmem:[%s1972_s28 + $0xe10] sm:$0xff] }
  0x2e   : > { %435 = vst [vmem:[%s1977_s29 + $0x180] sm:$0xff] %v434_v48  ;;  %437 = vst [vmem:[%s1977_s29 + $0x188] sm:$0xff] %v436_v49  ;;  %v440_v51 = vld [vmem:[%s1972_s28 + $0xe58] sm:$0xff]  ;;  %v442_v52 = vld [vmem:[%s1972_s28 + $0xea0] sm:$0xff] }
  0x2f   : > { %439 = vst [vmem:[%s1977_s29 + $0x190] sm:$0xff] %v438_v50  ;;  %v444_v53 = vld [vmem:[%s1972_s28 + $0xee8] sm:$0xff]  ;;  %441 = vst [vmem:[%s1977_s29 + $0x198] sm:$0xff] %v440_v51  ;;  %v446_v54 = vld [vmem:[%s1972_s28 + $0xf30] sm:$0xff] }
  0x30   : > { %443 = vst [vmem:[%s1977_s29 + $0x1a0] sm:$0xff] %v442_v52  ;;  %445 = vst [vmem:[%s1977_s29 + $0x1a8] sm:$0xff] %v444_v53  ;;  %v448_v55 = vld [vmem:[%s1972_s28 + $0xf78] sm:$0xff]  ;;  %v450_v56 = vld [vmem:[%s1972_s28 + $0xfc0] sm:$0xff] }
  0x31   : > { %447 = vst [vmem:[%s1977_s29 + $0x1b0] sm:$0xff] %v446_v54  ;;  %449 = vst [vmem:[%s1977_s29 + $0x1b8] sm:$0xff] %v448_v55  ;;  %v452_v57 = vld [vmem:[%s1972_s28 + $0x1008] sm:$0xff]  ;;  %v454_v58 = vld [vmem:[%s1972_s28 + $0x1050] sm:$0xff] }
  0x32   : > { %451 = vst [vmem:[%s1977_s29 + $0x1c0] sm:$0xff] %v450_v56  ;;  %v456_v59 = vld [vmem:[%s1972_s28 + $0x1098] sm:$0xff]  ;;  %453 = vst [vmem:[%s1977_s29 + $0x1c8] sm:$0xff] %v452_v57  ;;  %v458_v60 = vld [vmem:[%s1972_s28 + $0x10e0] sm:$0xff] }
  0x33   : > { %455 = vst [vmem:[%s1977_s29 + $0x1d0] sm:$0xff] %v454_v58  ;;  %457 = vst [vmem:[%s1977_s29 + $0x1d8] sm:$0xff] %v456_v59  ;;  %v460_v61 = vld [vmem:[%s1972_s28 + $0x1128] sm:$0xff]  ;;  %v462_v62 = vld [vmem:[%s1972_s28 + $0x1170] sm:$0xff] }
  0x34   : > { %459 = vst [vmem:[%s1977_s29 + $0x1e0] sm:$0xff] %v458_v60  ;;  %461 = vst [vmem:[%s1977_s29 + $0x1e8] sm:$0xff] %v460_v61  ;;  %v464_v63 = vld [vmem:[%s1972_s28 + $0x11b8] sm:$0xff] }
  0x35   : > { %463 = vst [vmem:[%s1977_s29 + $0x1f0] sm:$0xff] %v462_v62  ;;  %465 = vst [vmem:[%s1977_s29 + $0x1f8] sm:$0xff] %v464_v63 }
  0x36 PF: > { %p1583_p8 = scmp.ge.s32.totalorder %s1902_s16, 1  ;;  %p479_p9 = scmp.lt.s32.totalorder %s1902_s16, 10 }
  0x38   : > { %p480_p10 = pnand %p1583_p8, %p479_p9 }
  0x39   : > { %s486_s30 = sand.u32 (!%p480_p10), 1, %s1886_s12   ;;  %v1836_v0 = vld [vmem:[%s2374_s0 + $0x4] ss:$16 sps:$4 sm:$0xff] (!%p480_p10)   ;;  %v1839_v1 = vld [vmem:[%s2374_s0 + $0xc] ss:$16 sps:$4 sm:$0xff] (!%p480_p10)   ;;  %s1585_s10 = sshll.u32 (!%p480_p10), %s1894_s14, 1 }
  0x3a   : > { %483 = sbr.rel (%p480_p10) target bundleno = 388 (0x184), region = 66  ;;  %s1584_s4 = sshll.u32 (!%p480_p10), %s486_s30, 9  ;;  %1125 = vmatprep.mubr.bf16.mxu1 (!%p480_p10), %v1836_v0  ;;  %1208 = vmatprep.mubr.bf16.mxu0 (!%p480_p10), %v1839_v1 }
  0x3b   : > { %s2115_s9 = scalar_lea.vmem (!%p480_p10), [#allocation3], %s1584_s4  ;;  %p538_p11 = scmp.lt.s32.totalorder (!%p480_p10), %s1585_s10, 17 }
  0x3c   : > { %v1738_v2 = vld [vmem:[%s2115_s9 + $0x4] ss:$8 sps:$4 sm:$0xff] (!%p480_p10)   ;;  %v1742_v4 = vld [vmem:[%s2115_s9] ss:$8 sps:$4 sm:$0xff] (!%p480_p10)   ;;  %v1744_v6 = vld [vmem:[%s2115_s9 + $0x14] ss:$8 sps:$4 sm:$0xff] (!%p480_p10)  }
  0x3d   : > { %v1740_v3 = vld [vmem:[%s2115_s9 + $0x104] ss:$8 sps:$4 sm:$0xff] (!%p480_p10)   ;;  %1093 = vmatprep.subr.bf16.mxu1 (!%p480_p10), %v1738_v2  ;;  %v1743_v5 = vld [vmem:[%s2115_s9 + $0x100] ss:$8 sps:$4 sm:$0xff] (!%p480_p10)   ;;  %v1746_v7 = vld [vmem:[%s2115_s9 + $0x114] ss:$8 sps:$4 sm:$0xff] (!%p480_p10)  }
  0x3e   : > { %1176 = vmatprep.subr.bf16.mxu0 (!%p480_p10), %v1740_v3  ;;  %1094 = vmatpush1.bf16.msra.mxu1 (!%p480_p10), %v1742_v4  ;;  %v1748_v8 = vld [vmem:[%s2115_s9 + $0x10] ss:$8 sps:$4 sm:$0xff] (!%p480_p10)   ;;  %v1750_v10 = vld [vmem:[%s2115_s9 + $0x24] ss:$8 sps:$4 sm:$0xff] (!%p480_p10)   ;;  %v1754_v12 = vld [vmem:[%s2115_s9 + $0x20] ss:$8 sps:$4 sm:$0xff] (!%p480_p10)  }
  0x3f   : > { %1177 = vmatpush1.bf16.msra.mxu0 (!%p480_p10), %v1743_v5  ;;  %1095 = vmatprep.subr.bf16.mxu1 (!%p480_p10), %v1744_v6  ;;  %v1749_v9 = vld [vmem:[%s2115_s9 + $0x110] ss:$8 sps:$4 sm:$0xff] (!%p480_p10)   ;;  %v1752_v11 = vld [vmem:[%s2115_s9 + $0x124] ss:$8 sps:$4 sm:$0xff] (!%p480_p10)   ;;  %v1755_v13 = vld [vmem:[%s2115_s9 + $0x120] ss:$8 sps:$4 sm:$0xff] (!%p480_p10)  }
  0x40   : > { %1178 = vmatprep.subr.bf16.mxu0 (!%p480_p10), %v1746_v7  ;;  %v1756_v14 = vld [vmem:[%s2115_s9 + $0x34] ss:$8 sps:$4 sm:$0xff] (!%p480_p10)   ;;  %v1760_v16 = vld [vmem:[%s2115_s9 + $0x30] ss:$8 sps:$4 sm:$0xff] (!%p480_p10)   ;;  %v1762_v18 = vld [vmem:[%s2115_s9 + $0x44] ss:$8 sps:$4 sm:$0xff] (!%p480_p10)  }
  0x41   : > { %v1758_v15 = vld [vmem:[%s2115_s9 + $0x134] ss:$8 sps:$4 sm:$0xff]   ;;  %v1761_v17 = vld [vmem:[%s2115_s9 + $0x130] ss:$8 sps:$4 sm:$0xff]   ;;  %v1764_v19 = vld [vmem:[%s2115_s9 + $0x144] ss:$8 sps:$4 sm:$0xff]  }
  0x42   : > { %1096 = vmatpush1.bf16.msra.mxu1 %v1748_v8  ;;  %v1766_v20 = vld [vmem:[%s2115_s9 + $0x40] ss:$8 sps:$4 sm:$0xff]   ;;  %v1768_v22 = vld [vmem:[%s2115_s9 + $0x54] ss:$8 sps:$4 sm:$0xff]   ;;  %v1772_v24 = vld [vmem:[%s2115_s9 + $0x50] ss:$8 sps:$4 sm:$0xff]  }
  0x43   : > { %1179 = vmatpush1.bf16.msra.mxu0 %v1749_v9  ;;  %1097 = vmatprep.subr.bf16.mxu1 %v1750_v10  ;;  %v1767_v21 = vld [vmem:[%s2115_s9 + $0x140] ss:$8 sps:$4 sm:$0xff]   ;;  %v1770_v23 = vld [vmem:[%s2115_s9 + $0x154] ss:$8 sps:$4 sm:$0xff]   ;;  %v1773_v25 = vld [vmem:[%s2115_s9 + $0x150] ss:$8 sps:$4 sm:$0xff]  }
  0x44   : > { %1180 = vmatprep.subr.bf16.mxu0 %v1752_v11  ;;  %v1774_v26 = vld [vmem:[%s2115_s9 + $0x64] ss:$8 sps:$4 sm:$0xff]   ;;  %v1778_v28 = vld [vmem:[%s2115_s9 + $0x60] ss:$8 sps:$4 sm:$0xff]   ;;  %v1780_v30 = vld [vmem:[%s2115_s9 + $0x74] ss:$8 sps:$4 sm:$0xff]  }
  0x45   : > { %v1776_v27 = vld [vmem:[%s2115_s9 + $0x164] ss:$8 sps:$4 sm:$0xff]   ;;  %v1779_v29 = vld [vmem:[%s2115_s9 + $0x160] ss:$8 sps:$4 sm:$0xff]   ;;  %v1782_v31 = vld [vmem:[%s2115_s9 + $0x174] ss:$8 sps:$4 sm:$0xff]  }
  0x46   : > { %1098 = vmatpush1.bf16.msra.mxu1 %v1754_v12  ;;  %v1784_v32 = vld [vmem:[%s2115_s9 + $0x70] ss:$8 sps:$4 sm:$0xff]   ;;  %v1786_v34 = vld [vmem:[%s2115_s9 + $0x84] ss:$8 sps:$4 sm:$0xff]   ;;  %v1790_v36 = vld [vmem:[%s2115_s9 + $0x80] ss:$8 sps:$4 sm:$0xff]  }
  0x47   : > { %1181 = vmatpush1.bf16.msra.mxu0 %v1755_v13  ;;  %1099 = vmatprep.subr.bf16.mxu1 %v1756_v14  ;;  %v1785_v33 = vld [vmem:[%s2115_s9 + $0x170] ss:$8 sps:$4 sm:$0xff]   ;;  %v1788_v35 = vld [vmem:[%s2115_s9 + $0x184] ss:$8 sps:$4 sm:$0xff]   ;;  %v1791_v37 = vld [vmem:[%s2115_s9 + $0x180] ss:$8 sps:$4 sm:$0xff]  }
  0x48   : > { %1182 = vmatprep.subr.bf16.mxu0 %v1758_v15  ;;  %v1792_v38 = vld [vmem:[%s2115_s9 + $0x94] ss:$8 sps:$4 sm:$0xff]   ;;  %v1796_v40 = vld [vmem:[%s2115_s9 + $0x90] ss:$8 sps:$4 sm:$0xff]   ;;  %v1798_v42 = vld [vmem:[%s2115_s9 + $0xa4] ss:$8 sps:$4 sm:$0xff]  }
  0x49   : > { %v1794_v39 = vld [vmem:[%s2115_s9 + $0x194] ss:$8 sps:$4 sm:$0xff]   ;;  %v1797_v41 = vld [vmem:[%s2115_s9 + $0x190] ss:$8 sps:$4 sm:$0xff]   ;;  %v1800_v43 = vld [vmem:[%s2115_s9 + $0x1a4] ss:$8 sps:$4 sm:$0xff]  }
  0x4a   : > { %1100 = vmatpush1.bf16.msra.mxu1 %v1760_v16  ;;  %v1802_v44 = vld [vmem:[%s2115_s9 + $0xa0] ss:$8 sps:$4 sm:$0xff]   ;;  %v1804_v46 = vld [vmem:[%s2115_s9 + $0xb4] ss:$8 sps:$4 sm:$0xff]   ;;  %v1808_v48 = vld [vmem:[%s2115_s9 + $0xb0] ss:$8 sps:$4 sm:$0xff]  }
  0x4b   : > { %1183 = vmatpush1.bf16.msra.mxu0 %v1761_v17  ;;  %1101 = vmatprep.subr.bf16.mxu1 %v1762_v18  ;;  %v1803_v45 = vld [vmem:[%s2115_s9 + $0x1a0] ss:$8 sps:$4 sm:$0xff]   ;;  %v1806_v47 = vld [vmem:[%s2115_s9 + $0x1b4] ss:$8 sps:$4 sm:$0xff]   ;;  %v1809_v49 = vld [vmem:[%s2115_s9 + $0x1b0] ss:$8 sps:$4 sm:$0xff]  }
  0x4c   : > { %1184 = vmatprep.subr.bf16.mxu0 %v1764_v19  ;;  %v1810_v50 = vld [vmem:[%s2115_s9 + $0xc4] ss:$8 sps:$4 sm:$0xff]   ;;  %v1814_v52 = vld [vmem:[%s2115_s9 + $0xc0] ss:$8 sps:$4 sm:$0xff]   ;;  %v1816_v54 = vld [vmem:[%s2115_s9 + $0xd4] ss:$8 sps:$4 sm:$0xff]  }
  0x4d   : > { %v1812_v51 = vld [vmem:[%s2115_s9 + $0x1c4] ss:$8 sps:$4 sm:$0xff]   ;;  %v1815_v53 = vld [vmem:[%s2115_s9 + $0x1c0] ss:$8 sps:$4 sm:$0xff]   ;;  %v1818_v55 = vld [vmem:[%s2115_s9 + $0x1d4] ss:$8 sps:$4 sm:$0xff]  }
  0x4e   : > { %1102 = vmatpush1.bf16.msra.mxu1 %v1766_v20  ;;  %v1820_v56 = vld [vmem:[%s2115_s9 + $0xd0] ss:$8 sps:$4 sm:$0xff]   ;;  %v1822_v58 = vld [vmem:[%s2115_s9 + $0xe4] ss:$8 sps:$4 sm:$0xff]   ;;  %v1826_v60 = vld [vmem:[%s2115_s9 + $0xe0] ss:$8 sps:$4 sm:$0xff]   ;;  %v1324_v20 = vlaneseq }
  0x4f   : > { %1185 = vmatpush1.bf16.msra.mxu0 %v1767_v21  ;;  %1103 = vmatprep.subr.bf16.mxu1 %v1768_v22  ;;  %v1821_v57 = vld [vmem:[%s2115_s9 + $0x1d0] ss:$8 sps:$4 sm:$0xff]   ;;  %v1824_v59 = vld [vmem:[%s2115_s9 + $0x1e4] ss:$8 sps:$4 sm:$0xff]   ;;  %v1827_v61 = vld [vmem:[%s2115_s9 + $0x1e0] ss:$8 sps:$4 sm:$0xff]  }
  0x50   : > { %1186 = vmatprep.subr.bf16.mxu0 %v1770_v23  ;;  %v1828_v62 = vld [vmem:[%s2115_s9 + $0xf4] ss:$8 sps:$4 sm:$0xff]   ;;  %v1832_v0 = vld [vmem:[%s2115_s9 + $0xf0] ss:$8 sps:$4 sm:$0xff]   ;;  %s2386_s10 = smov (!%p538_p11, %s1585_s10), 17  ;;  %v1325_v21 = vshrl.u32 %v1324_v20, 7 }
  0x51   : > { %v1830_v63 = vld [vmem:[%s2115_s9 + $0x1f4] ss:$8 sps:$4 sm:$0xff]   ;;  %v1833_v1 = vld [vmem:[%s2115_s9 + $0x1f0] ss:$8 sps:$4 sm:$0xff]   ;;  %s1586_s11 = sshll.u32 %s2386_s10, 3  ;;  %s1697_s23 = smul.u32 160, %s486_s30 }
  0x52   : > { %1104 = vmatpush1.bf16.msra.mxu1 %v1772_v24  ;;  %v1834_v2 = vld [vmem:[%s2374_s0] ss:$16 sps:$4 sm:$0xff]   ;;  %v1837_v3 = vld [vmem:[%s2374_s0 + $0x8] ss:$16 sps:$4 sm:$0xff]   ;;  %v1840_v4 = vld [vmem:[%s2374_s0 + $0x24] ss:$16 sps:$4 sm:$0xff]   ;;  %s541_s20 = scalar_lea.vmem %s2376_s2, %s1586_s11 }
  0x53   : > { %1187 = vmatpush1.bf16.msra.mxu0 %v1773_v25  ;;  %1105 = vmatprep.subr.bf16.mxu1 %v1774_v26  ;;  %v1842_v5 = vld [vmem:[%s2374_s0 + $0x2c] ss:$16 sps:$4 sm:$0xff]   ;;  %v1844_v6 = vld [vmem:[%s2374_s0 + $0x20] ss:$16 sps:$4 sm:$0xff]   ;;  %v1845_v7 = vld [vmem:[%s2374_s0 + $0x28] ss:$16 sps:$4 sm:$0xff]  }
  0x54   : > { %1188 = vmatprep.subr.bf16.mxu0 %v1776_v27  ;;  %v1846_v8 = vld [vmem:[%s2374_s0 + $0x44] ss:$16 sps:$4 sm:$0xff]   ;;  %v1848_v9 = vld [vmem:[%s2374_s0 + $0x4c] ss:$16 sps:$4 sm:$0xff]   ;;  %v1850_v10 = vld [vmem:[%s2374_s0 + $0x40] ss:$16 sps:$4 sm:$0xff]  }
  0x55   : > { %v1851_v11 = vld [vmem:[%s2374_s0 + $0x48] ss:$16 sps:$4 sm:$0xff]   ;;  %v1852_v12 = vld [vmem:[%s2374_s0 + $0x64] ss:$16 sps:$4 sm:$0xff]   ;;  %v1854_v13 = vld [vmem:[%s2374_s0 + $0x6c] ss:$16 sps:$4 sm:$0xff]  }
  0x56   : > { %1106 = vmatpush1.bf16.msra.mxu1 %v1778_v28  ;;  %v1856_v14 = vld [vmem:[%s2374_s0 + $0x60] ss:$16 sps:$4 sm:$0xff]   ;;  %v1857_v15 = vld [vmem:[%s2374_s0 + $0x68] ss:$16 sps:$4 sm:$0xff]   ;;  %v1858_v16 = vld [vmem:[%s2374_s0 + $0x84] ss:$16 sps:$4 sm:$0xff]  }
  0x57   : > { %1189 = vmatpush1.bf16.msra.mxu0 %v1779_v29  ;;  %1107 = vmatprep.subr.bf16.mxu1 %v1780_v30  ;;  %v1860_v17 = vld [vmem:[%s2374_s0 + $0x8c] ss:$16 sps:$4 sm:$0xff]   ;;  %v1862_v18 = vld [vmem:[%s2374_s0 + $0x80] ss:$16 sps:$4 sm:$0xff]   ;;  %v1863_v19 = vld [vmem:[%s2374_s0 + $0x88] ss:$16 sps:$4 sm:$0xff]  }
  0x58   : > { %1190 = vmatprep.subr.bf16.mxu0 %v1782_v31  ;;  %v1326_v22 = vsub.s32 0, %v1325_v21  ;;  %v1302_v23 = vld [vmem:[%s541_s20] sm:$0xff]  ;;  %v1354_v24 = vsub.s32 1, %v1325_v21  ;;  %v1303_v25 = vld [vmem:[%s541_s20 + $0x8] sm:$0xff]  ;;  %s2255_s12 = scalar_lea.vmem [#allocation4], %s1697_s23  ;;  %s1676_s30 = sshll.u32 (%p1959_p6), %s1894_s14, 4 }
  0x59   : > { %s2320_s26 = scalar_lea.vmem (%p1959_p6), %s2377_s3, %s1676_s30 }
  0x5a   : > { %1108 = vmatpush1.bf16.msra.mxu1 %v1784_v32  ;;  %v2239_v26 = vrot.slane %v1302_v23, %v1326_v22  ;;  %v2243_v29 = vrot.slane %v1303_v25, %v1326_v22  ;;  %v2245_v31 = vrot.slane %v1302_v23, %v1354_v24 }
  0x5b   : > { %1191 = vmatpush1.bf16.msra.mxu0 %v1785_v33  ;;  %1109 = vmatprep.subr.bf16.mxu1 %v1786_v34 }
  0x5c   : > { %1192 = vmatprep.subr.bf16.mxu0 %v1788_v35  ;;  %v2247_v35 = vrot.slane %v1303_v25, %v1354_v24 }
  0x5e   : > { %1110 = vmatpush1.bf16.msra.mxu1 %v1790_v36 }
  0x5f   : > { %1193 = vmatpush1.bf16.msra.mxu0 %v1791_v37  ;;  %1111 = vmatprep.subr.bf16.mxu1 %v1792_v38 }
  0x60   : > { %1194 = vmatprep.subr.bf16.mxu0 %v1794_v39 }
  0x62   : > { %1112 = vmatpush1.bf16.msra.mxu1 %v1796_v40 }
  0x63   : > { %1195 = vmatpush1.bf16.msra.mxu0 %v1797_v41  ;;  %1113 = vmatprep.subr.bf16.mxu1 %v1798_v42 }
  0x64   : > { %1196 = vmatprep.subr.bf16.mxu0 %v1800_v43 }
  0x66   : > { %1114 = vmatpush1.bf16.msra.mxu1 %v1802_v44 }
  0x67   : > { %1197 = vmatpush1.bf16.msra.mxu0 %v1803_v45  ;;  %1115 = vmatprep.subr.bf16.mxu1 %v1804_v46 }
  0x68   : > { %1198 = vmatprep.subr.bf16.mxu0 %v1806_v47 }
  0x6a   : > { %1116 = vmatpush1.bf16.msra.mxu1 %v1808_v48 }
  0x6b   : > { %1199 = vmatpush1.bf16.msra.mxu0 %v1809_v49  ;;  %1117 = vmatprep.subr.bf16.mxu1 %v1810_v50 }
  0x6c   : > { %1200 = vmatprep.subr.bf16.mxu0 %v1812_v51 }
  0x6e   : > { %1118 = vmatpush1.bf16.msra.mxu1 %v1814_v52 }
  0x6f   : > { %1201 = vmatpush1.bf16.msra.mxu0 %v1815_v53  ;;  %1119 = vmatprep.subr.bf16.mxu1 %v1816_v54 }
  0x70   : > { %1202 = vmatprep.subr.bf16.mxu0 %v1818_v55 }
  0x72   : > { %1120 = vmatpush1.bf16.msra.mxu1 %v1820_v56 }
  0x73   : > { %1203 = vmatpush1.bf16.msra.mxu0 %v1821_v57  ;;  %1121 = vmatprep.subr.bf16.mxu1 %v1822_v58 }
  0x74   : > { %1204 = vmatprep.subr.bf16.mxu0 %v1824_v59 }
  0x76   : > { %1122 = vmatpush1.bf16.msra.mxu1 %v1826_v60 }
  0x77   : > { %1205 = vmatpush1.bf16.msra.mxu0 %v1827_v61  ;;  %1123 = vmatprep.subr.bf16.mxu1 %v1828_v62 }
  0x78   : > { %1206 = vmatprep.subr.bf16.mxu0 %v1830_v63 }
  0x7a   : > { %1124 = vmatpush1.bf16.msra.mxu1 %v1832_v0 }
  0x7b   : > { %1207 = vmatpush1.bf16.msra.mxu0 %v1833_v1 }
  0x7d   : > { %1126 = vmatmul.mubr.bf16.vlgmr.msra.gmra.mrb[0].mxu1 %v1834_v2 }
  0x7e   : > { %1209 = vmatmul.mubr.bf16.vlgmr.msra.gmra.mrb[0].mxu0 %v1837_v3  ;;  %1135 = vmatprep.mubr.bf16.mxu1 %v1840_v4 }
  0x7f   : > { %1218 = vmatprep.mubr.bf16.mxu0 %v1842_v5 }
  0x85   : > { %1136 = vmatmul.mubr.bf16.gmra.mrb[4].mxu1 %v1844_v6 }
  0x86   : > { %1219 = vmatmul.mubr.bf16.gmra.mrb[4].mxu0 %v1845_v7  ;;  %1145 = vmatprep.mubr.bf16.mxu1 %v1846_v8 }
  0x87   : > { %1228 = vmatprep.mubr.bf16.mxu0 %v1848_v9 }
  0x8d   : > { %1146 = vmatmul.mubr.bf16.gmra.mrb[8].mxu1 %v1850_v10 }
  0x8e   : > { %1229 = vmatmul.mubr.bf16.gmra.mrb[8].mxu0 %v1851_v11  ;;  %1155 = vmatprep.mubr.bf16.mxu1 %v1852_v12 }
  0x8f   : > { %1238 = vmatprep.mubr.bf16.mxu0 %v1854_v13 }
  0x95   : > { %1156 = vmatmul.mubr.bf16.gmra.mrb[12].mxu1 %v1856_v14 }
  0x96   : > { %1239 = vmatmul.mubr.bf16.gmra.mrb[12].mxu0 %v1857_v15  ;;  %1165 = vmatprep.mubr.bf16.mxu1 %v1858_v16 }
  0x97   : > { %1248 = vmatprep.mubr.bf16.mxu0 %v1860_v17 }
  0x9d   : > { %1166 = vmatmul.mubr.bf16.gmra.mrb[16].mxu1 %v1862_v18 }
  0x9e   : > { %1249 = vmatmul.mubr.bf16.gmra.mrb[16].mxu0 %v1863_v19 }
 0x150   : > { %v1127_v27 = vpop.f32.mrb[0].mxu1 }
 0x151   : > { %v1210_v28 = vpop.f32.mrb[0].mxu0  ;;  %v1129_v32 = vpop.f32.mrb[1].mxu1 }
 0x152   : > { %v1211_v30 = vadd.f32 %v1210_v28, %v1127_v27  ;;  %v1212_v33 = vpop.f32.mrb[1].mxu0  ;;  %v1131_v36 = vpop.f32.mrb[2].mxu1 }
 0x153   : > { %v1213_v34 = vadd.f32 %v1212_v33, %v1129_v32  ;;  %v1214_v37 = vpop.f32.mrb[2].mxu0  ;;  %v1133_v40 = vpop.f32.mrb[3].mxu1 }
 0x154   : > { %v1332_v38 = vmul.f32 %v2239_v26, %v1211_v30  ;;  %v1215_v39 = vadd.f32 %v1214_v37, %v1131_v36  ;;  %v1216_v41 = vpop.f32.mrb[3].mxu0 }
 0x155   : > { %v1333_v42 = vmul.f32 %v2243_v29, %v1213_v34  ;;  %v1217_v43 = vadd.f32 %v1216_v41, %v1133_v40 }
 0x156   : > { %v1360_v44 = vadd.f32 %v2245_v31, %v1332_v38  ;;  %v1334_v45 = vmul.f32 %v2239_v26, %v1215_v39 }
 0x157   : > { %v1361_v46 = vadd.f32 %v2247_v35, %v1333_v42  ;;  %v1335_v47 = vmul.f32 %v2243_v29, %v1217_v43 }
 0x158   : > { %1380 = vst [vmem:[%s2255_s12] sm:$0xff] %v1360_v44  ;;  %v1362_v48 = vadd.f32 %v2245_v31, %v1334_v45  ;;  %v1137_v50 = vpop.f32.mrb[4].mxu1 }
 0x159   : > { %1381 = vst [vmem:[%s2255_s12 + $0x8] sm:$0xff] %v1361_v46  ;;  %v1363_v49 = vadd.f32 %v2247_v35, %v1335_v47  ;;  %v1220_v51 = vpop.f32.mrb[4].mxu0  ;;  %v1139_v53 = vpop.f32.mrb[5].mxu1 }
 0x15a   : > { %1382 = vst [vmem:[%s2255_s12 + $0x10] sm:$0xff] %v1362_v48  ;;  %v1221_v52 = vadd.f32 %v1220_v51, %v1137_v50  ;;  %v1222_v54 = vpop.f32.mrb[5].mxu0  ;;  %v1141_v56 = vpop.f32.mrb[6].mxu1 }
 0x15b   : > { %1383 = vst [vmem:[%s2255_s12 + $0x18] sm:$0xff] %v1363_v49  ;;  %v1223_v55 = vadd.f32 %v1222_v54, %v1139_v53  ;;  %v1224_v57 = vpop.f32.mrb[6].mxu0  ;;  %v1143_v60 = vpop.f32.mrb[7].mxu1 }
 0x15c   : > { %v1336_v58 = vmul.f32 %v2239_v26, %v1221_v52  ;;  %v1225_v59 = vadd.f32 %v1224_v57, %v1141_v56  ;;  %v1226_v61 = vpop.f32.mrb[7].mxu0 }
 0x15d   : > { %v1337_v62 = vmul.f32 %v2243_v29, %v1223_v55  ;;  %v1227_v63 = vadd.f32 %v1226_v61, %v1143_v60 }
 0x15e   : > { %v1364_v0 = vadd.f32 %v2245_v31, %v1336_v58  ;;  %v1338_v1 = vmul.f32 %v2239_v26, %v1225_v59 }
 0x15f   : > { %v1365_v2 = vadd.f32 %v2247_v35, %v1337_v62  ;;  %v1339_v3 = vmul.f32 %v2243_v29, %v1227_v63 }
 0x160   : > { %1384 = vst [vmem:[%s2255_s12 + $0x20] sm:$0xff] %v1364_v0  ;;  %v1366_v4 = vadd.f32 %v2245_v31, %v1338_v1  ;;  %v1147_v6 = vpop.f32.mrb[8].mxu1 }
 0x161   : > { %1385 = vst [vmem:[%s2255_s12 + $0x28] sm:$0xff] %v1365_v2  ;;  %v1367_v5 = vadd.f32 %v2247_v35, %v1339_v3  ;;  %v1230_v7 = vpop.f32.mrb[8].mxu0  ;;  %v1149_v9 = vpop.f32.mrb[9].mxu1 }
 0x162   : > { %1386 = vst [vmem:[%s2255_s12 + $0x30] sm:$0xff] %v1366_v4  ;;  %v1231_v8 = vadd.f32 %v1230_v7, %v1147_v6  ;;  %v1232_v10 = vpop.f32.mrb[9].mxu0  ;;  %v1151_v12 = vpop.f32.mrb[10].mxu1 }
 0x163   : > { %1387 = vst [vmem:[%s2255_s12 + $0x38] sm:$0xff] %v1367_v5  ;;  %v1233_v11 = vadd.f32 %v1232_v10, %v1149_v9  ;;  %v1234_v13 = vpop.f32.mrb[10].mxu0  ;;  %v1153_v16 = vpop.f32.mrb[11].mxu1 }
 0x164   : > { %v1340_v14 = vmul.f32 %v2239_v26, %v1231_v8  ;;  %v1235_v15 = vadd.f32 %v1234_v13, %v1151_v12  ;;  %v1236_v17 = vpop.f32.mrb[11].mxu0 }
 0x165   : > { %v1341_v18 = vmul.f32 %v2243_v29, %v1233_v11  ;;  %v1237_v19 = vadd.f32 %v1236_v17, %v1153_v16 }
 0x166   : > { %v1368_v20 = vadd.f32 %v2245_v31, %v1340_v14  ;;  %v1342_v21 = vmul.f32 %v2239_v26, %v1235_v15 }
 0x167   : > { %v1369_v22 = vadd.f32 %v2247_v35, %v1341_v18  ;;  %v1343_v23 = vmul.f32 %v2243_v29, %v1237_v19  ;;  %v1433_v6 = vld [vmem:[%s2255_s12 + $0x20] sm:$0xff] (%p1959_p6) }
 0x168   : > { %1388 = vst [vmem:[%s2255_s12 + $0x40] sm:$0xff] %v1368_v20  ;;  %v1370_v24 = vadd.f32 %v2245_v31, %v1342_v21  ;;  %v1157_v27 = vpop.f32.mrb[12].mxu1  ;;  %v1435_v7 = vld [vmem:[%s2255_s12 + $0x28] sm:$0xff] (%p1959_p6)  ;;  %1434 = vst [vmem:[%s2320_s26 + $0x120] sm:$0xff] (%p1959_p6), %v1433_v6 }
 0x169   : > { %1389 = vst [vmem:[%s2255_s12 + $0x48] sm:$0xff] %v1369_v22  ;;  %v1371_v25 = vadd.f32 %v2247_v35, %v1343_v23  ;;  %v1240_v28 = vpop.f32.mrb[12].mxu0  ;;  %v1159_v32 = vpop.f32.mrb[13].mxu1  ;;  %1436 = vst [vmem:[%s2320_s26 + $0x128] sm:$0xff] (%p1959_p6), %v1435_v7  ;;  %v1437_v8 = vld [vmem:[%s2255_s12 + $0x30] sm:$0xff] (%p1959_p6) }
 0x16a   : > { %1390 = vst [vmem:[%s2255_s12 + $0x50] sm:$0xff] %v1370_v24  ;;  %v1241_v30 = vadd.f32 %v1240_v28, %v1157_v27  ;;  %v1242_v33 = vpop.f32.mrb[13].mxu0  ;;  %v1161_v36 = vpop.f32.mrb[14].mxu1  ;;  %v1439_v9 = vld [vmem:[%s2255_s12 + $0x38] sm:$0xff] (%p1959_p6)  ;;  %1438 = vst [vmem:[%s2320_s26 + $0x1b0] sm:$0xff] (%p1959_p6), %v1437_v8 }
 0x16b   : > { %1391 = vst [vmem:[%s2255_s12 + $0x58] sm:$0xff] %v1371_v25  ;;  %v1243_v34 = vadd.f32 %v1242_v33, %v1159_v32  ;;  %v1244_v37 = vpop.f32.mrb[14].mxu0  ;;  %v1163_v40 = vpop.f32.mrb[15].mxu1  ;;  %1440 = vst [vmem:[%s2320_s26 + $0x1b8] sm:$0xff] (%p1959_p6), %v1439_v9 }
 0x16c   : > { %v1344_v38 = vmul.f32 %v2239_v26, %v1241_v30  ;;  %v1245_v39 = vadd.f32 %v1244_v37, %v1161_v36  ;;  %v1246_v41 = vpop.f32.mrb[15].mxu0 }
 0x16d   : > { %v1345_v42 = vmul.f32 %v2243_v29, %v1243_v34  ;;  %v1247_v43 = vadd.f32 %v1246_v41, %v1163_v40 }
 0x16e   : > { %v1372_v44 = vadd.f32 %v2245_v31, %v1344_v38  ;;  %v1346_v45 = vmul.f32 %v2239_v26, %v1245_v39 }
 0x16f   : > { %v1373_v46 = vadd.f32 %v2247_v35, %v1345_v42  ;;  %v1347_v47 = vmul.f32 %v2243_v29, %v1247_v43  ;;  %v1441_v10 = vld [vmem:[%s2255_s12 + $0x40] sm:$0xff] (%p1959_p6) }
 0x170   : > { %1392 = vst [vmem:[%s2255_s12 + $0x60] sm:$0xff] %v1372_v44  ;;  %v1374_v48 = vadd.f32 %v2245_v31, %v1346_v45  ;;  %v1167_v50 = vpop.f32.mrb[16].mxu1  ;;  %1442 = vst [vmem:[%s2320_s26 + $0x240] sm:$0xff] (%p1959_p6), %v1441_v10  ;;  %v1443_v11 = vld [vmem:[%s2255_s12 + $0x48] sm:$0xff] (%p1959_p6) }
 0x171   : > { %1393 = vst [vmem:[%s2255_s12 + $0x68] sm:$0xff] %v1373_v46  ;;  %v1375_v49 = vadd.f32 %v2247_v35, %v1347_v47  ;;  %v1250_v51 = vpop.f32.mrb[16].mxu0  ;;  %v1169_v53 = vpop.f32.mrb[17].mxu1  ;;  %v1445_v12 = vld [vmem:[%s2255_s12 + $0x50] sm:$0xff] (%p1959_p6)  ;;  %1444 = vst [vmem:[%s2320_s26 + $0x248] sm:$0xff] (%p1959_p6), %v1443_v11 }
 0x172   : > { %1394 = vst [vmem:[%s2255_s12 + $0x70] sm:$0xff] %v1374_v48  ;;  %v1251_v52 = vadd.f32 %v1250_v51, %v1167_v50  ;;  %v1252_v54 = vpop.f32.mrb[17].mxu0  ;;  %v1171_v56 = vpop.f32.mrb[18].mxu1  ;;  %v1447_v13 = vld [vmem:[%s2255_s12 + $0x58] sm:$0xff] (%p1959_p6)  ;;  %1446 = vst [vmem:[%s2320_s26 + $0x2d0] sm:$0xff] (%p1959_p6), %v1445_v12 }
 0x173   : > { %1395 = vst [vmem:[%s2255_s12 + $0x78] sm:$0xff] %v1375_v49  ;;  %v1253_v55 = vadd.f32 %v1252_v54, %v1169_v53  ;;  %v1254_v57 = vpop.f32.mrb[18].mxu0  ;;  %v1173_v60 = vpop.f32.mrb[19].mxu1  ;;  %1448 = vst [vmem:[%s2320_s26 + $0x2d8] sm:$0xff] (%p1959_p6), %v1447_v13 }
 0x174   : > { %v1348_v58 = vmul.f32 %v2239_v26, %v1251_v52  ;;  %v1255_v59 = vadd.f32 %v1254_v57, %v1171_v56  ;;  %v1256_v61 = vpop.f32.mrb[19].mxu0 }
 0x175   : > { %v1349_v62 = vmul.f32 %v2243_v29, %v1253_v55  ;;  %v1257_v63 = vadd.f32 %v1256_v61, %v1173_v60  ;;  %1406 = sbr.rel (!%p1959_p6) target bundleno = 388 (0x184), region = 82 }
 0x176   : > { %v1376_v0 = vadd.f32 %v2245_v31, %v1348_v58  ;;  %v1350_v1 = vmul.f32 %v2239_v26, %v1255_v59  ;;  %v1425_v26 = vld [vmem:[%s2255_s12] sm:$0xff] (%p1959_p6) }
 0x177   : > { %v1377_v2 = vadd.f32 %v2247_v35, %v1349_v62  ;;  %v1351_v3 = vmul.f32 %v2243_v29, %v1257_v63  ;;  %v1427_v29 = vld [vmem:[%s2255_s12 + $0x8] sm:$0xff] (%p1959_p6)  ;;  %1426 = vst [vmem:[%s2320_s26] sm:$0xff] (%p1959_p6), %v1425_v26  ;;  %v1449_v14 = vld [vmem:[%s2255_s12 + $0x60] sm:$0xff] (%p1959_p6) }
 0x178   : > { %1396 = vst [vmem:[%s2255_s12 + $0x80] sm:$0xff] %v1376_v0  ;;  %v1378_v4 = vadd.f32 %v2245_v31, %v1350_v1  ;;  %v1429_v31 = vld [vmem:[%s2255_s12 + $0x10] sm:$0xff] (%p1959_p6)  ;;  %1428 = vst [vmem:[%s2320_s26 + $0x8] sm:$0xff] (%p1959_p6), %v1427_v29  ;;  %v1451_v15 = vld [vmem:[%s2255_s12 + $0x68] sm:$0xff] (%p1959_p6) }
 0x179   : > { %1397 = vst [vmem:[%s2255_s12 + $0x88] sm:$0xff] %v1377_v2  ;;  %v1379_v5 = vadd.f32 %v2247_v35, %v1351_v3  ;;  %v1431_v35 = vld [vmem:[%s2255_s12 + $0x18] sm:$0xff] (%p1959_p6)  ;;  %1430 = vst [vmem:[%s2320_s26 + $0x90] sm:$0xff] (%p1959_p6), %v1429_v31  ;;  %v1453_v16 = vld [vmem:[%s2255_s12 + $0x70] sm:$0xff] (%p1959_p6) }
 0x17a   : > { %1398 = vst [vmem:[%s2255_s12 + $0x90] sm:$0xff] %v1378_v4  ;;  %1432 = vst [vmem:[%s2320_s26 + $0x98] sm:$0xff] (%p1959_p6), %v1431_v35  ;;  %v1455_v17 = vld [vmem:[%s2255_s12 + $0x78] sm:$0xff] (%p1959_p6) }
 0x17b   : > { %1399 = vst [vmem:[%s2255_s12 + $0x98] sm:$0xff] %v1379_v5  ;;  %1450 = vst [vmem:[%s2320_s26 + $0x360] sm:$0xff] (%p1959_p6), %v1449_v14 }
 0x17c   : > { %1452 = vst [vmem:[%s2320_s26 + $0x368] sm:$0xff] %v1451_v15  ;;  %1454 = vst [vmem:[%s2320_s26 + $0x3f0] sm:$0xff] %v1453_v16 }
 0x17d   : > { %1456 = vst [vmem:[%s2320_s26 + $0x3f8] sm:$0xff] %v1455_v17 }
 0x17f   : > { %v1457_v18 = vld [vmem:[%s2255_s12 + $0x80] sm:$0xff] }
 0x180   : > { %v1459_v19 = vld [vmem:[%s2255_s12 + $0x88] sm:$0xff]  ;;  %1458 = vst [vmem:[%s2320_s26 + $0x480] sm:$0xff] %v1457_v18 }
 0x181   : > { %1460 = vst [vmem:[%s2320_s26 + $0x488] sm:$0xff] %v1459_v19  ;;  %v1461_v20 = vld [vmem:[%s2255_s12 + $0x90] sm:$0xff] }
 0x182   : > { %v1463_v21 = vld [vmem:[%s2255_s12 + $0x98] sm:$0xff]  ;;  %1462 = vst [vmem:[%s2320_s26 + $0x510] sm:$0xff] %v1461_v20 }
 0x183   : > { %1464 = vst [vmem:[%s2320_s26 + $0x518] sm:$0xff] %v1463_v21 }
 0x184 PF: > { %s13_s16 = sadd.s32 1, %s1902_s16   ;;  %s2379_s12 = smov %s1890_s13 }
 0x185   : > { %p10_p12 = scmp.ge.s32.totalorder %s13_s16, 11   ;;  %s2380_s13 = smov %s1964_s22 }
 0x186   : > { %s2381_s14 = smov %s1898_s15  ;;  %s2382_s15 = smov %s2384_s17 }
 0x187   :  { %12 = sbr.rel (!%p10_p12) target bundleno = 3 (0x3), region = 142 }

// kernel: decoder_forward.14
= control target key start
LH: loop header
LB: loop body
LE: loop exit
PB: predicated region body
PF: predicated region fallthrough
CT: control target
= control target key end

     0   :  { %s1639_s12 = smov 0   ;;  %s1641_s13 = smov 0   ;;  %s2061_s0 = inlined_call_operand.vmem [shape: bf16[384,256], index: 0, kind: input, shape index: {}]   ;;  %s2062_s1 = inlined_call_operand.vmem [shape: bf16[256,1280], index: 1, kind: input, shape index: {}]   ;;  %s2063_s2 = inlined_call_operand.vmem [shape: f32[8,1280], index: 2, kind: input, shape index: {}]   ;;  %s2064_s3 = inlined_call_operand.vmem [shape: f32[384,1280], index: 3, kind: output, shape index: {}]  }
   0x1   :  { %s1643_s14 = smov 0   ;;  %s1645_s15 = smov 0  }
   0x2   :  { %s1647_s16 = smov 0   ;;  %s1649_s17 = smov 0  }
   0x3   :  { %s1651_s18 = smov 0   ;;  %s1653_s19 = smov 0  }
   0x4   :  { %s1655_s20 = smov 0  }
   0x5 LB: > { %s1298_s21 = sadd.s32 4294967295, %s1617_s20   ;;  %s28_s22 = sadd.s32 1, %s1609_s18  ;;  %s1617_s20 = sphi %s1655_s20, %s13_s20   ;;  %s1613_s19 = sphi %s1653_s19, %s2073_s19   ;;  %s1609_s18 = sphi %s1651_s18, %s2072_s18   ;;  %s1605_s17 = sphi %s1649_s17, %s2071_s17   ;;  %s1601_s16 = sphi %s1647_s16, %s2070_s16   ;;  %s1597_s15 = sphi %s1645_s15, %s2069_s15   ;;  %s1593_s14 = sphi %s1643_s14, %s2068_s14   ;;  %s1589_s13 = sphi %s1641_s13, %s2067_s13   ;;  %s1585_s12 = sphi %s1639_s12, %s2066_s12  }
   0x6   : > { %p30_p0 = scmp.ge.s32.totalorder %s28_s22, 5  ;;  %s32_s23 = sadd.s32 1, %s1613_s19 }
   0x7   : > { %s69_s24 = sadd.s32 1, %s1597_s15  ;;  %p76_p1 = scmp.ne.s32.totalorder %s1597_s15, %s1593_s14 }
   0x8   : > { %s2075_s22 = smov (%p30_p0, %s28_s22), 0  ;;  %s2077_s23 = smov (!%p30_p0, %s32_s23), %s1613_s19 }
   0x9   : > { %s65_s25 = ssub.s32 %s1609_s18, %s2075_s22  ;;  %p77_p2 = scmp.eq.s32.totalorder %s1617_s20, 0 }
   0xa   : > { %p34_p3 = scmp.ge.s32.totalorder %s2077_s23, 3  ;;  %p67_p4 = scmp.eq.s32.totalorder %s65_s25, 0 }
   0xb   : > { %p78_p5 = por %p77_p2, %p76_p1  ;;  %s123_s26 = sadd.s32 1, %s1589_s13 }
   0xc   : > { %s2079_s23 = smov (%p34_p3, %s2077_s23), 0  ;;  %p133_p6 = scmp.ne.s32.totalorder %s1589_s13, %s1585_s12 }
   0xd   : > { %s1700_s27 = scalar_select %p67_p4, %s1597_s15, %s69_s24  }
   0xe   : > { %s118_s28 = ssub.s32 %s1613_s19, %s2079_s23  ;;  %p134_p7 = scmp.eq.s32.totalorder %s1298_s21, 14 }
   0xf   : > { %s120_s29 = sor.u32 %s118_s28, %s65_s25  ;;  %p1301_p10 = scmp.ge.s32.totalorder %s1617_s20, 15 }
  0x10   : > { %p121_p8 = scmp.eq.s32.totalorder %s120_s29, 0  ;;  %p1706_p9 = por %p134_p7, %p133_p6 }
  0x11   : > { %156 = sbr.rel (%p1301_p10) target bundleno = 44 (0x2c), region = 16 }
  0x12   : > { %s1711_s4 = scalar_select %p121_p8, %s1589_s13, %s123_s26  }
  0x18   : > { %174 = sbr.rel (!%p78_p5) target bundleno = 44 (0x2c), region = 24  ;;  %s176_s5 = sand.u32 (%p78_p5), 1, %s1597_s15  }
  0x19   : > { %s1368_s6 = sshll.u32 (%p78_p5), %s1609_s18, 3  ;;  %s1302_s7 = sshll.u32 (%p78_p5), %s176_s5, 8 }
  0x1a   : > { %s1719_s10 = scalar_lea.vmem (%p78_p5), %s2062_s1, %s1368_s6  ;;  %s1724_s11 = scalar_lea.vmem (%p78_p5), [#allocation3], %s1302_s7 }
  0x1b   : > { %v274_v0 = vld [vmem:[%s1719_s10] sm:$0xff] (%p78_p5)  ;;  %v276_v1 = vld [vmem:[%s1719_s10 + $0x28] sm:$0xff] (%p78_p5)  ;;  %v278_v2 = vld [vmem:[%s1719_s10 + $0x50] sm:$0xff] (%p78_p5) }
  0x1c   : > { %275 = vst [vmem:[%s1724_s11] sm:$0xff] (%p78_p5), %v274_v0  ;;  %277 = vst [vmem:[%s1724_s11 + $0x8] sm:$0xff] (%p78_p5), %v276_v1  ;;  %v280_v3 = vld [vmem:[%s1719_s10 + $0x78] sm:$0xff] (%p78_p5)  ;;  %v282_v4 = vld [vmem:[%s1719_s10 + $0xa0] sm:$0xff] (%p78_p5) }
  0x1d   : > { %279 = vst [vmem:[%s1724_s11 + $0x10] sm:$0xff] (%p78_p5), %v278_v2  ;;  %v284_v5 = vld [vmem:[%s1719_s10 + $0xc8] sm:$0xff] (%p78_p5)  ;;  %281 = vst [vmem:[%s1724_s11 + $0x18] sm:$0xff] (%p78_p5), %v280_v3  ;;  %v286_v6 = vld [vmem:[%s1719_s10 + $0xf0] sm:$0xff] (%p78_p5) }
  0x1e   : > { %283 = vst [vmem:[%s1724_s11 + $0x20] sm:$0xff] (%p78_p5), %v282_v4  ;;  %285 = vst [vmem:[%s1724_s11 + $0x28] sm:$0xff] (%p78_p5), %v284_v5  ;;  %v288_v7 = vld [vmem:[%s1719_s10 + $0x118] sm:$0xff] (%p78_p5)  ;;  %v290_v8 = vld [vmem:[%s1719_s10 + $0x140] sm:$0xff] (%p78_p5) }
  0x1f   : > { %287 = vst [vmem:[%s1724_s11 + $0x30] sm:$0xff] %v286_v6  ;;  %289 = vst [vmem:[%s1724_s11 + $0x38] sm:$0xff] %v288_v7  ;;  %v292_v9 = vld [vmem:[%s1719_s10 + $0x168] sm:$0xff]  ;;  %v294_v10 = vld [vmem:[%s1719_s10 + $0x190] sm:$0xff] }
  0x20   : > { %291 = vst [vmem:[%s1724_s11 + $0x40] sm:$0xff] %v290_v8  ;;  %v296_v11 = vld [vmem:[%s1719_s10 + $0x1b8] sm:$0xff]  ;;  %293 = vst [vmem:[%s1724_s11 + $0x48] sm:$0xff] %v292_v9  ;;  %v298_v12 = vld [vmem:[%s1719_s10 + $0x1e0] sm:$0xff] }
  0x21   : > { %295 = vst [vmem:[%s1724_s11 + $0x50] sm:$0xff] %v294_v10  ;;  %297 = vst [vmem:[%s1724_s11 + $0x58] sm:$0xff] %v296_v11  ;;  %v300_v13 = vld [vmem:[%s1719_s10 + $0x208] sm:$0xff]  ;;  %v302_v14 = vld [vmem:[%s1719_s10 + $0x230] sm:$0xff] }
  0x22   : > { %299 = vst [vmem:[%s1724_s11 + $0x60] sm:$0xff] %v298_v12  ;;  %301 = vst [vmem:[%s1724_s11 + $0x68] sm:$0xff] %v300_v13  ;;  %v304_v15 = vld [vmem:[%s1719_s10 + $0x258] sm:$0xff]  ;;  %v306_v16 = vld [vmem:[%s1719_s10 + $0x280] sm:$0xff] }
  0x23   : > { %303 = vst [vmem:[%s1724_s11 + $0x70] sm:$0xff] %v302_v14  ;;  %v308_v17 = vld [vmem:[%s1719_s10 + $0x2a8] sm:$0xff]  ;;  %305 = vst [vmem:[%s1724_s11 + $0x78] sm:$0xff] %v304_v15  ;;  %v310_v18 = vld [vmem:[%s1719_s10 + $0x2d0] sm:$0xff] }
  0x24   : > { %307 = vst [vmem:[%s1724_s11 + $0x80] sm:$0xff] %v306_v16  ;;  %309 = vst [vmem:[%s1724_s11 + $0x88] sm:$0xff] %v308_v17  ;;  %v312_v19 = vld [vmem:[%s1719_s10 + $0x2f8] sm:$0xff]  ;;  %v314_v20 = vld [vmem:[%s1719_s10 + $0x320] sm:$0xff] }
  0x25   : > { %311 = vst [vmem:[%s1724_s11 + $0x90] sm:$0xff] %v310_v18  ;;  %313 = vst [vmem:[%s1724_s11 + $0x98] sm:$0xff] %v312_v19  ;;  %v316_v21 = vld [vmem:[%s1719_s10 + $0x348] sm:$0xff]  ;;  %v318_v22 = vld [vmem:[%s1719_s10 + $0x370] sm:$0xff] }
  0x26   : > { %315 = vst [vmem:[%s1724_s11 + $0xa0] sm:$0xff] %v314_v20  ;;  %v320_v23 = vld [vmem:[%s1719_s10 + $0x398] sm:$0xff]  ;;  %317 = vst [vmem:[%s1724_s11 + $0xa8] sm:$0xff] %v316_v21  ;;  %v322_v24 = vld [vmem:[%s1719_s10 + $0x3c0] sm:$0xff] }
  0x27   : > { %319 = vst [vmem:[%s1724_s11 + $0xb0] sm:$0xff] %v318_v22  ;;  %321 = vst [vmem:[%s1724_s11 + $0xb8] sm:$0xff] %v320_v23  ;;  %v324_v25 = vld [vmem:[%s1719_s10 + $0x3e8] sm:$0xff]  ;;  %v326_v26 = vld [vmem:[%s1719_s10 + $0x410] sm:$0xff] }
  0x28   : > { %323 = vst [vmem:[%s1724_s11 + $0xc0] sm:$0xff] %v322_v24  ;;  %325 = vst [vmem:[%s1724_s11 + $0xc8] sm:$0xff] %v324_v25  ;;  %v328_v27 = vld [vmem:[%s1719_s10 + $0x438] sm:$0xff]  ;;  %v330_v28 = vld [vmem:[%s1719_s10 + $0x460] sm:$0xff] }
  0x29   : > { %327 = vst [vmem:[%s1724_s11 + $0xd0] sm:$0xff] %v326_v26  ;;  %v332_v29 = vld [vmem:[%s1719_s10 + $0x488] sm:$0xff]  ;;  %329 = vst [vmem:[%s1724_s11 + $0xd8] sm:$0xff] %v328_v27  ;;  %v334_v30 = vld [vmem:[%s1719_s10 + $0x4b0] sm:$0xff] }
  0x2a   : > { %331 = vst [vmem:[%s1724_s11 + $0xe0] sm:$0xff] %v330_v28  ;;  %333 = vst [vmem:[%s1724_s11 + $0xe8] sm:$0xff] %v332_v29  ;;  %v336_v31 = vld [vmem:[%s1719_s10 + $0x4d8] sm:$0xff] }
  0x2b   : > { %335 = vst [vmem:[%s1724_s11 + $0xf0] sm:$0xff] %v334_v30  ;;  %337 = vst [vmem:[%s1724_s11 + $0xf8] sm:$0xff] %v336_v31 }
  0x2c PF: > { %p1305_p11 = scmp.ge.s32.totalorder %s1617_s20, 1  ;;  %p351_p12 = scmp.lt.s32.totalorder %s1617_s20, 16 }
  0x2e   : > { %p352_p13 = pnand %p1305_p11, %p351_p12 }
  0x2f   : > { %s358_s21 = sand.u32 (!%p352_p13), 1, %s1593_s14   ;;  %s1308_s14 = sshll.u32 (!%p352_p13), %s1605_s17, 4  ;;  %v987_v16 = vlaneseq (!%p352_p13) }
  0x30   : > { %355 = sbr.rel (%p352_p13) target bundleno = 370 (0x172), region = 66  ;;  %s1306_s24 = sshll.u32 (!%p352_p13), %s358_s21, 8 }
  0x31   : > { %s1790_s25 = scalar_lea.vmem (!%p352_p13), [#allocation3], %s1306_s24  ;;  %p397_p0 = scmp.lt.s32.totalorder (!%p352_p13), %s1308_s14, 47  ;;  %v988_v17 = vshrl.u32 (!%p352_p13), %v987_v16, 7 }
  0x32   : > { %v1475_v32 = vld [vmem:[%s1790_s25 + $0x4] ss:$8 sps:$4 sm:$0xff] (!%p352_p13)   ;;  %v1477_v33 = vld [vmem:[%s1790_s25] ss:$8 sps:$4 sm:$0xff] (!%p352_p13)   ;;  %v1478_v34 = vld [vmem:[%s1790_s25 + $0x14] ss:$8 sps:$4 sm:$0xff] (!%p352_p13)  }
  0x33   : > { %773 = vmatprep.subr.bf16.mxu0 (!%p352_p13), %v1475_v32  ;;  %1370 = vmatprep.subr.bf16.mxu1 (!%p352_p13), %v1475_v32  ;;  %v1480_v35 = vld [vmem:[%s1790_s25 + $0x10] ss:$8 sps:$4 sm:$0xff] (!%p352_p13)   ;;  %v1481_v36 = vld [vmem:[%s1790_s25 + $0x24] ss:$8 sps:$4 sm:$0xff] (!%p352_p13)   ;;  %v1483_v37 = vld [vmem:[%s1790_s25 + $0x20] ss:$8 sps:$4 sm:$0xff] (!%p352_p13)  }
  0x34   : > { %774 = vmatpush1.bf16.msra.mxu0 (!%p352_p13), %v1477_v33  ;;  %1386 = vmatpush1.bf16.msra.mxu1 (!%p352_p13), %v1477_v33  ;;  %v1484_v38 = vld [vmem:[%s1790_s25 + $0x34] ss:$8 sps:$4 sm:$0xff] (!%p352_p13)   ;;  %v1486_v39 = vld [vmem:[%s1790_s25 + $0x30] ss:$8 sps:$4 sm:$0xff] (!%p352_p13)   ;;  %v1487_v40 = vld [vmem:[%s1790_s25 + $0x44] ss:$8 sps:$4 sm:$0xff] (!%p352_p13)  }
  0x35   : > { %775 = vmatprep.subr.bf16.mxu0 (!%p352_p13), %v1478_v34  ;;  %1371 = vmatprep.subr.bf16.mxu1 (!%p352_p13), %v1478_v34  ;;  %v1489_v41 = vld [vmem:[%s1790_s25 + $0x40] ss:$8 sps:$4 sm:$0xff] (!%p352_p13)   ;;  %v1490_v42 = vld [vmem:[%s1790_s25 + $0x54] ss:$8 sps:$4 sm:$0xff] (!%p352_p13)   ;;  %v1492_v43 = vld [vmem:[%s1790_s25 + $0x50] ss:$8 sps:$4 sm:$0xff] (!%p352_p13)  }
  0x36   : > { %v1493_v44 = vld [vmem:[%s1790_s25 + $0x64] ss:$8 sps:$4 sm:$0xff] (!%p352_p13)   ;;  %v1495_v46 = vld [vmem:[%s1790_s25 + $0x60] ss:$8 sps:$4 sm:$0xff] (!%p352_p13)   ;;  %v1496_v48 = vld [vmem:[%s1790_s25 + $0x74] ss:$8 sps:$4 sm:$0xff] (!%p352_p13)  }
  0x37   : > { %s2081_s14 = smov (!%p397_p0, %s1308_s14), 47  ;;  %v1498_v49 = vld [vmem:[%s1790_s25 + $0x70] ss:$8 sps:$4 sm:$0xff]   ;;  %v1499_v50 = vld [vmem:[%s1790_s25 + $0x84] ss:$8 sps:$4 sm:$0xff]   ;;  %s1847_s6 = sshll.u32 %s1601_s16, 1 }
  0x38   : > { %776 = vmatpush1.bf16.msra.mxu0 %v1480_v35  ;;  %1387 = vmatpush1.bf16.msra.mxu1 %v1480_v35  ;;  %s1369_s26 = sshll.u32 %s2081_s14, 3  ;;  %v1501_v51 = vld [vmem:[%s1790_s25 + $0x80] ss:$8 sps:$4 sm:$0xff]   ;;  %v1502_v52 = vld [vmem:[%s1790_s25 + $0x94] ss:$8 sps:$4 sm:$0xff]   ;;  %p410_p1 = scmp.lt.s32.totalorder %s1847_s6, 9 }
  0x39   : > { %777 = vmatprep.subr.bf16.mxu0 %v1481_v36  ;;  %1372 = vmatprep.subr.bf16.mxu1 %v1481_v36  ;;  %s1808_s5 = scalar_lea.vmem %s2061_s0, %s1369_s26  ;;  %v1504_v53 = vld [vmem:[%s1790_s25 + $0x90] ss:$8 sps:$4 sm:$0xff]   ;;  %v1505_v54 = vld [vmem:[%s1790_s25 + $0xa4] ss:$8 sps:$4 sm:$0xff]   ;;  %v1507_v55 = vld [vmem:[%s1790_s25 + $0xa0] ss:$8 sps:$4 sm:$0xff]  }
  0x3a   : > { %v1525_v45 = vld [vmem:[%s1808_s5 + $0x4] ss:$8 sps:$4 sm:$0xff]   ;;  %v1508_v56 = vld [vmem:[%s1790_s25 + $0xb4] ss:$8 sps:$4 sm:$0xff]   ;;  %v1510_v57 = vld [vmem:[%s1790_s25 + $0xb0] ss:$8 sps:$4 sm:$0xff]  }
  0x3b   : > { %v1528_v47 = vld [vmem:[%s1808_s5 + $0x44] ss:$8 sps:$4 sm:$0xff]   ;;  %805 = vmatprep.mubr.bf16.mxu0 %v1525_v45  ;;  %v1513_v59 = vld [vmem:[%s1790_s25 + $0xc0] ss:$8 sps:$4 sm:$0xff]   ;;  %v1514_v60 = vld [vmem:[%s1790_s25 + $0xd4] ss:$8 sps:$4 sm:$0xff]  }
  0x3c   : > { %778 = vmatpush1.bf16.msra.mxu0 %v1483_v37  ;;  %1388 = vmatpush1.bf16.msra.mxu1 %v1483_v37  ;;  %v1511_v58 = vld [vmem:[%s1790_s25 + $0xc4] ss:$8 sps:$4 sm:$0xff]   ;;  %v1516_v61 = vld [vmem:[%s1790_s25 + $0xd0] ss:$8 sps:$4 sm:$0xff]   ;;  %v1519_v63 = vld [vmem:[%s1790_s25 + $0xe0] ss:$8 sps:$4 sm:$0xff]  }
  0x3d   : > { %779 = vmatprep.subr.bf16.mxu0 %v1484_v38  ;;  %1373 = vmatprep.subr.bf16.mxu1 %v1484_v38  ;;  %v1517_v62 = vld [vmem:[%s1790_s25 + $0xe4] ss:$8 sps:$4 sm:$0xff]   ;;  %v1520_v0 = vld [vmem:[%s1790_s25 + $0xf4] ss:$8 sps:$4 sm:$0xff]   ;;  %v1522_v1 = vld [vmem:[%s1790_s25 + $0xf0] ss:$8 sps:$4 sm:$0xff]  }
  0x3e   : > { %845 = vmatprep.mubr.bf16.mxu1 %v1528_v47  ;;  %v1523_v2 = vld [vmem:[%s1808_s5] ss:$8 sps:$4 sm:$0xff]   ;;  %v1529_v4 = vld [vmem:[%s1808_s5 + $0x14] ss:$8 sps:$4 sm:$0xff]   ;;  %v1533_v6 = vld [vmem:[%s1808_s5 + $0x10] ss:$8 sps:$4 sm:$0xff]  }
  0x3f   : > { %v1526_v3 = vld [vmem:[%s1808_s5 + $0x40] ss:$8 sps:$4 sm:$0xff]   ;;  %v1531_v5 = vld [vmem:[%s1808_s5 + $0x54] ss:$8 sps:$4 sm:$0xff]   ;;  %v1534_v7 = vld [vmem:[%s1808_s5 + $0x50] ss:$8 sps:$4 sm:$0xff]  }
  0x40   : > { %780 = vmatpush1.bf16.msra.mxu0 %v1486_v39  ;;  %1389 = vmatpush1.bf16.msra.mxu1 %v1486_v39  ;;  %v1535_v8 = vld [vmem:[%s1808_s5 + $0x24] ss:$8 sps:$4 sm:$0xff]   ;;  %v1539_v10 = vld [vmem:[%s1808_s5 + $0x20] ss:$8 sps:$4 sm:$0xff]   ;;  %v1541_v12 = vld [vmem:[%s1808_s5 + $0x34] ss:$8 sps:$4 sm:$0xff]  }
  0x41   : > { %781 = vmatprep.subr.bf16.mxu0 %v1487_v40  ;;  %1374 = vmatprep.subr.bf16.mxu1 %v1487_v40  ;;  %v1537_v9 = vld [vmem:[%s1808_s5 + $0x64] ss:$8 sps:$4 sm:$0xff]   ;;  %v1540_v11 = vld [vmem:[%s1808_s5 + $0x60] ss:$8 sps:$4 sm:$0xff]   ;;  %v1543_v13 = vld [vmem:[%s1808_s5 + $0x74] ss:$8 sps:$4 sm:$0xff]  }
  0x42   : > { %v1545_v14 = vld [vmem:[%s1808_s5 + $0x30] ss:$8 sps:$4 sm:$0xff]   ;;  %s411_s7 = scalar_select %p410_p1, %s1847_s6, 9  ;;  %v989_v18 = vsub.s32 0, %v988_v17  ;;  %v1029_v20 = vsub.s32 1, %v988_v17 }
  0x43   : > { %v1546_v15 = vld [vmem:[%s1808_s5 + $0x70] ss:$8 sps:$4 sm:$0xff]   ;;  %s392_s21 = sand.u32 1, %s1585_s12   ;;  %s1402_s24 = smul.u32 (%p1706_p9), 160, %s1605_s17 }
  0x44   : > { %782 = vmatpush1.bf16.msra.mxu0 %v1489_v41  ;;  %1390 = vmatpush1.bf16.msra.mxu1 %v1489_v41  ;;  %s1312_s8 = sshll.u32 %s411_s7, 3  ;;  %s1307_s16 = sshll.u32 %s392_s21, 8 }
  0x45   : > { %783 = vmatprep.subr.bf16.mxu0 %v1490_v42  ;;  %1375 = vmatprep.subr.bf16.mxu1 %v1490_v42  ;;  %s413_s11 = scalar_lea.vmem %s2063_s2, %s1312_s8  ;;  %s1875_s12 = scalar_lea.vmem [#allocation4], %s1307_s16 }
  0x46   : > { %v953_v19 = vld [vmem:[%s413_s11] sm:$0xff]  ;;  %v954_v21 = vld [vmem:[%s413_s11 + $0x8] sm:$0xff]  ;;  %s1109_s30 = sadd.s32 (%p1706_p9), %s1402_s24, %s1847_s6 }
  0x47   : > { %v1855_v22 = vrot.slane %v953_v19, %v989_v18  ;;  %v1857_v23 = vrot.slane %v954_v21, %v989_v18  ;;  %v1859_v24 = vrot.slane %v953_v19, %v1029_v20  ;;  %v1861_v27 = vrot.slane %v954_v21, %v1029_v20  ;;  %s1365_s25 = sshll.u32 (%p1706_p9), %s1109_s30, 3 }
  0x48   : > { %784 = vmatpush1.bf16.msra.mxu0 %v1492_v43  ;;  %1391 = vmatpush1.bf16.msra.mxu1 %v1492_v43  ;;  %s1980_s17 = scalar_lea.vmem (%p1706_p9), %s2064_s3, %s1365_s25 }
  0x49   : > { %785 = vmatprep.subr.bf16.mxu0 %v1493_v44  ;;  %1376 = vmatprep.subr.bf16.mxu1 %v1493_v44 }
  0x4c   : > { %786 = vmatpush1.bf16.msra.mxu0 %v1495_v46  ;;  %1392 = vmatpush1.bf16.msra.mxu1 %v1495_v46 }
  0x4d   : > { %787 = vmatprep.subr.bf16.mxu0 %v1496_v48  ;;  %1377 = vmatprep.subr.bf16.mxu1 %v1496_v48 }
  0x50   : > { %788 = vmatpush1.bf16.msra.mxu0 %v1498_v49  ;;  %1393 = vmatpush1.bf16.msra.mxu1 %v1498_v49 }
  0x51   : > { %789 = vmatprep.subr.bf16.mxu0 %v1499_v50  ;;  %1378 = vmatprep.subr.bf16.mxu1 %v1499_v50 }
  0x54   : > { %790 = vmatpush1.bf16.msra.mxu0 %v1501_v51  ;;  %1394 = vmatpush1.bf16.msra.mxu1 %v1501_v51 }
  0x55   : > { %791 = vmatprep.subr.bf16.mxu0 %v1502_v52  ;;  %1379 = vmatprep.subr.bf16.mxu1 %v1502_v52 }
  0x58   : > { %792 = vmatpush1.bf16.msra.mxu0 %v1504_v53  ;;  %1395 = vmatpush1.bf16.msra.mxu1 %v1504_v53 }
  0x59   : > { %793 = vmatprep.subr.bf16.mxu0 %v1505_v54  ;;  %1380 = vmatprep.subr.bf16.mxu1 %v1505_v54 }
  0x5c   : > { %794 = vmatpush1.bf16.msra.mxu0 %v1507_v55  ;;  %1396 = vmatpush1.bf16.msra.mxu1 %v1507_v55 }
  0x5d   : > { %795 = vmatprep.subr.bf16.mxu0 %v1508_v56  ;;  %1381 = vmatprep.subr.bf16.mxu1 %v1508_v56 }
  0x60   : > { %796 = vmatpush1.bf16.msra.mxu0 %v1510_v57  ;;  %1397 = vmatpush1.bf16.msra.mxu1 %v1510_v57 }
  0x61   : > { %797 = vmatprep.subr.bf16.mxu0 %v1511_v58  ;;  %1382 = vmatprep.subr.bf16.mxu1 %v1511_v58 }
  0x64   : > { %798 = vmatpush1.bf16.msra.mxu0 %v1513_v59  ;;  %1398 = vmatpush1.bf16.msra.mxu1 %v1513_v59 }
  0x65   : > { %799 = vmatprep.subr.bf16.mxu0 %v1514_v60  ;;  %1383 = vmatprep.subr.bf16.mxu1 %v1514_v60 }
  0x68   : > { %800 = vmatpush1.bf16.msra.mxu0 %v1516_v61  ;;  %1399 = vmatpush1.bf16.msra.mxu1 %v1516_v61 }
  0x69   : > { %801 = vmatprep.subr.bf16.mxu0 %v1517_v62  ;;  %1384 = vmatprep.subr.bf16.mxu1 %v1517_v62 }
  0x6c   : > { %802 = vmatpush1.bf16.msra.mxu0 %v1519_v63  ;;  %1400 = vmatpush1.bf16.msra.mxu1 %v1519_v63 }
  0x6d   : > { %803 = vmatprep.subr.bf16.mxu0 %v1520_v0  ;;  %1385 = vmatprep.subr.bf16.mxu1 %v1520_v0 }
  0x70   : > { %804 = vmatpush1.bf16.msra.mxu0 %v1522_v1  ;;  %1401 = vmatpush1.bf16.msra.mxu1 %v1522_v1 }
  0x73   : > { %806 = vmatmul.mubr.bf16.vlgmr.msra.gmra.mrb[0].mxu0 %v1523_v2  ;;  %846 = vmatmul.mubr.bf16.vlgmr.msra.gmra.mrb[0].mxu1 %v1526_v3 }
  0x74   : > { %815 = vmatprep.mubr.bf16.mxu0 %v1529_v4  ;;  %855 = vmatprep.mubr.bf16.mxu1 %v1531_v5 }
  0x7b   : > { %816 = vmatmul.mubr.bf16.gmra.mrb[4].mxu0 %v1533_v6  ;;  %856 = vmatmul.mubr.bf16.gmra.mrb[4].mxu1 %v1534_v7 }
  0x7c   : > { %825 = vmatprep.mubr.bf16.mxu0 %v1535_v8  ;;  %865 = vmatprep.mubr.bf16.mxu1 %v1537_v9 }
  0x83   : > { %826 = vmatmul.mubr.bf16.gmra.mrb[8].mxu0 %v1539_v10  ;;  %866 = vmatmul.mubr.bf16.gmra.mrb[8].mxu1 %v1540_v11 }
  0x84   : > { %835 = vmatprep.mubr.bf16.mxu0 %v1541_v12  ;;  %875 = vmatprep.mubr.bf16.mxu1 %v1543_v13 }
  0x8b   : > { %836 = vmatmul.mubr.bf16.gmra.mrb[12].mxu0 %v1545_v14  ;;  %876 = vmatmul.mubr.bf16.gmra.mrb[12].mxu1 %v1546_v15 }
 0x146   : > { %v807_v25 = vpop.f32.mrb[0].mxu0  ;;  %v847_v26 = vpop.f32.mrb[0].mxu1 }
 0x147   : > { %v995_v28 = vmul.f32 %v1855_v22, %v807_v25  ;;  %v1011_v29 = vmul.f32 %v1855_v22, %v847_v26  ;;  %v809_v30 = vpop.f32.mrb[1].mxu0  ;;  %v849_v31 = vpop.f32.mrb[1].mxu1 }
 0x148   : > { %v996_v32 = vmul.f32 %v1857_v23, %v809_v30  ;;  %v1012_v33 = vmul.f32 %v1857_v23, %v849_v31  ;;  %v811_v34 = vpop.f32.mrb[2].mxu0  ;;  %v851_v35 = vpop.f32.mrb[2].mxu1 }
 0x149   : > { %v1035_v36 = vadd.f32 %v1859_v24, %v995_v28  ;;  %v1051_v37 = vadd.f32 %v1859_v24, %v1011_v29  ;;  %v997_v38 = vmul.f32 %v1855_v22, %v811_v34  ;;  %v1013_v39 = vmul.f32 %v1855_v22, %v851_v35  ;;  %v813_v40 = vpop.f32.mrb[3].mxu0  ;;  %v853_v41 = vpop.f32.mrb[3].mxu1 }
 0x14a   : > { %v1036_v42 = vadd.f32 %v1861_v27, %v996_v32  ;;  %v1052_v43 = vadd.f32 %v1861_v27, %v1012_v33  ;;  %v998_v44 = vmul.f32 %v1857_v23, %v813_v40  ;;  %v1014_v45 = vmul.f32 %v1857_v23, %v853_v41 }
 0x14b   : > { %1067 = vst [vmem:[%s1875_s12] sm:$0xff] %v1035_v36  ;;  %1083 = vst [vmem:[%s1875_s12 + $0x80] sm:$0xff] %v1051_v37  ;;  %v1037_v46 = vadd.f32 %v1859_v24, %v997_v38  ;;  %v1053_v47 = vadd.f32 %v1859_v24, %v1013_v39 }
 0x14c   : > { %1068 = vst [vmem:[%s1875_s12 + $0x8] sm:$0xff] %v1036_v42  ;;  %1084 = vst [vmem:[%s1875_s12 + $0x88] sm:$0xff] %v1052_v43  ;;  %v1038_v48 = vadd.f32 %v1861_v27, %v998_v44  ;;  %v1054_v49 = vadd.f32 %v1861_v27, %v1014_v45 }
 0x14d   : > { %1069 = vst [vmem:[%s1875_s12 + $0x10] sm:$0xff] %v1037_v46  ;;  %1085 = vst [vmem:[%s1875_s12 + $0x90] sm:$0xff] %v1053_v47 }
 0x14e   : > { %1070 = vst [vmem:[%s1875_s12 + $0x18] sm:$0xff] %v1038_v48  ;;  %1086 = vst [vmem:[%s1875_s12 + $0x98] sm:$0xff] %v1054_v49  ;;  %v817_v50 = vpop.f32.mrb[4].mxu0  ;;  %v857_v51 = vpop.f32.mrb[4].mxu1 }
 0x14f   : > { %v999_v52 = vmul.f32 %v1855_v22, %v817_v50  ;;  %v1015_v53 = vmul.f32 %v1855_v22, %v857_v51  ;;  %v819_v54 = vpop.f32.mrb[5].mxu0  ;;  %v859_v55 = vpop.f32.mrb[5].mxu1 }
 0x150   : > { %v1000_v56 = vmul.f32 %v1857_v23, %v819_v54  ;;  %v1016_v57 = vmul.f32 %v1857_v23, %v859_v55  ;;  %v821_v58 = vpop.f32.mrb[6].mxu0  ;;  %v861_v59 = vpop.f32.mrb[6].mxu1 }
 0x151   : > { %v1039_v60 = vadd.f32 %v1859_v24, %v999_v52  ;;  %v1055_v61 = vadd.f32 %v1859_v24, %v1015_v53  ;;  %v1001_v62 = vmul.f32 %v1855_v22, %v821_v58  ;;  %v1017_v63 = vmul.f32 %v1855_v22, %v861_v59  ;;  %v823_v0 = vpop.f32.mrb[7].mxu0  ;;  %v863_v1 = vpop.f32.mrb[7].mxu1 }
 0x152   : > { %v1040_v2 = vadd.f32 %v1861_v27, %v1000_v56  ;;  %v1056_v3 = vadd.f32 %v1861_v27, %v1016_v57  ;;  %v1002_v4 = vmul.f32 %v1857_v23, %v823_v0  ;;  %v1018_v5 = vmul.f32 %v1857_v23, %v863_v1 }
 0x153   : > { %1071 = vst [vmem:[%s1875_s12 + $0x20] sm:$0xff] %v1039_v60  ;;  %1087 = vst [vmem:[%s1875_s12 + $0xa0] sm:$0xff] %v1055_v61  ;;  %v1041_v6 = vadd.f32 %v1859_v24, %v1001_v62  ;;  %v1057_v7 = vadd.f32 %v1859_v24, %v1017_v63 }
 0x154   : > { %1072 = vst [vmem:[%s1875_s12 + $0x28] sm:$0xff] %v1040_v2  ;;  %1088 = vst [vmem:[%s1875_s12 + $0xa8] sm:$0xff] %v1056_v3  ;;  %v1042_v8 = vadd.f32 %v1861_v27, %v1002_v4  ;;  %v1058_v9 = vadd.f32 %v1861_v27, %v1018_v5 }
 0x155   : > { %1073 = vst [vmem:[%s1875_s12 + $0x30] sm:$0xff] %v1041_v6  ;;  %1089 = vst [vmem:[%s1875_s12 + $0xb0] sm:$0xff] %v1057_v7  ;;  %v1130_v61 = vld [vmem:[%s1875_s12 + $0x18] sm:$0xff] (%p1706_p9) }
 0x156   : > { %1074 = vst [vmem:[%s1875_s12 + $0x38] sm:$0xff] %v1042_v8  ;;  %1090 = vst [vmem:[%s1875_s12 + $0xb8] sm:$0xff] %v1058_v9  ;;  %v827_v10 = vpop.f32.mrb[8].mxu0  ;;  %v867_v11 = vpop.f32.mrb[8].mxu1 }
 0x157   : > { %v1003_v12 = vmul.f32 %v1855_v22, %v827_v10  ;;  %v1019_v13 = vmul.f32 %v1855_v22, %v867_v11  ;;  %v829_v14 = vpop.f32.mrb[9].mxu0  ;;  %v869_v15 = vpop.f32.mrb[9].mxu1  ;;  %1131 = vst [vmem:[%s1980_s17 + $0x58] sm:$0xff] (%p1706_p9), %v1130_v61  ;;  %v1156_v10 = vld [vmem:[%s1875_s12 + $0x80] sm:$0xff] (%p1706_p9)  ;;  %v1158_v11 = vld [vmem:[%s1875_s12 + $0x88] sm:$0xff] (%p1706_p9) }
 0x158   : > { %v1004_v16 = vmul.f32 %v1857_v23, %v829_v14  ;;  %v1020_v17 = vmul.f32 %v1857_v23, %v869_v15  ;;  %v831_v18 = vpop.f32.mrb[10].mxu0  ;;  %v871_v19 = vpop.f32.mrb[10].mxu1  ;;  %1157 = vst [vmem:[%s1980_s17 + $0x280] sm:$0xff] (%p1706_p9), %v1156_v10  ;;  %1159 = vst [vmem:[%s1980_s17 + $0x288] sm:$0xff] (%p1706_p9), %v1158_v11 }
 0x159   : > { %v1043_v20 = vadd.f32 %v1859_v24, %v1003_v12  ;;  %v1059_v21 = vadd.f32 %v1859_v24, %v1019_v13  ;;  %v1005_v25 = vmul.f32 %v1855_v22, %v831_v18  ;;  %v1021_v26 = vmul.f32 %v1855_v22, %v871_v19  ;;  %v833_v28 = vpop.f32.mrb[11].mxu0  ;;  %v873_v29 = vpop.f32.mrb[11].mxu1  ;;  %v1160_v12 = vld [vmem:[%s1875_s12 + $0x90] sm:$0xff] (%p1706_p9)  ;;  %v1162_v13 = vld [vmem:[%s1875_s12 + $0x98] sm:$0xff] (%p1706_p9) }
 0x15a   : > { %v1044_v30 = vadd.f32 %v1861_v27, %v1004_v16  ;;  %v1060_v31 = vadd.f32 %v1861_v27, %v1020_v17  ;;  %v1006_v32 = vmul.f32 %v1857_v23, %v833_v28  ;;  %v1022_v33 = vmul.f32 %v1857_v23, %v873_v29  ;;  %v1132_v62 = vld [vmem:[%s1875_s12 + $0x20] sm:$0xff] (%p1706_p9)  ;;  %1161 = vst [vmem:[%s1980_s17 + $0x2d0] sm:$0xff] (%p1706_p9), %v1160_v12 }
 0x15b   : > { %1075 = vst [vmem:[%s1875_s12 + $0x40] sm:$0xff] %v1043_v20  ;;  %1091 = vst [vmem:[%s1875_s12 + $0xc0] sm:$0xff] %v1059_v21  ;;  %v1045_v34 = vadd.f32 %v1859_v24, %v1005_v25  ;;  %v1061_v35 = vadd.f32 %v1859_v24, %v1021_v26  ;;  %v1134_v63 = vld [vmem:[%s1875_s12 + $0x28] sm:$0xff] (%p1706_p9)  ;;  %v1164_v14 = vld [vmem:[%s1875_s12 + $0xa0] sm:$0xff] (%p1706_p9) }
 0x15c   : > { %1076 = vst [vmem:[%s1875_s12 + $0x48] sm:$0xff] %v1044_v30  ;;  %1092 = vst [vmem:[%s1875_s12 + $0xc8] sm:$0xff] %v1060_v31  ;;  %v1046_v36 = vadd.f32 %v1861_v27, %v1006_v32  ;;  %v1062_v37 = vadd.f32 %v1861_v27, %v1022_v33  ;;  %v1136_v0 = vld [vmem:[%s1875_s12 + $0x30] sm:$0xff] (%p1706_p9)  ;;  %v1166_v15 = vld [vmem:[%s1875_s12 + $0xa8] sm:$0xff] (%p1706_p9) }
 0x15d   : > { %1077 = vst [vmem:[%s1875_s12 + $0x50] sm:$0xff] %v1045_v34  ;;  %1093 = vst [vmem:[%s1875_s12 + $0xd0] sm:$0xff] %v1061_v35  ;;  %v1138_v1 = vld [vmem:[%s1875_s12 + $0x38] sm:$0xff] (%p1706_p9)  ;;  %v1168_v16 = vld [vmem:[%s1875_s12 + $0xb0] sm:$0xff] (%p1706_p9) }
 0x15e   : > { %1078 = vst [vmem:[%s1875_s12 + $0x58] sm:$0xff] %v1046_v36  ;;  %1094 = vst [vmem:[%s1875_s12 + $0xd8] sm:$0xff] %v1062_v37  ;;  %v837_v38 = vpop.f32.mrb[12].mxu0  ;;  %v877_v39 = vpop.f32.mrb[12].mxu1  ;;  %v1170_v17 = vld [vmem:[%s1875_s12 + $0xb8] sm:$0xff] (%p1706_p9) }
 0x15f   : > { %v1007_v40 = vmul.f32 %v1855_v22, %v837_v38  ;;  %v1023_v41 = vmul.f32 %v1855_v22, %v877_v39  ;;  %v839_v42 = vpop.f32.mrb[13].mxu0  ;;  %v879_v43 = vpop.f32.mrb[13].mxu1  ;;  %1133 = vst [vmem:[%s1980_s17 + $0xa0] sm:$0xff] (%p1706_p9), %v1132_v62  ;;  %1135 = vst [vmem:[%s1980_s17 + $0xa8] sm:$0xff] (%p1706_p9), %v1134_v63 }
 0x160   : > { %v1008_v44 = vmul.f32 %v1857_v23, %v839_v42  ;;  %v1024_v45 = vmul.f32 %v1857_v23, %v879_v43  ;;  %v841_v46 = vpop.f32.mrb[14].mxu0  ;;  %v881_v47 = vpop.f32.mrb[14].mxu1  ;;  %1105 = sbr.rel (!%p1706_p9) target bundleno = 370 (0x172), region = 82  ;;  %1137 = vst [vmem:[%s1980_s17 + $0xf0] sm:$0xff] (%p1706_p9), %v1136_v0  ;;  %1139 = vst [vmem:[%s1980_s17 + $0xf8] sm:$0xff] (%p1706_p9), %v1138_v1 }
 0x161   : > { %v1047_v48 = vadd.f32 %v1859_v24, %v1007_v40  ;;  %v1063_v49 = vadd.f32 %v1859_v24, %v1023_v41  ;;  %v1009_v50 = vmul.f32 %v1855_v22, %v841_v46  ;;  %v1025_v51 = vmul.f32 %v1855_v22, %v881_v47  ;;  %v843_v52 = vpop.f32.mrb[15].mxu0  ;;  %v883_v53 = vpop.f32.mrb[15].mxu1  ;;  %1163 = vst [vmem:[%s1980_s17 + $0x2d8] sm:$0xff] (%p1706_p9), %v1162_v13 }
 0x162   : > { %v1048_v54 = vadd.f32 %v1861_v27, %v1008_v44  ;;  %v1064_v55 = vadd.f32 %v1861_v27, %v1024_v45  ;;  %v1010_v56 = vmul.f32 %v1857_v23, %v843_v52  ;;  %v1026_v57 = vmul.f32 %v1857_v23, %v883_v53  ;;  %v1124_v23 = vld [vmem:[%s1875_s12] sm:$0xff] (%p1706_p9)  ;;  %1165 = vst [vmem:[%s1980_s17 + $0x320] sm:$0xff] (%p1706_p9), %v1164_v14 }
 0x163   : > { %1079 = vst [vmem:[%s1875_s12 + $0x60] sm:$0xff] %v1047_v48  ;;  %1095 = vst [vmem:[%s1875_s12 + $0xe0] sm:$0xff] %v1063_v49  ;;  %v1049_v58 = vadd.f32 %v1859_v24, %v1009_v50  ;;  %v1065_v59 = vadd.f32 %v1859_v24, %v1025_v51  ;;  %v1126_v24 = vld [vmem:[%s1875_s12 + $0x8] sm:$0xff] (%p1706_p9)  ;;  %v1140_v2 = vld [vmem:[%s1875_s12 + $0x40] sm:$0xff] (%p1706_p9) }
 0x164   : > { %1080 = vst [vmem:[%s1875_s12 + $0x68] sm:$0xff] %v1048_v54  ;;  %1096 = vst [vmem:[%s1875_s12 + $0xe8] sm:$0xff] %v1064_v55  ;;  %v1050_v22 = vadd.f32 %v1861_v27, %v1010_v56  ;;  %v1066_v60 = vadd.f32 %v1861_v27, %v1026_v57  ;;  %v1128_v27 = vld [vmem:[%s1875_s12 + $0x10] sm:$0xff] (%p1706_p9)  ;;  %v1142_v3 = vld [vmem:[%s1875_s12 + $0x48] sm:$0xff] (%p1706_p9) }
 0x165   : > { %1081 = vst [vmem:[%s1875_s12 + $0x70] sm:$0xff] %v1049_v58  ;;  %1097 = vst [vmem:[%s1875_s12 + $0xf0] sm:$0xff] %v1065_v59  ;;  %v1144_v4 = vld [vmem:[%s1875_s12 + $0x50] sm:$0xff] (%p1706_p9)  ;;  %v1146_v5 = vld [vmem:[%s1875_s12 + $0x58] sm:$0xff] (%p1706_p9) }
 0x166   : > { %1082 = vst [vmem:[%s1875_s12 + $0x78] sm:$0xff] %v1050_v22  ;;  %1098 = vst [vmem:[%s1875_s12 + $0xf8] sm:$0xff] %v1066_v60  ;;  %v1172_v18 = vld [vmem:[%s1875_s12 + $0xc0] sm:$0xff] (%p1706_p9)  ;;  %v1174_v19 = vld [vmem:[%s1875_s12 + $0xc8] sm:$0xff] (%p1706_p9) }
 0x167   : > { %1125 = vst [vmem:[%s1980_s17] sm:$0xff] %v1124_v23  ;;  %1127 = vst [vmem:[%s1980_s17 + $0x8] sm:$0xff] %v1126_v24  ;;  %v1176_v20 = vld [vmem:[%s1875_s12 + $0xd0] sm:$0xff]  ;;  %v1178_v21 = vld [vmem:[%s1875_s12 + $0xd8] sm:$0xff] }
 0x168   : > { %1129 = vst [vmem:[%s1980_s17 + $0x50] sm:$0xff] %v1128_v27  ;;  %1141 = vst [vmem:[%s1980_s17 + $0x140] sm:$0xff] %v1140_v2 }
 0x169   : > { %1143 = vst [vmem:[%s1980_s17 + $0x148] sm:$0xff] %v1142_v3  ;;  %1145 = vst [vmem:[%s1980_s17 + $0x190] sm:$0xff] %v1144_v4 }
 0x16a   : > { %v1148_v6 = vld [vmem:[%s1875_s12 + $0x60] sm:$0xff]  ;;  %1147 = vst [vmem:[%s1980_s17 + $0x198] sm:$0xff] %v1146_v5  ;;  %1167 = vst [vmem:[%s1980_s17 + $0x328] sm:$0xff] %v1166_v15 }
 0x16b   : > { %v1150_v7 = vld [vmem:[%s1875_s12 + $0x68] sm:$0xff]  ;;  %1149 = vst [vmem:[%s1980_s17 + $0x1e0] sm:$0xff] %v1148_v6  ;;  %1169 = vst [vmem:[%s1980_s17 + $0x370] sm:$0xff] %v1168_v16  ;;  %v1180_v25 = vld [vmem:[%s1875_s12 + $0xe0] sm:$0xff] }
 0x16c   : > { %v1152_v8 = vld [vmem:[%s1875_s12 + $0x70] sm:$0xff]  ;;  %1151 = vst [vmem:[%s1980_s17 + $0x1e8] sm:$0xff] %v1150_v7  ;;  %1171 = vst [vmem:[%s1980_s17 + $0x378] sm:$0xff] %v1170_v17  ;;  %v1182_v26 = vld [vmem:[%s1875_s12 + $0xe8] sm:$0xff] }
 0x16d   : > { %1153 = vst [vmem:[%s1980_s17 + $0x230] sm:$0xff] %v1152_v8  ;;  %v1154_v9 = vld [vmem:[%s1875_s12 + $0x78] sm:$0xff]  ;;  %1173 = vst [vmem:[%s1980_s17 + $0x3c0] sm:$0xff] %v1172_v18  ;;  %v1184_v28 = vld [vmem:[%s1875_s12 + $0xf0] sm:$0xff] }
 0x16e   : > { %1155 = vst [vmem:[%s1980_s17 + $0x238] sm:$0xff] %v1154_v9  ;;  %1175 = vst [vmem:[%s1980_s17 + $0x3c8] sm:$0xff] %v1174_v19  ;;  %v1186_v29 = vld [vmem:[%s1875_s12 + $0xf8] sm:$0xff] }
 0x16f   : > { %1177 = vst [vmem:[%s1980_s17 + $0x410] sm:$0xff] %v1176_v20  ;;  %1179 = vst [vmem:[%s1980_s17 + $0x418] sm:$0xff] %v1178_v21 }
 0x170   : > { %1181 = vst [vmem:[%s1980_s17 + $0x460] sm:$0xff] %v1180_v25  ;;  %1183 = vst [vmem:[%s1980_s17 + $0x468] sm:$0xff] %v1182_v26 }
 0x171   : > { %1185 = vst [vmem:[%s1980_s17 + $0x4b0] sm:$0xff] %v1184_v28  ;;  %1187 = vst [vmem:[%s1980_s17 + $0x4b8] sm:$0xff] %v1186_v29 }
 0x172 PF: > { %s13_s20 = sadd.s32 1, %s1617_s20   ;;  %s2066_s12 = smov %s1589_s13 }
 0x173   : > { %p10_p2 = scmp.ge.s32.totalorder %s13_s20, 17   ;;  %s2067_s13 = smov %s1711_s4 }
 0x174   : > { %s2068_s14 = smov %s1597_s15  ;;  %s2069_s15 = smov %s1700_s27 }
 0x175   : > { %s2070_s16 = smov %s1609_s18  ;;  %s2071_s17 = smov %s1613_s19 }
 0x176   : > { %s2072_s18 = smov %s2075_s22  ;;  %s2073_s19 = smov %s2079_s23 }
 0x177   :  { %12 = sbr.rel (!%p10_p2) target bundleno = 5 (0x5), region = 142 }

// kernel: decoder_forward.15
= control target key start
LH: loop header
LB: loop body
LE: loop exit
PB: predicated region body
PF: predicated region fallthrough
CT: control target
= control target key end

     0   :  { %s1357_s12 = smov 0   ;;  %s1359_s13 = smov 0   ;;  %s1713_s0 = inlined_call_operand.vmem [shape: bf16[1152,128], index: 0, kind: input, shape index: {}]   ;;  %s1714_s1 = inlined_call_operand.vmem [shape: bf16[128,768], index: 1, kind: input, shape index: {}]   ;;  %s1715_s2 = inlined_call_operand.vmem [shape: f32[8,768], index: 2, kind: input, shape index: {}]   ;;  %s1716_s3 = inlined_call_operand.vmem [shape: f32[1152,768], index: 3, kind: output, shape index: {}]  }
   0x1   :  { %s1361_s14 = smov 0   ;;  %s1363_s15 = smov 0  }
   0x2   :  { %s1365_s16 = smov 0   ;;  %s1367_s17 = smov 0  }
   0x3   :  { %s1369_s18 = smov 0   ;;  %s1371_s19 = smov 0  }
   0x4   :  { %s1373_s20 = smov 0  }
   0x5 LB: > { %s1096_s21 = sadd.s32 4294967295, %s1334_s20   ;;  %s28_s22 = sadd.s32 1, %s1326_s18  ;;  %s1334_s20 = sphi %s1373_s20, %s13_s20   ;;  %s1330_s19 = sphi %s1371_s19, %s1725_s19   ;;  %s1326_s18 = sphi %s1369_s18, %s1724_s18   ;;  %s1322_s17 = sphi %s1367_s17, %s1723_s17   ;;  %s1318_s16 = sphi %s1365_s16, %s1722_s16   ;;  %s1314_s15 = sphi %s1363_s15, %s1721_s15   ;;  %s1310_s14 = sphi %s1361_s14, %s1720_s14   ;;  %s1306_s13 = sphi %s1359_s13, %s1719_s13   ;;  %s1302_s12 = sphi %s1357_s12, %s1718_s12  }
   0x6   : > { %p30_p0 = scmp.ge.s32.totalorder %s28_s22, 3  ;;  %s32_s23 = sadd.s32 1, %s1330_s19 }
   0x7   : > { %s69_s24 = sadd.s32 1, %s1314_s15  ;;  %p76_p1 = scmp.ne.s32.totalorder %s1314_s15, %s1310_s14 }
   0x8   : > { %s1727_s22 = smov (%p30_p0, %s28_s22), 0  ;;  %s1729_s23 = smov (!%p30_p0, %s32_s23), %s1330_s19 }
   0x9   : > { %s65_s25 = ssub.s32 %s1326_s18, %s1727_s22  ;;  %p77_p2 = scmp.eq.s32.totalorder %s1334_s20, 0 }
   0xa   : > { %p34_p3 = scmp.ge.s32.totalorder %s1729_s23, 9  ;;  %p67_p4 = scmp.eq.s32.totalorder %s65_s25, 0 }
   0xb   : > { %p78_p5 = por %p77_p2, %p76_p1  ;;  %s123_s26 = sadd.s32 1, %s1306_s13 }
   0xc   : > { %s1731_s23 = smov (%p34_p3, %s1729_s23), 0  ;;  %p133_p6 = scmp.ne.s32.totalorder %s1306_s13, %s1302_s12 }
   0xd   : > { %s1418_s27 = scalar_select %p67_p4, %s1314_s15, %s69_s24  }
   0xe   : > { %s118_s28 = ssub.s32 %s1330_s19, %s1731_s23  ;;  %p134_p7 = scmp.eq.s32.totalorder %s1096_s21, 26 }
   0xf   : > { %s120_s29 = sor.u32 %s118_s28, %s65_s25  ;;  %p1099_p10 = scmp.ge.s32.totalorder %s1334_s20, 27 }
  0x10   : > { %p121_p8 = scmp.eq.s32.totalorder %s120_s29, 0  ;;  %p1424_p9 = por %p134_p7, %p133_p6 }
  0x11   : > { %156 = sbr.rel (%p1099_p10) target bundleno = 36 (0x24), region = 16 }
  0x12   : > { %s1429_s4 = scalar_select %p121_p8, %s1306_s13, %s123_s26  }
  0x18   : > { %171 = sbr.rel (!%p78_p5) target bundleno = 36 (0x24), region = 24  ;;  %s173_s5 = sand.u32 (%p78_p5), 1, %s1314_s15  }
  0x19   : > { %s1141_s6 = sshll.u32 (%p78_p5), %s1326_s18, 3  ;;  %s1100_s7 = sshll.u32 (%p78_p5), %s173_s5, 7 }
  0x1a   : > { %s1437_s10 = scalar_lea.vmem (%p78_p5), %s1714_s1, %s1141_s6  ;;  %s175_s11 = scalar_lea.vmem (%p78_p5), [#allocation3], %s1100_s7 }
  0x1b   : > { %v239_v0 = vld [vmem:[%s1437_s10] sm:$0xff] (%p78_p5)  ;;  %v241_v1 = vld [vmem:[%s1437_s10 + $0x18] sm:$0xff] (%p78_p5)  ;;  %v243_v2 = vld [vmem:[%s1437_s10 + $0x30] sm:$0xff] (%p78_p5) }
  0x1c   : > { %240 = vst [vmem:[%s175_s11] sm:$0xff] (%p78_p5), %v239_v0  ;;  %242 = vst [vmem:[%s175_s11 + $0x8] sm:$0xff] (%p78_p5), %v241_v1  ;;  %v245_v3 = vld [vmem:[%s1437_s10 + $0x48] sm:$0xff] (%p78_p5)  ;;  %v247_v4 = vld [vmem:[%s1437_s10 + $0x60] sm:$0xff] (%p78_p5) }
  0x1d   : > { %244 = vst [vmem:[%s175_s11 + $0x10] sm:$0xff] (%p78_p5), %v243_v2  ;;  %v249_v5 = vld [vmem:[%s1437_s10 + $0x78] sm:$0xff] (%p78_p5)  ;;  %246 = vst [vmem:[%s175_s11 + $0x18] sm:$0xff] (%p78_p5), %v245_v3  ;;  %v251_v6 = vld [vmem:[%s1437_s10 + $0x90] sm:$0xff] (%p78_p5) }
  0x1e   : > { %248 = vst [vmem:[%s175_s11 + $0x20] sm:$0xff] (%p78_p5), %v247_v4  ;;  %250 = vst [vmem:[%s175_s11 + $0x28] sm:$0xff] (%p78_p5), %v249_v5  ;;  %v253_v7 = vld [vmem:[%s1437_s10 + $0xa8] sm:$0xff] (%p78_p5)  ;;  %v255_v8 = vld [vmem:[%s1437_s10 + $0xc0] sm:$0xff] (%p78_p5) }
  0x1f   : > { %252 = vst [vmem:[%s175_s11 + $0x30] sm:$0xff] %v251_v6  ;;  %254 = vst [vmem:[%s175_s11 + $0x38] sm:$0xff] %v253_v7  ;;  %v257_v9 = vld [vmem:[%s1437_s10 + $0xd8] sm:$0xff]  ;;  %v259_v10 = vld [vmem:[%s1437_s10 + $0xf0] sm:$0xff] }
  0x20   : > { %256 = vst [vmem:[%s175_s11 + $0x40] sm:$0xff] %v255_v8  ;;  %v261_v11 = vld [vmem:[%s1437_s10 + $0x108] sm:$0xff]  ;;  %258 = vst [vmem:[%s175_s11 + $0x48] sm:$0xff] %v257_v9  ;;  %v263_v12 = vld [vmem:[%s1437_s10 + $0x120] sm:$0xff] }
  0x21   : > { %260 = vst [vmem:[%s175_s11 + $0x50] sm:$0xff] %v259_v10  ;;  %262 = vst [vmem:[%s175_s11 + $0x58] sm:$0xff] %v261_v11  ;;  %v265_v13 = vld [vmem:[%s1437_s10 + $0x138] sm:$0xff]  ;;  %v267_v14 = vld [vmem:[%s1437_s10 + $0x150] sm:$0xff] }
  0x22   : > { %264 = vst [vmem:[%s175_s11 + $0x60] sm:$0xff] %v263_v12  ;;  %266 = vst [vmem:[%s175_s11 + $0x68] sm:$0xff] %v265_v13  ;;  %v269_v15 = vld [vmem:[%s1437_s10 + $0x168] sm:$0xff] }
  0x23   : > { %268 = vst [vmem:[%s175_s11 + $0x70] sm:$0xff] %v267_v14  ;;  %270 = vst [vmem:[%s175_s11 + $0x78] sm:$0xff] %v269_v15 }
  0x24 PF: > { %p1103_p11 = scmp.ge.s32.totalorder %s1334_s20, 1  ;;  %p284_p12 = scmp.lt.s32.totalorder %s1334_s20, 28 }
  0x26   : > { %p285_p13 = pnand %p1103_p11, %p284_p12 }
  0x27   : > { %s291_s21 = sand.u32 (!%p285_p13), 1, %s1310_s14   ;;  %s1106_s24 = sshll.u32 (!%p285_p13), %s1322_s17, 4  ;;  %v1336_v16 = vmov (!%p285_p13), 0   ;;  %v788_v41 = vlaneseq (!%p285_p13) }
  0x28   : > { %288 = sbr.rel (%p285_p13) target bundleno = 330 (0x14a), region = 66  ;;  %s1104_s25 = sshll.u32 (!%p285_p13), %s291_s21, 7  ;;  %606 = vmatprep.mubr.bf16.mxu0 (!%p285_p13), %v1336_v16  ;;  %646 = vmatprep.mubr.bf16.mxu1 (!%p285_p13), %v1336_v16 }
  0x29   : > { %p327_p0 = scmp.lt.s32.totalorder (!%p285_p13), %s1106_s24, 143  ;;  %s1461_s26 = scalar_lea.vmem (!%p285_p13), [#allocation3], %s1104_s25  ;;  %v789_v42 = vshrl.u32 (!%p285_p13), %v788_v41, 7 }
  0x2a   : > { %v1232_v17 = vld [vmem:[%s1461_s26 + $0x4] ss:$8 sps:$4 sm:$0xff] (!%p285_p13)   ;;  %v1234_v18 = vld [vmem:[%s1461_s26] ss:$8 sps:$4 sm:$0xff] (!%p285_p13)   ;;  %v1235_v19 = vld [vmem:[%s1461_s26 + $0x14] ss:$8 sps:$4 sm:$0xff] (!%p285_p13)  }
  0x2b   : > { %574 = vmatprep.subr.bf16.mxu0 (!%p285_p13), %v1232_v17  ;;  %1142 = vmatprep.subr.bf16.mxu1 (!%p285_p13), %v1232_v17  ;;  %v1237_v20 = vld [vmem:[%s1461_s26 + $0x10] ss:$8 sps:$4 sm:$0xff] (!%p285_p13)   ;;  %v1238_v21 = vld [vmem:[%s1461_s26 + $0x24] ss:$8 sps:$4 sm:$0xff] (!%p285_p13)   ;;  %v1240_v22 = vld [vmem:[%s1461_s26 + $0x20] ss:$8 sps:$4 sm:$0xff] (!%p285_p13)  }
  0x2c   : > { %575 = vmatpush1.bf16.msra.mxu0 (!%p285_p13), %v1234_v18  ;;  %1150 = vmatpush1.bf16.msra.mxu1 (!%p285_p13), %v1234_v18  ;;  %v1241_v23 = vld [vmem:[%s1461_s26 + $0x34] ss:$8 sps:$4 sm:$0xff] (!%p285_p13)   ;;  %v1243_v24 = vld [vmem:[%s1461_s26 + $0x30] ss:$8 sps:$4 sm:$0xff] (!%p285_p13)   ;;  %v1244_v25 = vld [vmem:[%s1461_s26 + $0x44] ss:$8 sps:$4 sm:$0xff] (!%p285_p13)  }
  0x2d   : > { %576 = vmatprep.subr.bf16.mxu0 (!%p285_p13), %v1235_v19  ;;  %1143 = vmatprep.subr.bf16.mxu1 (!%p285_p13), %v1235_v19  ;;  %v1246_v26 = vld [vmem:[%s1461_s26 + $0x40] ss:$8 sps:$4 sm:$0xff] (!%p285_p13)   ;;  %v1247_v27 = vld [vmem:[%s1461_s26 + $0x54] ss:$8 sps:$4 sm:$0xff] (!%p285_p13)   ;;  %v1249_v28 = vld [vmem:[%s1461_s26 + $0x50] ss:$8 sps:$4 sm:$0xff] (!%p285_p13)  }
  0x2e   : > { %v1250_v29 = vld [vmem:[%s1461_s26 + $0x64] ss:$8 sps:$4 sm:$0xff] (!%p285_p13)   ;;  %v1252_v30 = vld [vmem:[%s1461_s26 + $0x60] ss:$8 sps:$4 sm:$0xff] (!%p285_p13)   ;;  %v1253_v31 = vld [vmem:[%s1461_s26 + $0x74] ss:$8 sps:$4 sm:$0xff] (!%p285_p13)  }
  0x2f   : > { %s1733_s24 = smov (!%p327_p0, %s1106_s24), 143  ;;  %v1255_v32 = vld [vmem:[%s1461_s26 + $0x70] ss:$8 sps:$4 sm:$0xff]   ;;  %s1499_s6 = sshll.u32 %s1318_s16, 1  ;;  %v790_v43 = vsub.s32 0, %v789_v42  ;;  %v830_v45 = vsub.s32 1, %v789_v42 }
  0x30   : > { %s1107_s14 = sshll.u32 %s1733_s24, 2  ;;  %577 = vmatpush1.bf16.msra.mxu0 %v1237_v20  ;;  %1151 = vmatpush1.bf16.msra.mxu1 %v1237_v20  ;;  %p338_p1 = scmp.lt.s32.totalorder %s1499_s6, 5 }
  0x31   : > { %578 = vmatprep.subr.bf16.mxu0 %v1238_v21  ;;  %1144 = vmatprep.subr.bf16.mxu1 %v1238_v21  ;;  %s1473_s5 = scalar_lea.vmem %s1713_s0, %s1107_s14  ;;  %s323_s21 = sand.u32 1, %s1302_s12  }
  0x32   : > { %v1256_v33 = vld [vmem:[%s1473_s5] sm:$0xff]   ;;  %v1258_v35 = vld [vmem:[%s1473_s5 + $0x8] sm:$0xff]   ;;  %v1260_v37 = vld [vmem:[%s1473_s5 + $0x10] sm:$0xff]   ;;  %s339_s7 = scalar_select %p338_p1, %s1499_s6, 5 }
  0x33   : > { %v1257_v34 = vld [vmem:[%s1473_s5 + $0x20] sm:$0xff]   ;;  %v1259_v36 = vld [vmem:[%s1473_s5 + $0x28] sm:$0xff]   ;;  %v1261_v38 = vld [vmem:[%s1473_s5 + $0x30] sm:$0xff]   ;;  %s1105_s16 = sshll.u32 %s323_s21, 8  ;;  %s1158_s24 = smul.u32 (%p1424_p9), 96, %s1322_s17 }
  0x34   : > { %579 = vmatpush1.bf16.msra.mxu0 %v1240_v22  ;;  %1152 = vmatpush1.bf16.msra.mxu1 %v1240_v22  ;;  %v1262_v39 = vld [vmem:[%s1473_s5 + $0x18] sm:$0xff]   ;;  %s1109_s8 = sshll.u32 %s339_s7, 3  ;;  %s1527_s12 = scalar_lea.vmem [#allocation4], %s1105_s16 }
  0x35   : > { %580 = vmatprep.subr.bf16.mxu0 %v1241_v23  ;;  %1145 = vmatprep.subr.bf16.mxu1 %v1241_v23  ;;  %v1263_v40 = vld [vmem:[%s1473_s5 + $0x38] sm:$0xff]   ;;  %s341_s11 = scalar_lea.vmem %s1715_s2, %s1109_s8  ;;  %s910_s30 = sadd.s32 (%p1424_p9), %s1158_s24, %s1499_s6 }
  0x36   : > { %v754_v44 = vld [vmem:[%s341_s11] sm:$0xff]  ;;  %v755_v46 = vld [vmem:[%s341_s11 + $0x8] sm:$0xff]  ;;  %s1138_s25 = sshll.u32 (%p1424_p9), %s910_s30, 3 }
  0x37   : > { %v1507_v47 = vrot.slane %v754_v44, %v790_v43  ;;  %v1509_v48 = vrot.slane %v755_v46, %v790_v43  ;;  %v1511_v49 = vrot.slane %v754_v44, %v830_v45  ;;  %v1513_v52 = vrot.slane %v755_v46, %v830_v45  ;;  %s1632_s17 = scalar_lea.vmem (%p1424_p9), %s1716_s3, %s1138_s25 }
  0x38   : > { %581 = vmatpush1.bf16.msra.mxu0 %v1243_v24  ;;  %1153 = vmatpush1.bf16.msra.mxu1 %v1243_v24 }
  0x39   : > { %582 = vmatprep.subr.bf16.mxu0 %v1244_v25  ;;  %1146 = vmatprep.subr.bf16.mxu1 %v1244_v25 }
  0x3c   : > { %583 = vmatpush1.bf16.msra.mxu0 %v1246_v26  ;;  %1154 = vmatpush1.bf16.msra.mxu1 %v1246_v26 }
  0x3d   : > { %584 = vmatprep.subr.bf16.mxu0 %v1247_v27  ;;  %1147 = vmatprep.subr.bf16.mxu1 %v1247_v27 }
  0x40   : > { %585 = vmatpush1.bf16.msra.mxu0 %v1249_v28  ;;  %1155 = vmatpush1.bf16.msra.mxu1 %v1249_v28 }
  0x41   : > { %586 = vmatprep.subr.bf16.mxu0 %v1250_v29  ;;  %1148 = vmatprep.subr.bf16.mxu1 %v1250_v29 }
  0x44   : > { %587 = vmatpush1.bf16.msra.mxu0 %v1252_v30  ;;  %1156 = vmatpush1.bf16.msra.mxu1 %v1252_v30 }
  0x45   : > { %588 = vmatprep.subr.bf16.mxu0 %v1253_v31  ;;  %1149 = vmatprep.subr.bf16.mxu1 %v1253_v31 }
  0x48   : > { %589 = vmatpush1.bf16.msra.mxu0 %v1255_v32  ;;  %1157 = vmatpush1.bf16.msra.mxu1 %v1255_v32 }
  0x4b   : > { %607 = vmatmul.mubr.bf16.vlgmr.msra.gmra.mrb[0].mxu0 %v1256_v33  ;;  %647 = vmatmul.mubr.bf16.vlgmr.msra.gmra.mrb[0].mxu1 %v1257_v34 }
  0x4c   : > { %616 = vmatprep.mubr.bf16.mxu0 %v1336_v16  ;;  %656 = vmatprep.mubr.bf16.mxu1 %v1336_v16 }
  0x53   : > { %617 = vmatmul.mubr.bf16.gmra.mrb[4].mxu0 %v1258_v35  ;;  %657 = vmatmul.mubr.bf16.gmra.mrb[4].mxu1 %v1259_v36 }
  0x54   : > { %626 = vmatprep.mubr.bf16.mxu0 %v1336_v16  ;;  %666 = vmatprep.mubr.bf16.mxu1 %v1336_v16 }
  0x5b   : > { %627 = vmatmul.mubr.bf16.gmra.mrb[8].mxu0 %v1260_v37  ;;  %667 = vmatmul.mubr.bf16.gmra.mrb[8].mxu1 %v1261_v38 }
  0x5c   : > { %636 = vmatprep.mubr.bf16.mxu0 %v1336_v16  ;;  %676 = vmatprep.mubr.bf16.mxu1 %v1336_v16 }
  0x63   : > { %637 = vmatmul.mubr.bf16.gmra.mrb[12].mxu0 %v1262_v39  ;;  %677 = vmatmul.mubr.bf16.gmra.mrb[12].mxu1 %v1263_v40 }
 0x11e   : > { %v608_v50 = vpop.f32.mrb[0].mxu0  ;;  %v648_v51 = vpop.f32.mrb[0].mxu1 }
 0x11f   : > { %v796_v53 = vmul.f32 %v1507_v47, %v608_v50  ;;  %v812_v54 = vmul.f32 %v1507_v47, %v648_v51  ;;  %v610_v55 = vpop.f32.mrb[1].mxu0  ;;  %v650_v56 = vpop.f32.mrb[1].mxu1 }
 0x120   : > { %v797_v57 = vmul.f32 %v1509_v48, %v610_v55  ;;  %v813_v58 = vmul.f32 %v1509_v48, %v650_v56  ;;  %v612_v59 = vpop.f32.mrb[2].mxu0  ;;  %v652_v60 = vpop.f32.mrb[2].mxu1 }
 0x121   : > { %v836_v61 = vadd.f32 %v1511_v49, %v796_v53  ;;  %v852_v62 = vadd.f32 %v1511_v49, %v812_v54  ;;  %v798_v63 = vmul.f32 %v1507_v47, %v612_v59  ;;  %v814_v0 = vmul.f32 %v1507_v47, %v652_v60  ;;  %v614_v1 = vpop.f32.mrb[3].mxu0  ;;  %v654_v2 = vpop.f32.mrb[3].mxu1 }
 0x122   : > { %v837_v3 = vadd.f32 %v1513_v52, %v797_v57  ;;  %v853_v4 = vadd.f32 %v1513_v52, %v813_v58  ;;  %v799_v5 = vmul.f32 %v1509_v48, %v614_v1  ;;  %v815_v6 = vmul.f32 %v1509_v48, %v654_v2 }
 0x123   : > { %868 = vst [vmem:[%s1527_s12] sm:$0xff] %v836_v61  ;;  %884 = vst [vmem:[%s1527_s12 + $0x80] sm:$0xff] %v852_v62  ;;  %v838_v7 = vadd.f32 %v1511_v49, %v798_v63  ;;  %v854_v8 = vadd.f32 %v1511_v49, %v814_v0 }
 0x124   : > { %869 = vst [vmem:[%s1527_s12 + $0x8] sm:$0xff] %v837_v3  ;;  %885 = vst [vmem:[%s1527_s12 + $0x88] sm:$0xff] %v853_v4  ;;  %v839_v9 = vadd.f32 %v1513_v52, %v799_v5  ;;  %v855_v10 = vadd.f32 %v1513_v52, %v815_v6 }
 0x125   : > { %870 = vst [vmem:[%s1527_s12 + $0x10] sm:$0xff] %v838_v7  ;;  %886 = vst [vmem:[%s1527_s12 + $0x90] sm:$0xff] %v854_v8 }
 0x126   : > { %871 = vst [vmem:[%s1527_s12 + $0x18] sm:$0xff] %v839_v9  ;;  %887 = vst [vmem:[%s1527_s12 + $0x98] sm:$0xff] %v855_v10  ;;  %v618_v11 = vpop.f32.mrb[4].mxu0  ;;  %v658_v12 = vpop.f32.mrb[4].mxu1 }
 0x127   : > { %v800_v13 = vmul.f32 %v1507_v47, %v618_v11  ;;  %v816_v14 = vmul.f32 %v1507_v47, %v658_v12  ;;  %v620_v15 = vpop.f32.mrb[5].mxu0  ;;  %v660_v16 = vpop.f32.mrb[5].mxu1 }
 0x128   : > { %v801_v17 = vmul.f32 %v1509_v48, %v620_v15  ;;  %v817_v18 = vmul.f32 %v1509_v48, %v660_v16  ;;  %v622_v19 = vpop.f32.mrb[6].mxu0  ;;  %v662_v20 = vpop.f32.mrb[6].mxu1 }
 0x129   : > { %v840_v21 = vadd.f32 %v1511_v49, %v800_v13  ;;  %v856_v22 = vadd.f32 %v1511_v49, %v816_v14  ;;  %v802_v23 = vmul.f32 %v1507_v47, %v622_v19  ;;  %v818_v24 = vmul.f32 %v1507_v47, %v662_v20  ;;  %v624_v25 = vpop.f32.mrb[7].mxu0  ;;  %v664_v26 = vpop.f32.mrb[7].mxu1 }
 0x12a   : > { %v841_v27 = vadd.f32 %v1513_v52, %v801_v17  ;;  %v857_v28 = vadd.f32 %v1513_v52, %v817_v18  ;;  %v803_v29 = vmul.f32 %v1509_v48, %v624_v25  ;;  %v819_v30 = vmul.f32 %v1509_v48, %v664_v26 }
 0x12b   : > { %872 = vst [vmem:[%s1527_s12 + $0x20] sm:$0xff] %v840_v21  ;;  %888 = vst [vmem:[%s1527_s12 + $0xa0] sm:$0xff] %v856_v22  ;;  %v842_v31 = vadd.f32 %v1511_v49, %v802_v23  ;;  %v858_v32 = vadd.f32 %v1511_v49, %v818_v24 }
 0x12c   : > { %873 = vst [vmem:[%s1527_s12 + $0x28] sm:$0xff] %v841_v27  ;;  %889 = vst [vmem:[%s1527_s12 + $0xa8] sm:$0xff] %v857_v28  ;;  %v843_v33 = vadd.f32 %v1513_v52, %v803_v29  ;;  %v859_v34 = vadd.f32 %v1513_v52, %v819_v30 }
 0x12d   : > { %874 = vst [vmem:[%s1527_s12 + $0x30] sm:$0xff] %v842_v31  ;;  %890 = vst [vmem:[%s1527_s12 + $0xb0] sm:$0xff] %v858_v32  ;;  %v931_v22 = vld [vmem:[%s1527_s12 + $0x18] sm:$0xff] (%p1424_p9) }
 0x12e   : > { %875 = vst [vmem:[%s1527_s12 + $0x38] sm:$0xff] %v843_v33  ;;  %891 = vst [vmem:[%s1527_s12 + $0xb8] sm:$0xff] %v859_v34  ;;  %v628_v35 = vpop.f32.mrb[8].mxu0  ;;  %v668_v36 = vpop.f32.mrb[8].mxu1 }
 0x12f   : > { %v804_v37 = vmul.f32 %v1507_v47, %v628_v35  ;;  %v820_v38 = vmul.f32 %v1507_v47, %v668_v36  ;;  %v630_v39 = vpop.f32.mrb[9].mxu0  ;;  %v670_v40 = vpop.f32.mrb[9].mxu1  ;;  %932 = vst [vmem:[%s1632_s17 + $0x38] sm:$0xff] (%p1424_p9), %v931_v22  ;;  %v957_v35 = vld [vmem:[%s1527_s12 + $0x80] sm:$0xff] (%p1424_p9)  ;;  %v959_v36 = vld [vmem:[%s1527_s12 + $0x88] sm:$0xff] (%p1424_p9) }
 0x130   : > { %v805_v41 = vmul.f32 %v1509_v48, %v630_v39  ;;  %v821_v42 = vmul.f32 %v1509_v48, %v670_v40  ;;  %v632_v43 = vpop.f32.mrb[10].mxu0  ;;  %v672_v44 = vpop.f32.mrb[10].mxu1  ;;  %958 = vst [vmem:[%s1632_s17 + $0x180] sm:$0xff] (%p1424_p9), %v957_v35  ;;  %960 = vst [vmem:[%s1632_s17 + $0x188] sm:$0xff] (%p1424_p9), %v959_v36 }
 0x131   : > { %v844_v45 = vadd.f32 %v1511_v49, %v804_v37  ;;  %v860_v46 = vadd.f32 %v1511_v49, %v820_v38  ;;  %v806_v50 = vmul.f32 %v1507_v47, %v632_v43  ;;  %v822_v51 = vmul.f32 %v1507_v47, %v672_v44  ;;  %v634_v53 = vpop.f32.mrb[11].mxu0  ;;  %v674_v54 = vpop.f32.mrb[11].mxu1  ;;  %v961_v37 = vld [vmem:[%s1527_s12 + $0x90] sm:$0xff] (%p1424_p9)  ;;  %v963_v38 = vld [vmem:[%s1527_s12 + $0x98] sm:$0xff] (%p1424_p9) }
 0x132   : > { %v845_v55 = vadd.f32 %v1513_v52, %v805_v41  ;;  %v861_v56 = vadd.f32 %v1513_v52, %v821_v42  ;;  %v807_v57 = vmul.f32 %v1509_v48, %v634_v53  ;;  %v823_v58 = vmul.f32 %v1509_v48, %v674_v54  ;;  %v933_v23 = vld [vmem:[%s1527_s12 + $0x20] sm:$0xff] (%p1424_p9)  ;;  %962 = vst [vmem:[%s1632_s17 + $0x1b0] sm:$0xff] (%p1424_p9), %v961_v37 }
 0x133   : > { %876 = vst [vmem:[%s1527_s12 + $0x40] sm:$0xff] %v844_v45  ;;  %892 = vst [vmem:[%s1527_s12 + $0xc0] sm:$0xff] %v860_v46  ;;  %v846_v59 = vadd.f32 %v1511_v49, %v806_v50  ;;  %v862_v60 = vadd.f32 %v1511_v49, %v822_v51  ;;  %v935_v24 = vld [vmem:[%s1527_s12 + $0x28] sm:$0xff] (%p1424_p9)  ;;  %v965_v39 = vld [vmem:[%s1527_s12 + $0xa0] sm:$0xff] (%p1424_p9) }
 0x134   : > { %877 = vst [vmem:[%s1527_s12 + $0x48] sm:$0xff] %v845_v55  ;;  %893 = vst [vmem:[%s1527_s12 + $0xc8] sm:$0xff] %v861_v56  ;;  %v847_v61 = vadd.f32 %v1513_v52, %v807_v57  ;;  %v863_v62 = vadd.f32 %v1513_v52, %v823_v58  ;;  %v937_v25 = vld [vmem:[%s1527_s12 + $0x30] sm:$0xff] (%p1424_p9)  ;;  %v967_v40 = vld [vmem:[%s1527_s12 + $0xa8] sm:$0xff] (%p1424_p9) }
 0x135   : > { %878 = vst [vmem:[%s1527_s12 + $0x50] sm:$0xff] %v846_v59  ;;  %894 = vst [vmem:[%s1527_s12 + $0xd0] sm:$0xff] %v862_v60  ;;  %v939_v26 = vld [vmem:[%s1527_s12 + $0x38] sm:$0xff] (%p1424_p9)  ;;  %v969_v41 = vld [vmem:[%s1527_s12 + $0xb0] sm:$0xff] (%p1424_p9) }
 0x136   : > { %879 = vst [vmem:[%s1527_s12 + $0x58] sm:$0xff] %v847_v61  ;;  %895 = vst [vmem:[%s1527_s12 + $0xd8] sm:$0xff] %v863_v62  ;;  %v638_v63 = vpop.f32.mrb[12].mxu0  ;;  %v678_v0 = vpop.f32.mrb[12].mxu1  ;;  %v971_v42 = vld [vmem:[%s1527_s12 + $0xb8] sm:$0xff] (%p1424_p9) }
 0x137   : > { %v808_v1 = vmul.f32 %v1507_v47, %v638_v63  ;;  %v824_v2 = vmul.f32 %v1507_v47, %v678_v0  ;;  %v640_v3 = vpop.f32.mrb[13].mxu0  ;;  %v680_v4 = vpop.f32.mrb[13].mxu1  ;;  %934 = vst [vmem:[%s1632_s17 + $0x60] sm:$0xff] (%p1424_p9), %v933_v23  ;;  %936 = vst [vmem:[%s1632_s17 + $0x68] sm:$0xff] (%p1424_p9), %v935_v24 }
 0x138   : > { %v809_v5 = vmul.f32 %v1509_v48, %v640_v3  ;;  %v825_v6 = vmul.f32 %v1509_v48, %v680_v4  ;;  %v642_v7 = vpop.f32.mrb[14].mxu0  ;;  %v682_v8 = vpop.f32.mrb[14].mxu1  ;;  %906 = sbr.rel (!%p1424_p9) target bundleno = 330 (0x14a), region = 82  ;;  %938 = vst [vmem:[%s1632_s17 + $0x90] sm:$0xff] (%p1424_p9), %v937_v25  ;;  %940 = vst [vmem:[%s1632_s17 + $0x98] sm:$0xff] (%p1424_p9), %v939_v26 }
 0x139   : > { %v848_v9 = vadd.f32 %v1511_v49, %v808_v1  ;;  %v864_v10 = vadd.f32 %v1511_v49, %v824_v2  ;;  %v810_v11 = vmul.f32 %v1507_v47, %v642_v7  ;;  %v826_v12 = vmul.f32 %v1507_v47, %v682_v8  ;;  %v644_v13 = vpop.f32.mrb[15].mxu0  ;;  %v684_v14 = vpop.f32.mrb[15].mxu1  ;;  %964 = vst [vmem:[%s1632_s17 + $0x1b8] sm:$0xff] (%p1424_p9), %v963_v38 }
 0x13a   : > { %v849_v15 = vadd.f32 %v1513_v52, %v809_v5  ;;  %v865_v16 = vadd.f32 %v1513_v52, %v825_v6  ;;  %v811_v17 = vmul.f32 %v1509_v48, %v644_v13  ;;  %v827_v18 = vmul.f32 %v1509_v48, %v684_v14  ;;  %v925_v48 = vld [vmem:[%s1527_s12] sm:$0xff] (%p1424_p9)  ;;  %966 = vst [vmem:[%s1632_s17 + $0x1e0] sm:$0xff] (%p1424_p9), %v965_v39 }
 0x13b   : > { %880 = vst [vmem:[%s1527_s12 + $0x60] sm:$0xff] %v848_v9  ;;  %896 = vst [vmem:[%s1527_s12 + $0xe0] sm:$0xff] %v864_v10  ;;  %v850_v19 = vadd.f32 %v1511_v49, %v810_v11  ;;  %v866_v20 = vadd.f32 %v1511_v49, %v826_v12  ;;  %v927_v49 = vld [vmem:[%s1527_s12 + $0x8] sm:$0xff] (%p1424_p9)  ;;  %v941_v27 = vld [vmem:[%s1527_s12 + $0x40] sm:$0xff] (%p1424_p9) }
 0x13c   : > { %881 = vst [vmem:[%s1527_s12 + $0x68] sm:$0xff] %v849_v15  ;;  %897 = vst [vmem:[%s1527_s12 + $0xe8] sm:$0xff] %v865_v16  ;;  %v851_v47 = vadd.f32 %v1513_v52, %v811_v17  ;;  %v867_v21 = vadd.f32 %v1513_v52, %v827_v18  ;;  %v929_v52 = vld [vmem:[%s1527_s12 + $0x10] sm:$0xff] (%p1424_p9)  ;;  %v943_v28 = vld [vmem:[%s1527_s12 + $0x48] sm:$0xff] (%p1424_p9) }
 0x13d   : > { %882 = vst [vmem:[%s1527_s12 + $0x70] sm:$0xff] %v850_v19  ;;  %898 = vst [vmem:[%s1527_s12 + $0xf0] sm:$0xff] %v866_v20  ;;  %v945_v29 = vld [vmem:[%s1527_s12 + $0x50] sm:$0xff] (%p1424_p9)  ;;  %v947_v30 = vld [vmem:[%s1527_s12 + $0x58] sm:$0xff] (%p1424_p9) }
 0x13e   : > { %883 = vst [vmem:[%s1527_s12 + $0x78] sm:$0xff] %v851_v47  ;;  %899 = vst [vmem:[%s1527_s12 + $0xf8] sm:$0xff] %v867_v21  ;;  %v973_v43 = vld [vmem:[%s1527_s12 + $0xc0] sm:$0xff] (%p1424_p9)  ;;  %v975_v44 = vld [vmem:[%s1527_s12 + $0xc8] sm:$0xff] (%p1424_p9) }
 0x13f   : > { %926 = vst [vmem:[%s1632_s17] sm:$0xff] %v925_v48  ;;  %928 = vst [vmem:[%s1632_s17 + $0x8] sm:$0xff] %v927_v49  ;;  %v977_v45 = vld [vmem:[%s1527_s12 + $0xd0] sm:$0xff]  ;;  %v979_v46 = vld [vmem:[%s1527_s12 + $0xd8] sm:$0xff] }
 0x140   : > { %930 = vst [vmem:[%s1632_s17 + $0x30] sm:$0xff] %v929_v52  ;;  %942 = vst [vmem:[%s1632_s17 + $0xc0] sm:$0xff] %v941_v27 }
 0x141   : > { %944 = vst [vmem:[%s1632_s17 + $0xc8] sm:$0xff] %v943_v28  ;;  %946 = vst [vmem:[%s1632_s17 + $0xf0] sm:$0xff] %v945_v29 }
 0x142   : > { %v949_v31 = vld [vmem:[%s1527_s12 + $0x60] sm:$0xff]  ;;  %948 = vst [vmem:[%s1632_s17 + $0xf8] sm:$0xff] %v947_v30  ;;  %968 = vst [vmem:[%s1632_s17 + $0x1e8] sm:$0xff] %v967_v40 }
 0x143   : > { %v951_v32 = vld [vmem:[%s1527_s12 + $0x68] sm:$0xff]  ;;  %950 = vst [vmem:[%s1632_s17 + $0x120] sm:$0xff] %v949_v31  ;;  %970 = vst [vmem:[%s1632_s17 + $0x210] sm:$0xff] %v969_v41  ;;  %v981_v50 = vld [vmem:[%s1527_s12 + $0xe0] sm:$0xff] }
 0x144   : > { %v953_v33 = vld [vmem:[%s1527_s12 + $0x70] sm:$0xff]  ;;  %952 = vst [vmem:[%s1632_s17 + $0x128] sm:$0xff] %v951_v32  ;;  %972 = vst [vmem:[%s1632_s17 + $0x218] sm:$0xff] %v971_v42  ;;  %v983_v51 = vld [vmem:[%s1527_s12 + $0xe8] sm:$0xff] }
 0x145   : > { %954 = vst [vmem:[%s1632_s17 + $0x150] sm:$0xff] %v953_v33  ;;  %v955_v34 = vld [vmem:[%s1527_s12 + $0x78] sm:$0xff]  ;;  %974 = vst [vmem:[%s1632_s17 + $0x240] sm:$0xff] %v973_v43  ;;  %v985_v53 = vld [vmem:[%s1527_s12 + $0xf0] sm:$0xff] }
 0x146   : > { %956 = vst [vmem:[%s1632_s17 + $0x158] sm:$0xff] %v955_v34  ;;  %976 = vst [vmem:[%s1632_s17 + $0x248] sm:$0xff] %v975_v44  ;;  %v987_v54 = vld [vmem:[%s1527_s12 + $0xf8] sm:$0xff] }
 0x147   : > { %978 = vst [vmem:[%s1632_s17 + $0x270] sm:$0xff] %v977_v45  ;;  %980 = vst [vmem:[%s1632_s17 + $0x278] sm:$0xff] %v979_v46 }
 0x148   : > { %982 = vst [vmem:[%s1632_s17 + $0x2a0] sm:$0xff] %v981_v50  ;;  %984 = vst [vmem:[%s1632_s17 + $0x2a8] sm:$0xff] %v983_v51 }
 0x149   : > { %986 = vst [vmem:[%s1632_s17 + $0x2d0] sm:$0xff] %v985_v53  ;;  %988 = vst [vmem:[%s1632_s17 + $0x2d8] sm:$0xff] %v987_v54 }
 0x14a PF: > { %s13_s20 = sadd.s32 1, %s1334_s20   ;;  %s1718_s12 = smov %s1306_s13 }
 0x14b   : > { %p10_p2 = scmp.ge.s32.totalorder %s13_s20, 29   ;;  %s1719_s13 = smov %s1429_s4 }
 0x14c   : > { %s1720_s14 = smov %s1314_s15  ;;  %s1721_s15 = smov %s1418_s27 }
 0x14d   : > { %s1722_s16 = smov %s1326_s18  ;;  %s1723_s17 = smov %s1330_s19 }
 0x14e   : > { %s1724_s18 = smov %s1727_s22  ;;  %s1725_s19 = smov %s1731_s23 }
 0x14f   :  { %12 = sbr.rel (!%p10_p2) target bundleno = 5 (0x5), region = 142 }

// kernel: decoder_forward.16
= control target key start
LH: loop header
LB: loop body
LE: loop exit
PB: predicated region body
PF: predicated region fallthrough
CT: control target
= control target key end

     0   :  { %s1559_s12 = smov 0   ;;  %s1561_s13 = smov 0   ;;  %s1900_s0 = inlined_call_operand.vmem [shape: bf16[3840,128], index: 0, kind: input, shape index: {}]   ;;  %s1901_s1 = inlined_call_operand.vmem [shape: bf16[128,384], index: 1, kind: input, shape index: {}]   ;;  %s1902_s2 = inlined_call_operand.vmem [shape: f32[8,384], index: 2, kind: input, shape index: {}]   ;;  %s1903_s3 = inlined_call_operand.vmem [shape: f32[3840,384], index: 3, kind: output, shape index: {}]  }
   0x1   :  { %s1563_s14 = smov 0   ;;  %s1565_s15 = smov 0  }
   0x2   :  { %s1567_s16 = smov 0   ;;  %s1569_s17 = smov 0  }
   0x3   :  { %s1571_s18 = smov 0   ;;  %s1573_s19 = smov 0  }
   0x4   :  { %s1575_s20 = smov 0  }
   0x5 LB: > { %s1240_s21 = sadd.s32 4294967295, %s1537_s20   ;;  %s28_s22 = sadd.s32 1, %s1529_s18  ;;  %s1537_s20 = sphi %s1575_s20, %s13_s20   ;;  %s1533_s19 = sphi %s1573_s19, %s1912_s19   ;;  %s1529_s18 = sphi %s1571_s18, %s1911_s18   ;;  %s1525_s17 = sphi %s1569_s17, %s1910_s17   ;;  %s1521_s16 = sphi %s1567_s16, %s1909_s16   ;;  %s1517_s15 = sphi %s1565_s15, %s1908_s15   ;;  %s1513_s14 = sphi %s1563_s14, %s1907_s14   ;;  %s1509_s13 = sphi %s1561_s13, %s1906_s13   ;;  %s1505_s12 = sphi %s1559_s12, %s1905_s12  }
   0x6   : > { %p30_p0 = scmp.ge.s32.totalorder %s28_s22, 3  ;;  %s32_s23 = sadd.s32 1, %s1533_s19 }
   0x7   : > { %s69_s24 = sadd.s32 1, %s1517_s15  ;;  %p76_p1 = scmp.ne.s32.totalorder %s1517_s15, %s1513_s14 }
   0x8   : > { %s1914_s22 = smov (%p30_p0, %s28_s22), 0  ;;  %s1916_s23 = smov (!%p30_p0, %s32_s23), %s1533_s19 }
   0x9   : > { %s65_s25 = ssub.s32 %s1529_s18, %s1914_s22  ;;  %p77_p2 = scmp.eq.s32.totalorder %s1537_s20, 0 }
   0xa   : > { %p34_p3 = scmp.ge.s32.totalorder %s1916_s23, 15  ;;  %p67_p4 = scmp.eq.s32.totalorder %s65_s25, 0 }
   0xb   : > { %p78_p5 = por %p77_p2, %p76_p1  ;;  %s123_s26 = sadd.s32 1, %s1509_s13 }
   0xc   : > { %s1918_s23 = smov (%p34_p3, %s1916_s23), 0  ;;  %p133_p6 = scmp.ne.s32.totalorder %s1509_s13, %s1505_s12 }
   0xd   : > { %s1620_s27 = scalar_select %p67_p4, %s1517_s15, %s69_s24  }
   0xe   : > { %s118_s28 = ssub.s32 %s1533_s19, %s1918_s23  ;;  %p134_p7 = scmp.eq.s32.totalorder %s1240_s21, 44 }
   0xf   : > { %s120_s29 = sor.u32 %s118_s28, %s65_s25  ;;  %p1243_p10 = scmp.ge.s32.totalorder %s1537_s20, 45 }
  0x10   : > { %p121_p8 = scmp.eq.s32.totalorder %s120_s29, 0  ;;  %p1626_p9 = por %p134_p7, %p133_p6 }
  0x11   : > { %156 = sbr.rel (%p1243_p10) target bundleno = 38 (0x26), region = 16 }
  0x12   : > { %s1631_s4 = scalar_select %p121_p8, %s1509_s13, %s123_s26  }
  0x18   : > { %171 = sbr.rel (!%p78_p5) target bundleno = 38 (0x26), region = 24  ;;  %s173_s5 = sand.u32 (%p78_p5), 1, %s1517_s15  }
  0x19   : > { %s1245_s6 = sshll.u32 (%p78_p5), %s1529_s18, 2  ;;  %s1244_s7 = sshll.u32 (%p78_p5), %s173_s5, 6 }
  0x1a   : > { %s1639_s10 = scalar_lea.vmem (%p78_p5), %s1901_s1, %s1245_s6  ;;  %s175_s11 = scalar_lea.vmem (%p78_p5), [#allocation3], %s1244_s7 }
  0x1b   : > { %v196_v0 = vld [vmem:[%s1639_s10] sm:$0xf] (%p78_p5)  ;;  %v198_v1 = vld [vmem:[%s1639_s10 + $0xc] sm:$0xf] (%p78_p5)  ;;  %v200_v2 = vld [vmem:[%s1639_s10 + $0x18] sm:$0xf] (%p78_p5) }
  0x1c   : > { %197 = vst [vmem:[%s175_s11] sm:$0xf] (%p78_p5), %v196_v0  ;;  %199 = vst [vmem:[%s175_s11 + $0x4] sm:$0xf] (%p78_p5), %v198_v1  ;;  %v202_v3 = vld [vmem:[%s1639_s10 + $0x24] sm:$0xf] (%p78_p5) }
  0x1d   : > { %v204_v4 = vld [vmem:[%s1639_s10 + $0x30] sm:$0xf] (%p78_p5)  ;;  %201 = vst [vmem:[%s175_s11 + $0x8] sm:$0xf] (%p78_p5), %v200_v2  ;;  %203 = vst [vmem:[%s175_s11 + $0xc] sm:$0xf] (%p78_p5), %v202_v3 }
  0x1e   : > { %205 = vst [vmem:[%s175_s11 + $0x10] sm:$0xf] (%p78_p5), %v204_v4  ;;  %v206_v5 = vld [vmem:[%s1639_s10 + $0x3c] sm:$0xf] (%p78_p5)  ;;  %v208_v6 = vld [vmem:[%s1639_s10 + $0x48] sm:$0xf] (%p78_p5) }
  0x1f   : > { %v210_v7 = vld [vmem:[%s1639_s10 + $0x54] sm:$0xf]  ;;  %207 = vst [vmem:[%s175_s11 + $0x14] sm:$0xf] %v206_v5  ;;  %209 = vst [vmem:[%s175_s11 + $0x18] sm:$0xf] %v208_v6 }
  0x20   : > { %211 = vst [vmem:[%s175_s11 + $0x1c] sm:$0xf] %v210_v7  ;;  %v212_v8 = vld [vmem:[%s1639_s10 + $0x60] sm:$0xf]  ;;  %v214_v9 = vld [vmem:[%s1639_s10 + $0x6c] sm:$0xf] }
  0x21   : > { %v216_v10 = vld [vmem:[%s1639_s10 + $0x78] sm:$0xf]  ;;  %213 = vst [vmem:[%s175_s11 + $0x20] sm:$0xf] %v212_v8  ;;  %215 = vst [vmem:[%s175_s11 + $0x24] sm:$0xf] %v214_v9 }
  0x22   : > { %217 = vst [vmem:[%s175_s11 + $0x28] sm:$0xf] %v216_v10  ;;  %v218_v11 = vld [vmem:[%s1639_s10 + $0x84] sm:$0xf]  ;;  %v220_v12 = vld [vmem:[%s1639_s10 + $0x90] sm:$0xf] }
  0x23   : > { %v222_v13 = vld [vmem:[%s1639_s10 + $0x9c] sm:$0xf]  ;;  %219 = vst [vmem:[%s175_s11 + $0x2c] sm:$0xf] %v218_v11  ;;  %221 = vst [vmem:[%s175_s11 + $0x30] sm:$0xf] %v220_v12 }
  0x24   : > { %223 = vst [vmem:[%s175_s11 + $0x34] sm:$0xf] %v222_v13  ;;  %v224_v14 = vld [vmem:[%s1639_s10 + $0xa8] sm:$0xf]  ;;  %v226_v15 = vld [vmem:[%s1639_s10 + $0xb4] sm:$0xf] }
  0x25   : > { %225 = vst [vmem:[%s175_s11 + $0x38] sm:$0xf] %v224_v14  ;;  %227 = vst [vmem:[%s175_s11 + $0x3c] sm:$0xf] %v226_v15 }
  0x26 PF: > { %p1246_p11 = scmp.ge.s32.totalorder %s1537_s20, 1  ;;  %p288_p12 = scmp.lt.s32.totalorder %s1537_s20, 46 }
  0x28   : > { %p289_p13 = pnand %p1246_p11, %p288_p12 }
  0x29   : > { %s295_s21 = sand.u32 (!%p289_p13), 1, %s1513_s14   ;;  %s1249_s24 = sshll.u32 (!%p289_p13), %s1525_s17, 5  ;;  %v866_v40 = vlaneseq (!%p289_p13) }
  0x2a   : > { %292 = sbr.rel (%p289_p13) target bundleno = 332 (0x14c), region = 69  ;;  %s1247_s25 = sshll.u32 (!%p289_p13), %s295_s21, 6 }
  0x2b   : > { %p330_p0 = scmp.lt.s32.totalorder (!%p289_p13), %s1249_s24, 479  ;;  %s1661_s26 = scalar_lea.vmem (!%p289_p13), [#allocation3], %s1247_s25  ;;  %v867_v41 = vshrl.u32 (!%p289_p13), %v866_v40, 7 }
  0x2c   : > { %v1443_v16 = vld [vmem:[%s1661_s26] sm:$0xff] (!%p289_p13)   ;;  %v1444_v17 = vld [vmem:[%s1661_s26 + $0x8] sm:$0xff] (!%p289_p13)   ;;  %v1445_v18 = vld [vmem:[%s1661_s26 + $0x10] sm:$0xff] (!%p289_p13)   ;;  %p339_p1 = scmp.lt.s32.totalorder (!%p289_p13), %s1521_s16, 2  ;;  %s326_s11 = sand.u32 (!%p289_p13), 1, %s1505_s12  }
  0x2d   : > { %1306 = vmatprep.subr.bf16.mxu0 (!%p289_p13), %v1443_v16  ;;  %1354 = vmatprep.subr.bf16.mxu1 (!%p289_p13), %v1443_v16  ;;  %v1446_v19 = vld [vmem:[%s1661_s26 + $0x18] sm:$0xff] (!%p289_p13)   ;;  %v1447_v22 = vld [vmem:[%s1661_s26 + $0x20] sm:$0xff] (!%p289_p13)   ;;  %v1448_v23 = vld [vmem:[%s1661_s26 + $0x28] sm:$0xff] (!%p289_p13)   ;;  %v868_v42 = vsub.s32 (!%p289_p13), 0, %v867_v41  ;;  %v904_v44 = vsub.s32 (!%p289_p13), 1, %v867_v41  ;;  %s1248_s21 = sshll.u32 (!%p289_p13), %s326_s11, 8 }
  0x2e   : > { %1307 = vmatpush3.bf16.msra.mxu0 (!%p289_p13), %v1443_v16  ;;  %1362 = vmatpush3.bf16.msra.mxu1 (!%p289_p13), %v1443_v16  ;;  %v1449_v24 = vld [vmem:[%s1661_s26 + $0x30] sm:$0xff] (!%p289_p13)   ;;  %v1450_v25 = vld [vmem:[%s1661_s26 + $0x38] sm:$0xff] (!%p289_p13)   ;;  %s1714_s12 = scalar_lea.vmem (!%p289_p13), [#allocation4], %s1248_s21 }
  0x2f   : > { %1308 = vmatprep.subr.bf16.mxu0 (!%p289_p13), %v1444_v17  ;;  %1355 = vmatprep.subr.bf16.mxu1 (!%p289_p13), %v1444_v17 }
  0x31   : > { %s1920_s24 = smov (!%p330_p0, %s1249_s24), 479 }
  0x32   : > { %s1250_s28 = sshll.u32 %s1920_s24, 2  ;;  %1309 = vmatpush3.bf16.msra.mxu0 %v1444_v17  ;;  %1363 = vmatpush3.bf16.msra.mxu1 %v1444_v17  ;;  %s1370_s24 = smul.u32 (%p1626_p9), 96, %s1525_s17 }
  0x33   : > { %s1669_s5 = scalar_lea.vmem %s1900_s0, %s1250_s28  ;;  %1310 = vmatprep.subr.bf16.mxu0 %v1445_v18  ;;  %1356 = vmatprep.subr.bf16.mxu1 %v1445_v18 }
  0x34   : > { %v1451_v20 = vld [vmem:[%s1669_s5] sm:$0xff]   ;;  %v1453_v26 = vld [vmem:[%s1669_s5 + $0x8] sm:$0xff]   ;;  %v1455_v28 = vld [vmem:[%s1669_s5 + $0x10] sm:$0xff]   ;;  %s340_s6 = scalar_select %p339_p1, %s1521_s16, 2 }
  0x35   : > { %v1452_v21 = vld [vmem:[%s1669_s5 + $0x40] sm:$0xff]   ;;  %1322 = vmatprep.mubr.bf16.mxu0 %v1451_v20  ;;  %v1454_v27 = vld [vmem:[%s1669_s5 + $0x48] sm:$0xff]   ;;  %v1456_v29 = vld [vmem:[%s1669_s5 + $0x50] sm:$0xff]   ;;  %s979_s30 = sadd.s32 (%p1626_p9), %s1521_s16, %s1370_s24 }
  0x36   : > { %1311 = vmatpush3.bf16.msra.mxu0 %v1445_v18  ;;  %1364 = vmatpush3.bf16.msra.mxu1 %v1445_v18  ;;  %v1457_v30 = vld [vmem:[%s1669_s5 + $0x18] sm:$0xff]   ;;  %v1459_v32 = vld [vmem:[%s1669_s5 + $0x20] sm:$0xff]   ;;  %v1461_v34 = vld [vmem:[%s1669_s5 + $0x28] sm:$0xff]   ;;  %s1251_s7 = sshll.u32 %s340_s6, 3  ;;  %s1279_s25 = sshll.u32 (%p1626_p9), %s979_s30, 3 }
  0x37   : > { %1312 = vmatprep.subr.bf16.mxu0 %v1446_v19  ;;  %1357 = vmatprep.subr.bf16.mxu1 %v1446_v19  ;;  %v1458_v31 = vld [vmem:[%s1669_s5 + $0x58] sm:$0xff]   ;;  %v1460_v33 = vld [vmem:[%s1669_s5 + $0x60] sm:$0xff]   ;;  %v1462_v35 = vld [vmem:[%s1669_s5 + $0x68] sm:$0xff]   ;;  %s342_s10 = scalar_lea.vmem %s1902_s2, %s1251_s7  ;;  %s1819_s17 = scalar_lea.vmem (%p1626_p9), %s1903_s3, %s1279_s25 }
  0x38   : > { %1338 = vmatprep.mubr.bf16.mxu1 %v1452_v21  ;;  %v1463_v36 = vld [vmem:[%s1669_s5 + $0x30] sm:$0xff]   ;;  %v1465_v38 = vld [vmem:[%s1669_s5 + $0x38] sm:$0xff]   ;;  %v833_v43 = vld [vmem:[%s342_s10] sm:$0xff] }
  0x39   : > { %v1464_v37 = vld [vmem:[%s1669_s5 + $0x70] sm:$0xff]   ;;  %v1466_v39 = vld [vmem:[%s1669_s5 + $0x78] sm:$0xff]   ;;  %v1698_v45 = vrot.slane %v833_v43, %v868_v42  ;;  %v1700_v46 = vrot.slane %v833_v43, %v904_v44 }
  0x3a   : > { %1313 = vmatpush3.bf16.msra.mxu0 %v1446_v19  ;;  %1365 = vmatpush3.bf16.msra.mxu1 %v1446_v19 }
  0x3b   : > { %1314 = vmatprep.subr.bf16.mxu0 %v1447_v22  ;;  %1358 = vmatprep.subr.bf16.mxu1 %v1447_v22 }
  0x3e   : > { %1315 = vmatpush3.bf16.msra.mxu0 %v1447_v22  ;;  %1366 = vmatpush3.bf16.msra.mxu1 %v1447_v22 }
  0x3f   : > { %1316 = vmatprep.subr.bf16.mxu0 %v1448_v23  ;;  %1359 = vmatprep.subr.bf16.mxu1 %v1448_v23 }
  0x42   : > { %1317 = vmatpush3.bf16.msra.mxu0 %v1448_v23  ;;  %1367 = vmatpush3.bf16.msra.mxu1 %v1448_v23 }
  0x43   : > { %1318 = vmatprep.subr.bf16.mxu0 %v1449_v24  ;;  %1360 = vmatprep.subr.bf16.mxu1 %v1449_v24 }
  0x46   : > { %1319 = vmatpush3.bf16.msra.mxu0 %v1449_v24  ;;  %1368 = vmatpush3.bf16.msra.mxu1 %v1449_v24 }
  0x47   : > { %1320 = vmatprep.subr.bf16.mxu0 %v1450_v25  ;;  %1361 = vmatprep.subr.bf16.mxu1 %v1450_v25 }
  0x4a   : > { %1321 = vmatpush3.bf16.msra.mxu0 %v1450_v25  ;;  %1369 = vmatpush3.bf16.msra.mxu1 %v1450_v25 }
  0x4d   : > { %1323 = vmatmul.mubr.bf16.vlgmr.msra.gmra.mrb[0].mxu0 %v1453_v26  ;;  %1339 = vmatmul.mubr.bf16.vlgmr.msra.gmra.mrb[0].mxu1 %v1454_v27 }
  0x4e   : > { %1326 = vmatprep.mubr.bf16.mxu0 %v1455_v28  ;;  %1342 = vmatprep.mubr.bf16.mxu1 %v1456_v29 }
  0x55   : > { %1327 = vmatmul.mubr.bf16.gmra.mrb[4].mxu0 %v1457_v30  ;;  %1343 = vmatmul.mubr.bf16.gmra.mrb[4].mxu1 %v1458_v31 }
  0x56   : > { %1330 = vmatprep.mubr.bf16.mxu0 %v1459_v32  ;;  %1346 = vmatprep.mubr.bf16.mxu1 %v1460_v33 }
  0x5d   : > { %1331 = vmatmul.mubr.bf16.gmra.mrb[8].mxu0 %v1461_v34  ;;  %1347 = vmatmul.mubr.bf16.gmra.mrb[8].mxu1 %v1462_v35 }
  0x5e   : > { %1334 = vmatprep.mubr.bf16.mxu0 %v1463_v36  ;;  %1350 = vmatprep.mubr.bf16.mxu1 %v1464_v37 }
  0x65   : > { %1335 = vmatmul.mubr.bf16.gmra.mrb[12].mxu0 %v1465_v38  ;;  %1351 = vmatmul.mubr.bf16.gmra.mrb[12].mxu1 %v1466_v39 }
 0x120   : > { %v1324_v47 = vpop.f32.mrb[0].mxu0  ;;  %v1340_v48 = vpop.f32.mrb[0].mxu1 }
 0x121   : > { %v872_v49 = vmul.f32 %v1324_v47, %v1698_v45  ;;  %v888_v50 = vmul.f32 %v1340_v48, %v1698_v45  ;;  %v639_v51 = vpop.f32.mrb[1].mxu0  ;;  %v703_v52 = vpop.f32.mrb[1].mxu1 }
 0x122   : > { %v870_v53 = vmul.f32 %v1698_v45, %v639_v51  ;;  %v886_v54 = vmul.f32 %v1698_v45, %v703_v52  ;;  %v1325_v55 = vpop.f32.mrb[2].mxu0  ;;  %v1341_v56 = vpop.f32.mrb[2].mxu1 }
 0x123   : > { %v908_v57 = vadd.f32 %v1700_v46, %v872_v49  ;;  %v924_v58 = vadd.f32 %v1700_v46, %v888_v50  ;;  %v873_v59 = vmul.f32 %v1325_v55, %v1698_v45  ;;  %v889_v60 = vmul.f32 %v1341_v56, %v1698_v45  ;;  %v642_v61 = vpop.f32.mrb[3].mxu0  ;;  %v706_v62 = vpop.f32.mrb[3].mxu1 }
 0x124   : > { %v906_v63 = vadd.f32 %v1700_v46, %v870_v53  ;;  %v922_v0 = vadd.f32 %v1700_v46, %v886_v54  ;;  %v871_v1 = vmul.f32 %v1698_v45, %v642_v61  ;;  %v887_v2 = vmul.f32 %v1698_v45, %v706_v62 }
 0x125   : > { %940 = vst [vmem:[%s1714_s12 + $0x10] sm:$0xff] %v908_v57  ;;  %956 = vst [vmem:[%s1714_s12 + $0x90] sm:$0xff] %v924_v58  ;;  %v909_v3 = vadd.f32 %v1700_v46, %v873_v59  ;;  %v925_v4 = vadd.f32 %v1700_v46, %v889_v60 }
 0x126   : > { %938 = vst [vmem:[%s1714_s12] sm:$0xff] %v906_v63  ;;  %954 = vst [vmem:[%s1714_s12 + $0x80] sm:$0xff] %v922_v0  ;;  %v907_v5 = vadd.f32 %v1700_v46, %v871_v1  ;;  %v923_v6 = vadd.f32 %v1700_v46, %v887_v2 }
 0x127   : > { %941 = vst [vmem:[%s1714_s12 + $0x18] sm:$0xff] %v909_v3  ;;  %957 = vst [vmem:[%s1714_s12 + $0x98] sm:$0xff] %v925_v4 }
 0x128   : > { %939 = vst [vmem:[%s1714_s12 + $0x8] sm:$0xff] %v907_v5  ;;  %955 = vst [vmem:[%s1714_s12 + $0x88] sm:$0xff] %v923_v6  ;;  %v1328_v7 = vpop.f32.mrb[4].mxu0  ;;  %v1344_v8 = vpop.f32.mrb[4].mxu1 }
 0x129   : > { %v876_v9 = vmul.f32 %v1328_v7, %v1698_v45  ;;  %v892_v10 = vmul.f32 %v1344_v8, %v1698_v45  ;;  %v655_v11 = vpop.f32.mrb[5].mxu0  ;;  %v719_v12 = vpop.f32.mrb[5].mxu1 }
 0x12a   : > { %v874_v13 = vmul.f32 %v1698_v45, %v655_v11  ;;  %v890_v14 = vmul.f32 %v1698_v45, %v719_v12  ;;  %v1329_v15 = vpop.f32.mrb[6].mxu0  ;;  %v1345_v16 = vpop.f32.mrb[6].mxu1 }
 0x12b   : > { %v912_v17 = vadd.f32 %v1700_v46, %v876_v9  ;;  %v928_v18 = vadd.f32 %v1700_v46, %v892_v10  ;;  %v877_v19 = vmul.f32 %v1329_v15, %v1698_v45  ;;  %v893_v20 = vmul.f32 %v1345_v16, %v1698_v45  ;;  %v658_v21 = vpop.f32.mrb[7].mxu0  ;;  %v722_v22 = vpop.f32.mrb[7].mxu1 }
 0x12c   : > { %v910_v23 = vadd.f32 %v1700_v46, %v874_v13  ;;  %v926_v24 = vadd.f32 %v1700_v46, %v890_v14  ;;  %v875_v25 = vmul.f32 %v1698_v45, %v658_v21  ;;  %v891_v26 = vmul.f32 %v1698_v45, %v722_v22 }
 0x12d   : > { %944 = vst [vmem:[%s1714_s12 + $0x30] sm:$0xff] %v912_v17  ;;  %960 = vst [vmem:[%s1714_s12 + $0xb0] sm:$0xff] %v928_v18  ;;  %v913_v27 = vadd.f32 %v1700_v46, %v877_v19  ;;  %v929_v28 = vadd.f32 %v1700_v46, %v893_v20  ;;  %v1075_v17 = vld [vmem:[%s1714_s12 + $0x10] sm:$0xff] (%p1626_p9) }
 0x12e   : > { %942 = vst [vmem:[%s1714_s12 + $0x20] sm:$0xff] %v910_v23  ;;  %958 = vst [vmem:[%s1714_s12 + $0xa0] sm:$0xff] %v926_v24  ;;  %v911_v29 = vadd.f32 %v1700_v46, %v875_v25  ;;  %v927_v30 = vadd.f32 %v1700_v46, %v891_v26  ;;  %v1077_v18 = vld [vmem:[%s1714_s12 + $0x18] sm:$0xff] (%p1626_p9) }
 0x12f   : > { %945 = vst [vmem:[%s1714_s12 + $0x38] sm:$0xff] %v913_v27  ;;  %961 = vst [vmem:[%s1714_s12 + $0xb8] sm:$0xff] %v929_v28 }
 0x130   : > { %943 = vst [vmem:[%s1714_s12 + $0x28] sm:$0xff] %v911_v29  ;;  %959 = vst [vmem:[%s1714_s12 + $0xa8] sm:$0xff] %v927_v30  ;;  %v1332_v31 = vpop.f32.mrb[8].mxu0  ;;  %v1348_v32 = vpop.f32.mrb[8].mxu1 }
 0x131   : > { %v880_v33 = vmul.f32 %v1332_v31, %v1698_v45  ;;  %v896_v34 = vmul.f32 %v1348_v32, %v1698_v45  ;;  %v671_v35 = vpop.f32.mrb[9].mxu0  ;;  %v735_v36 = vpop.f32.mrb[9].mxu1  ;;  %1076 = vst [vmem:[%s1819_s17 + $0x30] sm:$0xff] (%p1626_p9), %v1075_v17  ;;  %1078 = vst [vmem:[%s1819_s17 + $0x48] sm:$0xff] (%p1626_p9), %v1077_v18  ;;  %v1103_v31 = vld [vmem:[%s1714_s12 + $0x80] sm:$0xff] (%p1626_p9)  ;;  %v1105_v32 = vld [vmem:[%s1714_s12 + $0x88] sm:$0xff] (%p1626_p9) }
 0x132   : > { %v878_v37 = vmul.f32 %v1698_v45, %v671_v35  ;;  %v894_v38 = vmul.f32 %v1698_v45, %v735_v36  ;;  %v1333_v39 = vpop.f32.mrb[10].mxu0  ;;  %v1349_v40 = vpop.f32.mrb[10].mxu1  ;;  %1104 = vst [vmem:[%s1819_s17 + $0x180] sm:$0xff] (%p1626_p9), %v1103_v31  ;;  %1106 = vst [vmem:[%s1819_s17 + $0x198] sm:$0xff] (%p1626_p9), %v1105_v32 }
 0x133   : > { %v916_v41 = vadd.f32 %v1700_v46, %v880_v33  ;;  %v932_v42 = vadd.f32 %v1700_v46, %v896_v34  ;;  %v881_v43 = vmul.f32 %v1333_v39, %v1698_v45  ;;  %v897_v44 = vmul.f32 %v1349_v40, %v1698_v45  ;;  %v674_v47 = vpop.f32.mrb[11].mxu0  ;;  %v738_v48 = vpop.f32.mrb[11].mxu1  ;;  %v1107_v33 = vld [vmem:[%s1714_s12 + $0x90] sm:$0xff] (%p1626_p9)  ;;  %v1109_v34 = vld [vmem:[%s1714_s12 + $0x98] sm:$0xff] (%p1626_p9) }
 0x134   : > { %v914_v49 = vadd.f32 %v1700_v46, %v878_v37  ;;  %v930_v50 = vadd.f32 %v1700_v46, %v894_v38  ;;  %v879_v51 = vmul.f32 %v1698_v45, %v674_v47  ;;  %v895_v52 = vmul.f32 %v1698_v45, %v738_v48  ;;  %v1083_v21 = vld [vmem:[%s1714_s12 + $0x30] sm:$0xff] (%p1626_p9)  ;;  %1108 = vst [vmem:[%s1819_s17 + $0x1b0] sm:$0xff] (%p1626_p9), %v1107_v33 }
 0x135   : > { %948 = vst [vmem:[%s1714_s12 + $0x50] sm:$0xff] %v916_v41  ;;  %964 = vst [vmem:[%s1714_s12 + $0xd0] sm:$0xff] %v932_v42  ;;  %v917_v53 = vadd.f32 %v1700_v46, %v881_v43  ;;  %v933_v54 = vadd.f32 %v1700_v46, %v897_v44  ;;  %v1079_v19 = vld [vmem:[%s1714_s12 + $0x20] sm:$0xff] (%p1626_p9)  ;;  %v1115_v37 = vld [vmem:[%s1714_s12 + $0xb0] sm:$0xff] (%p1626_p9) }
 0x136   : > { %946 = vst [vmem:[%s1714_s12 + $0x40] sm:$0xff] %v914_v49  ;;  %962 = vst [vmem:[%s1714_s12 + $0xc0] sm:$0xff] %v930_v50  ;;  %v915_v55 = vadd.f32 %v1700_v46, %v879_v51  ;;  %v931_v56 = vadd.f32 %v1700_v46, %v895_v52  ;;  %v1085_v22 = vld [vmem:[%s1714_s12 + $0x38] sm:$0xff] (%p1626_p9)  ;;  %v1111_v35 = vld [vmem:[%s1714_s12 + $0xa0] sm:$0xff] (%p1626_p9) }
 0x137   : > { %949 = vst [vmem:[%s1714_s12 + $0x58] sm:$0xff] %v917_v53  ;;  %965 = vst [vmem:[%s1714_s12 + $0xd8] sm:$0xff] %v933_v54  ;;  %v1081_v20 = vld [vmem:[%s1714_s12 + $0x28] sm:$0xff] (%p1626_p9)  ;;  %v1117_v38 = vld [vmem:[%s1714_s12 + $0xb8] sm:$0xff] (%p1626_p9) }
 0x138   : > { %947 = vst [vmem:[%s1714_s12 + $0x48] sm:$0xff] %v915_v55  ;;  %963 = vst [vmem:[%s1714_s12 + $0xc8] sm:$0xff] %v931_v56  ;;  %v1336_v57 = vpop.f32.mrb[12].mxu0  ;;  %v1352_v58 = vpop.f32.mrb[12].mxu1  ;;  %v1113_v36 = vld [vmem:[%s1714_s12 + $0xa8] sm:$0xff] (%p1626_p9) }
 0x139   : > { %v884_v59 = vmul.f32 %v1336_v57, %v1698_v45  ;;  %v900_v60 = vmul.f32 %v1352_v58, %v1698_v45  ;;  %v687_v61 = vpop.f32.mrb[13].mxu0  ;;  %v751_v62 = vpop.f32.mrb[13].mxu1  ;;  %1080 = vst [vmem:[%s1819_s17 + $0x60] sm:$0xff] (%p1626_p9), %v1079_v19  ;;  %1082 = vst [vmem:[%s1819_s17 + $0x78] sm:$0xff] (%p1626_p9), %v1081_v20 }
 0x13a   : > { %v882_v63 = vmul.f32 %v1698_v45, %v687_v61  ;;  %v898_v0 = vmul.f32 %v1698_v45, %v751_v62  ;;  %v1337_v1 = vpop.f32.mrb[14].mxu0  ;;  %v1353_v2 = vpop.f32.mrb[14].mxu1  ;;  %976 = sbr.rel (!%p1626_p9) target bundleno = 332 (0x14c), region = 85  ;;  %1084 = vst [vmem:[%s1819_s17 + $0x90] sm:$0xff] (%p1626_p9), %v1083_v21  ;;  %1086 = vst [vmem:[%s1819_s17 + $0xa8] sm:$0xff] (%p1626_p9), %v1085_v22 }
 0x13b   : > { %v920_v3 = vadd.f32 %v1700_v46, %v884_v59  ;;  %v936_v4 = vadd.f32 %v1700_v46, %v900_v60  ;;  %v885_v5 = vmul.f32 %v1337_v1, %v1698_v45  ;;  %v901_v6 = vmul.f32 %v1353_v2, %v1698_v45  ;;  %v690_v7 = vpop.f32.mrb[15].mxu0  ;;  %v754_v8 = vpop.f32.mrb[15].mxu1  ;;  %1110 = vst [vmem:[%s1819_s17 + $0x1c8] sm:$0xff] (%p1626_p9), %v1109_v34 }
 0x13c   : > { %v918_v9 = vadd.f32 %v1700_v46, %v882_v63  ;;  %v934_v10 = vadd.f32 %v1700_v46, %v898_v0  ;;  %v883_v11 = vmul.f32 %v1698_v45, %v690_v7  ;;  %v899_v12 = vmul.f32 %v1698_v45, %v754_v8  ;;  %v1071_v45 = vld [vmem:[%s1714_s12] sm:$0xff] (%p1626_p9)  ;;  %v1091_v25 = vld [vmem:[%s1714_s12 + $0x50] sm:$0xff] (%p1626_p9)  ;;  %1112 = vst [vmem:[%s1819_s17 + $0x1e0] sm:$0xff] (%p1626_p9), %v1111_v35 }
 0x13d   : > { %952 = vst [vmem:[%s1714_s12 + $0x70] sm:$0xff] %v920_v3  ;;  %968 = vst [vmem:[%s1714_s12 + $0xf0] sm:$0xff] %v936_v4  ;;  %v921_v13 = vadd.f32 %v1700_v46, %v885_v5  ;;  %v937_v14 = vadd.f32 %v1700_v46, %v901_v6  ;;  %v1087_v23 = vld [vmem:[%s1714_s12 + $0x40] sm:$0xff] (%p1626_p9)  ;;  %v1123_v41 = vld [vmem:[%s1714_s12 + $0xd0] sm:$0xff] (%p1626_p9) }
 0x13e   : > { %950 = vst [vmem:[%s1714_s12 + $0x60] sm:$0xff] %v918_v9  ;;  %966 = vst [vmem:[%s1714_s12 + $0xe0] sm:$0xff] %v934_v10  ;;  %v919_v15 = vadd.f32 %v1700_v46, %v883_v11  ;;  %v935_v16 = vadd.f32 %v1700_v46, %v899_v12  ;;  %v1073_v46 = vld [vmem:[%s1714_s12 + $0x8] sm:$0xff] (%p1626_p9)  ;;  %v1093_v26 = vld [vmem:[%s1714_s12 + $0x58] sm:$0xff] (%p1626_p9) }
 0x13f   : > { %953 = vst [vmem:[%s1714_s12 + $0x78] sm:$0xff] %v921_v13  ;;  %969 = vst [vmem:[%s1714_s12 + $0xf8] sm:$0xff] %v937_v14  ;;  %v1089_v24 = vld [vmem:[%s1714_s12 + $0x48] sm:$0xff] (%p1626_p9)  ;;  %v1119_v39 = vld [vmem:[%s1714_s12 + $0xc0] sm:$0xff] (%p1626_p9) }
 0x140   : > { %951 = vst [vmem:[%s1714_s12 + $0x68] sm:$0xff] %v919_v15  ;;  %967 = vst [vmem:[%s1714_s12 + $0xe8] sm:$0xff] %v935_v16  ;;  %v1121_v40 = vld [vmem:[%s1714_s12 + $0xc8] sm:$0xff] (%p1626_p9)  ;;  %v1125_v42 = vld [vmem:[%s1714_s12 + $0xd8] sm:$0xff] (%p1626_p9) }
 0x141   : > { %1072 = vst [vmem:[%s1819_s17] sm:$0xff] %v1071_v45  ;;  %1074 = vst [vmem:[%s1819_s17 + $0x18] sm:$0xff] %v1073_v46 }
 0x142   : > { %1088 = vst [vmem:[%s1819_s17 + $0xc0] sm:$0xff] %v1087_v23  ;;  %1090 = vst [vmem:[%s1819_s17 + $0xd8] sm:$0xff] %v1089_v24 }
 0x143   : > { %1092 = vst [vmem:[%s1819_s17 + $0xf0] sm:$0xff] %v1091_v25  ;;  %1094 = vst [vmem:[%s1819_s17 + $0x108] sm:$0xff] %v1093_v26 }
 0x144   : > { %v1099_v29 = vld [vmem:[%s1714_s12 + $0x70] sm:$0xff]  ;;  %1114 = vst [vmem:[%s1819_s17 + $0x1f8] sm:$0xff] %v1113_v36  ;;  %1116 = vst [vmem:[%s1819_s17 + $0x210] sm:$0xff] %v1115_v37 }
 0x145   : > { %v1095_v27 = vld [vmem:[%s1714_s12 + $0x60] sm:$0xff]  ;;  %1100 = vst [vmem:[%s1819_s17 + $0x150] sm:$0xff] %v1099_v29  ;;  %1118 = vst [vmem:[%s1819_s17 + $0x228] sm:$0xff] %v1117_v38  ;;  %v1131_v47 = vld [vmem:[%s1714_s12 + $0xf0] sm:$0xff] }
 0x146   : > { %1096 = vst [vmem:[%s1819_s17 + $0x120] sm:$0xff] %v1095_v27  ;;  %v1101_v30 = vld [vmem:[%s1714_s12 + $0x78] sm:$0xff]  ;;  %1120 = vst [vmem:[%s1819_s17 + $0x240] sm:$0xff] %v1119_v39  ;;  %v1127_v43 = vld [vmem:[%s1714_s12 + $0xe0] sm:$0xff] }
 0x147   : > { %v1097_v28 = vld [vmem:[%s1714_s12 + $0x68] sm:$0xff]  ;;  %1102 = vst [vmem:[%s1819_s17 + $0x168] sm:$0xff] %v1101_v30  ;;  %1122 = vst [vmem:[%s1819_s17 + $0x258] sm:$0xff] %v1121_v40  ;;  %v1133_v48 = vld [vmem:[%s1714_s12 + $0xf8] sm:$0xff] }
 0x148   : > { %1098 = vst [vmem:[%s1819_s17 + $0x138] sm:$0xff] %v1097_v28  ;;  %1124 = vst [vmem:[%s1819_s17 + $0x270] sm:$0xff] %v1123_v41  ;;  %v1129_v44 = vld [vmem:[%s1714_s12 + $0xe8] sm:$0xff] }
 0x149   : > { %1126 = vst [vmem:[%s1819_s17 + $0x288] sm:$0xff] %v1125_v42  ;;  %1128 = vst [vmem:[%s1819_s17 + $0x2a0] sm:$0xff] %v1127_v43 }
 0x14a   : > { %1130 = vst [vmem:[%s1819_s17 + $0x2b8] sm:$0xff] %v1129_v44  ;;  %1132 = vst [vmem:[%s1819_s17 + $0x2d0] sm:$0xff] %v1131_v47 }
 0x14b   : > { %1134 = vst [vmem:[%s1819_s17 + $0x2e8] sm:$0xff] %v1133_v48 }
 0x14c PF: > { %s13_s20 = sadd.s32 1, %s1537_s20   ;;  %s1905_s12 = smov %s1509_s13 }
 0x14d   : > { %p10_p2 = scmp.ge.s32.totalorder %s13_s20, 47   ;;  %s1906_s13 = smov %s1631_s4 }
 0x14e   : > { %s1907_s14 = smov %s1517_s15  ;;  %s1908_s15 = smov %s1620_s27 }
 0x14f   : > { %s1909_s16 = smov %s1529_s18  ;;  %s1910_s17 = smov %s1533_s19 }
 0x150   : > { %s1911_s18 = smov %s1914_s22  ;;  %s1912_s19 = smov %s1918_s23 }
 0x151   :  { %12 = sbr.rel (!%p10_p2) target bundleno = 5 (0x5), region = 160 }

// kernel: decoder_forward.17
= control target key start
LH: loop header
LB: loop body
LE: loop exit
PB: predicated region body
PF: predicated region fallthrough
CT: control target
= control target key end

     0   :  { %s1534_s12 = smov 0   ;;  %s1536_s13 = smov 0   ;;  %s1861_s0 = inlined_call_operand.vmem [shape: bf16[3840,128], index: 0, kind: input, shape index: {}]   ;;  %s1862_s1 = inlined_call_operand.vmem [shape: bf16[128,256], index: 1, kind: input, shape index: {}]   ;;  %s1863_s2 = inlined_call_operand.vmem [shape: f32[8,256], index: 2, kind: input, shape index: {}]   ;;  %s1864_s3 = inlined_call_operand.vmem [shape: f32[3840,256], index: 3, kind: output, shape index: {}]  }
   0x1   :  { %s1538_s14 = smov 0  }
   0x2 LB: > { %s32_s15 = sadd.s32 1, %s1507_s13  ;;  %p1367_p0 = scmp.ge.s32.totalorder %s1511_s14, 1  ;;  %s1511_s14 = sphi %s1538_s14, %s13_s14   ;;  %s1507_s13 = sphi %s1536_s13, %s1866_s13   ;;  %s1503_s12 = sphi %s1534_s12, %s1865_s12  }
   0x3   : > { %p34_p1 = scmp.ge.s32.totalorder %s32_s15, 15  ;;  %p194_p2 = scmp.lt.s32.totalorder %s1511_s14, 16 }
   0x5   : > { %s1868_s15 = smov (%p34_p1, %s32_s15), 0  ;;  %p195_p3 = pnand %p1367_p0, %p194_p2 }
   0x6   : > { %v1449_v0 = vld [vmem:[%s1862_s1 + $0x4] ss:$8 sps:$4 sm:$0xff] (!%p195_p3)   ;;  %s1368_s18 = sshll.u32 (!%p195_p3), %s1503_s12, 5  ;;  %v1451_v1 = vld [vmem:[%s1862_s1] ss:$8 sps:$4 sm:$0xff] (!%p195_p3)   ;;  %v1513_v2 = vmov (!%p195_p3), 0   ;;  %v1027_v33 = vlaneseq (!%p195_p3) }
   0x7   : > { %198 = sbr.rel (%p195_p3) target bundleno = 316 (0x13c), region = 32  ;;  %669 = vmatprep.mubr.bf16.mxu0 (!%p195_p3), %v1513_v2  ;;  %749 = vmatprep.mubr.bf16.mxu1 (!%p195_p3), %v1513_v2  ;;  %p242_p4 = scmp.lt.s32.totalorder (!%p195_p3), %s1368_s18, 479  ;;  %v1452_v3 = vld [vmem:[%s1862_s1 + $0x14] ss:$8 sps:$4 sm:$0xff] (!%p195_p3)   ;;  %v1454_v4 = vld [vmem:[%s1862_s1 + $0x10] ss:$8 sps:$4 sm:$0xff] (!%p195_p3)  }
   0x8   : > { %637 = vmatprep.subr.bf16.mxu0 (!%p195_p3), %v1449_v0  ;;  %1408 = vmatprep.subr.bf16.mxu1 (!%p195_p3), %v1449_v0  ;;  %v1455_v5 = vld [vmem:[%s1862_s1 + $0x24] ss:$8 sps:$4 sm:$0xff] (!%p195_p3)   ;;  %v1457_v6 = vld [vmem:[%s1862_s1 + $0x20] ss:$8 sps:$4 sm:$0xff] (!%p195_p3)   ;;  %v1458_v7 = vld [vmem:[%s1862_s1 + $0x34] ss:$8 sps:$4 sm:$0xff] (!%p195_p3)  }
   0x9   : > { %638 = vmatpush1.bf16.msra.mxu0 (!%p195_p3), %v1451_v1  ;;  %1416 = vmatpush1.bf16.msra.mxu1 (!%p195_p3), %v1451_v1  ;;  %v1460_v8 = vld [vmem:[%s1862_s1 + $0x30] ss:$8 sps:$4 sm:$0xff] (!%p195_p3)   ;;  %v1461_v9 = vld [vmem:[%s1862_s1 + $0x44] ss:$8 sps:$4 sm:$0xff] (!%p195_p3)   ;;  %v1463_v10 = vld [vmem:[%s1862_s1 + $0x40] ss:$8 sps:$4 sm:$0xff] (!%p195_p3)  }
   0xa   : > { %639 = vmatprep.subr.bf16.mxu0 (!%p195_p3), %v1452_v3  ;;  %1409 = vmatprep.subr.bf16.mxu1 (!%p195_p3), %v1452_v3  ;;  %v1464_v11 = vld [vmem:[%s1862_s1 + $0x54] ss:$8 sps:$4 sm:$0xff] (!%p195_p3)   ;;  %v1466_v12 = vld [vmem:[%s1862_s1 + $0x50] ss:$8 sps:$4 sm:$0xff] (!%p195_p3)   ;;  %v1467_v13 = vld [vmem:[%s1862_s1 + $0x64] ss:$8 sps:$4 sm:$0xff] (!%p195_p3)  }
   0xb   : > { %v1469_v14 = vld [vmem:[%s1862_s1 + $0x60] ss:$8 sps:$4 sm:$0xff] (!%p195_p3)   ;;  %v1470_v15 = vld [vmem:[%s1862_s1 + $0x74] ss:$8 sps:$4 sm:$0xff] (!%p195_p3)   ;;  %v1472_v16 = vld [vmem:[%s1862_s1 + $0x70] ss:$8 sps:$4 sm:$0xff] (!%p195_p3)  }
   0xc   : > { %v1028_v34 = vshrl.u32 (!%p195_p3), %v1027_v33, 7  ;;  %v961_v36 = vld [vmem:[%s1863_s2] sm:$0xff] (!%p195_p3)  ;;  %v962_v38 = vld [vmem:[%s1863_s2 + $0x8] sm:$0xff] (!%p195_p3) }
   0xd   : > { %640 = vmatpush1.bf16.msra.mxu0 (!%p195_p3), %v1454_v4  ;;  %1417 = vmatpush1.bf16.msra.mxu1 (!%p195_p3), %v1454_v4 }
   0xe   : > { %s1870_s18 = smov (!%p242_p4, %s1368_s18), 479  ;;  %641 = vmatprep.subr.bf16.mxu0 %v1455_v5  ;;  %1410 = vmatprep.subr.bf16.mxu1 %v1455_v5  ;;  %v1029_v35 = vsub.s32 0, %v1028_v34  ;;  %v1101_v37 = vsub.s32 1, %v1028_v34 }
   0xf   : > { %s1369_s27 = sshll.u32 %s1870_s18, 2  ;;  %s1407_s8 = sshll.u32 %s1870_s18, 4 }
  0x10   : > { %s1581_s7 = scalar_lea.vmem %s1861_s0, %s1369_s27  ;;  %v1646_v39 = vrot.slane %v961_v36, %v1029_v35  ;;  %v1648_v40 = vrot.slane %v962_v38, %v1029_v35  ;;  %v1651_v41 = vrot.slane %v961_v36, %v1101_v37  ;;  %v1653_v44 = vrot.slane %v962_v38, %v1101_v37  ;;  %s1660_s10 = scalar_lea.vmem %s1864_s3, %s1407_s8 }
  0x11   : > { %642 = vmatpush1.bf16.msra.mxu0 %v1457_v6  ;;  %1418 = vmatpush1.bf16.msra.mxu1 %v1457_v6  ;;  %v1473_v17 = vld [vmem:[%s1581_s7] sm:$0xff]   ;;  %v1475_v19 = vld [vmem:[%s1581_s7 + $0x8] sm:$0xff]   ;;  %v1477_v21 = vld [vmem:[%s1581_s7 + $0x10] sm:$0xff]  }
  0x12   : > { %643 = vmatprep.subr.bf16.mxu0 %v1458_v7  ;;  %1411 = vmatprep.subr.bf16.mxu1 %v1458_v7  ;;  %v1474_v18 = vld [vmem:[%s1581_s7 + $0x40] sm:$0xff]   ;;  %v1476_v20 = vld [vmem:[%s1581_s7 + $0x48] sm:$0xff]   ;;  %v1478_v22 = vld [vmem:[%s1581_s7 + $0x50] sm:$0xff]  }
  0x13   : > { %v1479_v23 = vld [vmem:[%s1581_s7 + $0x18] sm:$0xff]   ;;  %v1481_v25 = vld [vmem:[%s1581_s7 + $0x20] sm:$0xff]   ;;  %v1483_v27 = vld [vmem:[%s1581_s7 + $0x28] sm:$0xff]  }
  0x14   : > { %v1480_v24 = vld [vmem:[%s1581_s7 + $0x58] sm:$0xff]   ;;  %v1482_v26 = vld [vmem:[%s1581_s7 + $0x60] sm:$0xff]   ;;  %v1484_v28 = vld [vmem:[%s1581_s7 + $0x68] sm:$0xff]  }
  0x15   : > { %644 = vmatpush1.bf16.msra.mxu0 %v1460_v8  ;;  %1419 = vmatpush1.bf16.msra.mxu1 %v1460_v8  ;;  %v1485_v29 = vld [vmem:[%s1581_s7 + $0x30] sm:$0xff]   ;;  %v1487_v31 = vld [vmem:[%s1581_s7 + $0x38] sm:$0xff]  }
  0x16   : > { %645 = vmatprep.subr.bf16.mxu0 %v1461_v9  ;;  %1412 = vmatprep.subr.bf16.mxu1 %v1461_v9  ;;  %v1486_v30 = vld [vmem:[%s1581_s7 + $0x70] sm:$0xff]   ;;  %v1488_v32 = vld [vmem:[%s1581_s7 + $0x78] sm:$0xff]  }
  0x19   : > { %646 = vmatpush1.bf16.msra.mxu0 %v1463_v10  ;;  %1420 = vmatpush1.bf16.msra.mxu1 %v1463_v10 }
  0x1a   : > { %647 = vmatprep.subr.bf16.mxu0 %v1464_v11  ;;  %1413 = vmatprep.subr.bf16.mxu1 %v1464_v11 }
  0x1d   : > { %648 = vmatpush1.bf16.msra.mxu0 %v1466_v12  ;;  %1421 = vmatpush1.bf16.msra.mxu1 %v1466_v12 }
  0x1e   : > { %649 = vmatprep.subr.bf16.mxu0 %v1467_v13  ;;  %1414 = vmatprep.subr.bf16.mxu1 %v1467_v13 }
  0x21   : > { %650 = vmatpush1.bf16.msra.mxu0 %v1469_v14  ;;  %1422 = vmatpush1.bf16.msra.mxu1 %v1469_v14 }
  0x22   : > { %651 = vmatprep.subr.bf16.mxu0 %v1470_v15  ;;  %1415 = vmatprep.subr.bf16.mxu1 %v1470_v15 }
  0x25   : > { %652 = vmatpush1.bf16.msra.mxu0 %v1472_v16  ;;  %1423 = vmatpush1.bf16.msra.mxu1 %v1472_v16 }
  0x28   : > { %670 = vmatmul.mubr.bf16.vlgmr.msra.gmra.mrb[0].mxu0 %v1473_v17  ;;  %750 = vmatmul.mubr.bf16.vlgmr.msra.gmra.mrb[0].mxu1 %v1474_v18 }
  0x29   : > { %679 = vmatprep.mubr.bf16.mxu0 %v1513_v2  ;;  %759 = vmatprep.mubr.bf16.mxu1 %v1513_v2 }
  0x30   : > { %680 = vmatmul.mubr.bf16.gmra.mrb[4].mxu0 %v1475_v19  ;;  %760 = vmatmul.mubr.bf16.gmra.mrb[4].mxu1 %v1476_v20 }
  0x31   : > { %689 = vmatprep.mubr.bf16.mxu0 %v1513_v2  ;;  %769 = vmatprep.mubr.bf16.mxu1 %v1513_v2 }
  0x38   : > { %690 = vmatmul.mubr.bf16.gmra.mrb[8].mxu0 %v1477_v21  ;;  %770 = vmatmul.mubr.bf16.gmra.mrb[8].mxu1 %v1478_v22 }
  0x39   : > { %699 = vmatprep.mubr.bf16.mxu0 %v1513_v2  ;;  %779 = vmatprep.mubr.bf16.mxu1 %v1513_v2 }
  0x40   : > { %700 = vmatmul.mubr.bf16.gmra.mrb[12].mxu0 %v1479_v23  ;;  %780 = vmatmul.mubr.bf16.gmra.mrb[12].mxu1 %v1480_v24 }
  0x41   : > { %709 = vmatprep.mubr.bf16.mxu0 %v1513_v2  ;;  %789 = vmatprep.mubr.bf16.mxu1 %v1513_v2 }
  0x48   : > { %710 = vmatmul.mubr.bf16.gmra.mrb[16].mxu0 %v1481_v25  ;;  %790 = vmatmul.mubr.bf16.gmra.mrb[16].mxu1 %v1482_v26 }
  0x49   : > { %719 = vmatprep.mubr.bf16.mxu0 %v1513_v2  ;;  %799 = vmatprep.mubr.bf16.mxu1 %v1513_v2 }
  0x50   : > { %720 = vmatmul.mubr.bf16.gmra.mrb[20].mxu0 %v1483_v27  ;;  %800 = vmatmul.mubr.bf16.gmra.mrb[20].mxu1 %v1484_v28 }
  0x51   : > { %729 = vmatprep.mubr.bf16.mxu0 %v1513_v2  ;;  %809 = vmatprep.mubr.bf16.mxu1 %v1513_v2 }
  0x58   : > { %730 = vmatmul.mubr.bf16.gmra.mrb[24].mxu0 %v1485_v29  ;;  %810 = vmatmul.mubr.bf16.gmra.mrb[24].mxu1 %v1486_v30 }
  0x59   : > { %739 = vmatprep.mubr.bf16.mxu0 %v1513_v2  ;;  %819 = vmatprep.mubr.bf16.mxu1 %v1513_v2 }
  0x60   : > { %740 = vmatmul.mubr.bf16.gmra.mrb[28].mxu0 %v1487_v31  ;;  %820 = vmatmul.mubr.bf16.gmra.mrb[28].mxu1 %v1488_v32 }
  0xfb   : > { %v671_v42 = vpop.f32.mrb[0].mxu0  ;;  %v751_v43 = vpop.f32.mrb[0].mxu1 }
  0xfc   : > { %v1035_v45 = vmul.f32 %v1646_v39, %v671_v42  ;;  %v1067_v46 = vmul.f32 %v1646_v39, %v751_v43  ;;  %v673_v47 = vpop.f32.mrb[1].mxu0  ;;  %v753_v48 = vpop.f32.mrb[1].mxu1 }
  0xfd   : > { %v1036_v49 = vmul.f32 %v1648_v40, %v673_v47  ;;  %v1068_v50 = vmul.f32 %v1648_v40, %v753_v48  ;;  %v675_v51 = vpop.f32.mrb[2].mxu0  ;;  %v755_v52 = vpop.f32.mrb[2].mxu1 }
  0xfe   : > { %v1107_v53 = vadd.f32 %v1651_v41, %v1035_v45  ;;  %v1139_v54 = vadd.f32 %v1651_v41, %v1067_v46  ;;  %v1037_v55 = vmul.f32 %v1646_v39, %v675_v51  ;;  %v1069_v56 = vmul.f32 %v1646_v39, %v755_v52  ;;  %v677_v57 = vpop.f32.mrb[3].mxu0  ;;  %v757_v58 = vpop.f32.mrb[3].mxu1 }
  0xff   : > { %v1108_v59 = vadd.f32 %v1653_v44, %v1036_v49  ;;  %v1140_v60 = vadd.f32 %v1653_v44, %v1068_v50  ;;  %v1038_v61 = vmul.f32 %v1648_v40, %v677_v57  ;;  %v1070_v62 = vmul.f32 %v1648_v40, %v757_v58 }
 0x100   : > { %1171 = vst [vmem:[%s1660_s10] sm:$0xff] %v1107_v53  ;;  %1203 = vst [vmem:[%s1660_s10 + $0x100] sm:$0xff] %v1139_v54  ;;  %v1109_v63 = vadd.f32 %v1651_v41, %v1037_v55  ;;  %v1141_v0 = vadd.f32 %v1651_v41, %v1069_v56 }
 0x101   : > { %1172 = vst [vmem:[%s1660_s10 + $0x8] sm:$0xff] %v1108_v59  ;;  %1204 = vst [vmem:[%s1660_s10 + $0x108] sm:$0xff] %v1140_v60  ;;  %v1110_v1 = vadd.f32 %v1653_v44, %v1038_v61  ;;  %v1142_v2 = vadd.f32 %v1653_v44, %v1070_v62 }
 0x102   : > { %1173 = vst [vmem:[%s1660_s10 + $0x10] sm:$0xff] %v1109_v63  ;;  %1205 = vst [vmem:[%s1660_s10 + $0x110] sm:$0xff] %v1141_v0 }
 0x103   : > { %1174 = vst [vmem:[%s1660_s10 + $0x18] sm:$0xff] %v1110_v1  ;;  %1206 = vst [vmem:[%s1660_s10 + $0x118] sm:$0xff] %v1142_v2  ;;  %v681_v3 = vpop.f32.mrb[4].mxu0  ;;  %v761_v4 = vpop.f32.mrb[4].mxu1 }
 0x104   : > { %v1039_v5 = vmul.f32 %v1646_v39, %v681_v3  ;;  %v1071_v6 = vmul.f32 %v1646_v39, %v761_v4  ;;  %v683_v7 = vpop.f32.mrb[5].mxu0  ;;  %v763_v8 = vpop.f32.mrb[5].mxu1 }
 0x105   : > { %v1040_v9 = vmul.f32 %v1648_v40, %v683_v7  ;;  %v1072_v10 = vmul.f32 %v1648_v40, %v763_v8  ;;  %v685_v11 = vpop.f32.mrb[6].mxu0  ;;  %v765_v12 = vpop.f32.mrb[6].mxu1 }
 0x106   : > { %v1111_v13 = vadd.f32 %v1651_v41, %v1039_v5  ;;  %v1143_v14 = vadd.f32 %v1651_v41, %v1071_v6  ;;  %v1041_v15 = vmul.f32 %v1646_v39, %v685_v11  ;;  %v1073_v16 = vmul.f32 %v1646_v39, %v765_v12  ;;  %v687_v17 = vpop.f32.mrb[7].mxu0  ;;  %v767_v18 = vpop.f32.mrb[7].mxu1 }
 0x107   : > { %v1112_v19 = vadd.f32 %v1653_v44, %v1040_v9  ;;  %v1144_v20 = vadd.f32 %v1653_v44, %v1072_v10  ;;  %v1042_v21 = vmul.f32 %v1648_v40, %v687_v17  ;;  %v1074_v22 = vmul.f32 %v1648_v40, %v767_v18 }
 0x108   : > { %1175 = vst [vmem:[%s1660_s10 + $0x20] sm:$0xff] %v1111_v13  ;;  %1207 = vst [vmem:[%s1660_s10 + $0x120] sm:$0xff] %v1143_v14  ;;  %v1113_v23 = vadd.f32 %v1651_v41, %v1041_v15  ;;  %v1145_v24 = vadd.f32 %v1651_v41, %v1073_v16 }
 0x109   : > { %1176 = vst [vmem:[%s1660_s10 + $0x28] sm:$0xff] %v1112_v19  ;;  %1208 = vst [vmem:[%s1660_s10 + $0x128] sm:$0xff] %v1144_v20  ;;  %v1114_v25 = vadd.f32 %v1653_v44, %v1042_v21  ;;  %v1146_v26 = vadd.f32 %v1653_v44, %v1074_v22 }
 0x10a   : > { %1177 = vst [vmem:[%s1660_s10 + $0x30] sm:$0xff] %v1113_v23  ;;  %1209 = vst [vmem:[%s1660_s10 + $0x130] sm:$0xff] %v1145_v24 }
 0x10b   : > { %1178 = vst [vmem:[%s1660_s10 + $0x38] sm:$0xff] %v1114_v25  ;;  %1210 = vst [vmem:[%s1660_s10 + $0x138] sm:$0xff] %v1146_v26  ;;  %v691_v27 = vpop.f32.mrb[8].mxu0  ;;  %v771_v28 = vpop.f32.mrb[8].mxu1 }
 0x10c   : > { %v1043_v29 = vmul.f32 %v1646_v39, %v691_v27  ;;  %v1075_v30 = vmul.f32 %v1646_v39, %v771_v28  ;;  %v693_v31 = vpop.f32.mrb[9].mxu0  ;;  %v773_v32 = vpop.f32.mrb[9].mxu1 }
 0x10d   : > { %v1044_v33 = vmul.f32 %v1648_v40, %v693_v31  ;;  %v1076_v34 = vmul.f32 %v1648_v40, %v773_v32  ;;  %v695_v35 = vpop.f32.mrb[10].mxu0  ;;  %v775_v36 = vpop.f32.mrb[10].mxu1 }
 0x10e   : > { %v1115_v37 = vadd.f32 %v1651_v41, %v1043_v29  ;;  %v1147_v38 = vadd.f32 %v1651_v41, %v1075_v30  ;;  %v1045_v42 = vmul.f32 %v1646_v39, %v695_v35  ;;  %v1077_v43 = vmul.f32 %v1646_v39, %v775_v36  ;;  %v697_v45 = vpop.f32.mrb[11].mxu0  ;;  %v777_v46 = vpop.f32.mrb[11].mxu1 }
 0x10f   : > { %v1116_v47 = vadd.f32 %v1653_v44, %v1044_v33  ;;  %v1148_v48 = vadd.f32 %v1653_v44, %v1076_v34  ;;  %v1046_v49 = vmul.f32 %v1648_v40, %v697_v45  ;;  %v1078_v50 = vmul.f32 %v1648_v40, %v777_v46 }
 0x110   : > { %1179 = vst [vmem:[%s1660_s10 + $0x40] sm:$0xff] %v1115_v37  ;;  %1211 = vst [vmem:[%s1660_s10 + $0x140] sm:$0xff] %v1147_v38  ;;  %v1117_v51 = vadd.f32 %v1651_v41, %v1045_v42  ;;  %v1149_v52 = vadd.f32 %v1651_v41, %v1077_v43 }
 0x111   : > { %1180 = vst [vmem:[%s1660_s10 + $0x48] sm:$0xff] %v1116_v47  ;;  %1212 = vst [vmem:[%s1660_s10 + $0x148] sm:$0xff] %v1148_v48  ;;  %v1118_v53 = vadd.f32 %v1653_v44, %v1046_v49  ;;  %v1150_v54 = vadd.f32 %v1653_v44, %v1078_v50 }
 0x112   : > { %1181 = vst [vmem:[%s1660_s10 + $0x50] sm:$0xff] %v1117_v51  ;;  %1213 = vst [vmem:[%s1660_s10 + $0x150] sm:$0xff] %v1149_v52 }
 0x113   : > { %1182 = vst [vmem:[%s1660_s10 + $0x58] sm:$0xff] %v1118_v53  ;;  %1214 = vst [vmem:[%s1660_s10 + $0x158] sm:$0xff] %v1150_v54  ;;  %v701_v55 = vpop.f32.mrb[12].mxu0  ;;  %v781_v56 = vpop.f32.mrb[12].mxu1 }
 0x114   : > { %v1047_v57 = vmul.f32 %v1646_v39, %v701_v55  ;;  %v1079_v58 = vmul.f32 %v1646_v39, %v781_v56  ;;  %v703_v59 = vpop.f32.mrb[13].mxu0  ;;  %v783_v60 = vpop.f32.mrb[13].mxu1 }
 0x115   : > { %v1048_v61 = vmul.f32 %v1648_v40, %v703_v59  ;;  %v1080_v62 = vmul.f32 %v1648_v40, %v783_v60  ;;  %v705_v63 = vpop.f32.mrb[14].mxu0  ;;  %v785_v0 = vpop.f32.mrb[14].mxu1 }
 0x116   : > { %v1119_v1 = vadd.f32 %v1651_v41, %v1047_v57  ;;  %v1151_v2 = vadd.f32 %v1651_v41, %v1079_v58  ;;  %v1049_v3 = vmul.f32 %v1646_v39, %v705_v63  ;;  %v1081_v4 = vmul.f32 %v1646_v39, %v785_v0  ;;  %v707_v5 = vpop.f32.mrb[15].mxu0  ;;  %v787_v6 = vpop.f32.mrb[15].mxu1 }
 0x117   : > { %v1120_v7 = vadd.f32 %v1653_v44, %v1048_v61  ;;  %v1152_v8 = vadd.f32 %v1653_v44, %v1080_v62  ;;  %v1050_v9 = vmul.f32 %v1648_v40, %v707_v5  ;;  %v1082_v10 = vmul.f32 %v1648_v40, %v787_v6 }
 0x118   : > { %1183 = vst [vmem:[%s1660_s10 + $0x60] sm:$0xff] %v1119_v1  ;;  %1215 = vst [vmem:[%s1660_s10 + $0x160] sm:$0xff] %v1151_v2  ;;  %v1121_v11 = vadd.f32 %v1651_v41, %v1049_v3  ;;  %v1153_v12 = vadd.f32 %v1651_v41, %v1081_v4 }
 0x119   : > { %1184 = vst [vmem:[%s1660_s10 + $0x68] sm:$0xff] %v1120_v7  ;;  %1216 = vst [vmem:[%s1660_s10 + $0x168] sm:$0xff] %v1152_v8  ;;  %v1122_v13 = vadd.f32 %v1653_v44, %v1050_v9  ;;  %v1154_v14 = vadd.f32 %v1653_v44, %v1082_v10 }
 0x11a   : > { %1185 = vst [vmem:[%s1660_s10 + $0x70] sm:$0xff] %v1121_v11  ;;  %1217 = vst [vmem:[%s1660_s10 + $0x170] sm:$0xff] %v1153_v12 }
 0x11b   : > { %1186 = vst [vmem:[%s1660_s10 + $0x78] sm:$0xff] %v1122_v13  ;;  %1218 = vst [vmem:[%s1660_s10 + $0x178] sm:$0xff] %v1154_v14  ;;  %v711_v15 = vpop.f32.mrb[16].mxu0  ;;  %v791_v16 = vpop.f32.mrb[16].mxu1 }
 0x11c   : > { %v1051_v17 = vmul.f32 %v1646_v39, %v711_v15  ;;  %v1083_v18 = vmul.f32 %v1646_v39, %v791_v16  ;;  %v713_v19 = vpop.f32.mrb[17].mxu0  ;;  %v793_v20 = vpop.f32.mrb[17].mxu1 }
 0x11d   : > { %v1052_v21 = vmul.f32 %v1648_v40, %v713_v19  ;;  %v1084_v22 = vmul.f32 %v1648_v40, %v793_v20  ;;  %v715_v23 = vpop.f32.mrb[18].mxu0  ;;  %v795_v24 = vpop.f32.mrb[18].mxu1 }
 0x11e   : > { %v1123_v25 = vadd.f32 %v1651_v41, %v1051_v17  ;;  %v1155_v26 = vadd.f32 %v1651_v41, %v1083_v18  ;;  %v1053_v27 = vmul.f32 %v1646_v39, %v715_v23  ;;  %v1085_v28 = vmul.f32 %v1646_v39, %v795_v24  ;;  %v717_v29 = vpop.f32.mrb[19].mxu0  ;;  %v797_v30 = vpop.f32.mrb[19].mxu1 }
 0x11f   : > { %v1124_v31 = vadd.f32 %v1653_v44, %v1052_v21  ;;  %v1156_v32 = vadd.f32 %v1653_v44, %v1084_v22  ;;  %v1054_v33 = vmul.f32 %v1648_v40, %v717_v29  ;;  %v1086_v34 = vmul.f32 %v1648_v40, %v797_v30 }
 0x120   : > { %1187 = vst [vmem:[%s1660_s10 + $0x80] sm:$0xff] %v1123_v25  ;;  %1219 = vst [vmem:[%s1660_s10 + $0x180] sm:$0xff] %v1155_v26  ;;  %v1125_v35 = vadd.f32 %v1651_v41, %v1053_v27  ;;  %v1157_v36 = vadd.f32 %v1651_v41, %v1085_v28 }
 0x121   : > { %1188 = vst [vmem:[%s1660_s10 + $0x88] sm:$0xff] %v1124_v31  ;;  %1220 = vst [vmem:[%s1660_s10 + $0x188] sm:$0xff] %v1156_v32  ;;  %v1126_v37 = vadd.f32 %v1653_v44, %v1054_v33  ;;  %v1158_v38 = vadd.f32 %v1653_v44, %v1086_v34 }
 0x122   : > { %1189 = vst [vmem:[%s1660_s10 + $0x90] sm:$0xff] %v1125_v35  ;;  %1221 = vst [vmem:[%s1660_s10 + $0x190] sm:$0xff] %v1157_v36 }
 0x123   : > { %1190 = vst [vmem:[%s1660_s10 + $0x98] sm:$0xff] %v1126_v37  ;;  %1222 = vst [vmem:[%s1660_s10 + $0x198] sm:$0xff] %v1158_v38  ;;  %v721_v42 = vpop.f32.mrb[20].mxu0  ;;  %v801_v43 = vpop.f32.mrb[20].mxu1 }
 0x124   : > { %v1055_v45 = vmul.f32 %v1646_v39, %v721_v42  ;;  %v1087_v46 = vmul.f32 %v1646_v39, %v801_v43  ;;  %v723_v47 = vpop.f32.mrb[21].mxu0  ;;  %v803_v48 = vpop.f32.mrb[21].mxu1 }
 0x125   : > { %v1056_v49 = vmul.f32 %v1648_v40, %v723_v47  ;;  %v1088_v50 = vmul.f32 %v1648_v40, %v803_v48  ;;  %v725_v51 = vpop.f32.mrb[22].mxu0  ;;  %v805_v52 = vpop.f32.mrb[22].mxu1 }
 0x126   : > { %v1127_v53 = vadd.f32 %v1651_v41, %v1055_v45  ;;  %v1159_v54 = vadd.f32 %v1651_v41, %v1087_v46  ;;  %v1057_v55 = vmul.f32 %v1646_v39, %v725_v51  ;;  %v1089_v56 = vmul.f32 %v1646_v39, %v805_v52  ;;  %v727_v57 = vpop.f32.mrb[23].mxu0  ;;  %v807_v58 = vpop.f32.mrb[23].mxu1 }
 0x127   : > { %v1128_v59 = vadd.f32 %v1653_v44, %v1056_v49  ;;  %v1160_v60 = vadd.f32 %v1653_v44, %v1088_v50  ;;  %v1058_v61 = vmul.f32 %v1648_v40, %v727_v57  ;;  %v1090_v62 = vmul.f32 %v1648_v40, %v807_v58 }
 0x128   : > { %1191 = vst [vmem:[%s1660_s10 + $0xa0] sm:$0xff] %v1127_v53  ;;  %1223 = vst [vmem:[%s1660_s10 + $0x1a0] sm:$0xff] %v1159_v54  ;;  %v1129_v63 = vadd.f32 %v1651_v41, %v1057_v55  ;;  %v1161_v0 = vadd.f32 %v1651_v41, %v1089_v56 }
 0x129   : > { %1192 = vst [vmem:[%s1660_s10 + $0xa8] sm:$0xff] %v1128_v59  ;;  %1224 = vst [vmem:[%s1660_s10 + $0x1a8] sm:$0xff] %v1160_v60  ;;  %v1130_v1 = vadd.f32 %v1653_v44, %v1058_v61  ;;  %v1162_v2 = vadd.f32 %v1653_v44, %v1090_v62 }
 0x12a   : > { %1193 = vst [vmem:[%s1660_s10 + $0xb0] sm:$0xff] %v1129_v63  ;;  %1225 = vst [vmem:[%s1660_s10 + $0x1b0] sm:$0xff] %v1161_v0 }
 0x12b   : > { %1194 = vst [vmem:[%s1660_s10 + $0xb8] sm:$0xff] %v1130_v1  ;;  %1226 = vst [vmem:[%s1660_s10 + $0x1b8] sm:$0xff] %v1162_v2  ;;  %v731_v3 = vpop.f32.mrb[24].mxu0  ;;  %v811_v4 = vpop.f32.mrb[24].mxu1 }
 0x12c   : > { %v1059_v5 = vmul.f32 %v1646_v39, %v731_v3  ;;  %v1091_v6 = vmul.f32 %v1646_v39, %v811_v4  ;;  %v733_v7 = vpop.f32.mrb[25].mxu0  ;;  %v813_v8 = vpop.f32.mrb[25].mxu1 }
 0x12d   : > { %v1060_v9 = vmul.f32 %v1648_v40, %v733_v7  ;;  %v1092_v10 = vmul.f32 %v1648_v40, %v813_v8  ;;  %v735_v11 = vpop.f32.mrb[26].mxu0  ;;  %v815_v12 = vpop.f32.mrb[26].mxu1 }
 0x12e   : > { %v1131_v13 = vadd.f32 %v1651_v41, %v1059_v5  ;;  %v1163_v14 = vadd.f32 %v1651_v41, %v1091_v6  ;;  %v1061_v15 = vmul.f32 %v1646_v39, %v735_v11  ;;  %v1093_v16 = vmul.f32 %v1646_v39, %v815_v12  ;;  %v737_v17 = vpop.f32.mrb[27].mxu0  ;;  %v817_v18 = vpop.f32.mrb[27].mxu1 }
 0x12f   : > { %v1132_v19 = vadd.f32 %v1653_v44, %v1060_v9  ;;  %v1164_v20 = vadd.f32 %v1653_v44, %v1092_v10  ;;  %v1062_v21 = vmul.f32 %v1648_v40, %v737_v17  ;;  %v1094_v22 = vmul.f32 %v1648_v40, %v817_v18 }
 0x130   : > { %1195 = vst [vmem:[%s1660_s10 + $0xc0] sm:$0xff] %v1131_v13  ;;  %1227 = vst [vmem:[%s1660_s10 + $0x1c0] sm:$0xff] %v1163_v14  ;;  %v1133_v23 = vadd.f32 %v1651_v41, %v1061_v15  ;;  %v1165_v24 = vadd.f32 %v1651_v41, %v1093_v16 }
 0x131   : > { %1196 = vst [vmem:[%s1660_s10 + $0xc8] sm:$0xff] %v1132_v19  ;;  %1228 = vst [vmem:[%s1660_s10 + $0x1c8] sm:$0xff] %v1164_v20  ;;  %v1134_v25 = vadd.f32 %v1653_v44, %v1062_v21  ;;  %v1166_v26 = vadd.f32 %v1653_v44, %v1094_v22 }
 0x132   : > { %1197 = vst [vmem:[%s1660_s10 + $0xd0] sm:$0xff] %v1133_v23  ;;  %1229 = vst [vmem:[%s1660_s10 + $0x1d0] sm:$0xff] %v1165_v24 }
 0x133   : > { %1198 = vst [vmem:[%s1660_s10 + $0xd8] sm:$0xff] %v1134_v25  ;;  %1230 = vst [vmem:[%s1660_s10 + $0x1d8] sm:$0xff] %v1166_v26  ;;  %v741_v27 = vpop.f32.mrb[28].mxu0  ;;  %v821_v28 = vpop.f32.mrb[28].mxu1 }
 0x134   : > { %v1063_v29 = vmul.f32 %v1646_v39, %v741_v27  ;;  %v1095_v30 = vmul.f32 %v1646_v39, %v821_v28  ;;  %v743_v31 = vpop.f32.mrb[29].mxu0  ;;  %v823_v32 = vpop.f32.mrb[29].mxu1 }
 0x135   : > { %v1064_v33 = vmul.f32 %v1648_v40, %v743_v31  ;;  %v1096_v34 = vmul.f32 %v1648_v40, %v823_v32  ;;  %v745_v35 = vpop.f32.mrb[30].mxu0  ;;  %v825_v36 = vpop.f32.mrb[30].mxu1 }
 0x136   : > { %v1135_v37 = vadd.f32 %v1651_v41, %v1063_v29  ;;  %v1167_v38 = vadd.f32 %v1651_v41, %v1095_v30  ;;  %v1065_v42 = vmul.f32 %v1646_v39, %v745_v35  ;;  %v1097_v43 = vmul.f32 %v1646_v39, %v825_v36  ;;  %v747_v45 = vpop.f32.mrb[31].mxu0  ;;  %v827_v46 = vpop.f32.mrb[31].mxu1 }
 0x137   : > { %v1136_v47 = vadd.f32 %v1653_v44, %v1064_v33  ;;  %v1168_v48 = vadd.f32 %v1653_v44, %v1096_v34  ;;  %v1066_v49 = vmul.f32 %v1648_v40, %v747_v45  ;;  %v1098_v50 = vmul.f32 %v1648_v40, %v827_v46 }
 0x138   : > { %1199 = vst [vmem:[%s1660_s10 + $0xe0] sm:$0xff] %v1135_v37  ;;  %1231 = vst [vmem:[%s1660_s10 + $0x1e0] sm:$0xff] %v1167_v38  ;;  %v1137_v51 = vadd.f32 %v1651_v41, %v1065_v42  ;;  %v1169_v52 = vadd.f32 %v1651_v41, %v1097_v43 }
 0x139   : > { %1200 = vst [vmem:[%s1660_s10 + $0xe8] sm:$0xff] %v1136_v47  ;;  %1232 = vst [vmem:[%s1660_s10 + $0x1e8] sm:$0xff] %v1168_v48  ;;  %v1138_v39 = vadd.f32 %v1653_v44, %v1066_v49  ;;  %v1170_v53 = vadd.f32 %v1653_v44, %v1098_v50 }
 0x13a   : > { %1201 = vst [vmem:[%s1660_s10 + $0xf0] sm:$0xff] %v1137_v51  ;;  %1233 = vst [vmem:[%s1660_s10 + $0x1f0] sm:$0xff] %v1169_v52 }
 0x13b   : > { %1202 = vst [vmem:[%s1660_s10 + $0xf8] sm:$0xff] %v1138_v39  ;;  %1234 = vst [vmem:[%s1660_s10 + $0x1f8] sm:$0xff] %v1170_v53 }
 0x13c PF: > { %s13_s14 = sadd.s32 1, %s1511_s14   ;;  %s1865_s12 = smov %s1507_s13 }
 0x13d   : > { %p10_p5 = scmp.ge.s32.totalorder %s13_s14, 17   ;;  %s1866_s13 = smov %s1868_s15 }
 0x13f   :  { %12 = sbr.rel (!%p10_p5) target bundleno = 2 (0x2), region = 76 }

// kernel: decoder_forward.18
= control target key start
LH: loop header
LB: loop body
LE: loop exit
PB: predicated region body
PF: predicated region fallthrough
CT: control target
= control target key end

     0   :  { %s1219_s12 = smov 0   ;;  %s1221_s13 = smov 0   ;;  %s1403_s0 = inlined_call_operand.vmem [shape: bf16[4096,128], index: 0, kind: input, shape index: {}]   ;;  %s1404_s1 = inlined_call_operand.vmem [shape: bf16[128,128], index: 1, kind: input, shape index: {}]   ;;  %s1405_s2 = inlined_call_operand.vmem [shape: f32[8,128], index: 2, kind: input, shape index: {}]   ;;  %s1406_s3 = inlined_call_operand.vmem [shape: f32[4096,128], index: 3, kind: output, shape index: {}]  }
   0x1   :  { %s1223_s14 = smov 0  }
   0x2 LB: > { %s32_s15 = sadd.s32 1, %s1193_s13  ;;  %p1008_p0 = scmp.ge.s32.totalorder %s1197_s14, 1  ;;  %s1197_s14 = sphi %s1223_s14, %s13_s14   ;;  %s1193_s13 = sphi %s1221_s13, %s1408_s13   ;;  %s1189_s12 = sphi %s1219_s12, %s1407_s12  }
   0x3   : > { %p34_p1 = scmp.ge.s32.totalorder %s32_s15, 16  ;;  %p189_p2 = scmp.lt.s32.totalorder %s1197_s14, 17 }
   0x5   : > { %s1410_s15 = smov (%p34_p1, %s32_s15), 0  ;;  %p190_p3 = pnand %p1008_p0, %p189_p2 }
   0x6   : > { %v1151_v0 = vld [vmem:[%s1404_s1] sm:$0xff] (!%p190_p3)   ;;  %s1009_s18 = sshll.u32 (!%p190_p3), %s1189_s12, 5  ;;  %v1152_v1 = vld [vmem:[%s1404_s1 + $0x8] sm:$0xff] (!%p190_p3)   ;;  %v1153_v2 = vld [vmem:[%s1404_s1 + $0x10] sm:$0xff] (!%p190_p3)   ;;  %v784_v24 = vlaneseq (!%p190_p3) }
   0x7   : > { %193 = sbr.rel (%p190_p3) target bundleno = 283 (0x11b), region = 32  ;;  %p232_p4 = scmp.lt.s32.totalorder (!%p190_p3), %s1009_s18, 511  ;;  %1063 = vmatprep.subr.bf16.mxu0 (!%p190_p3), %v1151_v0  ;;  %1111 = vmatprep.subr.bf16.mxu1 (!%p190_p3), %v1151_v0  ;;  %v1154_v3 = vld [vmem:[%s1404_s1 + $0x18] sm:$0xff] (!%p190_p3)   ;;  %v1155_v6 = vld [vmem:[%s1404_s1 + $0x20] sm:$0xff] (!%p190_p3)   ;;  %v1156_v7 = vld [vmem:[%s1404_s1 + $0x28] sm:$0xff] (!%p190_p3)  }
   0x8   : > { %1064 = vmatpush3.bf16.msra.mxu0 (!%p190_p3), %v1151_v0  ;;  %1119 = vmatpush3.bf16.msra.mxu1 (!%p190_p3), %v1151_v0  ;;  %v1157_v8 = vld [vmem:[%s1404_s1 + $0x30] sm:$0xff] (!%p190_p3)   ;;  %v1158_v9 = vld [vmem:[%s1404_s1 + $0x38] sm:$0xff] (!%p190_p3)   ;;  %v785_v25 = vshrl.u32 (!%p190_p3), %v784_v24, 7  ;;  %v751_v27 = vld [vmem:[%s1405_s2] sm:$0xff] (!%p190_p3) }
   0x9   : > { %1065 = vmatprep.subr.bf16.mxu0 (!%p190_p3), %v1152_v1  ;;  %1112 = vmatprep.subr.bf16.mxu1 (!%p190_p3), %v1152_v1 }
   0xa   : > { %v786_v26 = vsub.s32 (!%p190_p3), 0, %v785_v25  ;;  %v822_v28 = vsub.s32 (!%p190_p3), 1, %v785_v25 }
   0xc   : > { %1066 = vmatpush3.bf16.msra.mxu0 (!%p190_p3), %v1152_v1  ;;  %1120 = vmatpush3.bf16.msra.mxu1 (!%p190_p3), %v1152_v1  ;;  %v1288_v29 = vrot.slane (!%p190_p3), %v751_v27, %v786_v26  ;;  %v1291_v30 = vrot.slane (!%p190_p3), %v751_v27, %v822_v28 }
   0xd   : > { %1067 = vmatprep.subr.bf16.mxu0 (!%p190_p3), %v1153_v2  ;;  %1113 = vmatprep.subr.bf16.mxu1 (!%p190_p3), %v1153_v2 }
   0xe   : > { %s1412_s18 = smov (!%p232_p4, %s1009_s18), 511 }
   0xf   : > { %s1010_s23 = sshll.u32 %s1412_s18, 2  ;;  %s1012_s12 = sshll.u32 %s1412_s18, 3 }
  0x10   : > { %s1252_s26 = scalar_lea.vmem %s1403_s0, %s1010_s23  ;;  %1068 = vmatpush3.bf16.msra.mxu0 %v1153_v2  ;;  %1121 = vmatpush3.bf16.msra.mxu1 %v1153_v2  ;;  %s1298_s19 = scalar_lea.vmem %s1406_s3, %s1012_s12 }
  0x11   : > { %v1159_v4 = vld [vmem:[%s1252_s26] sm:$0xff]   ;;  %1069 = vmatprep.subr.bf16.mxu0 %v1154_v3  ;;  %1114 = vmatprep.subr.bf16.mxu1 %v1154_v3  ;;  %v1161_v10 = vld [vmem:[%s1252_s26 + $0x8] sm:$0xff]   ;;  %v1163_v12 = vld [vmem:[%s1252_s26 + $0x10] sm:$0xff]  }
  0x12   : > { %v1160_v5 = vld [vmem:[%s1252_s26 + $0x40] sm:$0xff]   ;;  %1079 = vmatprep.mubr.bf16.mxu0 %v1159_v4  ;;  %v1162_v11 = vld [vmem:[%s1252_s26 + $0x48] sm:$0xff]   ;;  %v1164_v13 = vld [vmem:[%s1252_s26 + $0x50] sm:$0xff]  }
  0x13   : > { %1095 = vmatprep.mubr.bf16.mxu1 %v1160_v5  ;;  %v1165_v14 = vld [vmem:[%s1252_s26 + $0x18] sm:$0xff]   ;;  %v1167_v16 = vld [vmem:[%s1252_s26 + $0x20] sm:$0xff]   ;;  %v1169_v18 = vld [vmem:[%s1252_s26 + $0x28] sm:$0xff]  }
  0x14   : > { %1070 = vmatpush3.bf16.msra.mxu0 %v1154_v3  ;;  %1122 = vmatpush3.bf16.msra.mxu1 %v1154_v3  ;;  %v1166_v15 = vld [vmem:[%s1252_s26 + $0x58] sm:$0xff]   ;;  %v1168_v17 = vld [vmem:[%s1252_s26 + $0x60] sm:$0xff]   ;;  %v1170_v19 = vld [vmem:[%s1252_s26 + $0x68] sm:$0xff]  }
  0x15   : > { %1071 = vmatprep.subr.bf16.mxu0 %v1155_v6  ;;  %1115 = vmatprep.subr.bf16.mxu1 %v1155_v6  ;;  %v1171_v20 = vld [vmem:[%s1252_s26 + $0x30] sm:$0xff]   ;;  %v1173_v22 = vld [vmem:[%s1252_s26 + $0x38] sm:$0xff]  }
  0x16   : > { %v1172_v21 = vld [vmem:[%s1252_s26 + $0x70] sm:$0xff]   ;;  %v1174_v23 = vld [vmem:[%s1252_s26 + $0x78] sm:$0xff]  }
  0x18   : > { %1072 = vmatpush3.bf16.msra.mxu0 %v1155_v6  ;;  %1123 = vmatpush3.bf16.msra.mxu1 %v1155_v6 }
  0x19   : > { %1073 = vmatprep.subr.bf16.mxu0 %v1156_v7  ;;  %1116 = vmatprep.subr.bf16.mxu1 %v1156_v7 }
  0x1c   : > { %1074 = vmatpush3.bf16.msra.mxu0 %v1156_v7  ;;  %1124 = vmatpush3.bf16.msra.mxu1 %v1156_v7 }
  0x1d   : > { %1075 = vmatprep.subr.bf16.mxu0 %v1157_v8  ;;  %1117 = vmatprep.subr.bf16.mxu1 %v1157_v8 }
  0x20   : > { %1076 = vmatpush3.bf16.msra.mxu0 %v1157_v8  ;;  %1125 = vmatpush3.bf16.msra.mxu1 %v1157_v8 }
  0x21   : > { %1077 = vmatprep.subr.bf16.mxu0 %v1158_v9  ;;  %1118 = vmatprep.subr.bf16.mxu1 %v1158_v9 }
  0x24   : > { %1078 = vmatpush3.bf16.msra.mxu0 %v1158_v9  ;;  %1126 = vmatpush3.bf16.msra.mxu1 %v1158_v9 }
  0x27   : > { %1080 = vmatmul.mubr.bf16.vlgmr.msra.gmra.mrb[0].mxu0 %v1161_v10  ;;  %1096 = vmatmul.mubr.bf16.vlgmr.msra.gmra.mrb[0].mxu1 %v1162_v11 }
  0x28   : > { %1083 = vmatprep.mubr.bf16.mxu0 %v1163_v12  ;;  %1099 = vmatprep.mubr.bf16.mxu1 %v1164_v13 }
  0x2f   : > { %1084 = vmatmul.mubr.bf16.gmra.mrb[4].mxu0 %v1165_v14  ;;  %1100 = vmatmul.mubr.bf16.gmra.mrb[4].mxu1 %v1166_v15 }
  0x30   : > { %1087 = vmatprep.mubr.bf16.mxu0 %v1167_v16  ;;  %1103 = vmatprep.mubr.bf16.mxu1 %v1168_v17 }
  0x37   : > { %1088 = vmatmul.mubr.bf16.gmra.mrb[8].mxu0 %v1169_v18  ;;  %1104 = vmatmul.mubr.bf16.gmra.mrb[8].mxu1 %v1170_v19 }
  0x38   : > { %1091 = vmatprep.mubr.bf16.mxu0 %v1171_v20  ;;  %1107 = vmatprep.mubr.bf16.mxu1 %v1172_v21 }
  0x3f   : > { %1092 = vmatmul.mubr.bf16.gmra.mrb[12].mxu0 %v1173_v22  ;;  %1108 = vmatmul.mubr.bf16.gmra.mrb[12].mxu1 %v1174_v23 }
  0xfa   : > { %v1081_v31 = vpop.f32.mrb[0].mxu0  ;;  %v1097_v32 = vpop.f32.mrb[0].mxu1 }
  0xfb   : > { %v790_v33 = vmul.f32 %v1081_v31, %v1288_v29  ;;  %v806_v34 = vmul.f32 %v1097_v32, %v1288_v29  ;;  %v557_v35 = vpop.f32.mrb[1].mxu0  ;;  %v621_v36 = vpop.f32.mrb[1].mxu1 }
  0xfc   : > { %v788_v37 = vmul.f32 %v1288_v29, %v557_v35  ;;  %v804_v38 = vmul.f32 %v1288_v29, %v621_v36  ;;  %v1082_v39 = vpop.f32.mrb[2].mxu0  ;;  %v1098_v40 = vpop.f32.mrb[2].mxu1 }
  0xfd   : > { %v826_v41 = vadd.f32 %v1291_v30, %v790_v33  ;;  %v842_v42 = vadd.f32 %v1291_v30, %v806_v34  ;;  %v791_v43 = vmul.f32 %v1082_v39, %v1288_v29  ;;  %v807_v44 = vmul.f32 %v1098_v40, %v1288_v29  ;;  %v560_v45 = vpop.f32.mrb[3].mxu0  ;;  %v624_v46 = vpop.f32.mrb[3].mxu1 }
  0xfe   : > { %v824_v47 = vadd.f32 %v1291_v30, %v788_v37  ;;  %v840_v48 = vadd.f32 %v1291_v30, %v804_v38  ;;  %v789_v49 = vmul.f32 %v1288_v29, %v560_v45  ;;  %v805_v50 = vmul.f32 %v1288_v29, %v624_v46 }
  0xff   : > { %858 = vst [vmem:[%s1298_s19 + $0x10] sm:$0xff] %v826_v41  ;;  %874 = vst [vmem:[%s1298_s19 + $0x90] sm:$0xff] %v842_v42  ;;  %v827_v51 = vadd.f32 %v1291_v30, %v791_v43  ;;  %v843_v52 = vadd.f32 %v1291_v30, %v807_v44 }
 0x100   : > { %856 = vst [vmem:[%s1298_s19] sm:$0xff] %v824_v47  ;;  %872 = vst [vmem:[%s1298_s19 + $0x80] sm:$0xff] %v840_v48  ;;  %v825_v53 = vadd.f32 %v1291_v30, %v789_v49  ;;  %v841_v54 = vadd.f32 %v1291_v30, %v805_v50 }
 0x101   : > { %859 = vst [vmem:[%s1298_s19 + $0x18] sm:$0xff] %v827_v51  ;;  %875 = vst [vmem:[%s1298_s19 + $0x98] sm:$0xff] %v843_v52 }
 0x102   : > { %857 = vst [vmem:[%s1298_s19 + $0x8] sm:$0xff] %v825_v53  ;;  %873 = vst [vmem:[%s1298_s19 + $0x88] sm:$0xff] %v841_v54  ;;  %v1085_v55 = vpop.f32.mrb[4].mxu0  ;;  %v1101_v56 = vpop.f32.mrb[4].mxu1 }
 0x103   : > { %v794_v57 = vmul.f32 %v1085_v55, %v1288_v29  ;;  %v810_v58 = vmul.f32 %v1101_v56, %v1288_v29  ;;  %v573_v59 = vpop.f32.mrb[5].mxu0  ;;  %v637_v60 = vpop.f32.mrb[5].mxu1 }
 0x104   : > { %v792_v61 = vmul.f32 %v1288_v29, %v573_v59  ;;  %v808_v62 = vmul.f32 %v1288_v29, %v637_v60  ;;  %v1086_v63 = vpop.f32.mrb[6].mxu0  ;;  %v1102_v0 = vpop.f32.mrb[6].mxu1 }
 0x105   : > { %v830_v1 = vadd.f32 %v1291_v30, %v794_v57  ;;  %v846_v2 = vadd.f32 %v1291_v30, %v810_v58  ;;  %v795_v3 = vmul.f32 %v1086_v63, %v1288_v29  ;;  %v811_v4 = vmul.f32 %v1102_v0, %v1288_v29  ;;  %v576_v5 = vpop.f32.mrb[7].mxu0  ;;  %v640_v6 = vpop.f32.mrb[7].mxu1 }
 0x106   : > { %v828_v7 = vadd.f32 %v1291_v30, %v792_v61  ;;  %v844_v8 = vadd.f32 %v1291_v30, %v808_v62  ;;  %v793_v9 = vmul.f32 %v1288_v29, %v576_v5  ;;  %v809_v10 = vmul.f32 %v1288_v29, %v640_v6 }
 0x107   : > { %862 = vst [vmem:[%s1298_s19 + $0x30] sm:$0xff] %v830_v1  ;;  %878 = vst [vmem:[%s1298_s19 + $0xb0] sm:$0xff] %v846_v2  ;;  %v831_v11 = vadd.f32 %v1291_v30, %v795_v3  ;;  %v847_v12 = vadd.f32 %v1291_v30, %v811_v4 }
 0x108   : > { %860 = vst [vmem:[%s1298_s19 + $0x20] sm:$0xff] %v828_v7  ;;  %876 = vst [vmem:[%s1298_s19 + $0xa0] sm:$0xff] %v844_v8  ;;  %v829_v13 = vadd.f32 %v1291_v30, %v793_v9  ;;  %v845_v14 = vadd.f32 %v1291_v30, %v809_v10 }
 0x109   : > { %863 = vst [vmem:[%s1298_s19 + $0x38] sm:$0xff] %v831_v11  ;;  %879 = vst [vmem:[%s1298_s19 + $0xb8] sm:$0xff] %v847_v12 }
 0x10a   : > { %861 = vst [vmem:[%s1298_s19 + $0x28] sm:$0xff] %v829_v13  ;;  %877 = vst [vmem:[%s1298_s19 + $0xa8] sm:$0xff] %v845_v14  ;;  %v1089_v15 = vpop.f32.mrb[8].mxu0  ;;  %v1105_v16 = vpop.f32.mrb[8].mxu1 }
 0x10b   : > { %v798_v17 = vmul.f32 %v1089_v15, %v1288_v29  ;;  %v814_v18 = vmul.f32 %v1105_v16, %v1288_v29  ;;  %v589_v19 = vpop.f32.mrb[9].mxu0  ;;  %v653_v20 = vpop.f32.mrb[9].mxu1 }
 0x10c   : > { %v796_v21 = vmul.f32 %v1288_v29, %v589_v19  ;;  %v812_v22 = vmul.f32 %v1288_v29, %v653_v20  ;;  %v1090_v23 = vpop.f32.mrb[10].mxu0  ;;  %v1106_v24 = vpop.f32.mrb[10].mxu1 }
 0x10d   : > { %v834_v25 = vadd.f32 %v1291_v30, %v798_v17  ;;  %v850_v26 = vadd.f32 %v1291_v30, %v814_v18  ;;  %v799_v27 = vmul.f32 %v1090_v23, %v1288_v29  ;;  %v815_v28 = vmul.f32 %v1106_v24, %v1288_v29  ;;  %v592_v31 = vpop.f32.mrb[11].mxu0  ;;  %v656_v32 = vpop.f32.mrb[11].mxu1 }
 0x10e   : > { %v832_v33 = vadd.f32 %v1291_v30, %v796_v21  ;;  %v848_v34 = vadd.f32 %v1291_v30, %v812_v22  ;;  %v797_v35 = vmul.f32 %v1288_v29, %v592_v31  ;;  %v813_v36 = vmul.f32 %v1288_v29, %v656_v32 }
 0x10f   : > { %866 = vst [vmem:[%s1298_s19 + $0x50] sm:$0xff] %v834_v25  ;;  %882 = vst [vmem:[%s1298_s19 + $0xd0] sm:$0xff] %v850_v26  ;;  %v835_v37 = vadd.f32 %v1291_v30, %v799_v27  ;;  %v851_v38 = vadd.f32 %v1291_v30, %v815_v28 }
 0x110   : > { %864 = vst [vmem:[%s1298_s19 + $0x40] sm:$0xff] %v832_v33  ;;  %880 = vst [vmem:[%s1298_s19 + $0xc0] sm:$0xff] %v848_v34  ;;  %v833_v39 = vadd.f32 %v1291_v30, %v797_v35  ;;  %v849_v40 = vadd.f32 %v1291_v30, %v813_v36 }
 0x111   : > { %867 = vst [vmem:[%s1298_s19 + $0x58] sm:$0xff] %v835_v37  ;;  %883 = vst [vmem:[%s1298_s19 + $0xd8] sm:$0xff] %v851_v38 }
 0x112   : > { %865 = vst [vmem:[%s1298_s19 + $0x48] sm:$0xff] %v833_v39  ;;  %881 = vst [vmem:[%s1298_s19 + $0xc8] sm:$0xff] %v849_v40  ;;  %v1093_v41 = vpop.f32.mrb[12].mxu0  ;;  %v1109_v42 = vpop.f32.mrb[12].mxu1 }
 0x113   : > { %v802_v43 = vmul.f32 %v1093_v41, %v1288_v29  ;;  %v818_v44 = vmul.f32 %v1109_v42, %v1288_v29  ;;  %v605_v45 = vpop.f32.mrb[13].mxu0  ;;  %v669_v46 = vpop.f32.mrb[13].mxu1 }
 0x114   : > { %v800_v47 = vmul.f32 %v1288_v29, %v605_v45  ;;  %v816_v48 = vmul.f32 %v1288_v29, %v669_v46  ;;  %v1094_v49 = vpop.f32.mrb[14].mxu0  ;;  %v1110_v50 = vpop.f32.mrb[14].mxu1 }
 0x115   : > { %v838_v51 = vadd.f32 %v1291_v30, %v802_v43  ;;  %v854_v52 = vadd.f32 %v1291_v30, %v818_v44  ;;  %v803_v53 = vmul.f32 %v1094_v49, %v1288_v29  ;;  %v819_v54 = vmul.f32 %v1110_v50, %v1288_v29  ;;  %v608_v55 = vpop.f32.mrb[15].mxu0  ;;  %v672_v56 = vpop.f32.mrb[15].mxu1 }
 0x116   : > { %v836_v57 = vadd.f32 %v1291_v30, %v800_v47  ;;  %v852_v58 = vadd.f32 %v1291_v30, %v816_v48  ;;  %v801_v59 = vmul.f32 %v1288_v29, %v608_v55  ;;  %v817_v60 = vmul.f32 %v1288_v29, %v672_v56 }
 0x117   : > { %870 = vst [vmem:[%s1298_s19 + $0x70] sm:$0xff] %v838_v51  ;;  %886 = vst [vmem:[%s1298_s19 + $0xf0] sm:$0xff] %v854_v52  ;;  %v839_v61 = vadd.f32 %v1291_v30, %v803_v53  ;;  %v855_v62 = vadd.f32 %v1291_v30, %v819_v54 }
 0x118   : > { %868 = vst [vmem:[%s1298_s19 + $0x60] sm:$0xff] %v836_v57  ;;  %884 = vst [vmem:[%s1298_s19 + $0xe0] sm:$0xff] %v852_v58  ;;  %v837_v63 = vadd.f32 %v1291_v30, %v801_v59  ;;  %v853_v0 = vadd.f32 %v1291_v30, %v817_v60 }
 0x119   : > { %871 = vst [vmem:[%s1298_s19 + $0x78] sm:$0xff] %v839_v61  ;;  %887 = vst [vmem:[%s1298_s19 + $0xf8] sm:$0xff] %v855_v62 }
 0x11a   : > { %869 = vst [vmem:[%s1298_s19 + $0x68] sm:$0xff] %v837_v63  ;;  %885 = vst [vmem:[%s1298_s19 + $0xe8] sm:$0xff] %v853_v0 }
 0x11b PF: > { %s13_s14 = sadd.s32 1, %s1197_s14   ;;  %s1407_s12 = smov %s1193_s13 }
 0x11c   : > { %p10_p5 = scmp.ge.s32.totalorder %s13_s14, 18   ;;  %s1408_s13 = smov %s1410_s15 }
 0x11e   :  { %12 = sbr.rel (!%p10_p5) target bundleno = 2 (0x2), region = 76 }

// kernel: decoder_forward.19
= control target key start
LH: loop header
LB: loop body
LE: loop exit
PB: predicated region body
PF: predicated region fallthrough
CT: control target
= control target key end

     0   :  { %s1219_s12 = smov 0   ;;  %s1221_s13 = smov 0   ;;  %s1403_s0 = inlined_call_operand.vmem [shape: bf16[3584,128], index: 0, kind: input, shape index: {}]   ;;  %s1404_s1 = inlined_call_operand.vmem [shape: bf16[128,128], index: 1, kind: input, shape index: {}]   ;;  %s1405_s2 = inlined_call_operand.vmem [shape: f32[8,128], index: 2, kind: input, shape index: {}]   ;;  %s1406_s3 = inlined_call_operand.vmem [shape: f32[3584,128], index: 3, kind: output, shape index: {}]  }
   0x1   :  { %s1223_s14 = smov 0  }
   0x2 LB: > { %s32_s15 = sadd.s32 1, %s1193_s13  ;;  %p1008_p0 = scmp.ge.s32.totalorder %s1197_s14, 1  ;;  %s1197_s14 = sphi %s1223_s14, %s13_s14   ;;  %s1193_s13 = sphi %s1221_s13, %s1408_s13   ;;  %s1189_s12 = sphi %s1219_s12, %s1407_s12  }
   0x3   : > { %p34_p1 = scmp.ge.s32.totalorder %s32_s15, 14  ;;  %p189_p2 = scmp.lt.s32.totalorder %s1197_s14, 15 }
   0x5   : > { %s1410_s15 = smov (%p34_p1, %s32_s15), 0  ;;  %p190_p3 = pnand %p1008_p0, %p189_p2 }
   0x6   : > { %v1151_v0 = vld [vmem:[%s1404_s1] sm:$0xff] (!%p190_p3)   ;;  %s1009_s18 = sshll.u32 (!%p190_p3), %s1189_s12, 5  ;;  %v1152_v1 = vld [vmem:[%s1404_s1 + $0x8] sm:$0xff] (!%p190_p3)   ;;  %v1153_v2 = vld [vmem:[%s1404_s1 + $0x10] sm:$0xff] (!%p190_p3)   ;;  %v784_v24 = vlaneseq (!%p190_p3) }
   0x7   : > { %193 = sbr.rel (%p190_p3) target bundleno = 283 (0x11b), region = 32  ;;  %p232_p4 = scmp.lt.s32.totalorder (!%p190_p3), %s1009_s18, 447  ;;  %1063 = vmatprep.subr.bf16.mxu0 (!%p190_p3), %v1151_v0  ;;  %1111 = vmatprep.subr.bf16.mxu1 (!%p190_p3), %v1151_v0  ;;  %v1154_v3 = vld [vmem:[%s1404_s1 + $0x18] sm:$0xff] (!%p190_p3)   ;;  %v1155_v6 = vld [vmem:[%s1404_s1 + $0x20] sm:$0xff] (!%p190_p3)   ;;  %v1156_v7 = vld [vmem:[%s1404_s1 + $0x28] sm:$0xff] (!%p190_p3)  }
   0x8   : > { %1064 = vmatpush3.bf16.msra.mxu0 (!%p190_p3), %v1151_v0  ;;  %1119 = vmatpush3.bf16.msra.mxu1 (!%p190_p3), %v1151_v0  ;;  %v1157_v8 = vld [vmem:[%s1404_s1 + $0x30] sm:$0xff] (!%p190_p3)   ;;  %v1158_v9 = vld [vmem:[%s1404_s1 + $0x38] sm:$0xff] (!%p190_p3)   ;;  %v785_v25 = vshrl.u32 (!%p190_p3), %v784_v24, 7  ;;  %v751_v27 = vld [vmem:[%s1405_s2] sm:$0xff] (!%p190_p3) }
   0x9   : > { %1065 = vmatprep.subr.bf16.mxu0 (!%p190_p3), %v1152_v1  ;;  %1112 = vmatprep.subr.bf16.mxu1 (!%p190_p3), %v1152_v1 }
   0xa   : > { %v786_v26 = vsub.s32 (!%p190_p3), 0, %v785_v25  ;;  %v822_v28 = vsub.s32 (!%p190_p3), 1, %v785_v25 }
   0xc   : > { %1066 = vmatpush3.bf16.msra.mxu0 (!%p190_p3), %v1152_v1  ;;  %1120 = vmatpush3.bf16.msra.mxu1 (!%p190_p3), %v1152_v1  ;;  %v1288_v29 = vrot.slane (!%p190_p3), %v751_v27, %v786_v26  ;;  %v1291_v30 = vrot.slane (!%p190_p3), %v751_v27, %v822_v28 }
   0xd   : > { %1067 = vmatprep.subr.bf16.mxu0 (!%p190_p3), %v1153_v2  ;;  %1113 = vmatprep.subr.bf16.mxu1 (!%p190_p3), %v1153_v2 }
   0xe   : > { %s1412_s18 = smov (!%p232_p4, %s1009_s18), 447 }
   0xf   : > { %s1010_s23 = sshll.u32 %s1412_s18, 2  ;;  %s1012_s12 = sshll.u32 %s1412_s18, 3 }
  0x10   : > { %s1252_s26 = scalar_lea.vmem %s1403_s0, %s1010_s23  ;;  %1068 = vmatpush3.bf16.msra.mxu0 %v1153_v2  ;;  %1121 = vmatpush3.bf16.msra.mxu1 %v1153_v2  ;;  %s1298_s19 = scalar_lea.vmem %s1406_s3, %s1012_s12 }
  0x11   : > { %v1159_v4 = vld [vmem:[%s1252_s26] sm:$0xff]   ;;  %1069 = vmatprep.subr.bf16.mxu0 %v1154_v3  ;;  %1114 = vmatprep.subr.bf16.mxu1 %v1154_v3  ;;  %v1161_v10 = vld [vmem:[%s1252_s26 + $0x8] sm:$0xff]   ;;  %v1163_v12 = vld [vmem:[%s1252_s26 + $0x10] sm:$0xff]  }
  0x12   : > { %v1160_v5 = vld [vmem:[%s1252_s26 + $0x40] sm:$0xff]   ;;  %1079 = vmatprep.mubr.bf16.mxu0 %v1159_v4  ;;  %v1162_v11 = vld [vmem:[%s1252_s26 + $0x48] sm:$0xff]   ;;  %v1164_v13 = vld [vmem:[%s1252_s26 + $0x50] sm:$0xff]  }
  0x13   : > { %1095 = vmatprep.mubr.bf16.mxu1 %v1160_v5  ;;  %v1165_v14 = vld [vmem:[%s1252_s26 + $0x18] sm:$0xff]   ;;  %v1167_v16 = vld [vmem:[%s1252_s26 + $0x20] sm:$0xff]   ;;  %v1169_v18 = vld [vmem:[%s1252_s26 + $0x28] sm:$0xff]  }
  0x14   : > { %1070 = vmatpush3.bf16.msra.mxu0 %v1154_v3  ;;  %1122 = vmatpush3.bf16.msra.mxu1 %v1154_v3  ;;  %v1166_v15 = vld [vmem:[%s1252_s26 + $0x58] sm:$0xff]   ;;  %v1168_v17 = vld [vmem:[%s1252_s26 + $0x60] sm:$0xff]   ;;  %v1170_v19 = vld [vmem:[%s1252_s26 + $0x68] sm:$0xff]  }
  0x15   : > { %1071 = vmatprep.subr.bf16.mxu0 %v1155_v6  ;;  %1115 = vmatprep.subr.bf16.mxu1 %v1155_v6  ;;  %v1171_v20 = vld [vmem:[%s1252_s26 + $0x30] sm:$0xff]   ;;  %v1173_v22 = vld [vmem:[%s1252_s26 + $0x38] sm:$0xff]  }
  0x16   : > { %v1172_v21 = vld [vmem:[%s1252_s26 + $0x70] sm:$0xff]   ;;  %v1174_v23 = vld [vmem:[%s1252_s26 + $0x78] sm:$0xff]  }
  0x18   : > { %1072 = vmatpush3.bf16.msra.mxu0 %v1155_v6  ;;  %1123 = vmatpush3.bf16.msra.mxu1 %v1155_v6 }
  0x19   : > { %1073 = vmatprep.subr.bf16.mxu0 %v1156_v7  ;;  %1116 = vmatprep.subr.bf16.mxu1 %v1156_v7 }
  0x1c   : > { %1074 = vmatpush3.bf16.msra.mxu0 %v1156_v7  ;;  %1124 = vmatpush3.bf16.msra.mxu1 %v1156_v7 }
  0x1d   : > { %1075 = vmatprep.subr.bf16.mxu0 %v1157_v8  ;;  %1117 = vmatprep.subr.bf16.mxu1 %v1157_v8 }
  0x20   : > { %1076 = vmatpush3.bf16.msra.mxu0 %v1157_v8  ;;  %1125 = vmatpush3.bf16.msra.mxu1 %v1157_v8 }
  0x21   : > { %1077 = vmatprep.subr.bf16.mxu0 %v1158_v9  ;;  %1118 = vmatprep.subr.bf16.mxu1 %v1158_v9 }
  0x24   : > { %1078 = vmatpush3.bf16.msra.mxu0 %v1158_v9  ;;  %1126 = vmatpush3.bf16.msra.mxu1 %v1158_v9 }
  0x27   : > { %1080 = vmatmul.mubr.bf16.vlgmr.msra.gmra.mrb[0].mxu0 %v1161_v10  ;;  %1096 = vmatmul.mubr.bf16.vlgmr.msra.gmra.mrb[0].mxu1 %v1162_v11 }
  0x28   : > { %1083 = vmatprep.mubr.bf16.mxu0 %v1163_v12  ;;  %1099 = vmatprep.mubr.bf16.mxu1 %v1164_v13 }
  0x2f   : > { %1084 = vmatmul.mubr.bf16.gmra.mrb[4].mxu0 %v1165_v14  ;;  %1100 = vmatmul.mubr.bf16.gmra.mrb[4].mxu1 %v1166_v15 }
  0x30   : > { %1087 = vmatprep.mubr.bf16.mxu0 %v1167_v16  ;;  %1103 = vmatprep.mubr.bf16.mxu1 %v1168_v17 }
  0x37   : > { %1088 = vmatmul.mubr.bf16.gmra.mrb[8].mxu0 %v1169_v18  ;;  %1104 = vmatmul.mubr.bf16.gmra.mrb[8].mxu1 %v1170_v19 }
  0x38   : > { %1091 = vmatprep.mubr.bf16.mxu0 %v1171_v20  ;;  %1107 = vmatprep.mubr.bf16.mxu1 %v1172_v21 }
  0x3f   : > { %1092 = vmatmul.mubr.bf16.gmra.mrb[12].mxu0 %v1173_v22  ;;  %1108 = vmatmul.mubr.bf16.gmra.mrb[12].mxu1 %v1174_v23 }
  0xfa   : > { %v1081_v31 = vpop.f32.mrb[0].mxu0  ;;  %v1097_v32 = vpop.f32.mrb[0].mxu1 }
  0xfb   : > { %v790_v33 = vmul.f32 %v1081_v31, %v1288_v29  ;;  %v806_v34 = vmul.f32 %v1097_v32, %v1288_v29  ;;  %v557_v35 = vpop.f32.mrb[1].mxu0  ;;  %v621_v36 = vpop.f32.mrb[1].mxu1 }
  0xfc   : > { %v788_v37 = vmul.f32 %v1288_v29, %v557_v35  ;;  %v804_v38 = vmul.f32 %v1288_v29, %v621_v36  ;;  %v1082_v39 = vpop.f32.mrb[2].mxu0  ;;  %v1098_v40 = vpop.f32.mrb[2].mxu1 }
  0xfd   : > { %v826_v41 = vadd.f32 %v1291_v30, %v790_v33  ;;  %v842_v42 = vadd.f32 %v1291_v30, %v806_v34  ;;  %v791_v43 = vmul.f32 %v1082_v39, %v1288_v29  ;;  %v807_v44 = vmul.f32 %v1098_v40, %v1288_v29  ;;  %v560_v45 = vpop.f32.mrb[3].mxu0  ;;  %v624_v46 = vpop.f32.mrb[3].mxu1 }
  0xfe   : > { %v824_v47 = vadd.f32 %v1291_v30, %v788_v37  ;;  %v840_v48 = vadd.f32 %v1291_v30, %v804_v38  ;;  %v789_v49 = vmul.f32 %v1288_v29, %v560_v45  ;;  %v805_v50 = vmul.f32 %v1288_v29, %v624_v46 }
  0xff   : > { %858 = vst [vmem:[%s1298_s19 + $0x10] sm:$0xff] %v826_v41  ;;  %874 = vst [vmem:[%s1298_s19 + $0x90] sm:$0xff] %v842_v42  ;;  %v827_v51 = vadd.f32 %v1291_v30, %v791_v43  ;;  %v843_v52 = vadd.f32 %v1291_v30, %v807_v44 }
 0x100   : > { %856 = vst [vmem:[%s1298_s19] sm:$0xff] %v824_v47  ;;  %872 = vst [vmem:[%s1298_s19 + $0x80] sm:$0xff] %v840_v48  ;;  %v825_v53 = vadd.f32 %v1291_v30, %v789_v49  ;;  %v841_v54 = vadd.f32 %v1291_v30, %v805_v50 }
 0x101   : > { %859 = vst [vmem:[%s1298_s19 + $0x18] sm:$0xff] %v827_v51  ;;  %875 = vst [vmem:[%s1298_s19 + $0x98] sm:$0xff] %v843_v52 }
 0x102   : > { %857 = vst [vmem:[%s1298_s19 + $0x8] sm:$0xff] %v825_v53  ;;  %873 = vst [vmem:[%s1298_s19 + $0x88] sm:$0xff] %v841_v54  ;;  %v1085_v55 = vpop.f32.mrb[4].mxu0  ;;  %v1101_v56 = vpop.f32.mrb[4].mxu1 }
 0x103   : > { %v794_v57 = vmul.f32 %v1085_v55, %v1288_v29  ;;  %v810_v58 = vmul.f32 %v1101_v56, %v1288_v29  ;;  %v573_v59 = vpop.f32.mrb[5].mxu0  ;;  %v637_v60 = vpop.f32.mrb[5].mxu1 }
 0x104   : > { %v792_v61 = vmul.f32 %v1288_v29, %v573_v59  ;;  %v808_v62 = vmul.f32 %v1288_v29, %v637_v60  ;;  %v1086_v63 = vpop.f32.mrb[6].mxu0  ;;  %v1102_v0 = vpop.f32.mrb[6].mxu1 }
 0x105   : > { %v830_v1 = vadd.f32 %v1291_v30, %v794_v57  ;;  %v846_v2 = vadd.f32 %v1291_v30, %v810_v58  ;;  %v795_v3 = vmul.f32 %v1086_v63, %v1288_v29  ;;  %v811_v4 = vmul.f32 %v1102_v0, %v1288_v29  ;;  %v576_v5 = vpop.f32.mrb[7].mxu0  ;;  %v640_v6 = vpop.f32.mrb[7].mxu1 }
 0x106   : > { %v828_v7 = vadd.f32 %v1291_v30, %v792_v61  ;;  %v844_v8 = vadd.f32 %v1291_v30, %v808_v62  ;;  %v793_v9 = vmul.f32 %v1288_v29, %v576_v5  ;;  %v809_v10 = vmul.f32 %v1288_v29, %v640_v6 }
 0x107   : > { %862 = vst [vmem:[%s1298_s19 + $0x30] sm:$0xff] %v830_v1  ;;  %878 = vst [vmem:[%s1298_s19 + $0xb0] sm:$0xff] %v846_v2  ;;  %v831_v11 = vadd.f32 %v1291_v30, %v795_v3  ;;  %v847_v12 = vadd.f32 %v1291_v30, %v811_v4 }
 0x108   : > { %860 = vst [vmem:[%s1298_s19 + $0x20] sm:$0xff] %v828_v7  ;;  %876 = vst [vmem:[%s1298_s19 + $0xa0] sm:$0xff] %v844_v8  ;;  %v829_v13 = vadd.f32 %v1291_v30, %v793_v9  ;;  %v845_v14 = vadd.f32 %v1291_v30, %v809_v10 }
 0x109   : > { %863 = vst [vmem:[%s1298_s19 + $0x38] sm:$0xff] %v831_v11  ;;  %879 = vst [vmem:[%s1298_s19 + $0xb8] sm:$0xff] %v847_v12 }
 0x10a   : > { %861 = vst [vmem:[%s1298_s19 + $0x28] sm:$0xff] %v829_v13  ;;  %877 = vst [vmem:[%s1298_s19 + $0xa8] sm:$0xff] %v845_v14  ;;  %v1089_v15 = vpop.f32.mrb[8].mxu0  ;;  %v1105_v16 = vpop.f32.mrb[8].mxu1 }
 0x10b   : > { %v798_v17 = vmul.f32 %v1089_v15, %v1288_v29  ;;  %v814_v18 = vmul.f32 %v1105_v16, %v1288_v29  ;;  %v589_v19 = vpop.f32.mrb[9].mxu0  ;;  %v653_v20 = vpop.f32.mrb[9].mxu1 }
 0x10c   : > { %v796_v21 = vmul.f32 %v1288_v29, %v589_v19  ;;  %v812_v22 = vmul.f32 %v1288_v29, %v653_v20  ;;  %v1090_v23 = vpop.f32.mrb[10].mxu0  ;;  %v1106_v24 = vpop.f32.mrb[10].mxu1 }
 0x10d   : > { %v834_v25 = vadd.f32 %v1291_v30, %v798_v17  ;;  %v850_v26 = vadd.f32 %v1291_v30, %v814_v18  ;;  %v799_v27 = vmul.f32 %v1090_v23, %v1288_v29  ;;  %v815_v28 = vmul.f32 %v1106_v24, %v1288_v29  ;;  %v592_v31 = vpop.f32.mrb[11].mxu0  ;;  %v656_v32 = vpop.f32.mrb[11].mxu1 }
 0x10e   : > { %v832_v33 = vadd.f32 %v1291_v30, %v796_v21  ;;  %v848_v34 = vadd.f32 %v1291_v30, %v812_v22  ;;  %v797_v35 = vmul.f32 %v1288_v29, %v592_v31  ;;  %v813_v36 = vmul.f32 %v1288_v29, %v656_v32 }
 0x10f   : > { %866 = vst [vmem:[%s1298_s19 + $0x50] sm:$0xff] %v834_v25  ;;  %882 = vst [vmem:[%s1298_s19 + $0xd0] sm:$0xff] %v850_v26  ;;  %v835_v37 = vadd.f32 %v1291_v30, %v799_v27  ;;  %v851_v38 = vadd.f32 %v1291_v30, %v815_v28 }
 0x110   : > { %864 = vst [vmem:[%s1298_s19 + $0x40] sm:$0xff] %v832_v33  ;;  %880 = vst [vmem:[%s1298_s19 + $0xc0] sm:$0xff] %v848_v34  ;;  %v833_v39 = vadd.f32 %v1291_v30, %v797_v35  ;;  %v849_v40 = vadd.f32 %v1291_v30, %v813_v36 }
 0x111   : > { %867 = vst [vmem:[%s1298_s19 + $0x58] sm:$0xff] %v835_v37  ;;  %883 = vst [vmem:[%s1298_s19 + $0xd8] sm:$0xff] %v851_v38 }
 0x112   : > { %865 = vst [vmem:[%s1298_s19 + $0x48] sm:$0xff] %v833_v39  ;;  %881 = vst [vmem:[%s1298_s19 + $0xc8] sm:$0xff] %v849_v40  ;;  %v1093_v41 = vpop.f32.mrb[12].mxu0  ;;  %v1109_v42 = vpop.f32.mrb[12].mxu1 }
 0x113   : > { %v802_v43 = vmul.f32 %v1093_v41, %v1288_v29  ;;  %v818_v44 = vmul.f32 %v1109_v42, %v1288_v29  ;;  %v605_v45 = vpop.f32.mrb[13].mxu0  ;;  %v669_v46 = vpop.f32.mrb[13].mxu1 }
 0x114   : > { %v800_v47 = vmul.f32 %v1288_v29, %v605_v45  ;;  %v816_v48 = vmul.f32 %v1288_v29, %v669_v46  ;;  %v1094_v49 = vpop.f32.mrb[14].mxu0  ;;  %v1110_v50 = vpop.f32.mrb[14].mxu1 }
 0x115   : > { %v838_v51 = vadd.f32 %v1291_v30, %v802_v43  ;;  %v854_v52 = vadd.f32 %v1291_v30, %v818_v44  ;;  %v803_v53 = vmul.f32 %v1094_v49, %v1288_v29  ;;  %v819_v54 = vmul.f32 %v1110_v50, %v1288_v29  ;;  %v608_v55 = vpop.f32.mrb[15].mxu0  ;;  %v672_v56 = vpop.f32.mrb[15].mxu1 }
 0x116   : > { %v836_v57 = vadd.f32 %v1291_v30, %v800_v47  ;;  %v852_v58 = vadd.f32 %v1291_v30, %v816_v48  ;;  %v801_v59 = vmul.f32 %v1288_v29, %v608_v55  ;;  %v817_v60 = vmul.f32 %v1288_v29, %v672_v56 }
 0x117   : > { %870 = vst [vmem:[%s1298_s19 + $0x70] sm:$0xff] %v838_v51  ;;  %886 = vst [vmem:[%s1298_s19 + $0xf0] sm:$0xff] %v854_v52  ;;  %v839_v61 = vadd.f32 %v1291_v30, %v803_v53  ;;  %v855_v62 = vadd.f32 %v1291_v30, %v819_v54 }
 0x118   : > { %868 = vst [vmem:[%s1298_s19 + $0x60] sm:$0xff] %v836_v57  ;;  %884 = vst [vmem:[%s1298_s19 + $0xe0] sm:$0xff] %v852_v58  ;;  %v837_v63 = vadd.f32 %v1291_v30, %v801_v59  ;;  %v853_v0 = vadd.f32 %v1291_v30, %v817_v60 }
 0x119   : > { %871 = vst [vmem:[%s1298_s19 + $0x78] sm:$0xff] %v839_v61  ;;  %887 = vst [vmem:[%s1298_s19 + $0xf8] sm:$0xff] %v855_v62 }
 0x11a   : > { %869 = vst [vmem:[%s1298_s19 + $0x68] sm:$0xff] %v837_v63  ;;  %885 = vst [vmem:[%s1298_s19 + $0xe8] sm:$0xff] %v853_v0 }
 0x11b PF: > { %s13_s14 = sadd.s32 1, %s1197_s14   ;;  %s1407_s12 = smov %s1193_s13 }
 0x11c   : > { %p10_p5 = scmp.ge.s32.totalorder %s13_s14, 16   ;;  %s1408_s13 = smov %s1410_s15 }
 0x11e   :  { %12 = sbr.rel (!%p10_p5) target bundleno = 2 (0x2), region = 76 }

</bundles_post_ra>
